<compile_context>
chip_gen: v7x
topology: tpu7x:2x2x1
jax: 0.10.0
libtpu: 0.0.40
codegen_flags: <defaults>
</compile_context>

<pallas_src>
import functools

import numpy as np
import jax
import jax.numpy as jnp
from jax.experimental import pallas as pl
from jax.experimental.pallas import tpu as pltpu

BN_EPS = 1e-5
F32 = jnp.float32
BF16 = jnp.bfloat16


def _full_spec(shape):
    nd = len(shape)
    return pl.BlockSpec(shape, lambda i, _nd=nd: (0,) * _nd)


# ------------------------------ fused kernel ------------------------------- #

def _gesture_kernel(cols_ref, w1_ref, b1_ref, g1_ref, be1_ref,
                    caw1_ref, caw2_ref, msa_ref,
                    wt_ref, bt_ref, wpg_ref, bpg_ref,
                    ww_ref, bw_ref, nlg_ref, nlb_ref, sel_ref,
                    out_ref, x_sc, wy_sc,
                    *, batch, hw, w_img, ci, hw_s):
    # ---- conv1 (3x3 via im2col, bf16 MXU / f32 acc) + BN(batch stats) + ReLU
    h = jnp.dot(cols_ref[...], w1_ref[...], preferred_element_type=F32) + b1_ref[...]
    mu = jnp.mean(h, axis=0, keepdims=True)
    var = jnp.mean((h - mu) ** 2, axis=0, keepdims=True)
    scale = g1_ref[...] * jax.lax.rsqrt(var + BN_EPS)
    shift = be1_ref[...] - mu * scale
    h = jnp.maximum(h * scale + shift, 0.0)                      # (B*HW, C1) f32

    sel0 = sel_ref[0]                                            # (HW/4, (H-1)W) bf16
    sel1 = sel_ref[1]

    def pool2x2(v):
        # 2x2 / stride-2 max pool on a row-major-flattened (HW, C) map:
        # vertical-neighbour max via an aligned sublane slice-max, then two
        # bf16 row-selection matmuls pick the even / odd columns of even rows.
        vert = jnp.maximum(v[0:hw - w_img, :], v[w_img:hw, :]).astype(BF16)
        p0 = jnp.dot(sel0, vert, preferred_element_type=F32)
        p1 = jnp.dot(sel1, vert, preferred_element_type=F32)
        return jnp.maximum(p0, p1)                               # (HW/4, C) f32

    sum_w = jnp.zeros_like(nlg_ref[...])                         # (1, C1)
    sumsq_w = jnp.zeros_like(nlg_ref[...])

    for b in range(batch):
        xb = h[b * hw:(b + 1) * hw, :]                           # (HW, C1)

        # --- CBAM channel attention (shared ratio-16 MLP on avg & max pooled)
        avg_c = jnp.mean(xb, axis=0, keepdims=True)
        max_c = jnp.max(xb, axis=0, keepdims=True)
        z = (jnp.dot(jnp.maximum(jnp.dot(avg_c, caw1_ref[...]), 0.0), caw2_ref[...]) +
             jnp.dot(jnp.maximum(jnp.dot(max_c, caw1_ref[...]), 0.0), caw2_ref[...]))
        xb = xb * jax.nn.sigmoid(z)

        # --- CBAM spatial attention: fused [M_avg | M_max] 7x7 stencil matmul
        sp = jnp.concatenate([jnp.mean(xb, axis=1, keepdims=True),
                              jnp.max(xb, axis=1, keepdims=True)],
                             axis=0).astype(BF16)                # (2*HW, 1)
        sa = jnp.dot(msa_ref[...], sp, preferred_element_type=F32)   # (HW, 1)
        xb = xb * jax.nn.sigmoid(sa)
        x_sc[b] = xb                                             # keep for residual

        # --- NONLocalBlock2D(32): inter=16, sub_sample=True, bn_layer=True ---
        xb_bf = xb.astype(BF16)
        theta = jnp.dot(xb_bf, wt_ref[...], preferred_element_type=F32) + bt_ref[...]
        pg = jnp.dot(xb_bf, wpg_ref[...], preferred_element_type=F32) + bpg_ref[...]
        pg_s = pool2x2(pg)                                       # (HW/4, 2*Ci)
        phi_s = pg_s[:, :ci].astype(BF16)
        g_s = pg_s[:, ci:].astype(BF16)
        f = jax.lax.dot_general(theta.astype(BF16), phi_s, (((1,), (1,)), ((), ())),
                                preferred_element_type=F32)      # (HW, HW/4)
        y = jnp.dot((f * (1.0 / hw_s)).astype(BF16), g_s,
                    preferred_element_type=F32)                  # (HW, Ci)
        wy = jnp.dot(y.astype(BF16), ww_ref[...], preferred_element_type=F32) + bw_ref[...]
        wy_sc[b] = wy

        # single-pass stats for the W-path BatchNorm
        sum_w = sum_w + jnp.sum(wy, axis=0, keepdims=True)
        sumsq_w = sumsq_w + jnp.sum(wy * wy, axis=0, keepdims=True)

    # --- BatchNorm on the W-path (batch stats over all B*HW rows) ---
    inv_n = 1.0 / float(batch * hw)
    mu_w = sum_w * inv_n
    var_w = jnp.maximum(sumsq_w * inv_n - mu_w * mu_w, 0.0)
    scale_w = nlg_ref[...] * jax.lax.rsqrt(var_w + BN_EPS)
    shift_w = nlb_ref[...] - mu_w * scale_w

    # --- residual (W_y + x) + final F.max_pool2d(x, 2) ---
    for b in range(batch):
        zb = wy_sc[b] * scale_w + shift_w + x_sc[b]              # (HW, C1)
        out_ref[b, :, :] = pool2x2(zb)                           # (HW/4, C1)


# ------------------------------ glue helpers ------------------------------- #

def im2col(x, k, pad):
    """NHWC -> (B*H*W, k*k*C), feature order (kh, kw, cin) to match conv2mat."""
    B, H, W, C = x.shape
    xp = jnp.pad(x, ((0, 0), (pad, pad), (pad, pad), (0, 0)))
    patches = [xp[:, dy:dy + H, dx:dx + W, :] for dy in range(k) for dx in range(k)]
    cols = jnp.stack(patches, axis=3)                            # (B, H, W, k*k, C)
    return cols.reshape(B * H * W, k * k * C)


def conv2mat(w):
    """PyTorch (Cout, Cin, kh, kw) -> matmul weight (kh*kw*Cin, Cout)."""
    co, ci, kh, kw = w.shape
    return jnp.transpose(w, (2, 3, 1, 0)).reshape(kh * kw * ci, co)


def conv1x1mat(w):
    """PyTorch (Cout, Cin, 1, 1) -> (Cin, Cout)."""
    return jnp.transpose(w[:, :, 0, 0], (1, 0))


def stencil_matrix(w7, H, W):
    """(HW, HW) matrix M with out_flat = M @ in_flat for a 7x7 'same' conv (pad 3)."""
    ys = jnp.arange(H)
    xs = jnp.arange(W)
    dy = ys[None, :] - ys[:, None]
    dx = xs[None, :] - xs[:, None]
    vy = jnp.abs(dy) <= 3
    vx = jnp.abs(dx) <= 3
    m = w7[jnp.clip(dy + 3, 0, 6)[:, None, :, None],
           jnp.clip(dx + 3, 0, 6)[None, :, None, :]]             # (H, W, H, W)
    m = m * (vy[:, None, :, None] & vx[None, :, None, :]).astype(w7.dtype)
    return m.reshape(H * W, H * W)


def pool_select_matrices(H, W):
    """(2, HW/4, (H-1)*W) row-selection matrices picking the even / odd columns
    of even rows from the vertically max-reduced map (host-built constant)."""
    Ho, Wo = H // 2, W // 2
    K = (H - 1) * W
    s = np.zeros((2, Ho * Wo, K), np.float32)
    for yy in range(Ho):
        for xx in range(Wo):
            o = yy * Wo + xx
            s[0, o, (2 * yy) * W + 2 * xx] = 1.0
            s[1, o, (2 * yy) * W + 2 * xx + 1] = 1.0
    return s


def init_params(key):
    C_in, C1, Ci = 4, 32, 16
    hidden = max(C1 // 16, 1)                                    # CBAM ratio 16
    ks = jax.random.split(key, 13)
    f = lambda k, shape: 0.1 * jax.random.normal(k, shape, F32)

    w1_pt = f(ks[0], (C1, C_in, 3, 3))
    b1 = f(ks[1], (C1,))
    ca1_pt = f(ks[2], (hidden, C1, 1, 1))                        # bias=False
    ca2_pt = f(ks[3], (C1, hidden, 1, 1))                        # bias=False
    sa_pt = f(ks[4], (1, 2, 7, 7))                               # bias=False
    th_pt, th_b = f(ks[5], (Ci, C1, 1, 1)), f(ks[6], (Ci,))
    ph_pt, ph_b = f(ks[7], (Ci, C1, 1, 1)), f(ks[8], (Ci,))
    g_pt, g_b = f(ks[9], (Ci, C1, 1, 1)), f(ks[10], (Ci,))
    W_pt, W_b = f(ks[11], (C1, Ci, 1, 1)), f(ks[12], (C1,))

    return dict(
        w1=conv2mat(w1_pt), b1=b1,
        bn1_gamma=jnp.ones((C1,), F32),
        bn1_beta=jnp.zeros((C1,), F32),
        ca_w1=conv1x1mat(ca1_pt),                                # (C1, hidden)
        ca_w2=conv1x1mat(ca2_pt),                                # (hidden, C1)
        sa_w=jnp.transpose(sa_pt[0], (1, 2, 0)),                 # (7, 7, [avg, max])
        nl_theta_w=conv1x1mat(th_pt), nl_theta_b=th_b,
        nl_phi_w=conv1x1mat(ph_pt), nl_phi_b=ph_b,
        nl_g_w=conv1x1mat(g_pt), nl_g_b=g_b,
        nl_W_w=conv1x1mat(W_pt), nl_W_b=W_b,
        # _NonLocalBlockND: nn.init.constant_(W[1].weight, 0); constant_(W[1].bias, 0)
        nl_bn_gamma=jnp.zeros((C1,), F32),
        nl_bn_beta=jnp.zeros((C1,), F32),
    )


# ------------------------------ forward pass ------------------------------- #

def gesture_net_forward(params, x_nchw):
    B, _, H, W = x_nchw.shape
    HW = H * W
    C1, Ci = 32, 16

    x = jnp.transpose(x_nchw, (0, 2, 3, 1)).astype(F32)          # NHWC
    cols = im2col(x, k=3, pad=1).astype(BF16)                    # (B*HW, 36) bf16

    # fused [avg | max] 7x7 spatial-attention stencil, bf16 (HW, 2*HW)
    m_sa = jnp.concatenate([stencil_matrix(params["sa_w"][:, :, 0], H, W),
                            stencil_matrix(params["sa_w"][:, :, 1], H, W)],
                           axis=1).astype(BF16)
    # 2x2/stride-2 max-pool row-selection matrices (bf16 constant).
    sel = jnp.asarray(pool_select_matrices(H, W), dtype=BF16)    # (2, HW/4, (H-1)*W)

    # fused phi|g 1x1-conv weight for the non-local block
    w_pg = jnp.concatenate([params["nl_phi_w"], params["nl_g_w"]], axis=1)
    b_pg = jnp.concatenate([params["nl_phi_b"], params["nl_g_b"]], axis=0)

    bf = lambda a: a.astype(BF16)
    row = lambda v: v.reshape(1, -1).astype(F32)
    args = (
        cols, bf(params["w1"]), row(params["b1"]),
        row(params["bn1_gamma"]), row(params["bn1_beta"]),
        params["ca_w1"], params["ca_w2"], m_sa,
        bf(params["nl_theta_w"]), row(params["nl_theta_b"]),
        bf(w_pg), row(b_pg),
        bf(params["nl_W_w"]), row(params["nl_W_b"]),
        row(params["nl_bn_gamma"]), row(params["nl_bn_beta"]),
        sel,
    )

    kernel = functools.partial(_gesture_kernel, batch=B, hw=HW, w_img=W,
                               ci=Ci, hw_s=HW // 4)
    out = pl.pallas_call(
        kernel,
        out_shape=jax.ShapeDtypeStruct((B, HW // 4, C1), F32),
        grid=(1,),
        in_specs=[_full_spec(a.shape) for a in args],
        out_specs=_full_spec((B, HW // 4, C1)),
        scratch_shapes=[pltpu.VMEM((B, HW, C1), F32),            # post-CBAM x
                        pltpu.VMEM((B, HW, C1), F32)],           # W_y
        compiler_params=pltpu.CompilerParams(dimension_semantics=("arbitrary",)),
    )(*args)                                                     # (B, HW/4, C1)

    # tiny (16 KiB) layout fixup kept outside the kernel
    out = out.reshape(B, H // 2, W // 2, C1)
    return jnp.transpose(out, (0, 3, 1, 2))                      # NCHW (B, 32, 8, 8)


if __name__ == "__main__":
    key = jax.random.PRNGKey(0)
    kx, kp = jax.random.split(key)
    x = jax.random.normal(kx, (2, 4, 16, 16), F32)
    params = init_params(kp)

    fwd = jax.jit(gesture_net_forward)
    out = fwd(params, x)
    jax.block_until_ready(out)
    assert out.shape == (2, 32, 8, 8) and out.dtype == jnp.float32
    assert bool(jnp.all(jnp.isfinite(out)))
    print("KERNEL_OK")
</pallas_src>

<mosaic_0001>
module attributes {stable_mosaic.version = 11 : i64} {
  func.func @_gesture_kernel(%arg0: i32, %arg1: memref<512x36xbf16, #tpu.memory_space<vmem>>, %arg2: memref<36x32xbf16, #tpu.memory_space<vmem>>, %arg3: memref<1x32xf32, #tpu.memory_space<vmem>>, %arg4: memref<1x32xf32, #tpu.memory_space<vmem>>, %arg5: memref<1x32xf32, #tpu.memory_space<vmem>>, %arg6: memref<32x2xf32, #tpu.memory_space<vmem>>, %arg7: memref<2x32xf32, #tpu.memory_space<vmem>>, %arg8: memref<256x512xbf16, #tpu.memory_space<vmem>>, %arg9: memref<32x16xbf16, #tpu.memory_space<vmem>>, %arg10: memref<1x16xf32, #tpu.memory_space<vmem>>, %arg11: memref<32x32xbf16, #tpu.memory_space<vmem>>, %arg12: memref<1x32xf32, #tpu.memory_space<vmem>>, %arg13: memref<16x32xbf16, #tpu.memory_space<vmem>>, %arg14: memref<1x32xf32, #tpu.memory_space<vmem>>, %arg15: memref<1x32xf32, #tpu.memory_space<vmem>>, %arg16: memref<1x32xf32, #tpu.memory_space<vmem>>, %arg17: memref<2x64x240xbf16, #tpu.memory_space<vmem>>, %arg18: memref<2x64x32xf32, #tpu.memory_space<vmem>>, %arg19: memref<2x256x32xf32, #tpu.memory_space<vmem>>, %arg20: memref<2x256x32xf32, #tpu.memory_space<vmem>>) attributes {dimension_semantics = [#tpu.dimension_semantics<arbitrary>], iteration_bounds = array<i64: 1>, scalar_prefetch = 0 : i64, scratch_operands = 2 : i64, tpu.core_type = #tpu.core_type<tc>, window_params = [{pipeline_mode = #tpu.pipeline_mode<synchronous>, transform_indices = @transform_0, window_bounds = array<i64: 512, 36>}, {pipeline_mode = #tpu.pipeline_mode<synchronous>, transform_indices = @transform_1, window_bounds = array<i64: 36, 32>}, {pipeline_mode = #tpu.pipeline_mode<synchronous>, transform_indices = @transform_2, window_bounds = array<i64: 1, 32>}, {pipeline_mode = #tpu.pipeline_mode<synchronous>, transform_indices = @transform_3, window_bounds = array<i64: 1, 32>}, {pipeline_mode = #tpu.pipeline_mode<synchronous>, transform_indices = @transform_4, window_bounds = array<i64: 1, 32>}, {pipeline_mode = #tpu.pipeline_mode<synchronous>, transform_indices = @transform_5, window_bounds = array<i64: 32, 2>}, {pipeline_mode = #tpu.pipeline_mode<synchronous>, transform_indices = @transform_6, window_bounds = array<i64: 2, 32>}, {pipeline_mode = #tpu.pipeline_mode<synchronous>, transform_indices = @transform_7, window_bounds = array<i64: 256, 512>}, {pipeline_mode = #tpu.pipeline_mode<synchronous>, transform_indices = @transform_8, window_bounds = array<i64: 32, 16>}, {pipeline_mode = #tpu.pipeline_mode<synchronous>, transform_indices = @transform_9, window_bounds = array<i64: 1, 16>}, {pipeline_mode = #tpu.pipeline_mode<synchronous>, transform_indices = @transform_10, window_bounds = array<i64: 32, 32>}, {pipeline_mode = #tpu.pipeline_mode<synchronous>, transform_indices = @transform_11, window_bounds = array<i64: 1, 32>}, {pipeline_mode = #tpu.pipeline_mode<synchronous>, transform_indices = @transform_12, window_bounds = array<i64: 16, 32>}, {pipeline_mode = #tpu.pipeline_mode<synchronous>, transform_indices = @transform_13, window_bounds = array<i64: 1, 32>}, {pipeline_mode = #tpu.pipeline_mode<synchronous>, transform_indices = @transform_14, window_bounds = array<i64: 1, 32>}, {pipeline_mode = #tpu.pipeline_mode<synchronous>, transform_indices = @transform_15, window_bounds = array<i64: 1, 32>}, {pipeline_mode = #tpu.pipeline_mode<synchronous>, transform_indices = @transform_16, window_bounds = array<i64: 2, 64, 240>}, {pipeline_mode = #tpu.pipeline_mode<synchronous>, transform_indices = @transform_17, window_bounds = array<i64: 2, 64, 32>}]} {
    %c0 = arith.constant 0 : index
    %c0_0 = arith.constant 0 : index
    %0 = vector.load %arg1[%c0, %c0_0] : memref<512x36xbf16, #tpu.memory_space<vmem>>, vector<512x36xbf16>
    %c0_1 = arith.constant 0 : index
    %c0_2 = arith.constant 0 : index
    %1 = vector.load %arg2[%c0_1, %c0_2] : memref<36x32xbf16, #tpu.memory_space<vmem>>, vector<36x32xbf16>
    %cst = arith.constant dense<0.000000e+00> : vector<512x32xf32>
    %2 = tpu.matmul %0, %1, %cst {dimension_numbers = #tpu.dot_dimension_numbers<[1], [0], [0], [1], [0, 0, 1, 1], [], []>} : vector<512x36xbf16>, vector<36x32xbf16>, vector<512x32xf32> -> vector<512x32xf32>
    %c0_3 = arith.constant 0 : index
    %c0_4 = arith.constant 0 : index
    %3 = vector.load %arg3[%c0_3, %c0_4] : memref<1x32xf32, #tpu.memory_space<vmem>>, vector<1x32xf32>
    %4 = vector.broadcast %3 : vector<1x32xf32> to vector<512x32xf32>
    %5 = arith.addf %2, %4 : vector<512x32xf32>
    %cst_5 = arith.constant dense<0.000000e+00> : vector<32xf32>
    %6 = vector.multi_reduction <add>, %5, %cst_5 [0] : vector<512x32xf32> to vector<32xf32>
    %7 = vector.shape_cast %6 : vector<32xf32> to vector<1x32xf32>
    %cst_6 = arith.constant 5.120000e+02 : f32
    %8 = vector.broadcast %cst_6 : f32 to vector<1x32xf32>
    %9 = arith.divf %7, %8 : vector<1x32xf32>
    %10 = vector.broadcast %9 : vector<1x32xf32> to vector<512x32xf32>
    %11 = arith.subf %5, %10 : vector<512x32xf32>
    %12 = arith.mulf %11, %11 : vector<512x32xf32>
    %cst_7 = arith.constant dense<0.000000e+00> : vector<32xf32>
    %13 = vector.multi_reduction <add>, %12, %cst_7 [0] : vector<512x32xf32> to vector<32xf32>
    %14 = vector.shape_cast %13 : vector<32xf32> to vector<1x32xf32>
    %cst_8 = arith.constant 5.120000e+02 : f32
    %15 = vector.broadcast %cst_8 : f32 to vector<1x32xf32>
    %16 = arith.divf %14, %15 : vector<1x32xf32>
    %c0_9 = arith.constant 0 : index
    %c0_10 = arith.constant 0 : index
    %17 = vector.load %arg4[%c0_9, %c0_10] : memref<1x32xf32, #tpu.memory_space<vmem>>, vector<1x32xf32>
    %cst_11 = arith.constant 9.99999974E-6 : f32
    %18 = vector.broadcast %cst_11 : f32 to vector<1x32xf32>
    %19 = arith.addf %16, %18 : vector<1x32xf32>
    %20 = math.rsqrt %19 : vector<1x32xf32>
    %21 = arith.mulf %17, %20 : vector<1x32xf32>
    %c0_12 = arith.constant 0 : index
    %c0_13 = arith.constant 0 : index
    %22 = vector.load %arg5[%c0_12, %c0_13] : memref<1x32xf32, #tpu.memory_space<vmem>>, vector<1x32xf32>
    %23 = arith.mulf %9, %21 : vector<1x32xf32>
    %24 = arith.subf %22, %23 : vector<1x32xf32>
    %25 = vector.broadcast %21 : vector<1x32xf32> to vector<512x32xf32>
    %26 = arith.mulf %5, %25 : vector<512x32xf32>
    %27 = vector.broadcast %24 : vector<1x32xf32> to vector<512x32xf32>
    %28 = arith.addf %26, %27 : vector<512x32xf32>
    %cst_14 = arith.constant 0.000000e+00 : f32
    %29 = vector.broadcast %cst_14 : f32 to vector<512x32xf32>
    %30 = arith.maximumf %28, %29 : vector<512x32xf32>
    %c0_15 = arith.constant 0 : index
    %c0_16 = arith.constant 0 : index
    %c0_17 = arith.constant 0 : index
    %31 = vector.load %arg17[%c0_15, %c0_16, %c0_17] : memref<2x64x240xbf16, #tpu.memory_space<vmem>>, vector<1x64x240xbf16>
    %32 = vector.shape_cast %31 : vector<1x64x240xbf16> to vector<64x240xbf16>
    %c1 = arith.constant 1 : index
    %c0_18 = arith.constant 0 : index
    %c0_19 = arith.constant 0 : index
    %33 = vector.load %arg17[%c1, %c0_18, %c0_19] : memref<2x64x240xbf16, #tpu.memory_space<vmem>>, vector<1x64x240xbf16>
    %34 = vector.shape_cast %33 : vector<1x64x240xbf16> to vector<64x240xbf16>
    %cst_20 = arith.constant 0.000000e+00 : f32
    %35 = vector.broadcast %cst_20 : f32 to vector<1x32xf32>
    %cst_21 = arith.constant 0.000000e+00 : f32
    %36 = vector.broadcast %cst_21 : f32 to vector<1x32xf32>
    %37 = vector.extract_strided_slice %30 {offsets = [0, 0], sizes = [256, 32], strides = [1, 1]} : vector<512x32xf32> to vector<256x32xf32>
    %cst_22 = arith.constant dense<0.000000e+00> : vector<32xf32>
    %38 = vector.multi_reduction <add>, %37, %cst_22 [0] : vector<256x32xf32> to vector<32xf32>
    %39 = vector.shape_cast %38 : vector<32xf32> to vector<1x32xf32>
    %cst_23 = arith.constant 2.560000e+02 : f32
    %40 = vector.broadcast %cst_23 : f32 to vector<1x32xf32>
    %41 = arith.divf %39, %40 : vector<1x32xf32>
    %cst_24 = arith.constant dense<0xFF800000> : vector<32xf32>
    %42 = vector.multi_reduction <maximumf>, %37, %cst_24 [0] : vector<256x32xf32> to vector<32xf32>
    %43 = vector.shape_cast %42 : vector<32xf32> to vector<1x32xf32>
    %c0_25 = arith.constant 0 : index
    %c0_26 = arith.constant 0 : index
    %44 = vector.load %arg6[%c0_25, %c0_26] : memref<32x2xf32, #tpu.memory_space<vmem>>, vector<32x2xf32>
    %cst_27 = arith.constant dense<0.000000e+00> : vector<1x2xf32>
    %45 = tpu.matmul %41, %44, %cst_27 {dimension_numbers = #tpu.dot_dimension_numbers<[1], [0], [0], [1], [0, 0, 1, 1], [], []>} : vector<1x32xf32>, vector<32x2xf32>, vector<1x2xf32> -> vector<1x2xf32>
    %cst_28 = arith.constant 0.000000e+00 : f32
    %46 = vector.broadcast %cst_28 : f32 to vector<1x2xf32>
    %47 = arith.maximumf %45, %46 : vector<1x2xf32>
    %c0_29 = arith.constant 0 : index
    %c0_30 = arith.constant 0 : index
    %48 = vector.load %arg7[%c0_29, %c0_30] : memref<2x32xf32, #tpu.memory_space<vmem>>, vector<2x32xf32>
    %cst_31 = arith.constant dense<0.000000e+00> : vector<1x32xf32>
    %49 = tpu.matmul %47, %48, %cst_31 {dimension_numbers = #tpu.dot_dimension_numbers<[1], [0], [0], [1], [0, 0, 1, 1], [], []>} : vector<1x2xf32>, vector<2x32xf32>, vector<1x32xf32> -> vector<1x32xf32>
    %c0_32 = arith.constant 0 : index
    %c0_33 = arith.constant 0 : index
    %50 = vector.load %arg6[%c0_32, %c0_33] : memref<32x2xf32, #tpu.memory_space<vmem>>, vector<32x2xf32>
    %cst_34 = arith.constant dense<0.000000e+00> : vector<1x2xf32>
    %51 = tpu.matmul %43, %50, %cst_34 {dimension_numbers = #tpu.dot_dimension_numbers<[1], [0], [0], [1], [0, 0, 1, 1], [], []>} : vector<1x32xf32>, vector<32x2xf32>, vector<1x2xf32> -> vector<1x2xf32>
    %cst_35 = arith.constant 0.000000e+00 : f32
    %52 = vector.broadcast %cst_35 : f32 to vector<1x2xf32>
    %53 = arith.maximumf %51, %52 : vector<1x2xf32>
    %c0_36 = arith.constant 0 : index
    %c0_37 = arith.constant 0 : index
    %54 = vector.load %arg7[%c0_36, %c0_37] : memref<2x32xf32, #tpu.memory_space<vmem>>, vector<2x32xf32>
    %cst_38 = arith.constant dense<0.000000e+00> : vector<1x32xf32>
    %55 = tpu.matmul %53, %54, %cst_38 {dimension_numbers = #tpu.dot_dimension_numbers<[1], [0], [0], [1], [0, 0, 1, 1], [], []>} : vector<1x2xf32>, vector<2x32xf32>, vector<1x32xf32> -> vector<1x32xf32>
    %56 = arith.addf %49, %55 : vector<1x32xf32>
    %57 = arith.negf %56 : vector<1x32xf32>
    %58 = math.exp %57 : vector<1x32xf32>
    %cst_39 = arith.constant 1.000000e+00 : f32
    %59 = vector.broadcast %cst_39 : f32 to vector<1x32xf32>
    %60 = arith.addf %59, %58 : vector<1x32xf32>
    %61 = arith.divf %59, %60 : vector<1x32xf32>
    %62 = vector.broadcast %61 : vector<1x32xf32> to vector<256x32xf32>
    %63 = arith.mulf %37, %62 : vector<256x32xf32>
    %cst_40 = arith.constant dense<0.000000e+00> : vector<256xf32>
    %64 = vector.multi_reduction <add>, %63, %cst_40 [1] : vector<256x32xf32> to vector<256xf32>
    %65 = vector.shape_cast %64 : vector<256xf32> to vector<256x1xf32>
    %cst_41 = arith.constant 3.200000e+01 : f32
    %66 = vector.broadcast %cst_41 : f32 to vector<256x1xf32>
    %67 = arith.divf %65, %66 : vector<256x1xf32>
    %cst_42 = arith.constant dense<0xFF800000> : vector<256xf32>
    %68 = vector.multi_reduction <maximumf>, %63, %cst_42 [1] : vector<256x32xf32> to vector<256xf32>
    %69 = vector.shape_cast %68 : vector<256xf32> to vector<256x1xf32>
    %70 = tpu.concatenate %67, %69 in 0 : vector<256x1xf32>, vector<256x1xf32> -> vector<512x1xf32>
    %71 = arith.truncf %70 : vector<512x1xf32> to vector<512x1xbf16>
    %c0_43 = arith.constant 0 : index
    %c0_44 = arith.constant 0 : index
    %72 = vector.load %arg8[%c0_43, %c0_44] : memref<256x512xbf16, #tpu.memory_space<vmem>>, vector<256x512xbf16>
    %cst_45 = arith.constant dense<0.000000e+00> : vector<256x1xf32>
    %73 = tpu.matmul %72, %71, %cst_45 {dimension_numbers = #tpu.dot_dimension_numbers<[1], [0], [0], [1], [0, 0, 1, 1], [], []>} : vector<256x512xbf16>, vector<512x1xbf16>, vector<256x1xf32> -> vector<256x1xf32>
    %74 = arith.negf %73 : vector<256x1xf32>
    %75 = math.exp %74 : vector<256x1xf32>
    %cst_46 = arith.constant 1.000000e+00 : f32
    %76 = vector.broadcast %cst_46 : f32 to vector<256x1xf32>
    %77 = arith.addf %76, %75 : vector<256x1xf32>
    %78 = arith.divf %76, %77 : vector<256x1xf32>
    %79 = vector.broadcast %78 : vector<256x1xf32> to vector<256x32xf32>
    %80 = arith.mulf %63, %79 : vector<256x32xf32>
    %c0_47 = arith.constant 0 : index
    %c0_48 = arith.constant 0 : index
    %c0_49 = arith.constant 0 : index
    %81 = vector.load %arg19[%c0_47, %c0_48, %c0_49] : memref<2x256x32xf32, #tpu.memory_space<vmem>>, vector<1x256x32xf32>
    %82 = vector.shape_cast %81 : vector<1x256x32xf32> to vector<256x32xf32>
    %83 = vector.shape_cast %80 : vector<256x32xf32> to vector<1x256x32xf32>
    tpu.vector_store %arg19[%c0_47, %c0_48, %c0_49], %83 {strides = array<i32>} : memref<2x256x32xf32, #tpu.memory_space<vmem>>, vector<1x256x32xf32>,
    %84 = arith.truncf %80 : vector<256x32xf32> to vector<256x32xbf16>
    %c0_50 = arith.constant 0 : index
    %c0_51 = arith.constant 0 : index
    %85 = vector.load %arg9[%c0_50, %c0_51] : memref<32x16xbf16, #tpu.memory_space<vmem>>, vector<32x16xbf16>
    %cst_52 = arith.constant dense<0.000000e+00> : vector<256x16xf32>
    %86 = tpu.matmul %84, %85, %cst_52 {dimension_numbers = #tpu.dot_dimension_numbers<[1], [0], [0], [1], [0, 0, 1, 1], [], []>} : vector<256x32xbf16>, vector<32x16xbf16>, vector<256x16xf32> -> vector<256x16xf32>
    %c0_53 = arith.constant 0 : index
    %c0_54 = arith.constant 0 : index
    %87 = vector.load %arg10[%c0_53, %c0_54] : memref<1x16xf32, #tpu.memory_space<vmem>>, vector<1x16xf32>
    %88 = vector.broadcast %87 : vector<1x16xf32> to vector<256x16xf32>
    %89 = arith.addf %86, %88 : vector<256x16xf32>
    %c0_55 = arith.constant 0 : index
    %c0_56 = arith.constant 0 : index
    %90 = vector.load %arg11[%c0_55, %c0_56] : memref<32x32xbf16, #tpu.memory_space<vmem>>, vector<32x32xbf16>
    %cst_57 = arith.constant dense<0.000000e+00> : vector<256x32xf32>
    %91 = tpu.matmul %84, %90, %cst_57 {dimension_numbers = #tpu.dot_dimension_numbers<[1], [0], [0], [1], [0, 0, 1, 1], [], []>} : vector<256x32xbf16>, vector<32x32xbf16>, vector<256x32xf32> -> vector<256x32xf32>
    %c0_58 = arith.constant 0 : index
    %c0_59 = arith.constant 0 : index
    %92 = vector.load %arg12[%c0_58, %c0_59] : memref<1x32xf32, #tpu.memory_space<vmem>>, vector<1x32xf32>
    %93 = vector.broadcast %92 : vector<1x32xf32> to vector<256x32xf32>
    %94 = arith.addf %91, %93 : vector<256x32xf32>
    %95 = vector.extract_strided_slice %94 {offsets = [0, 0], sizes = [240, 32], strides = [1, 1]} : vector<256x32xf32> to vector<240x32xf32>
    %96 = vector.extract_strided_slice %94 {offsets = [16, 0], sizes = [240, 32], strides = [1, 1]} : vector<256x32xf32> to vector<240x32xf32>
    %97 = arith.maximumf %95, %96 : vector<240x32xf32>
    %98 = arith.truncf %97 : vector<240x32xf32> to vector<240x32xbf16>
    %cst_60 = arith.constant dense<0.000000e+00> : vector<64x32xf32>
    %99 = tpu.matmul %32, %98, %cst_60 {dimension_numbers = #tpu.dot_dimension_numbers<[1], [0], [0], [1], [0, 0, 1, 1], [], []>} : vector<64x240xbf16>, vector<240x32xbf16>, vector<64x32xf32> -> vector<64x32xf32>
    %cst_61 = arith.constant dense<0.000000e+00> : vector<64x32xf32>
    %100 = tpu.matmul %34, %98, %cst_61 {dimension_numbers = #tpu.dot_dimension_numbers<[1], [0], [0], [1], [0, 0, 1, 1], [], []>} : vector<64x240xbf16>, vector<240x32xbf16>, vector<64x32xf32> -> vector<64x32xf32>
    %101 = arith.maximumf %99, %100 : vector<64x32xf32>
    %102 = vector.extract_strided_slice %101 {offsets = [0, 0], sizes = [64, 16], strides = [1, 1]} : vector<64x32xf32> to vector<64x16xf32>
    %103 = arith.truncf %102 : vector<64x16xf32> to vector<64x16xbf16>
    %104 = vector.extract_strided_slice %101 {offsets = [0, 16], sizes = [64, 16], strides = [1, 1]} : vector<64x32xf32> to vector<64x16xf32>
    %105 = arith.truncf %104 : vector<64x16xf32> to vector<64x16xbf16>
    %106 = arith.truncf %89 : vector<256x16xf32> to vector<256x16xbf16>
    %cst_62 = arith.constant dense<0.000000e+00> : vector<256x64xf32>
    %107 = tpu.matmul %106, %103, %cst_62 {dimension_numbers = #tpu.dot_dimension_numbers<[1], [1], [0], [0], [0, 0, 1, 0], [], []>} : vector<256x16xbf16>, vector<64x16xbf16>, vector<256x64xf32> -> vector<256x64xf32>
    %cst_63 = arith.constant 1.562500e-02 : f32
    %108 = vector.broadcast %cst_63 : f32 to vector<256x64xf32>
    %109 = arith.mulf %107, %108 : vector<256x64xf32>
    %110 = arith.truncf %109 : vector<256x64xf32> to vector<256x64xbf16>
    %cst_64 = arith.constant dense<0.000000e+00> : vector<256x16xf32>
    %111 = tpu.matmul %110, %105, %cst_64 {dimension_numbers = #tpu.dot_dimension_numbers<[1], [0], [0], [1], [0, 0, 1, 1], [], []>} : vector<256x64xbf16>, vector<64x16xbf16>, vector<256x16xf32> -> vector<256x16xf32>
    %112 = arith.truncf %111 : vector<256x16xf32> to vector<256x16xbf16>
    %c0_65 = arith.constant 0 : index
    %c0_66 = arith.constant 0 : index
    %113 = vector.load %arg13[%c0_65, %c0_66] : memref<16x32xbf16, #tpu.memory_space<vmem>>, vector<16x32xbf16>
    %cst_67 = arith.constant dense<0.000000e+00> : vector<256x32xf32>
    %114 = tpu.matmul %112, %113, %cst_67 {dimension_numbers = #tpu.dot_dimension_numbers<[1], [0], [0], [1], [0, 0, 1, 1], [], []>} : vector<256x16xbf16>, vector<16x32xbf16>, vector<256x32xf32> -> vector<256x32xf32>
    %c0_68 = arith.constant 0 : index
    %c0_69 = arith.constant 0 : index
    %115 = vector.load %arg14[%c0_68, %c0_69] : memref<1x32xf32, #tpu.memory_space<vmem>>, vector<1x32xf32>
    %116 = vector.broadcast %115 : vector<1x32xf32> to vector<256x32xf32>
    %117 = arith.addf %114, %116 : vector<256x32xf32>
    %c0_70 = arith.constant 0 : index
    %c0_71 = arith.constant 0 : index
    %c0_72 = arith.constant 0 : index
    %118 = vector.load %arg20[%c0_70, %c0_71, %c0_72] : memref<2x256x32xf32, #tpu.memory_space<vmem>>, vector<1x256x32xf32>
    %119 = vector.shape_cast %118 : vector<1x256x32xf32> to vector<256x32xf32>
    %120 = vector.shape_cast %117 : vector<256x32xf32> to vector<1x256x32xf32>
    tpu.vector_store %arg20[%c0_70, %c0_71, %c0_72], %120 {strides = array<i32>} : memref<2x256x32xf32, #tpu.memory_space<vmem>>, vector<1x256x32xf32>,
    %cst_73 = arith.constant dense<0.000000e+00> : vector<32xf32>
    %121 = vector.multi_reduction <add>, %117, %cst_73 [0] : vector<256x32xf32> to vector<32xf32>
    %122 = vector.shape_cast %121 : vector<32xf32> to vector<1x32xf32>
    %123 = arith.addf %35, %122 : vector<1x32xf32>
    %124 = arith.mulf %117, %117 : vector<256x32xf32>
    %cst_74 = arith.constant dense<0.000000e+00> : vector<32xf32>
    %125 = vector.multi_reduction <add>, %124, %cst_74 [0] : vector<256x32xf32> to vector<32xf32>
    %126 = vector.shape_cast %125 : vector<32xf32> to vector<1x32xf32>
    %127 = arith.addf %36, %126 : vector<1x32xf32>
    %128 = vector.extract_strided_slice %30 {offsets = [256, 0], sizes = [256, 32], strides = [1, 1]} : vector<512x32xf32> to vector<256x32xf32>
    %cst_75 = arith.constant dense<0.000000e+00> : vector<32xf32>
    %129 = vector.multi_reduction <add>, %128, %cst_75 [0] : vector<256x32xf32> to vector<32xf32>
    %130 = vector.shape_cast %129 : vector<32xf32> to vector<1x32xf32>
    %cst_76 = arith.constant 2.560000e+02 : f32
    %131 = vector.broadcast %cst_76 : f32 to vector<1x32xf32>
    %132 = arith.divf %130, %131 : vector<1x32xf32>
    %cst_77 = arith.constant dense<0xFF800000> : vector<32xf32>
    %133 = vector.multi_reduction <maximumf>, %128, %cst_77 [0] : vector<256x32xf32> to vector<32xf32>
    %134 = vector.shape_cast %133 : vector<32xf32> to vector<1x32xf32>
    %c0_78 = arith.constant 0 : index
    %c0_79 = arith.constant 0 : index
    %135 = vector.load %arg6[%c0_78, %c0_79] : memref<32x2xf32, #tpu.memory_space<vmem>>, vector<32x2xf32>
    %cst_80 = arith.constant dense<0.000000e+00> : vector<1x2xf32>
    %136 = tpu.matmul %132, %135, %cst_80 {dimension_numbers = #tpu.dot_dimension_numbers<[1], [0], [0], [1], [0, 0, 1, 1], [], []>} : vector<1x32xf32>, vector<32x2xf32>, vector<1x2xf32> -> vector<1x2xf32>
    %cst_81 = arith.constant 0.000000e+00 : f32
    %137 = vector.broadcast %cst_81 : f32 to vector<1x2xf32>
    %138 = arith.maximumf %136, %137 : vector<1x2xf32>
    %c0_82 = arith.constant 0 : index
    %c0_83 = arith.constant 0 : index
    %139 = vector.load %arg7[%c0_82, %c0_83] : memref<2x32xf32, #tpu.memory_space<vmem>>, vector<2x32xf32>
    %cst_84 = arith.constant dense<0.000000e+00> : vector<1x32xf32>
    %140 = tpu.matmul %138, %139, %cst_84 {dimension_numbers = #tpu.dot_dimension_numbers<[1], [0], [0], [1], [0, 0, 1, 1], [], []>} : vector<1x2xf32>, vector<2x32xf32>, vector<1x32xf32> -> vector<1x32xf32>
    %c0_85 = arith.constant 0 : index
    %c0_86 = arith.constant 0 : index
    %141 = vector.load %arg6[%c0_85, %c0_86] : memref<32x2xf32, #tpu.memory_space<vmem>>, vector<32x2xf32>
    %cst_87 = arith.constant dense<0.000000e+00> : vector<1x2xf32>
    %142 = tpu.matmul %134, %141, %cst_87 {dimension_numbers = #tpu.dot_dimension_numbers<[1], [0], [0], [1], [0, 0, 1, 1], [], []>} : vector<1x32xf32>, vector<32x2xf32>, vector<1x2xf32> -> vector<1x2xf32>
    %cst_88 = arith.constant 0.000000e+00 : f32
    %143 = vector.broadcast %cst_88 : f32 to vector<1x2xf32>
    %144 = arith.maximumf %142, %143 : vector<1x2xf32>
    %c0_89 = arith.constant 0 : index
    %c0_90 = arith.constant 0 : index
    %145 = vector.load %arg7[%c0_89, %c0_90] : memref<2x32xf32, #tpu.memory_space<vmem>>, vector<2x32xf32>
    %cst_91 = arith.constant dense<0.000000e+00> : vector<1x32xf32>
    %146 = tpu.matmul %144, %145, %cst_91 {dimension_numbers = #tpu.dot_dimension_numbers<[1], [0], [0], [1], [0, 0, 1, 1], [], []>} : vector<1x2xf32>, vector<2x32xf32>, vector<1x32xf32> -> vector<1x32xf32>
    %147 = arith.addf %140, %146 : vector<1x32xf32>
    %148 = arith.negf %147 : vector<1x32xf32>
    %149 = math.exp %148 : vector<1x32xf32>
    %cst_92 = arith.constant 1.000000e+00 : f32
    %150 = vector.broadcast %cst_92 : f32 to vector<1x32xf32>
    %151 = arith.addf %150, %149 : vector<1x32xf32>
    %152 = arith.divf %150, %151 : vector<1x32xf32>
    %153 = vector.broadcast %152 : vector<1x32xf32> to vector<256x32xf32>
    %154 = arith.mulf %128, %153 : vector<256x32xf32>
    %cst_93 = arith.constant dense<0.000000e+00> : vector<256xf32>
    %155 = vector.multi_reduction <add>, %154, %cst_93 [1] : vector<256x32xf32> to vector<256xf32>
    %156 = vector.shape_cast %155 : vector<256xf32> to vector<256x1xf32>
    %cst_94 = arith.constant 3.200000e+01 : f32
    %157 = vector.broadcast %cst_94 : f32 to vector<256x1xf32>
    %158 = arith.divf %156, %157 : vector<256x1xf32>
    %cst_95 = arith.constant dense<0xFF800000> : vector<256xf32>
    %159 = vector.multi_reduction <maximumf>, %154, %cst_95 [1] : vector<256x32xf32> to vector<256xf32>
    %160 = vector.shape_cast %159 : vector<256xf32> to vector<256x1xf32>
    %161 = tpu.concatenate %158, %160 in 0 : vector<256x1xf32>, vector<256x1xf32> -> vector<512x1xf32>
    %162 = arith.truncf %161 : vector<512x1xf32> to vector<512x1xbf16>
    %c0_96 = arith.constant 0 : index
    %c0_97 = arith.constant 0 : index
    %163 = vector.load %arg8[%c0_96, %c0_97] : memref<256x512xbf16, #tpu.memory_space<vmem>>, vector<256x512xbf16>
    %cst_98 = arith.constant dense<0.000000e+00> : vector<256x1xf32>
    %164 = tpu.matmul %163, %162, %cst_98 {dimension_numbers = #tpu.dot_dimension_numbers<[1], [0], [0], [1], [0, 0, 1, 1], [], []>} : vector<256x512xbf16>, vector<512x1xbf16>, vector<256x1xf32> -> vector<256x1xf32>
    %165 = arith.negf %164 : vector<256x1xf32>
    %166 = math.exp %165 : vector<256x1xf32>
    %cst_99 = arith.constant 1.000000e+00 : f32
    %167 = vector.broadcast %cst_99 : f32 to vector<256x1xf32>
    %168 = arith.addf %167, %166 : vector<256x1xf32>
    %169 = arith.divf %167, %168 : vector<256x1xf32>
    %170 = vector.broadcast %169 : vector<256x1xf32> to vector<256x32xf32>
    %171 = arith.mulf %154, %170 : vector<256x32xf32>
    %c1_100 = arith.constant 1 : index
    %c0_101 = arith.constant 0 : index
    %c0_102 = arith.constant 0 : index
    %172 = vector.load %arg19[%c1_100, %c0_101, %c0_102] : memref<2x256x32xf32, #tpu.memory_space<vmem>>, vector<1x256x32xf32>
    %173 = vector.shape_cast %172 : vector<1x256x32xf32> to vector<256x32xf32>
    %174 = vector.shape_cast %171 : vector<256x32xf32> to vector<1x256x32xf32>
    tpu.vector_store %arg19[%c1_100, %c0_101, %c0_102], %174 {strides = array<i32>} : memref<2x256x32xf32, #tpu.memory_space<vmem>>, vector<1x256x32xf32>,
    %175 = arith.truncf %171 : vector<256x32xf32> to vector<256x32xbf16>
    %c0_103 = arith.constant 0 : index
    %c0_104 = arith.constant 0 : index
    %176 = vector.load %arg9[%c0_103, %c0_104] : memref<32x16xbf16, #tpu.memory_space<vmem>>, vector<32x16xbf16>
    %cst_105 = arith.constant dense<0.000000e+00> : vector<256x16xf32>
    %177 = tpu.matmul %175, %176, %cst_105 {dimension_numbers = #tpu.dot_dimension_numbers<[1], [0], [0], [1], [0, 0, 1, 1], [], []>} : vector<256x32xbf16>, vector<32x16xbf16>, vector<256x16xf32> -> vector<256x16xf32>
    %c0_106 = arith.constant 0 : index
    %c0_107 = arith.constant 0 : index
    %178 = vector.load %arg10[%c0_106, %c0_107] : memref<1x16xf32, #tpu.memory_space<vmem>>, vector<1x16xf32>
    %179 = vector.broadcast %178 : vector<1x16xf32> to vector<256x16xf32>
    %180 = arith.addf %177, %179 : vector<256x16xf32>
    %c0_108 = arith.constant 0 : index
    %c0_109 = arith.constant 0 : index
    %181 = vector.load %arg11[%c0_108, %c0_109] : memref<32x32xbf16, #tpu.memory_space<vmem>>, vector<32x32xbf16>
    %cst_110 = arith.constant dense<0.000000e+00> : vector<256x32xf32>
    %182 = tpu.matmul %175, %181, %cst_110 {dimension_numbers = #tpu.dot_dimension_numbers<[1], [0], [0], [1], [0, 0, 1, 1], [], []>} : vector<256x32xbf16>, vector<32x32xbf16>, vector<256x32xf32> -> vector<256x32xf32>
    %c0_111 = arith.constant 0 : index
    %c0_112 = arith.constant 0 : index
    %183 = vector.load %arg12[%c0_111, %c0_112] : memref<1x32xf32, #tpu.memory_space<vmem>>, vector<1x32xf32>
    %184 = vector.broadcast %183 : vector<1x32xf32> to vector<256x32xf32>
    %185 = arith.addf %182, %184 : vector<256x32xf32>
    %186 = vector.extract_strided_slice %185 {offsets = [0, 0], sizes = [240, 32], strides = [1, 1]} : vector<256x32xf32> to vector<240x32xf32>
    %187 = vector.extract_strided_slice %185 {offsets = [16, 0], sizes = [240, 32], strides = [1, 1]} : vector<256x32xf32> to vector<240x32xf32>
    %188 = arith.maximumf %186, %187 : vector<240x32xf32>
    %189 = arith.truncf %188 : vector<240x32xf32> to vector<240x32xbf16>
    %cst_113 = arith.constant dense<0.000000e+00> : vector<64x32xf32>
    %190 = tpu.matmul %32, %189, %cst_113 {dimension_numbers = #tpu.dot_dimension_numbers<[1], [0], [0], [1], [0, 0, 1, 1], [], []>} : vector<64x240xbf16>, vector<240x32xbf16>, vector<64x32xf32> -> vector<64x32xf32>
    %cst_114 = arith.constant dense<0.000000e+00> : vector<64x32xf32>
    %191 = tpu.matmul %34, %189, %cst_114 {dimension_numbers = #tpu.dot_dimension_numbers<[1], [0], [0], [1], [0, 0, 1, 1], [], []>} : vector<64x240xbf16>, vector<240x32xbf16>, vector<64x32xf32> -> vector<64x32xf32>
    %192 = arith.maximumf %190, %191 : vector<64x32xf32>
    %193 = vector.extract_strided_slice %192 {offsets = [0, 0], sizes = [64, 16], strides = [1, 1]} : vector<64x32xf32> to vector<64x16xf32>
    %194 = arith.truncf %193 : vector<64x16xf32> to vector<64x16xbf16>
    %195 = vector.extract_strided_slice %192 {offsets = [0, 16], sizes = [64, 16], strides = [1, 1]} : vector<64x32xf32> to vector<64x16xf32>
    %196 = arith.truncf %195 : vector<64x16xf32> to vector<64x16xbf16>
    %197 = arith.truncf %180 : vector<256x16xf32> to vector<256x16xbf16>
    %cst_115 = arith.constant dense<0.000000e+00> : vector<256x64xf32>
    %198 = tpu.matmul %197, %194, %cst_115 {dimension_numbers = #tpu.dot_dimension_numbers<[1], [1], [0], [0], [0, 0, 1, 0], [], []>} : vector<256x16xbf16>, vector<64x16xbf16>, vector<256x64xf32> -> vector<256x64xf32>
    %cst_116 = arith.constant 1.562500e-02 : f32
    %199 = vector.broadcast %cst_116 : f32 to vector<256x64xf32>
    %200 = arith.mulf %198, %199 : vector<256x64xf32>
    %201 = arith.truncf %200 : vector<256x64xf32> to vector<256x64xbf16>
    %cst_117 = arith.constant dense<0.000000e+00> : vector<256x16xf32>
    %202 = tpu.matmul %201, %196, %cst_117 {dimension_numbers = #tpu.dot_dimension_numbers<[1], [0], [0], [1], [0, 0, 1, 1], [], []>} : vector<256x64xbf16>, vector<64x16xbf16>, vector<256x16xf32> -> vector<256x16xf32>
    %203 = arith.truncf %202 : vector<256x16xf32> to vector<256x16xbf16>
    %c0_118 = arith.constant 0 : index
    %c0_119 = arith.constant 0 : index
    %204 = vector.load %arg13[%c0_118, %c0_119] : memref<16x32xbf16, #tpu.memory_space<vmem>>, vector<16x32xbf16>
    %cst_120 = arith.constant dense<0.000000e+00> : vector<256x32xf32>
    %205 = tpu.matmul %203, %204, %cst_120 {dimension_numbers = #tpu.dot_dimension_numbers<[1], [0], [0], [1], [0, 0, 1, 1], [], []>} : vector<256x16xbf16>, vector<16x32xbf16>, vector<256x32xf32> -> vector<256x32xf32>
    %c0_121 = arith.constant 0 : index
    %c0_122 = arith.constant 0 : index
    %206 = vector.load %arg14[%c0_121, %c0_122] : memref<1x32xf32, #tpu.memory_space<vmem>>, vector<1x32xf32>
    %207 = vector.broadcast %206 : vector<1x32xf32> to vector<256x32xf32>
    %208 = arith.addf %205, %207 : vector<256x32xf32>
    %c1_123 = arith.constant 1 : index
    %c0_124 = arith.constant 0 : index
    %c0_125 = arith.constant 0 : index
    %209 = vector.load %arg20[%c1_123, %c0_124, %c0_125] : memref<2x256x32xf32, #tpu.memory_space<vmem>>, vector<1x256x32xf32>
    %210 = vector.shape_cast %209 : vector<1x256x32xf32> to vector<256x32xf32>
    %211 = vector.shape_cast %208 : vector<256x32xf32> to vector<1x256x32xf32>
    tpu.vector_store %arg20[%c1_123, %c0_124, %c0_125], %211 {strides = array<i32>} : memref<2x256x32xf32, #tpu.memory_space<vmem>>, vector<1x256x32xf32>,
    %cst_126 = arith.constant dense<0.000000e+00> : vector<32xf32>
    %212 = vector.multi_reduction <add>, %208, %cst_126 [0] : vector<256x32xf32> to vector<32xf32>
    %213 = vector.shape_cast %212 : vector<32xf32> to vector<1x32xf32>
    %214 = arith.addf %123, %213 : vector<1x32xf32>
    %215 = arith.mulf %208, %208 : vector<256x32xf32>
    %cst_127 = arith.constant dense<0.000000e+00> : vector<32xf32>
    %216 = vector.multi_reduction <add>, %215, %cst_127 [0] : vector<256x32xf32> to vector<32xf32>
    %217 = vector.shape_cast %216 : vector<32xf32> to vector<1x32xf32>
    %218 = arith.addf %127, %217 : vector<1x32xf32>
    %cst_128 = arith.constant 0.001953125 : f32
    %219 = vector.broadcast %cst_128 : f32 to vector<1x32xf32>
    %220 = arith.mulf %214, %219 : vector<1x32xf32>
    %cst_129 = arith.constant 0.001953125 : f32
    %221 = vector.broadcast %cst_129 : f32 to vector<1x32xf32>
    %222 = arith.mulf %218, %221 : vector<1x32xf32>
    %223 = arith.mulf %220, %220 : vector<1x32xf32>
    %224 = arith.subf %222, %223 : vector<1x32xf32>
    %cst_130 = arith.constant 0.000000e+00 : f32
    %225 = vector.broadcast %cst_130 : f32 to vector<1x32xf32>
    %226 = arith.maximumf %224, %225 : vector<1x32xf32>
    %c0_131 = arith.constant 0 : index
    %c0_132 = arith.constant 0 : index
    %227 = vector.load %arg15[%c0_131, %c0_132] : memref<1x32xf32, #tpu.memory_space<vmem>>, vector<1x32xf32>
    %cst_133 = arith.constant 9.99999974E-6 : f32
    %228 = vector.broadcast %cst_133 : f32 to vector<1x32xf32>
    %229 = arith.addf %226, %228 : vector<1x32xf32>
    %230 = math.rsqrt %229 : vector<1x32xf32>
    %231 = arith.mulf %227, %230 : vector<1x32xf32>
    %c0_134 = arith.constant 0 : index
    %c0_135 = arith.constant 0 : index
    %232 = vector.load %arg16[%c0_134, %c0_135] : memref<1x32xf32, #tpu.memory_space<vmem>>, vector<1x32xf32>
    %233 = arith.mulf %220, %231 : vector<1x32xf32>
    %234 = arith.subf %232, %233 : vector<1x32xf32>
    %c0_136 = arith.constant 0 : index
    %c0_137 = arith.constant 0 : index
    %c0_138 = arith.constant 0 : index
    %235 = vector.load %arg20[%c0_136, %c0_137, %c0_138] : memref<2x256x32xf32, #tpu.memory_space<vmem>>, vector<1x256x32xf32>
    %236 = vector.shape_cast %235 : vector<1x256x32xf32> to vector<256x32xf32>
    %237 = vector.broadcast %231 : vector<1x32xf32> to vector<256x32xf32>
    %238 = arith.mulf %236, %237 : vector<256x32xf32>
    %239 = vector.broadcast %234 : vector<1x32xf32> to vector<256x32xf32>
    %240 = arith.addf %238, %239 : vector<256x32xf32>
    %c0_139 = arith.constant 0 : index
    %c0_140 = arith.constant 0 : index
    %c0_141 = arith.constant 0 : index
    %241 = vector.load %arg19[%c0_139, %c0_140, %c0_141] : memref<2x256x32xf32, #tpu.memory_space<vmem>>, vector<1x256x32xf32>
    %242 = vector.shape_cast %241 : vector<1x256x32xf32> to vector<256x32xf32>
    %243 = arith.addf %240, %242 : vector<256x32xf32>
    %244 = vector.extract_strided_slice %243 {offsets = [0, 0], sizes = [240, 32], strides = [1, 1]} : vector<256x32xf32> to vector<240x32xf32>
    %245 = vector.extract_strided_slice %243 {offsets = [16, 0], sizes = [240, 32], strides = [1, 1]} : vector<256x32xf32> to vector<240x32xf32>
    %246 = arith.maximumf %244, %245 : vector<240x32xf32>
    %247 = arith.truncf %246 : vector<240x32xf32> to vector<240x32xbf16>
    %cst_142 = arith.constant dense<0.000000e+00> : vector<64x32xf32>
    %248 = tpu.matmul %32, %247, %cst_142 {dimension_numbers = #tpu.dot_dimension_numbers<[1], [0], [0], [1], [0, 0, 1, 1], [], []>} : vector<64x240xbf16>, vector<240x32xbf16>, vector<64x32xf32> -> vector<64x32xf32>
    %cst_143 = arith.constant dense<0.000000e+00> : vector<64x32xf32>
    %249 = tpu.matmul %34, %247, %cst_143 {dimension_numbers = #tpu.dot_dimension_numbers<[1], [0], [0], [1], [0, 0, 1, 1], [], []>} : vector<64x240xbf16>, vector<240x32xbf16>, vector<64x32xf32> -> vector<64x32xf32>
    %250 = arith.maximumf %248, %249 : vector<64x32xf32>
    %c0_144 = arith.constant 0 : index
    %c0_145 = arith.constant 0 : index
    %c0_146 = arith.constant 0 : index
    %251 = vector.load %arg18[%c0_144, %c0_145, %c0_146] : memref<2x64x32xf32, #tpu.memory_space<vmem>>, vector<1x64x32xf32>
    %252 = vector.shape_cast %251 : vector<1x64x32xf32> to vector<64x32xf32>
    %253 = vector.shape_cast %250 : vector<64x32xf32> to vector<1x64x32xf32>
    tpu.vector_store %arg18[%c0_144, %c0_145, %c0_146], %253 {strides = array<i32>} : memref<2x64x32xf32, #tpu.memory_space<vmem>>, vector<1x64x32xf32>,
    %c1_147 = arith.constant 1 : index
    %c0_148 = arith.constant 0 : index
    %c0_149 = arith.constant 0 : index
    %254 = vector.load %arg20[%c1_147, %c0_148, %c0_149] : memref<2x256x32xf32, #tpu.memory_space<vmem>>, vector<1x256x32xf32>
    %255 = vector.shape_cast %254 : vector<1x256x32xf32> to vector<256x32xf32>
    %256 = vector.broadcast %231 : vector<1x32xf32> to vector<256x32xf32>
    %257 = arith.mulf %255, %256 : vector<256x32xf32>
    %258 = vector.broadcast %234 : vector<1x32xf32> to vector<256x32xf32>
    %259 = arith.addf %257, %258 : vector<256x32xf32>
    %c1_150 = arith.constant 1 : index
    %c0_151 = arith.constant 0 : index
    %c0_152 = arith.constant 0 : index
    %260 = vector.load %arg19[%c1_150, %c0_151, %c0_152] : memref<2x256x32xf32, #tpu.memory_space<vmem>>, vector<1x256x32xf32>
    %261 = vector.shape_cast %260 : vector<1x256x32xf32> to vector<256x32xf32>
    %262 = arith.addf %259, %261 : vector<256x32xf32>
    %263 = vector.extract_strided_slice %262 {offsets = [0, 0], sizes = [240, 32], strides = [1, 1]} : vector<256x32xf32> to vector<240x32xf32>
    %264 = vector.extract_strided_slice %262 {offsets = [16, 0], sizes = [240, 32], strides = [1, 1]} : vector<256x32xf32> to vector<240x32xf32>
    %265 = arith.maximumf %263, %264 : vector<240x32xf32>
    %266 = arith.truncf %265 : vector<240x32xf32> to vector<240x32xbf16>
    %cst_153 = arith.constant dense<0.000000e+00> : vector<64x32xf32>
    %267 = tpu.matmul %32, %266, %cst_153 {dimension_numbers = #tpu.dot_dimension_numbers<[1], [0], [0], [1], [0, 0, 1, 1], [], []>} : vector<64x240xbf16>, vector<240x32xbf16>, vector<64x32xf32> -> vector<64x32xf32>
    %cst_154 = arith.constant dense<0.000000e+00> : vector<64x32xf32>
    %268 = tpu.matmul %34, %266, %cst_154 {dimension_numbers = #tpu.dot_dimension_numbers<[1], [0], [0], [1], [0, 0, 1, 1], [], []>} : vector<64x240xbf16>, vector<240x32xbf16>, vector<64x32xf32> -> vector<64x32xf32>
    %269 = arith.maximumf %267, %268 : vector<64x32xf32>
    %c1_155 = arith.constant 1 : index
    %c0_156 = arith.constant 0 : index
    %c0_157 = arith.constant 0 : index
    %270 = vector.load %arg18[%c1_155, %c0_156, %c0_157] : memref<2x64x32xf32, #tpu.memory_space<vmem>>, vector<1x64x32xf32>
    %271 = vector.shape_cast %270 : vector<1x64x32xf32> to vector<64x32xf32>
    %272 = vector.shape_cast %269 : vector<64x32xf32> to vector<1x64x32xf32>
    tpu.vector_store %arg18[%c1_155, %c0_156, %c0_157], %272 {strides = array<i32>} : memref<2x64x32xf32, #tpu.memory_space<vmem>>, vector<1x64x32xf32>,
    return
  }
  func.func @transform_0(%arg0: i32) -> (i32, i32) {
    %c0_i32 = arith.constant 0 : i32
    %c0_i32_0 = arith.constant 0 : i32
    %c0_i32_1 = arith.constant 0 : i32
    return %c0_i32, %c0_i32_0 : i32, i32
  }
  func.func @transform_1(%arg0: i32) -> (i32, i32) {
    %c0_i32 = arith.constant 0 : i32
    %c0_i32_0 = arith.constant 0 : i32
    %c0_i32_1 = arith.constant 0 : i32
    return %c0_i32, %c0_i32_0 : i32, i32
  }
  func.func @transform_2(%arg0: i32) -> (i32, i32) {
    %c0_i32 = arith.constant 0 : i32
    %c0_i32_0 = arith.constant 0 : i32
    %c0_i32_1 = arith.constant 0 : i32
    return %c0_i32, %c0_i32_0 : i32, i32
  }
  func.func @transform_3(%arg0: i32) -> (i32, i32) {
    %c0_i32 = arith.constant 0 : i32
    %c0_i32_0 = arith.constant 0 : i32
    %c0_i32_1 = arith.constant 0 : i32
    return %c0_i32, %c0_i32_0 : i32, i32
  }
  func.func @transform_4(%arg0: i32) -> (i32, i32) {
    %c0_i32 = arith.constant 0 : i32
    %c0_i32_0 = arith.constant 0 : i32
    %c0_i32_1 = arith.constant 0 : i32
    return %c0_i32, %c0_i32_0 : i32, i32
  }
  func.func @transform_5(%arg0: i32) -> (i32, i32) {
    %c0_i32 = arith.constant 0 : i32
    %c0_i32_0 = arith.constant 0 : i32
    %c0_i32_1 = arith.constant 0 : i32
    return %c0_i32, %c0_i32_0 : i32, i32
  }
  func.func @transform_6(%arg0: i32) -> (i32, i32) {
    %c0_i32 = arith.constant 0 : i32
    %c0_i32_0 = arith.constant 0 : i32
    %c0_i32_1 = arith.constant 0 : i32
    return %c0_i32, %c0_i32_0 : i32, i32
  }
  func.func @transform_7(%arg0: i32) -> (i32, i32) {
    %c0_i32 = arith.constant 0 : i32
    %c0_i32_0 = arith.constant 0 : i32
    %c0_i32_1 = arith.constant 0 : i32
    return %c0_i32, %c0_i32_0 : i32, i32
  }
  func.func @transform_8(%arg0: i32) -> (i32, i32) {
    %c0_i32 = arith.constant 0 : i32
    %c0_i32_0 = arith.constant 0 : i32
    %c0_i32_1 = arith.constant 0 : i32
    return %c0_i32, %c0_i32_0 : i32, i32
  }
  func.func @transform_9(%arg0: i32) -> (i32, i32) {
    %c0_i32 = arith.constant 0 : i32
    %c0_i32_0 = arith.constant 0 : i32
    %c0_i32_1 = arith.constant 0 : i32
    return %c0_i32, %c0_i32_0 : i32, i32
  }
  func.func @transform_10(%arg0: i32) -> (i32, i32) {
    %c0_i32 = arith.constant 0 : i32
    %c0_i32_0 = arith.constant 0 : i32
    %c0_i32_1 = arith.constant 0 : i32
    return %c0_i32, %c0_i32_0 : i32, i32
  }
  func.func @transform_11(%arg0: i32) -> (i32, i32) {
    %c0_i32 = arith.constant 0 : i32
    %c0_i32_0 = arith.constant 0 : i32
    %c0_i32_1 = arith.constant 0 : i32
    return %c0_i32, %c0_i32_0 : i32, i32
  }
  func.func @transform_12(%arg0: i32) -> (i32, i32) {
    %c0_i32 = arith.constant 0 : i32
    %c0_i32_0 = arith.constant 0 : i32
    %c0_i32_1 = arith.constant 0 : i32
    return %c0_i32, %c0_i32_0 : i32, i32
  }
  func.func @transform_13(%arg0: i32) -> (i32, i32) {
    %c0_i32 = arith.constant 0 : i32
    %c0_i32_0 = arith.constant 0 : i32
    %c0_i32_1 = arith.constant 0 : i32
    return %c0_i32, %c0_i32_0 : i32, i32
  }
  func.func @transform_14(%arg0: i32) -> (i32, i32) {
    %c0_i32 = arith.constant 0 : i32
    %c0_i32_0 = arith.constant 0 : i32
    %c0_i32_1 = arith.constant 0 : i32
    return %c0_i32, %c0_i32_0 : i32, i32
  }
  func.func @transform_15(%arg0: i32) -> (i32, i32) {
    %c0_i32 = arith.constant 0 : i32
    %c0_i32_0 = arith.constant 0 : i32
    %c0_i32_1 = arith.constant 0 : i32
    return %c0_i32, %c0_i32_0 : i32, i32
  }
  func.func @transform_16(%arg0: i32) -> (i32, i32, i32) {
    %c0_i32 = arith.constant 0 : i32
    %c0_i32_0 = arith.constant 0 : i32
    %c0_i32_1 = arith.constant 0 : i32
    %c0_i32_2 = arith.constant 0 : i32
    return %c0_i32, %c0_i32_0, %c0_i32_1 : i32, i32, i32
  }
  func.func @transform_17(%arg0: i32) -> (i32, i32, i32) {
    %c0_i32 = arith.constant 0 : i32
    %c0_i32_0 = arith.constant 0 : i32
    %c0_i32_1 = arith.constant 0 : i32
    %c0_i32_2 = arith.constant 0 : i32
    return %c0_i32, %c0_i32_0, %c0_i32_1 : i32, i32, i32
  }
}

</mosaic_0001>

<bundles_post_ra>
// kernel: gesture_net_forward.1
= control target key start
LH: loop header
LB: loop body
LE: loop exit
PB: predicated region body
PF: predicated region fallthrough
CT: control target
= control target key end

     0   :  { %s15549_s0 = inlined_call_operand.vmem [shape: bf16[512,36], index: 0, kind: input, shape index: {}]   ;;  %s15550_s1 = inlined_call_operand.vmem [shape: bf16[36,32], index: 1, kind: input, shape index: {}]   ;;  %s15551_s2 = inlined_call_operand.vmem [shape: f32[1,32], index: 2, kind: input, shape index: {}]   ;;  %s15552_s3 = inlined_call_operand.vmem [shape: f32[1,32], index: 3, kind: input, shape index: {}]   ;;  %s15553_s4 = inlined_call_operand.vmem [shape: f32[1,32], index: 4, kind: input, shape index: {}]   ;;  %s15554_s5 = inlined_call_operand.vmem [shape: f32[32,2], index: 5, kind: input, shape index: {}]   ;;  %s15555_s6 = inlined_call_operand.vmem [shape: f32[2,32], index: 6, kind: input, shape index: {}]   ;;  %s15556_s7 = inlined_call_operand.vmem [shape: bf16[256,512], index: 7, kind: input, shape index: {}]   ;;  %s15557_s8 = inlined_call_operand.vmem [shape: bf16[32,16], index: 8, kind: input, shape index: {}]   ;;  %s15558_s9 = inlined_call_operand.vmem [shape: f32[1,16], index: 9, kind: input, shape index: {}]   ;;  %s15559_s10 = inlined_call_operand.vmem [shape: bf16[32,32], index: 10, kind: input, shape index: {}]   ;;  %s15560_s11 = inlined_call_operand.vmem [shape: f32[1,32], index: 11, kind: input, shape index: {}]   ;;  %s15561_s12 = inlined_call_operand.vmem [shape: bf16[16,32], index: 12, kind: input, shape index: {}]   ;;  %s15562_s13 = inlined_call_operand.vmem [shape: f32[1,32], index: 13, kind: input, shape index: {}]   ;;  %s15563_s14 = inlined_call_operand.vmem [shape: f32[1,32], index: 14, kind: input, shape index: {}]   ;;  %s15564_s15 = inlined_call_operand.vmem [shape: f32[1,32], index: 15, kind: input, shape index: {}]   ;;  %s15565_s16 = inlined_call_operand.vmem [shape: bf16[2,64,240], index: 16, kind: input, shape index: {}]   ;;  %s15566_s17 = inlined_call_operand.hbm [shape: f32[2,64,32], index: 17, kind: output, shape index: {}]  }
   0x1   :  { %15632 = sst [smem:[#allocation57_spill]] %s15549_s0 }
   0x2   :  { %15633 = sst [smem:[#allocation58_spill]] %s15550_s1 }
   0x3   :  { %s15634_s26 = sld [smem:[#allocation58_spill]]  ;;  %vm309_vm0 = vcmask 293888   ;;  %s15635_s19 = sld [smem:[#allocation57_spill]]  ;;  %vm406_vm1 = vcmask 1041408  }
   0x9   :  { %v10803_v0 = vld [vmem:[%s15634_s26] sm:$0xff]   ;;  %v10804_v1 = vld [vmem:[%s15634_s26 + $0x8] sm:$0xff]   ;;  %v10805_v2 = vld [vmem:[%s15634_s26 + $0x10] ss:$0 sps:$4 sm:$0x33]  }
   0xa   :  { %10243 = vmatprep.subr.bf16.mxu0 %v10803_v0  ;;  %v10806_v3 = vld [vmem:[%s15635_s19] sm:$0xff]   ;;  %10773 = vmatprep.subr.bf16.mxu1 %v10803_v0  ;;  %v408_v4 = vsel %vm406_vm1, %v10805_v2, 0  ;;  %v10807_v5 = vld [vmem:[%s15635_s19 + $0x8] sm:$0xff]   ;;  %v10808_v6 = vld [vmem:[%s15635_s19 + $0x10] sm:$0xff]  }
   0xb   :  { %10244 = vmatpush3.bf16.msra.mxu0 %v10803_v0  ;;  %10776 = vmatpush3.bf16.msra.mxu1 %v10803_v0  ;;  %v10809_v7 = vld [vmem:[%s15635_s19 + $0x18] sm:$0xff]   ;;  %v10810_v8 = vld [vmem:[%s15635_s19 + $0x20] sm:$0xff]   ;;  %v10811_v9 = vld [vmem:[%s15635_s19 + $0x28] sm:$0xff]  }
   0xc   :  { %10245 = vmatprep.subr.bf16.mxu0 %v10804_v1  ;;  %10249 = vmatprep.mubr.msk.bf16.mxu0 %vm309_vm0, %v10806_v3  ;;  %v10812_v10 = vld [vmem:[%s15635_s19 + $0x30] sm:$0xff]   ;;  %v10834_v11 = vld [vmem:[%s15635_s19 + $0xe0] sm:$0xff]   ;;  %v10813_v12 = vld [vmem:[%s15635_s19 + $0x38] sm:$0xff]  }
   0xd   :  { %10774 = vmatprep.subr.bf16.mxu1 %v10804_v1  ;;  %v10835_v13 = vld [vmem:[%s15635_s19 + $0xe8] sm:$0xff]   ;;  %10305 = vmatprep.mubr.msk.bf16.mxu1 %vm309_vm0, %v10834_v11  ;;  %v10836_v14 = vld [vmem:[%s15635_s19 + $0xf0] sm:$0xff]   ;;  %v10814_v15 = vld [vmem:[%s15635_s19 + $0x40] sm:$0xff]  }
   0xe   :  { %v10837_v16 = vld [vmem:[%s15635_s19 + $0xf8] sm:$0xff]   ;;  %v10815_v17 = vld [vmem:[%s15635_s19 + $0x48] sm:$0xff]   ;;  %v10816_v18 = vld [vmem:[%s15635_s19 + $0x50] sm:$0xff]  }
   0xf   :  { %10246 = vmatpush3.bf16.msra.mxu0 %v10804_v1  ;;  %10777 = vmatpush3.bf16.msra.mxu1 %v10804_v1  ;;  %v10817_v19 = vld [vmem:[%s15635_s19 + $0x58] sm:$0xff]   ;;  %v10818_v20 = vld [vmem:[%s15635_s19 + $0x60] sm:$0xff]   ;;  %v10819_v21 = vld [vmem:[%s15635_s19 + $0x68] sm:$0xff]  }
  0x10   :  { %10783 = vmatprep.subr.msk.bf16.mxu0 %vm406_vm1, %v10805_v2  ;;  %10784 = vmatprep.subr.msk.bf16.mxu1 %vm406_vm1, %v10805_v2  ;;  %v10820_v22 = vld [vmem:[%s15635_s19 + $0x70] sm:$0xff]   ;;  %v10821_v23 = vld [vmem:[%s15635_s19 + $0x78] sm:$0xff]   ;;  %v10822_v24 = vld [vmem:[%s15635_s19 + $0x80] sm:$0xff]  }
  0x11   :  { %v10823_v25 = vld [vmem:[%s15635_s19 + $0x88] sm:$0xff]   ;;  %v10824_v26 = vld [vmem:[%s15635_s19 + $0x90] sm:$0xff]   ;;  %v10825_v27 = vld [vmem:[%s15635_s19 + $0x98] sm:$0xff]  }
  0x12   :  { %v10826_v28 = vld [vmem:[%s15635_s19 + $0xa0] sm:$0xff]  }
  0x13   :  { %10248 = vmatpush3.bf16.msra.mxu0 %v408_v4  ;;  %10778 = vmatpush3.bf16.msra.mxu1 %v408_v4 }
  0x16   :  { %10250 = vmatmul.mubr.msk.bf16.vlgmr.msra.gmra.mrb[0].mxu0 %vm309_vm0, %v10807_v5  ;;  %10306 = vmatmul.mubr.msk.bf16.vlgmr.msra.gmra.mrb[0].mxu1 %vm309_vm0, %v10835_v13 }
  0x17   :  { %10253 = vmatprep.mubr.msk.bf16.mxu0 %vm309_vm0, %v10808_v6  ;;  %10309 = vmatprep.mubr.msk.bf16.mxu1 %vm309_vm0, %v10836_v14 }
  0x1e   :  { %10254 = vmatmul.mubr.msk.bf16.gmra.mrb[4].mxu0 %vm309_vm0, %v10809_v7  ;;  %10310 = vmatmul.mubr.msk.bf16.gmra.mrb[4].mxu1 %vm309_vm0, %v10837_v16 }
  0x1f   :  { %10257 = vmatprep.mubr.msk.bf16.mxu0 %vm309_vm0, %v10810_v8 }
  0x26   :  { %10258 = vmatmul.mubr.msk.bf16.gmra.mrb[8].mxu0 %vm309_vm0, %v10811_v9 }
  0x27   :  { %10261 = vmatprep.mubr.msk.bf16.mxu0 %vm309_vm0, %v10812_v10 }
  0x2e   :  { %10262 = vmatmul.mubr.msk.bf16.gmra.mrb[12].mxu0 %vm309_vm0, %v10813_v12 }
  0x2f   :  { %10265 = vmatprep.mubr.msk.bf16.mxu0 %vm309_vm0, %v10814_v15 }
  0x36   :  { %10266 = vmatmul.mubr.msk.bf16.gmra.mrb[16].mxu0 %vm309_vm0, %v10815_v17 }
  0x37   :  { %10269 = vmatprep.mubr.msk.bf16.mxu0 %vm309_vm0, %v10816_v18 }
  0x3e   :  { %10270 = vmatmul.mubr.msk.bf16.gmra.mrb[20].mxu0 %vm309_vm0, %v10817_v19 }
  0x3f   :  { %10273 = vmatprep.mubr.msk.bf16.mxu0 %vm309_vm0, %v10818_v20 }
  0x46   :  { %10274 = vmatmul.mubr.msk.bf16.gmra.mrb[24].mxu0 %vm309_vm0, %v10819_v21 }
  0x47   :  { %10277 = vmatprep.mubr.msk.bf16.mxu0 %vm309_vm0, %v10820_v22 }
  0x4e   :  { %10278 = vmatmul.mubr.msk.bf16.gmra.mrb[28].mxu0 %vm309_vm0, %v10821_v23 }
  0x4f   :  { %10281 = vmatprep.mubr.msk.bf16.mxu0 %vm309_vm0, %v10822_v24 }
  0x56   :  { %10282 = vmatmul.mubr.msk.bf16.gmra.mrb[32].mxu0 %vm309_vm0, %v10823_v25 }
  0x57   :  { %10285 = vmatprep.mubr.msk.bf16.mxu0 %vm309_vm0, %v10824_v26 }
  0x5e   :  { %10286 = vmatmul.mubr.msk.bf16.gmra.mrb[36].mxu0 %vm309_vm0, %v10825_v27 }
  0x5f   :  { %10289 = vmatprep.mubr.msk.bf16.mxu0 %vm309_vm0, %v10826_v28 }
  0x60   :  { %22 = vsyncpa [#allocation5], 0  ;;  %v10827_v29 = vld [vmem:[%s15635_s19 + $0xa8] sm:$0xff]   ;;  %v10828_v30 = vld [vmem:[%s15635_s19 + $0xb0] sm:$0xff]   ;;  %vm699_vm2 = vcmask 261120   ;;  %vm11390_vm3 = vmmov 0  }
  0x61   :  { %v10829_v31 = vld [vmem:[%s15635_s19 + $0xb8] sm:$0xff]   ;;  %v10830_v32 = vld [vmem:[%s15635_s19 + $0xc0] sm:$0xff]   ;;  %v10831_v33 = vld [vmem:[%s15635_s19 + $0xc8] sm:$0xff]   ;;  %vm1618_vm4 = vcmask 15360   ;;  %vm3702_vm5 = vcmask 916480   ;;  %vm3921_vm6 = vcmask 130048  }
  0x62   :  { %v10832_v34 = vld [vmem:[%s15635_s19 + $0xd0] sm:$0xff]   ;;  %v10833_v35 = vld [vmem:[%s15635_s19 + $0xd8] sm:$0xff]   ;;  %v11630_v36 = vld [vmem:[%s15551_s2] ss:$0 sm:$0xff]  ;;  %s11393_s29 = smov 112   ;;  %vm4207_vm7 = vcmask 523264  }
  0x66   :  { %10290 = vmatmul.mubr.msk.bf16.gmra.mrb[40].mxu0 %vm309_vm0, %v10827_v29 }
  0x67   :  { %10293 = vmatprep.mubr.msk.bf16.mxu0 %vm309_vm0, %v10828_v30 }
  0x6e   :  { %10294 = vmatmul.mubr.msk.bf16.gmra.mrb[44].mxu0 %vm309_vm0, %v10829_v31 }
  0x6f   :  { %10297 = vmatprep.mubr.msk.bf16.mxu0 %vm309_vm0, %v10830_v32 }
  0x76   :  { %10298 = vmatmul.mubr.msk.bf16.gmra.mrb[48].mxu0 %vm309_vm0, %v10831_v33 }
  0x77   :  { %10301 = vmatprep.mubr.msk.bf16.mxu0 %vm309_vm0, %v10832_v34 }
  0x7e   :  { %10302 = vmatmul.mubr.msk.bf16.gmra.mrb[52].mxu0 %vm309_vm0, %v10833_v35 }
  0xe9   :  { %v10251_v37 = vpop.f32.mrb[0].mxu0  ;;  %v11683_v12 = vpop.f32.mrb[0].mxu1 }
  0xea   :  { %v444_v38 = vpop.f32.mrb[1].mxu0  ;;  %v11636_v42 = vadd.f32 %v10251_v37, %v11630_v36  ;;  %v11685_v14 = vpop.f32.mrb[1].mxu1 }
  0xeb   :  { %v11633_v39 = vadd.f32 %v11630_v36, %v444_v38  ;;  %v10252_v40 = vpop.f32.mrb[2].mxu0  ;;  %v11692_v17 = vpop.f32.mrb[2].mxu1 }
  0xec   :  { %v447_v41 = vpop.f32.mrb[3].mxu0  ;;  %v11644_v45 = vadd.f32 %v10252_v40, %v11630_v36  ;;  %v703_v48 = vsel %vm699_vm2, %v11636_v42, 0.0  ;;  %v11694_v19 = vpop.f32.mrb[3].mxu1 }
  0xed   :  { %v11639_v43 = vadd.f32 %v11630_v36, %v447_v41  ;;  %v700_v44 = vsel %vm699_vm2, %v11633_v39, 0.0 }
  0xee   :  { %15636 = vst [vmem:[#allocation7_spill] sm:$0xff] %v11644_v45  ;;  %v705_v52 = vsel %vm699_vm2, %v11644_v45, 0.0 }
  0xef   :  { %v701_v46 = vsel %vm699_vm2, %v11639_v43, 0.0 }
  0xf0   :  { %v702_v47 = vadd.f32 %v701_v46, %v700_v44 }
  0xf1   :  { %v10255_v49 = vpop.f32.mrb[4].mxu0  ;;  %v11711_v32 = vpop.f32.mrb[4].mxu1 }
  0xf2   :  { %v704_v50 = vadd.f32 %v703_v48, %v702_v47  ;;  %v460_v51 = vpop.f32.mrb[5].mxu0  ;;  %v11656_v57 = vadd.f32 %v10255_v49, %v11630_v36  ;;  %v11713_v34 = vpop.f32.mrb[5].mxu1 }
  0xf3   :  { %v11653_v53 = vadd.f32 %v11630_v36, %v460_v51  ;;  %v10256_v54 = vpop.f32.mrb[6].mxu0  ;;  %v11720_v38 = vpop.f32.mrb[6].mxu1 }
  0xf4   :  { %v706_v55 = vadd.f32 %v705_v52, %v704_v50  ;;  %v463_v56 = vpop.f32.mrb[7].mxu0  ;;  %v11664_v61 = vadd.f32 %v10256_v54, %v11630_v36  ;;  %v711_v0 = vsel %vm699_vm2, %v11656_v57, 0.0  ;;  %v11722_v41 = vpop.f32.mrb[7].mxu1 }
  0xf5   :  { %15637 = vst [vmem:[#allocation8_spill] sm:$0xff] %v11653_v53  ;;  %v707_v58 = vsel %vm699_vm2, %v11653_v53, 0.0  ;;  %v11661_v59 = vadd.f32 %v11630_v36, %v463_v56 }
  0xf6   :  { %v708_v60 = vadd.f32 %v707_v58, %v706_v55  ;;  %v713_v4 = vsel %vm699_vm2, %v11664_v61, 0.0 }
  0xf7   :  { %15638 = vst [vmem:[#allocation9_spill] sm:$0xff] %v11661_v59  ;;  %v709_v62 = vsel %vm699_vm2, %v11661_v59, 0.0 }
  0xf8   :  { %v710_v63 = vadd.f32 %v709_v62, %v708_v60 }
  0xf9   :  { %v10259_v1 = vpop.f32.mrb[8].mxu0 }
  0xfa   :  { %v712_v2 = vadd.f32 %v711_v0, %v710_v63  ;;  %v476_v3 = vpop.f32.mrb[9].mxu0  ;;  %v11676_v9 = vadd.f32 %v10259_v1, %v11630_v36 }
  0xfb   :  { %v11673_v5 = vadd.f32 %v11630_v36, %v476_v3  ;;  %v10260_v6 = vpop.f32.mrb[10].mxu0 }
  0xfc   :  { %v714_v7 = vadd.f32 %v713_v4, %v712_v2  ;;  %v479_v8 = vpop.f32.mrb[11].mxu0  ;;  %v11688_v15 = vadd.f32 %v10260_v6, %v11630_v36  ;;  %v719_v20 = vsel %vm699_vm2, %v11676_v9, 0.0 }
  0xfd   :  { %v715_v10 = vsel %vm699_vm2, %v11673_v5, 0.0  ;;  %v11681_v11 = vadd.f32 %v11630_v36, %v479_v8 }
  0xfe   :  { %v716_v13 = vadd.f32 %v715_v10, %v714_v7  ;;  %v721_v24 = vsel %vm699_vm2, %v11688_v15, 0.0 }
  0xff   :  { %v717_v16 = vsel %vm699_vm2, %v11681_v11, 0.0 }
 0x100   :  { %v718_v18 = vadd.f32 %v717_v16, %v716_v13 }
 0x101   :  { %v10263_v21 = vpop.f32.mrb[12].mxu0 }
 0x102   :  { %v720_v22 = vadd.f32 %v719_v20, %v718_v18  ;;  %v492_v23 = vpop.f32.mrb[13].mxu0  ;;  %v11704_v29 = vadd.f32 %v10263_v21, %v11630_v36 }
 0x103   :  { %v11701_v25 = vadd.f32 %v11630_v36, %v492_v23  ;;  %v10264_v26 = vpop.f32.mrb[14].mxu0 }
 0x104   :  { %v722_v27 = vadd.f32 %v721_v24, %v720_v22  ;;  %v495_v28 = vpop.f32.mrb[15].mxu0  ;;  %15640 = vst [vmem:[#allocation11_spill] sm:$0xff] %v11704_v29  ;;  %v11716_v35 = vadd.f32 %v10264_v26, %v11630_v36  ;;  %v727_v44 = vsel %vm699_vm2, %v11704_v29, 0.0 }
 0x105   :  { %15639 = vst [vmem:[#allocation10_spill] sm:$0xff] %v11701_v25  ;;  %v723_v30 = vsel %vm699_vm2, %v11701_v25, 0.0  ;;  %v11709_v31 = vadd.f32 %v11630_v36, %v495_v28 }
 0x106   :  { %v724_v33 = vadd.f32 %v723_v30, %v722_v27  ;;  %15642 = vst [vmem:[#allocation13_spill] sm:$0xff] %v11716_v35  ;;  %v729_v49 = vsel %vm699_vm2, %v11716_v35, 0.0 }
 0x107   :  { %15641 = vst [vmem:[#allocation12_spill] sm:$0xff] %v11709_v31  ;;  %v725_v37 = vsel %vm699_vm2, %v11709_v31, 0.0 }
 0x108   :  { %v726_v40 = vadd.f32 %v725_v37, %v724_v33 }
 0x109   :  { %v10267_v46 = vpop.f32.mrb[16].mxu0 }
 0x10a   :  { %v728_v47 = vadd.f32 %v727_v44, %v726_v40  ;;  %v508_v48 = vpop.f32.mrb[17].mxu0  ;;  %v11732_v55 = vadd.f32 %v10267_v46, %v11630_v36 }
 0x10b   :  { %v11729_v50 = vadd.f32 %v11630_v36, %v508_v48  ;;  %v10268_v51 = vpop.f32.mrb[18].mxu0 }
 0x10c   :  { %v730_v52 = vadd.f32 %v729_v49, %v728_v47  ;;  %v511_v54 = vpop.f32.mrb[19].mxu0  ;;  %15644 = vst [vmem:[#allocation15_spill] sm:$0xff] %v11732_v55  ;;  %v11740_v62 = vadd.f32 %v10268_v51, %v11630_v36  ;;  %v735_v1 = vsel %vm699_vm2, %v11732_v55, 0.0 }
 0x10d   :  { %15643 = vst [vmem:[#allocation14_spill] sm:$0xff] %v11729_v50  ;;  %v731_v56 = vsel %vm699_vm2, %v11729_v50, 0.0  ;;  %v11737_v58 = vadd.f32 %v11630_v36, %v511_v54 }
 0x10e   :  { %v732_v60 = vadd.f32 %v731_v56, %v730_v52  ;;  %15646 = vst [vmem:[#allocation17_spill] sm:$0xff] %v11740_v62  ;;  %v737_v6 = vsel %vm699_vm2, %v11740_v62, 0.0 }
 0x10f   :  { %15645 = vst [vmem:[#allocation16_spill] sm:$0xff] %v11737_v58  ;;  %v733_v63 = vsel %vm699_vm2, %v11737_v58, 0.0 }
 0x110   :  { %v734_v0 = vadd.f32 %v733_v63, %v732_v60 }
 0x111   :  { %v10271_v2 = vpop.f32.mrb[20].mxu0 }
 0x112   :  { %v736_v3 = vadd.f32 %v735_v1, %v734_v0  ;;  %v524_v4 = vpop.f32.mrb[21].mxu0  ;;  %v11752_v16 = vadd.f32 %v10271_v2, %v11630_v36 }
 0x113   :  { %v11749_v7 = vadd.f32 %v11630_v36, %v524_v4  ;;  %v10272_v8 = vpop.f32.mrb[22].mxu0 }
 0x114   :  { %v738_v10 = vadd.f32 %v737_v6, %v736_v3  ;;  %v527_v13 = vpop.f32.mrb[23].mxu0  ;;  %15648 = vst [vmem:[#allocation19_spill] sm:$0xff] %v11752_v16  ;;  %v11760_v22 = vadd.f32 %v10272_v8, %v11630_v36  ;;  %v743_v26 = vsel %vm699_vm2, %v11752_v16, 0.0 }
 0x115   :  { %15647 = vst [vmem:[#allocation18_spill] sm:$0xff] %v11749_v7  ;;  %v739_v18 = vsel %vm699_vm2, %v11749_v7, 0.0  ;;  %v11757_v20 = vadd.f32 %v11630_v36, %v527_v13 }
 0x116   :  { %v740_v21 = vadd.f32 %v739_v18, %v738_v10  ;;  %15650 = vst [vmem:[#allocation21_spill] sm:$0xff] %v11760_v22  ;;  %v745_v33 = vsel %vm699_vm2, %v11760_v22, 0.0 }
 0x117   :  { %15649 = vst [vmem:[#allocation20_spill] sm:$0xff] %v11757_v20  ;;  %v741_v23 = vsel %vm699_vm2, %v11757_v20, 0.0 }
 0x118   :  { %v742_v24 = vadd.f32 %v741_v23, %v740_v21 }
 0x119   :  { %v10275_v27 = vpop.f32.mrb[24].mxu0 }
 0x11a   :  { %v744_v28 = vadd.f32 %v743_v26, %v742_v24  ;;  %v540_v30 = vpop.f32.mrb[25].mxu0  ;;  %v11772_v47 = vadd.f32 %v10275_v27, %v11630_v36 }
 0x11b   :  { %v11769_v37 = vadd.f32 %v11630_v36, %v540_v30  ;;  %v10276_v40 = vpop.f32.mrb[26].mxu0 }
 0x11c   :  { %v746_v44 = vadd.f32 %v745_v33, %v744_v28  ;;  %v543_v46 = vpop.f32.mrb[27].mxu0  ;;  %15652 = vst [vmem:[#allocation23_spill] sm:$0xff] %v11772_v47  ;;  %v11780_v52 = vadd.f32 %v10276_v40, %v11630_v36  ;;  %v751_v60 = vsel %vm699_vm2, %v11772_v47, 0.0 }
 0x11d   :  { %15651 = vst [vmem:[#allocation22_spill] sm:$0xff] %v11769_v37  ;;  %v747_v48 = vsel %vm699_vm2, %v11769_v37, 0.0  ;;  %v11777_v49 = vadd.f32 %v11630_v36, %v543_v46 }
 0x11e   :  { %v748_v51 = vadd.f32 %v747_v48, %v746_v44  ;;  %15654 = vst [vmem:[#allocation25_spill] sm:$0xff] %v11780_v52  ;;  %v753_v2 = vsel %vm699_vm2, %v11780_v52, 0.0 }
 0x11f   :  { %15653 = vst [vmem:[#allocation24_spill] sm:$0xff] %v11777_v49  ;;  %v749_v54 = vsel %vm699_vm2, %v11777_v49, 0.0 }
 0x120   :  { %v750_v56 = vadd.f32 %v749_v54, %v748_v51 }
 0x121   :  { %v10279_v63 = vpop.f32.mrb[28].mxu0 }
 0x122   :  { %v752_v0 = vadd.f32 %v751_v60, %v750_v56  ;;  %v556_v1 = vpop.f32.mrb[29].mxu0  ;;  %v11792_v10 = vadd.f32 %v10279_v63, %v11630_v36 }
 0x123   :  { %v11789_v3 = vadd.f32 %v11630_v36, %v556_v1  ;;  %v10280_v4 = vpop.f32.mrb[30].mxu0 }
 0x124   :  { %v754_v6 = vadd.f32 %v753_v2, %v752_v0  ;;  %v559_v8 = vpop.f32.mrb[31].mxu0  ;;  %15656 = vst [vmem:[#allocation27_spill] sm:$0xff] %v11792_v10  ;;  %v11800_v23 = vadd.f32 %v10280_v4, %v11630_v36  ;;  %v759_v27 = vsel %vm699_vm2, %v11792_v10, 0.0 }
 0x125   :  { %15655 = vst [vmem:[#allocation26_spill] sm:$0xff] %v11789_v3  ;;  %v755_v13 = vsel %vm699_vm2, %v11789_v3, 0.0  ;;  %v11797_v18 = vadd.f32 %v11630_v36, %v559_v8 }
 0x126   :  { %v756_v21 = vadd.f32 %v755_v13, %v754_v6  ;;  %15658 = vst [vmem:[#allocation29_spill] sm:$0xff] %v11800_v23  ;;  %v761_v40 = vsel %vm699_vm2, %v11800_v23, 0.0 }
 0x127   :  { %15657 = vst [vmem:[#allocation28_spill] sm:$0xff] %v11797_v18  ;;  %v757_v24 = vsel %vm699_vm2, %v11797_v18, 0.0 }
 0x128   :  { %v758_v26 = vadd.f32 %v757_v24, %v756_v21 }
 0x129   :  { %v10283_v28 = vpop.f32.mrb[32].mxu0 }
 0x12a   :  { %v760_v30 = vadd.f32 %v759_v27, %v758_v26  ;;  %v572_v33 = vpop.f32.mrb[33].mxu0  ;;  %v11812_v54 = vadd.f32 %v10283_v28, %v11630_v36 }
 0x12b   :  { %v11809_v44 = vadd.f32 %v11630_v36, %v572_v33  ;;  %v10284_v46 = vpop.f32.mrb[34].mxu0 }
 0x12c   :  { %v762_v48 = vadd.f32 %v761_v40, %v760_v30  ;;  %v575_v51 = vpop.f32.mrb[35].mxu0  ;;  %v11820_v0 = vadd.f32 %v10284_v46, %v11630_v36  ;;  %v767_v4 = vsel %vm699_vm2, %v11812_v54, 0.0 }
 0x12d   :  { %v763_v56 = vsel %vm699_vm2, %v11809_v44, 0.0  ;;  %v11817_v60 = vadd.f32 %v11630_v36, %v575_v51 }
 0x12e   :  { %v764_v63 = vadd.f32 %v763_v56, %v762_v48  ;;  %v769_v21 = vsel %vm699_vm2, %v11820_v0, 0.0 }
 0x12f   :  { %v765_v1 = vsel %vm699_vm2, %v11817_v60, 0.0 }
 0x130   :  { %v766_v2 = vadd.f32 %v765_v1, %v764_v63 }
 0x131   :  { %v10287_v6 = vpop.f32.mrb[36].mxu0 }
 0x132   :  { %v768_v8 = vadd.f32 %v767_v4, %v766_v2  ;;  %v588_v13 = vpop.f32.mrb[37].mxu0  ;;  %v11832_v30 = vadd.f32 %v10287_v6, %v11630_v36 }
 0x133   :  { %v11829_v24 = vadd.f32 %v11630_v36, %v588_v13  ;;  %v10288_v26 = vpop.f32.mrb[38].mxu0 }
 0x134   :  { %v770_v27 = vadd.f32 %v769_v21, %v768_v8  ;;  %v591_v28 = vpop.f32.mrb[39].mxu0  ;;  %v11840_v48 = vadd.f32 %v10288_v26, %v11630_v36  ;;  %v775_v63 = vsel %vm699_vm2, %v11832_v30, 0.0 }
 0x135   :  { %v771_v33 = vsel %vm699_vm2, %v11829_v24, 0.0  ;;  %v11837_v40 = vadd.f32 %v11630_v36, %v591_v28 }
 0x136   :  { %v772_v46 = vadd.f32 %v771_v33, %v770_v27  ;;  %15659 = vst [vmem:[#allocation30_spill] sm:$0xff] %v11840_v48  ;;  %v777_v6 = vsel %vm699_vm2, %v11840_v48, 0.0 }
 0x137   :  { %v773_v51 = vsel %vm699_vm2, %v11837_v40, 0.0 }
 0x138   :  { %v774_v56 = vadd.f32 %v773_v51, %v772_v46 }
 0x139   :  { %v10291_v1 = vpop.f32.mrb[40].mxu0 }
 0x13a   :  { %v776_v2 = vadd.f32 %v775_v63, %v774_v56  ;;  %v604_v4 = vpop.f32.mrb[41].mxu0  ;;  %v11852_v27 = vadd.f32 %v10291_v1, %v11630_v36 }
 0x13b   :  { %v11849_v8 = vadd.f32 %v11630_v36, %v604_v4  ;;  %v10292_v13 = vpop.f32.mrb[42].mxu0 }
 0x13c   :  { %v778_v21 = vadd.f32 %v777_v6, %v776_v2  ;;  %v607_v26 = vpop.f32.mrb[43].mxu0  ;;  %15661 = vst [vmem:[#allocation32_spill] sm:$0xff] %v11852_v27  ;;  %v11860_v51 = vadd.f32 %v10292_v13, %v11630_v36  ;;  %v783_v2 = vsel %vm699_vm2, %v11852_v27, 0.0 }
 0x13d   :  { %15660 = vst [vmem:[#allocation31_spill] sm:$0xff] %v11849_v8  ;;  %v779_v28 = vsel %vm699_vm2, %v11849_v8, 0.0  ;;  %v11857_v33 = vadd.f32 %v11630_v36, %v607_v26 }
 0x13e   :  { %v780_v46 = vadd.f32 %v779_v28, %v778_v21  ;;  %15663 = vst [vmem:[#allocation34_spill] sm:$0xff] %v11860_v51  ;;  %v785_v8 = vsel %vm699_vm2, %v11860_v51, 0.0 }
 0x13f   :  { %15662 = vst [vmem:[#allocation33_spill] sm:$0xff] %v11857_v33  ;;  %v781_v56 = vsel %vm699_vm2, %v11857_v33, 0.0 }
 0x140   :  { %v782_v63 = vadd.f32 %v781_v56, %v780_v46 }
 0x141   :  { %v10295_v4 = vpop.f32.mrb[44].mxu0 }
 0x142   :  { %v784_v1 = vadd.f32 %v783_v2, %v782_v63  ;;  %v620_v6 = vpop.f32.mrb[45].mxu0  ;;  %v11872_v48 = vadd.f32 %v10295_v4, %v11630_v36 }
 0x143   :  { %v11869_v26 = vadd.f32 %v11630_v36, %v620_v6  ;;  %v10296_v21 = vpop.f32.mrb[46].mxu0 }
 0x144   :  { %v786_v28 = vadd.f32 %v785_v8, %v784_v1  ;;  %v623_v13 = vpop.f32.mrb[47].mxu0  ;;  %15665 = vst [vmem:[#allocation36_spill] sm:$0xff] %v11872_v48  ;;  %v11880_v2 = vadd.f32 %v10296_v21, %v11630_v36  ;;  %v791_v8 = vsel %vm699_vm2, %v11872_v48, 0.0 }
 0x145   :  { %15664 = vst [vmem:[#allocation35_spill] sm:$0xff] %v11869_v26  ;;  %v787_v46 = vsel %vm699_vm2, %v11869_v26, 0.0  ;;  %v11877_v56 = vadd.f32 %v11630_v36, %v623_v13 }
 0x146   :  { %v788_v63 = vadd.f32 %v787_v46, %v786_v28  ;;  %15667 = vst [vmem:[#allocation38_spill] sm:$0xff] %v11880_v2  ;;  %v793_v26 = vsel %vm699_vm2, %v11880_v2, 0.0 }
 0x147   :  { %15666 = vst [vmem:[#allocation37_spill] sm:$0xff] %v11877_v56  ;;  %v789_v6 = vsel %vm699_vm2, %v11877_v56, 0.0 }
 0x148   :  { %v790_v51 = vadd.f32 %v789_v6, %v788_v63 }
 0x149   :  { %v10299_v1 = vpop.f32.mrb[48].mxu0 }
 0x14a   :  { %v792_v4 = vadd.f32 %v791_v8, %v790_v51  ;;  %v636_v27 = vpop.f32.mrb[49].mxu0  ;;  %v11892_v33 = vadd.f32 %v10299_v1, %v11630_v36 }
 0x14b   :  { %v11889_v13 = vadd.f32 %v11630_v36, %v636_v27  ;;  %v10300_v28 = vpop.f32.mrb[50].mxu0 }
 0x14c   :  { %v794_v46 = vadd.f32 %v793_v26, %v792_v4  ;;  %v639_v21 = vpop.f32.mrb[51].mxu0  ;;  %v11900_v8 = vadd.f32 %v10300_v28, %v11630_v36  ;;  %v799_v26 = vsel %vm699_vm2, %v11892_v33, 0.0 }
 0x14d   :  { %15668 = vst [vmem:[#allocation39_spill] sm:$0xff] %v11889_v13  ;;  %v795_v63 = vsel %vm699_vm2, %v11889_v13, 0.0  ;;  %v11897_v6 = vadd.f32 %v11630_v36, %v639_v21 }
 0x14e   :  { %v796_v51 = vadd.f32 %v795_v63, %v794_v46  ;;  %15669 = vst [vmem:[#allocation40_spill] sm:$0xff] %v11900_v8  ;;  %v801_v13 = vsel %vm699_vm2, %v11900_v8, 0.0 }
 0x14f   :  { %v797_v27 = vsel %vm699_vm2, %v11897_v6, 0.0 }
 0x150   :  { %v798_v2 = vadd.f32 %v797_v27, %v796_v51 }
 0x151   :  { %v10303_v4 = vpop.f32.mrb[52].mxu0 }
 0x152   :  { %v800_v1 = vadd.f32 %v799_v26, %v798_v2  ;;  %v652_v48 = vpop.f32.mrb[53].mxu0  ;;  %v11912_v56 = vadd.f32 %v10303_v4, %v11630_v36 }
 0x153   :  { %v11909_v21 = vadd.f32 %v11630_v36, %v652_v48  ;;  %v10304_v46 = vpop.f32.mrb[54].mxu0 }
 0x154   :  { %v802_v63 = vadd.f32 %v801_v13, %v800_v1  ;;  %v655_v28 = vpop.f32.mrb[55].mxu0  ;;  %v11920_v26 = vadd.f32 %v10304_v46, %v11630_v36  ;;  %v11926_v13 = vadd.f32 %v11630_v36, %v11685_v14  ;;  %v807_v4 = vsel %vm699_vm2, %v11912_v56, 0.0 }
 0x155   :  { %v803_v51 = vsel %vm699_vm2, %v11909_v21, 0.0  ;;  %v11917_v27 = vadd.f32 %v11630_v36, %v655_v28  ;;  %v11936_v46 = vadd.f32 %v11630_v36, %v11694_v19  ;;  %v11940_v14 = vadd.f32 %v11683_v12, %v11630_v36 }
 0x156   :  { %v804_v2 = vadd.f32 %v803_v51, %v802_v63  ;;  %15670 = vst [vmem:[#allocation41_spill] sm:$0xff] %v11926_v13  ;;  %v809_v28 = vsel %vm699_vm2, %v11920_v26, 0.0  ;;  %v811_v63 = vsel %vm699_vm2, %v11926_v13, 0.0  ;;  %v11952_v19 = vadd.f32 %v11630_v36, %v11713_v34 }
 0x157   :  { %v805_v48 = vsel %vm699_vm2, %v11917_v27, 0.0  ;;  %15671 = vst [vmem:[#allocation42_spill] sm:$0xff] %v11940_v14  ;;  %v815_v13 = vsel %vm699_vm2, %v11940_v14, 0.0 }
 0x158   :  { %v806_v1 = vadd.f32 %v805_v48, %v804_v2  ;;  %v11944_v48 = vadd.f32 %v11692_v17, %v11630_v36  ;;  %15673 = vst [vmem:[#allocation44_spill] sm:$0xff] %v11952_v19  ;;  %v819_v17 = vsel %vm699_vm2, %v11952_v19, 0.0 }
 0x15a   :  { %v808_v8 = vadd.f32 %v807_v4, %v806_v1  ;;  %15672 = vst [vmem:[#allocation43_spill] sm:$0xff] %v11944_v48  ;;  %v813_v1 = vsel %vm699_vm2, %v11936_v46, 0.0  ;;  %v817_v12 = vsel %vm699_vm2, %v11944_v48, 0.0 }
 0x15c   :  { %v810_v51 = vadd.f32 %v809_v28, %v808_v8 }
 0x15e   :  { %v812_v2 = vadd.f32 %v811_v63, %v810_v51  ;;  %v11960_v63 = vadd.f32 %v11630_v36, %v11722_v41 }
 0x160   :  { %v814_v4 = vadd.f32 %v813_v1, %v812_v2  ;;  %15674 = vst [vmem:[#allocation45_spill] sm:$0xff] %v11960_v63  ;;  %v11964_v2 = vadd.f32 %v11711_v32, %v11630_v36  ;;  %v821_v34 = vsel %vm699_vm2, %v11960_v63, 0.0 }
 0x162   :  { %v816_v8 = vadd.f32 %v815_v13, %v814_v4  ;;  %v823_v1 = vsel %vm699_vm2, %v11964_v2, 0.0  ;;  %v11972_v4 = vadd.f32 %v11720_v38, %v11630_v36 }
 0x164   :  { %v818_v28 = vadd.f32 %v817_v12, %v816_v8  ;;  %v825_v41 = vsel %vm699_vm2, %v11972_v4, 0.0 }
 0x166   :  { %v820_v51 = vadd.f32 %v819_v17, %v818_v28 }
 0x168   :  { %v822_v13 = vadd.f32 %v821_v34, %v820_v51 }
 0x16a   :  { %v824_v8 = vadd.f32 %v823_v1, %v822_v13 }
 0x16c   :  { %v826_v12 = vadd.f32 %v825_v41, %v824_v8 }
 0x16e   :  { %v827_v28 = vrot.slane %v826_v12, 4 }
 0x170   :  { %v828_v17 = vadd.f32 %v827_v28, %v826_v12 }
 0x172   :  { %v829_v32 = vrot.slane %v828_v17, 2 }
 0x174   :  { %v830_v19 = vadd.f32 %v829_v32, %v828_v17 }
 0x176   :  { %v831_v48 = vrot.slane %v830_v19, 1 }
 0x178   :  { %v832_v14 = vadd.f32 %v831_v48, %v830_v19 }
 0x17a   :  { %v11976_v63 = vmul.f32 0.001953125, %v832_v14 }
 0x17c   :  { %v835_v51 = vsub.f32 %v11633_v39, %v11976_v63  ;;  %v836_v36 = vsub.f32 %v11639_v43, %v11976_v63  ;;  %v837_v38 = vsub.f32 %v11636_v42, %v11976_v63  ;;  %v838_v34 = vsub.f32 %v11644_v45, %v11976_v63 }
 0x17d   :  { %v839_v8 = vsub.f32 %v11653_v53, %v11976_v63  ;;  %v840_v14 = vsub.f32 %v11661_v59, %v11976_v63  ;;  %v841_v17 = vsub.f32 %v11656_v57, %v11976_v63  ;;  %v842_v53 = vsub.f32 %v11664_v61, %v11976_v63 }
 0x17e   :  { %v899_v13 = vmul.f32 %v835_v51, %v835_v51  ;;  %v900_v1 = vmul.f32 %v836_v36, %v836_v36  ;;  %v901_v48 = vmul.f32 %v837_v38, %v837_v38  ;;  %v902_v19 = vmul.f32 %v838_v34, %v838_v34 }
 0x17f   :  { %v903_v32 = vmul.f32 %v839_v8, %v839_v8  ;;  %v904_v38 = vmul.f32 %v840_v14, %v840_v14  ;;  %v843_v34 = vsub.f32 %v11673_v5, %v11976_v63  ;;  %v844_v8 = vsub.f32 %v11681_v11, %v11976_v63 }
 0x180   :  { %v963_v41 = vsel %vm699_vm2, %v899_v13, 0.0  ;;  %v964_v12 = vsel %vm699_vm2, %v900_v1, 0.0  ;;  %v966_v51 = vsel %vm699_vm2, %v901_v48, 0.0  ;;  %v968_v45 = vsel %vm699_vm2, %v902_v19, 0.0 }
 0x181   :  { %v965_v28 = vadd.f32 %v964_v12, %v963_v41  ;;  %v905_v13 = vmul.f32 %v841_v17, %v841_v17  ;;  %v970_v1 = vsel %vm699_vm2, %v903_v32, 0.0  ;;  %v906_v12 = vmul.f32 %v842_v53, %v842_v53 }
 0x182   :  { %v972_v48 = vsel %vm699_vm2, %v904_v38, 0.0  ;;  %v845_v14 = vsub.f32 %v11676_v9, %v11976_v63  ;;  %v846_v17 = vsub.f32 %v11688_v15, %v11976_v63  ;;  %v847_v53 = vsub.f32 %v11701_v25, %v11976_v63 }
 0x183   :  { %v967_v36 = vadd.f32 %v966_v51, %v965_v28  ;;  %v907_v51 = vmul.f32 %v843_v34, %v843_v34  ;;  %v848_v34 = vsub.f32 %v11709_v31, %v11976_v63 }
 0x185   :  { %v969_v59 = vadd.f32 %v968_v45, %v967_v36  ;;  %v974_v45 = vsel %vm699_vm2, %v905_v13, 0.0  ;;  %v908_v36 = vmul.f32 %v844_v8, %v844_v8  ;;  %v978_v38 = vsel %vm699_vm2, %v907_v51, 0.0 }
 0x186   :  { %v849_v8 = vsub.f32 %v11704_v29, %v11976_v63 }
 0x187   :  { %v971_v41 = vadd.f32 %v970_v1, %v969_v59  ;;  %v976_v59 = vsel %vm699_vm2, %v906_v12, 0.0  ;;  %v909_v1 = vmul.f32 %v845_v14, %v845_v14  ;;  %v980_v13 = vsel %vm699_vm2, %v908_v36, 0.0 }
 0x188   :  { %v850_v14 = vsub.f32 %v11716_v35, %v11976_v63 }
 0x189   :  { %v973_v28 = vadd.f32 %v972_v48, %v971_v41  ;;  %v910_v48 = vmul.f32 %v846_v17, %v846_v17  ;;  %v982_v12 = vsel %vm699_vm2, %v909_v1, 0.0  ;;  %v851_v17 = vsub.f32 %v11729_v50, %v11976_v63 }
 0x18b   :  { %v975_v19 = vadd.f32 %v974_v45, %v973_v28  ;;  %v911_v45 = vmul.f32 %v847_v53, %v847_v53  ;;  %v984_v51 = vsel %vm699_vm2, %v910_v48, 0.0  ;;  %v852_v53 = vsub.f32 %v11737_v58, %v11976_v63 }
 0x18d   :  { %v977_v32 = vadd.f32 %v976_v59, %v975_v19  ;;  %v912_v59 = vmul.f32 %v848_v34, %v848_v34  ;;  %v986_v36 = vsel %vm699_vm2, %v911_v45, 0.0  ;;  %v853_v34 = vsub.f32 %v11732_v55, %v11976_v63 }
 0x18f   :  { %v979_v41 = vadd.f32 %v978_v38, %v977_v32  ;;  %v913_v38 = vmul.f32 %v849_v8, %v849_v8  ;;  %v988_v1 = vsel %vm699_vm2, %v912_v59, 0.0  ;;  %v854_v8 = vsub.f32 %v11740_v62, %v11976_v63 }
 0x191   :  { %v981_v28 = vadd.f32 %v980_v13, %v979_v41  ;;  %v914_v13 = vmul.f32 %v850_v14, %v850_v14  ;;  %v990_v48 = vsel %vm699_vm2, %v913_v38, 0.0  ;;  %v855_v14 = vsub.f32 %v11749_v7, %v11976_v63 }
 0x193   :  { %v983_v19 = vadd.f32 %v982_v12, %v981_v28  ;;  %v915_v12 = vmul.f32 %v851_v17, %v851_v17  ;;  %v992_v45 = vsel %vm699_vm2, %v914_v13, 0.0  ;;  %v856_v17 = vsub.f32 %v11757_v20, %v11976_v63 }
 0x195   :  { %v985_v32 = vadd.f32 %v984_v51, %v983_v19  ;;  %v916_v51 = vmul.f32 %v852_v53, %v852_v53  ;;  %v994_v59 = vsel %vm699_vm2, %v915_v12, 0.0  ;;  %v857_v53 = vsub.f32 %v11752_v16, %v11976_v63 }
 0x197   :  { %v987_v41 = vadd.f32 %v986_v36, %v985_v32  ;;  %v917_v36 = vmul.f32 %v853_v34, %v853_v34  ;;  %v996_v38 = vsel %vm699_vm2, %v916_v51, 0.0  ;;  %v858_v34 = vsub.f32 %v11760_v22, %v11976_v63 }
 0x199   :  { %v989_v28 = vadd.f32 %v988_v1, %v987_v41  ;;  %v918_v1 = vmul.f32 %v854_v8, %v854_v8  ;;  %v998_v13 = vsel %vm699_vm2, %v917_v36, 0.0  ;;  %v859_v8 = vsub.f32 %v11769_v37, %v11976_v63 }
 0x19b   :  { %v991_v19 = vadd.f32 %v990_v48, %v989_v28  ;;  %v919_v48 = vmul.f32 %v855_v14, %v855_v14  ;;  %v1000_v12 = vsel %vm699_vm2, %v918_v1, 0.0  ;;  %v860_v14 = vsub.f32 %v11777_v49, %v11976_v63 }
 0x19d   :  { %v993_v32 = vadd.f32 %v992_v45, %v991_v19  ;;  %v920_v45 = vmul.f32 %v856_v17, %v856_v17  ;;  %v1002_v51 = vsel %vm699_vm2, %v919_v48, 0.0  ;;  %v861_v17 = vsub.f32 %v11772_v47, %v11976_v63 }
 0x19f   :  { %v995_v41 = vadd.f32 %v994_v59, %v993_v32  ;;  %v921_v59 = vmul.f32 %v857_v53, %v857_v53  ;;  %v1004_v36 = vsel %vm699_vm2, %v920_v45, 0.0  ;;  %v862_v53 = vsub.f32 %v11780_v52, %v11976_v63 }
 0x1a1   :  { %v997_v28 = vadd.f32 %v996_v38, %v995_v41  ;;  %v922_v38 = vmul.f32 %v858_v34, %v858_v34  ;;  %v1006_v1 = vsel %vm699_vm2, %v921_v59, 0.0  ;;  %v863_v34 = vsub.f32 %v11789_v3, %v11976_v63 }
 0x1a3   :  { %v999_v19 = vadd.f32 %v998_v13, %v997_v28  ;;  %v923_v13 = vmul.f32 %v859_v8, %v859_v8  ;;  %v1008_v48 = vsel %vm699_vm2, %v922_v38, 0.0  ;;  %v864_v8 = vsub.f32 %v11797_v18, %v11976_v63 }
 0x1a5   :  { %v1001_v32 = vadd.f32 %v1000_v12, %v999_v19  ;;  %v924_v12 = vmul.f32 %v860_v14, %v860_v14  ;;  %v1010_v45 = vsel %vm699_vm2, %v923_v13, 0.0  ;;  %v865_v14 = vsub.f32 %v11792_v10, %v11976_v63 }
 0x1a7   :  { %v1003_v41 = vadd.f32 %v1002_v51, %v1001_v32  ;;  %v925_v51 = vmul.f32 %v861_v17, %v861_v17  ;;  %v1012_v59 = vsel %vm699_vm2, %v924_v12, 0.0  ;;  %v866_v17 = vsub.f32 %v11800_v23, %v11976_v63 }
 0x1a9   :  { %v1005_v28 = vadd.f32 %v1004_v36, %v1003_v41  ;;  %v926_v36 = vmul.f32 %v862_v53, %v862_v53  ;;  %v1014_v38 = vsel %vm699_vm2, %v925_v51, 0.0  ;;  %v867_v53 = vsub.f32 %v11809_v44, %v11976_v63 }
 0x1ab   :  { %v1007_v19 = vadd.f32 %v1006_v1, %v1005_v28  ;;  %v927_v1 = vmul.f32 %v863_v34, %v863_v34  ;;  %v1016_v13 = vsel %vm699_vm2, %v926_v36, 0.0  ;;  %v868_v34 = vsub.f32 %v11817_v60, %v11976_v63 }
 0x1ad   :  { %v1009_v32 = vadd.f32 %v1008_v48, %v1007_v19  ;;  %v928_v48 = vmul.f32 %v864_v8, %v864_v8  ;;  %v1018_v12 = vsel %vm699_vm2, %v927_v1, 0.0  ;;  %v869_v8 = vsub.f32 %v11812_v54, %v11976_v63 }
 0x1af   :  { %v1011_v41 = vadd.f32 %v1010_v45, %v1009_v32  ;;  %v929_v45 = vmul.f32 %v865_v14, %v865_v14  ;;  %v1020_v51 = vsel %vm699_vm2, %v928_v48, 0.0  ;;  %v870_v14 = vsub.f32 %v11820_v0, %v11976_v63 }
 0x1b1   :  { %v1013_v28 = vadd.f32 %v1012_v59, %v1011_v41  ;;  %v930_v59 = vmul.f32 %v866_v17, %v866_v17  ;;  %v1022_v36 = vsel %vm699_vm2, %v929_v45, 0.0  ;;  %v871_v17 = vsub.f32 %v11829_v24, %v11976_v63 }
 0x1b3   :  { %v1015_v19 = vadd.f32 %v1014_v38, %v1013_v28  ;;  %v931_v38 = vmul.f32 %v867_v53, %v867_v53  ;;  %v1024_v1 = vsel %vm699_vm2, %v930_v59, 0.0  ;;  %v872_v53 = vsub.f32 %v11837_v40, %v11976_v63 }
 0x1b5   :  { %v1017_v32 = vadd.f32 %v1016_v13, %v1015_v19  ;;  %v932_v13 = vmul.f32 %v868_v34, %v868_v34  ;;  %v1026_v48 = vsel %vm699_vm2, %v931_v38, 0.0  ;;  %v873_v34 = vsub.f32 %v11832_v30, %v11976_v63 }
 0x1b6   :  { %v936_v23 = vmul.f32 %v872_v53, %v872_v53 }
 0x1b7   :  { %v1019_v41 = vadd.f32 %v1018_v12, %v1017_v32  ;;  %v933_v12 = vmul.f32 %v869_v8, %v869_v8  ;;  %v1028_v45 = vsel %vm699_vm2, %v932_v13, 0.0  ;;  %v937_v10 = vmul.f32 %v873_v34, %v873_v34 }
 0x1b9   :  { %v1021_v28 = vadd.f32 %v1020_v51, %v1019_v41  ;;  %v934_v51 = vmul.f32 %v870_v14, %v870_v14  ;;  %v1030_v59 = vsel %vm699_vm2, %v933_v12, 0.0  ;;  %v1036_v12 = vsel %vm699_vm2, %v936_v23, 0.0 }
 0x1bb   :  { %v1023_v19 = vadd.f32 %v1022_v36, %v1021_v28  ;;  %v935_v36 = vmul.f32 %v871_v17, %v871_v17  ;;  %v1032_v38 = vsel %vm699_vm2, %v934_v51, 0.0  ;;  %v1038_v51 = vsel %vm699_vm2, %v937_v10, 0.0 }
 0x1bd   :  { %v1025_v32 = vadd.f32 %v1024_v1, %v1023_v19  ;;  %v15675_v1 = vld [vmem:[#allocation30_spill] sm:$0xff]  ;;  %v1034_v13 = vsel %vm699_vm2, %v935_v36, 0.0 }
 0x1be   :  { %v874_v8 = vsub.f32 %v15675_v1, %v11976_v63 }
 0x1bf   :  { %v1027_v41 = vadd.f32 %v1026_v48, %v1025_v32  ;;  %v15676_v48 = vld [vmem:[#allocation31_spill] sm:$0xff] }
 0x1c0   :  { %v875_v14 = vsub.f32 %v15676_v48, %v11976_v63  ;;  %v938_v18 = vmul.f32 %v874_v8, %v874_v8 }
 0x1c1   :  { %v1029_v28 = vadd.f32 %v1028_v45, %v1027_v41  ;;  %v15677_v45 = vld [vmem:[#allocation33_spill] sm:$0xff] }
 0x1c2   :  { %v876_v17 = vsub.f32 %v15677_v45, %v11976_v63  ;;  %v939_v3 = vmul.f32 %v875_v14, %v875_v14  ;;  %v1040_v36 = vsel %vm699_vm2, %v938_v18, 0.0 }
 0x1c3   :  { %v1031_v19 = vadd.f32 %v1030_v59, %v1029_v28  ;;  %v15678_v59 = vld [vmem:[#allocation32_spill] sm:$0xff] }
 0x1c4   :  { %v877_v53 = vsub.f32 %v15678_v59, %v11976_v63  ;;  %v940_v52 = vmul.f32 %v876_v17, %v876_v17  ;;  %v1042_v23 = vsel %vm699_vm2, %v939_v3, 0.0 }
 0x1c5   :  { %v1033_v32 = vadd.f32 %v1032_v38, %v1031_v19  ;;  %v15679_v38 = vld [vmem:[#allocation34_spill] sm:$0xff] }
 0x1c6   :  { %v878_v34 = vsub.f32 %v15679_v38, %v11976_v63  ;;  %v941_v47 = vmul.f32 %v877_v53, %v877_v53  ;;  %v1044_v10 = vsel %vm699_vm2, %v940_v52, 0.0 }
 0x1c7   :  { %v1035_v41 = vadd.f32 %v1034_v13, %v1033_v32  ;;  %v15680_v13 = vld [vmem:[#allocation35_spill] sm:$0xff] }
 0x1c8   :  { %v879_v8 = vsub.f32 %v15680_v13, %v11976_v63  ;;  %v942_v49 = vmul.f32 %v878_v34, %v878_v34  ;;  %v1046_v18 = vsel %vm699_vm2, %v941_v47, 0.0 }
 0x1c9   :  { %v1037_v28 = vadd.f32 %v1036_v12, %v1035_v41  ;;  %v15681_v12 = vld [vmem:[#allocation37_spill] sm:$0xff] }
 0x1ca   :  { %v880_v14 = vsub.f32 %v15681_v12, %v11976_v63  ;;  %v943_v37 = vmul.f32 %v879_v8, %v879_v8  ;;  %v1048_v3 = vsel %vm699_vm2, %v942_v49, 0.0  ;;  %v884_v8 = vsub.f32 %v11897_v6, %v11976_v63 }
 0x1cb   :  { %v1039_v19 = vadd.f32 %v1038_v51, %v1037_v28  ;;  %v15682_v51 = vld [vmem:[#allocation36_spill] sm:$0xff] }
 0x1cc   :  { %v881_v17 = vsub.f32 %v15682_v51, %v11976_v63  ;;  %v944_v22 = vmul.f32 %v880_v14, %v880_v14  ;;  %v1050_v52 = vsel %vm699_vm2, %v943_v37, 0.0  ;;  %v885_v14 = vsub.f32 %v11892_v33, %v11976_v63 }
 0x1cd   :  { %v1041_v32 = vadd.f32 %v1040_v36, %v1039_v19  ;;  %v15683_v36 = vld [vmem:[#allocation38_spill] sm:$0xff]  ;;  %v948_v20 = vmul.f32 %v884_v8, %v884_v8  ;;  %v889_v8 = vsub.f32 %v11912_v56, %v11976_v63 }
 0x1ce   :  { %v882_v53 = vsub.f32 %v15683_v36, %v11976_v63  ;;  %v945_v16 = vmul.f32 %v881_v17, %v881_v17  ;;  %v1052_v47 = vsel %vm699_vm2, %v944_v22, 0.0 }
 0x1cf   :  { %v1043_v41 = vadd.f32 %v1042_v23, %v1041_v32  ;;  %v15684_v23 = vld [vmem:[#allocation39_spill] sm:$0xff]  ;;  %v953_v7 = vmul.f32 %v889_v8, %v889_v8 }
 0x1d0   :  { %v883_v34 = vsub.f32 %v15684_v23, %v11976_v63  ;;  %v1054_v49 = vsel %vm699_vm2, %v945_v16, 0.0  ;;  %v1060_v16 = vsel %vm699_vm2, %v948_v20, 0.0 }
 0x1d1   :  { %v1045_v28 = vadd.f32 %v1044_v10, %v1043_v41  ;;  %v946_v10 = vmul.f32 %v882_v53, %v882_v53  ;;  %v887_v53 = vsub.f32 %v11909_v21, %v11976_v63 }
 0x1d3   :  { %v1047_v19 = vadd.f32 %v1046_v18, %v1045_v28  ;;  %v947_v18 = vmul.f32 %v883_v34, %v883_v34  ;;  %v1056_v37 = vsel %vm699_vm2, %v946_v10, 0.0  ;;  %v888_v34 = vsub.f32 %v11917_v27, %v11976_v63 }
 0x1d5   :  { %v1049_v32 = vadd.f32 %v1048_v3, %v1047_v19  ;;  %v15685_v3 = vld [vmem:[#allocation40_spill] sm:$0xff]  ;;  %v1058_v22 = vsel %vm699_vm2, %v947_v18, 0.0 }
 0x1d6   :  { %v886_v17 = vsub.f32 %v15685_v3, %v11976_v63 }
 0x1d7   :  { %v1051_v41 = vadd.f32 %v1050_v52, %v1049_v32  ;;  %v949_v52 = vmul.f32 %v885_v14, %v885_v14  ;;  %v890_v14 = vsub.f32 %v11920_v26, %v11976_v63 }
 0x1d9   :  { %v1053_v28 = vadd.f32 %v1052_v47, %v1051_v41  ;;  %v950_v47 = vmul.f32 %v886_v17, %v886_v17  ;;  %v1062_v10 = vsel %vm699_vm2, %v949_v52, 0.0 }
 0x1db   :  { %v1055_v19 = vadd.f32 %v1054_v49, %v1053_v28  ;;  %v951_v49 = vmul.f32 %v887_v53, %v887_v53  ;;  %v1064_v18 = vsel %vm699_vm2, %v950_v47, 0.0  ;;  %v892_v53 = vsub.f32 %v11936_v46, %v11976_v63 }
 0x1dc   :  { %v1070_v47 = vsel %vm699_vm2, %v953_v7, 0.0 }
 0x1dd   :  { %v1057_v32 = vadd.f32 %v1056_v37, %v1055_v19  ;;  %v952_v37 = vmul.f32 %v888_v34, %v888_v34  ;;  %v1066_v20 = vsel %vm699_vm2, %v951_v49, 0.0  ;;  %v956_v55 = vmul.f32 %v892_v53, %v892_v53 }
 0x1de   :  { %v897_v53 = vsub.f32 %v11964_v2, %v11976_v63 }
 0x1df   :  { %v1059_v41 = vadd.f32 %v1058_v22, %v1057_v32  ;;  %v15686_v22 = vld [vmem:[#allocation41_spill] sm:$0xff]  ;;  %v1068_v52 = vsel %vm699_vm2, %v952_v37, 0.0  ;;  %v1076_v7 = vsel %vm699_vm2, %v956_v55, 0.0 }
 0x1e0   :  { %v891_v17 = vsub.f32 %v15686_v22, %v11976_v63 }
 0x1e1   :  { %v1061_v28 = vadd.f32 %v1060_v16, %v1059_v41  ;;  %v954_v16 = vmul.f32 %v890_v14, %v890_v14 }
 0x1e2   :  { %v955_v62 = vmul.f32 %v891_v17, %v891_v17 }
 0x1e3   :  { %v1063_v19 = vadd.f32 %v1062_v10, %v1061_v28  ;;  %v15687_v10 = vld [vmem:[#allocation42_spill] sm:$0xff]  ;;  %v1072_v49 = vsel %vm699_vm2, %v954_v16, 0.0 }
 0x1e4   :  { %v893_v34 = vsub.f32 %v15687_v10, %v11976_v63  ;;  %v1074_v37 = vsel %vm699_vm2, %v955_v62, 0.0 }
 0x1e5   :  { %v1065_v32 = vadd.f32 %v1064_v18, %v1063_v19  ;;  %v15688_v18 = vld [vmem:[#allocation43_spill] sm:$0xff] }
 0x1e6   :  { %v894_v8 = vsub.f32 %v15688_v18, %v11976_v63  ;;  %v957_v58 = vmul.f32 %v893_v34, %v893_v34  ;;  %v898_v34 = vsub.f32 %v11972_v4, %v11976_v63 }
 0x1e7   :  { %v1067_v41 = vadd.f32 %v1066_v20, %v1065_v32  ;;  %v15689_v20 = vld [vmem:[#allocation44_spill] sm:$0xff] }
 0x1e8   :  { %v895_v14 = vsub.f32 %v15689_v20, %v11976_v63  ;;  %v958_v50 = vmul.f32 %v894_v8, %v894_v8  ;;  %v1078_v16 = vsel %vm699_vm2, %v957_v58, 0.0  ;;  %v962_v55 = vmul.f32 %v898_v34, %v898_v34 }
 0x1e9   :  { %v1069_v28 = vadd.f32 %v1068_v52, %v1067_v41  ;;  %v15690_v52 = vld [vmem:[#allocation45_spill] sm:$0xff] }
 0x1ea   :  { %v896_v17 = vsub.f32 %v15690_v52, %v11976_v63  ;;  %v1080_v62 = vsel %vm699_vm2, %v958_v50, 0.0  ;;  %v1088_v58 = vsel %vm699_vm2, %v962_v55, 0.0 }
 0x1eb   :  { %v1071_v19 = vadd.f32 %v1070_v47, %v1069_v28  ;;  %v959_v47 = vmul.f32 %v895_v14, %v895_v14 }
 0x1ed   :  { %v1073_v32 = vadd.f32 %v1072_v49, %v1071_v19  ;;  %v960_v49 = vmul.f32 %v896_v17, %v896_v17  ;;  %v1082_v8 = vsel %vm699_vm2, %v959_v47, 0.0  ;;  %v1105_v47 = vlaneseq }
 0x1ef   :  { %v1075_v41 = vadd.f32 %v1074_v37, %v1073_v32  ;;  %v961_v37 = vmul.f32 %v897_v53, %v897_v53  ;;  %v1106_v34 = vshrl.u32 %v1105_v47, 7 }
 0x1f1   :  { %v1077_v28 = vadd.f32 %v1076_v7, %v1075_v41  ;;  %v1084_v41 = vsel %vm699_vm2, %v960_v49, 0.0  ;;  %v1086_v14 = vsel %vm699_vm2, %v961_v37, 0.0  ;;  %v12173_v49 = vsub.s32 0, %v1106_v34 }
 0x1f3   :  { %v1079_v19 = vadd.f32 %v1078_v16, %v1077_v28  ;;  %15691 = vst [vmem:[#allocation30_spill] sm:$0xff] %v12173_v49 }
 0x1f5   :  { %v1081_v32 = vadd.f32 %v1080_v62, %v1079_v19 }
 0x1f7   :  { %v1083_v35 = vadd.f32 %v1082_v8, %v1081_v32 }
 0x1f9   :  { %v1085_v7 = vadd.f32 %v1084_v41, %v1083_v35  ;;  %v1097_v35 = vld [vmem:[%s15552_s3] sm:$0x1] }
 0x1fb   :  { %v1087_v29 = vadd.f32 %v1086_v14, %v1085_v7 }
 0x1fd   :  { %v1089_v28 = vadd.f32 %v1088_v58, %v1087_v29  ;;  %v1101_v29 = vld [vmem:[%s15553_s4] sm:$0x1] }
 0x1ff   :  { %v1090_v16 = vrot.slane %v1089_v28, 4 }
 0x201   :  { %v1091_v31 = vadd.f32 %v1090_v16, %v1089_v28 }
 0x203   :  { %v1092_v17 = vrot.slane %v1091_v31, 2 }
 0x205   :  { %v1093_v25 = vadd.f32 %v1092_v17, %v1091_v31 }
 0x207   :  { %v1094_v50 = vrot.slane %v1093_v25, 1 }
 0x209   :  { %v1095_v19 = vadd.f32 %v1094_v50, %v1093_v25 }
 0x20b   :  { %v1096_v53 = vmul.f32 0.001953125, %v1095_v19 }
 0x20d   :  { %v1098_v62 = vadd.f32 1e-05, %v1096_v53 }
 0x20f   :  { %11064 = vrsqrt.f32 %v1098_v62 }
 0x219   :  { %v11065_v32 = vpop.eup %11064 }
 0x21a   :  { %v1100_v37 = vmul.f32 %v11065_v32, %v1097_v35 }
 0x21c   :  { %v1102_v31 = vmul.f32 %v1100_v37, %v11976_v63  ;;  %v12180_v25 = vrot.slane %v1100_v37, %v12173_v49 }
 0x21e   :  { %v1103_v8 = vsub.f32 %v1101_v29, %v1102_v31  ;;  %v1142_v55 = vmul.f32 %v12180_v25, %v11809_v44  ;;  %v1143_v41 = vmul.f32 %v12180_v25, %v11817_v60  ;;  %v1144_v7 = vmul.f32 %v12180_v25, %v11812_v54 }
 0x21f   :  { %v1145_v14 = vmul.f32 %v12180_v25, %v11820_v0  ;;  %v1146_v58 = vmul.f32 %v12180_v25, %v11829_v24  ;;  %v1147_v63 = vmul.f32 %v12180_v25, %v11837_v40  ;;  %v1148_v28 = vmul.f32 %v12180_v25, %v11832_v30 }
 0x220   :  { %v1149_v44 = vmul.f32 %v12180_v25, %v15675_v1  ;;  %v1150_v60 = vmul.f32 %v12180_v25, %v15676_v48  ;;  %v1151_v54 = vmul.f32 %v12180_v25, %v15677_v45  ;;  %v1152_v0 = vmul.f32 %v12180_v25, %v15678_v59 }
 0x221   :  { %v1153_v24 = vmul.f32 %v12180_v25, %v15679_v38  ;;  %v1154_v40 = vmul.f32 %v12180_v25, %v15680_v13  ;;  %v1155_v30 = vmul.f32 %v12180_v25, %v15681_v12  ;;  %v1156_v1 = vmul.f32 %v12180_v25, %v15682_v51 }
 0x222   :  { %v1157_v48 = vmul.f32 %v12180_v25, %v15683_v36  ;;  %v1158_v45 = vmul.f32 %v12180_v25, %v15684_v23  ;;  %v1159_v59 = vmul.f32 %v12180_v25, %v11897_v6  ;;  %v1160_v38 = vmul.f32 %v12180_v25, %v11892_v33 }
 0x223   :  { %v1161_v13 = vmul.f32 %v12180_v25, %v15685_v3  ;;  %v1162_v12 = vmul.f32 %v12180_v25, %v11909_v21  ;;  %v1163_v51 = vmul.f32 %v12180_v25, %v11917_v27  ;;  %v1164_v36 = vmul.f32 %v12180_v25, %v11912_v56 }
 0x224   :  { %v1165_v23 = vmul.f32 %v12180_v25, %v11920_v26  ;;  %v1166_v6 = vmul.f32 %v12180_v25, %v15686_v22  ;;  %v1167_v33 = vmul.f32 %v12180_v25, %v11936_v46  ;;  %v1168_v3 = vmul.f32 %v12180_v25, %v15687_v10 }
 0x225   :  { %v1169_v21 = vmul.f32 %v12180_v25, %v15688_v18  ;;  %v12239_v27 = vrot.slane %v1103_v8, %v12173_v49  ;;  %v1170_v56 = vmul.f32 %v12180_v25, %v15689_v20  ;;  %v1171_v26 = vmul.f32 %v12180_v25, %v15690_v52 }
 0x226   :  { %v1172_v22 = vmul.f32 %v12180_v25, %v11964_v2  ;;  %v1173_v46 = vmul.f32 %v12180_v25, %v11972_v4 }
 0x227   :  { %v12250_v10 = vadd.f32 %v12239_v27, %v1142_v55  ;;  %v12253_v18 = vadd.f32 %v12239_v27, %v1143_v41  ;;  %v12256_v16 = vadd.f32 %v12239_v27, %v1144_v7  ;;  %v12259_v20 = vadd.f32 %v12239_v27, %v1145_v14 }
 0x228   :  { %v12262_v52 = vadd.f32 %v12239_v27, %v1146_v58  ;;  %v12265_v2 = vadd.f32 %v12239_v27, %v1147_v63  ;;  %v12268_v4 = vadd.f32 %v12239_v27, %v1148_v28  ;;  %v12271_v17 = vadd.f32 %v12239_v27, %v1149_v44 }
 0x229   :  { %v12274_v50 = vadd.f32 %v12239_v27, %v1150_v60  ;;  %v12277_v19 = vadd.f32 %v12239_v27, %v1151_v54  ;;  %v12280_v53 = vadd.f32 %v12239_v27, %v1152_v0  ;;  %v12283_v62 = vadd.f32 %v12239_v27, %v1153_v24 }
 0x22a   :  { %15692 = vst [vmem:[#allocation31_spill] sm:$0xff] %v12268_v4  ;;  %15693 = vst [vmem:[#allocation33_spill] sm:$0xff] %v12271_v17  ;;  %v12286_v47 = vadd.f32 %v12239_v27, %v1154_v40  ;;  %v12289_v34 = vadd.f32 %v12239_v27, %v1155_v30  ;;  %v12292_v35 = vadd.f32 %v12239_v27, %v1156_v1  ;;  %v15741_v4 = vmov 0.0|0.0  }
 0x22b   :  { %15694 = vst [vmem:[#allocation32_spill] sm:$0xff] %v12274_v50  ;;  %15695 = vst [vmem:[#allocation34_spill] sm:$0xff] %v12277_v19  ;;  %v12295_v32 = vadd.f32 %v12239_v27, %v1157_v48  ;;  %v12298_v37 = vadd.f32 %v12239_v27, %v1158_v45  ;;  %v12301_v29 = vadd.f32 %v12239_v27, %v1159_v59  ;;  %v15718_v59 = vld [vmem:[#allocation7_spill] sm:$0xff]  ;;  %v1468_v19 = vld [vmem:[%s15554_s5 + $0x18] sm:$0xff] }
 0x22c   :  { %15696 = vst [vmem:[#allocation35_spill] sm:$0xff] %v12280_v53  ;;  %15697 = vst [vmem:[#allocation37_spill] sm:$0xff] %v12283_v62  ;;  %v12304_v31 = vadd.f32 %v12239_v27, %v1160_v38  ;;  %v12307_v8 = vadd.f32 %v12239_v27, %v1161_v13  ;;  %v12310_v55 = vadd.f32 %v12239_v27, %v1162_v12 }
 0x22d   :  { %15698 = vst [vmem:[#allocation36_spill] sm:$0xff] %v12286_v47  ;;  %15699 = vst [vmem:[#allocation38_spill] sm:$0xff] %v12289_v34  ;;  %v12313_v41 = vadd.f32 %v12239_v27, %v1163_v51  ;;  %v12316_v7 = vadd.f32 %v12239_v27, %v1164_v36  ;;  %v12319_v14 = vadd.f32 %v12239_v27, %v1165_v23  ;;  %v15719_v51 = vld [vmem:[#allocation8_spill] sm:$0xff]  ;;  %v15720_v23 = vld [vmem:[#allocation9_spill] sm:$0xff] }
 0x22e   :  { %15700 = vst [vmem:[#allocation39_spill] sm:$0xff] %v12292_v35  ;;  %15701 = vst [vmem:[#allocation40_spill] sm:$0xff] %v12295_v32  ;;  %v12322_v58 = vadd.f32 %v12239_v27, %v1166_v6  ;;  %v12325_v63 = vadd.f32 %v12239_v27, %v1167_v33  ;;  %v12328_v28 = vadd.f32 %v12239_v27, %v1168_v3  ;;  %v1465_v32 = vld [vmem:[%s15554_s5] sm:$0xff]  ;;  %v1466_v35 = vld [vmem:[%s15554_s5 + $0x8] sm:$0xff] }
 0x22f   :  { %15702 = vst [vmem:[#allocation41_spill] sm:$0xff] %v12298_v37  ;;  %15703 = vst [vmem:[#allocation42_spill] sm:$0xff] %v12301_v29  ;;  %v12331_v44 = vadd.f32 %v12239_v27, %v1169_v21  ;;  %v12334_v60 = vadd.f32 %v12239_v27, %v1170_v56  ;;  %v12337_v54 = vadd.f32 %v12239_v27, %v1171_v26 }
 0x230   :  { %15704 = vst [vmem:[#allocation43_spill] sm:$0xff] %v12304_v31  ;;  %15705 = vst [vmem:[#allocation44_spill] sm:$0xff] %v12307_v8  ;;  %v12340_v0 = vadd.f32 %v12239_v27, %v1172_v22  ;;  %v12343_v24 = vadd.f32 %v12239_v27, %v1173_v46  ;;  %v1110_v40 = vmul.f32 %v12180_v25, %v11633_v39  ;;  %v15736_v8 = vld [vmem:[#allocation25_spill] sm:$0xff]  ;;  %v15739_v31 = vld [vmem:[#allocation27_spill] sm:$0xff] }
 0x231   :  { %15706 = vst [vmem:[#allocation45_spill] sm:$0xff] %v12310_v55  ;;  %15707 = vst [vmem:[#allocation46_spill] sm:$0xff] %v12313_v41  ;;  %v1111_v30 = vmul.f32 %v12180_v25, %v11639_v43  ;;  %v1112_v48 = vmul.f32 %v12180_v25, %v11636_v42  ;;  %v1113_v38 = vmul.f32 %v12180_v25, %v15718_v59  ;;  %v15740_v41 = vld [vmem:[#allocation29_spill] sm:$0xff] }
 0x232   :  { %15708 = vst [vmem:[#allocation47_spill] sm:$0xff] %v12316_v7  ;;  %15709 = vst [vmem:[#allocation48_spill] sm:$0xff] %v12319_v14  ;;  %v1180_v1 = vadd.f32 %v12239_v27, %v1110_v40  ;;  %v1114_v39 = vmul.f32 %v12180_v25, %v15719_v51  ;;  %v1115_v6 = vmul.f32 %v12180_v25, %v15720_v23  ;;  %v15722_v23 = vld [vmem:[#allocation12_spill] sm:$0xff]  ;;  %v15732_v14 = vld [vmem:[#allocation21_spill] sm:$0xff] }
 0x233   :  { %15710 = vst [vmem:[#allocation49_spill] sm:$0xff] %v12322_v58  ;;  %15711 = vst [vmem:[#allocation50_spill] sm:$0xff] %v12325_v63  ;;  %v1181_v45 = vadd.f32 %v12239_v27, %v1111_v30  ;;  %v1182_v13 = vadd.f32 %v12239_v27, %v1112_v48  ;;  %v1183_v36 = vadd.f32 %v12239_v27, %v1113_v38  ;;  %v15733_v7 = vld [vmem:[#allocation22_spill] sm:$0xff]  ;;  %v15738_v58 = vld [vmem:[#allocation28_spill] sm:$0xff] }
 0x234   :  { %15712 = vst [vmem:[#allocation51_spill] sm:$0xff] %v12328_v28  ;;  %15713 = vst [vmem:[#allocation52_spill] sm:$0xff] %v12331_v44  ;;  %v12356_v12 = vmax.f32 %v1180_v1, 0.0  ;;  %v1184_v42 = vadd.f32 %v12239_v27, %v1114_v39  ;;  %v1116_v21 = vmul.f32 %v12180_v25, %v11656_v57  ;;  %v1185_v56 = vadd.f32 %v12239_v27, %v1115_v6  ;;  %v15730_v44 = vld [vmem:[#allocation20_spill] sm:$0xff]  ;;  %v15737_v63 = vld [vmem:[#allocation26_spill] sm:$0xff] }
 0x235   :  { %15714 = vst [vmem:[#allocation53_spill] sm:$0xff] %v12334_v60  ;;  %15715 = vst [vmem:[#allocation54_spill] sm:$0xff] %v12337_v54  ;;  %v12361_v43 = vmax.f32 %v1181_v45, 0.0  ;;  %v12366_v33 = vmax.f32 %v1182_v13, 0.0  ;;  %v12373_v26 = vmax.f32 %v1183_v36, 0.0  ;;  %v1117_v40 = vmul.f32 %v12180_v25, %v11664_v61  ;;  %v15721_v36 = vld [vmem:[#allocation10_spill] sm:$0xff] }
 0x236   :  { %15716 = vst [vmem:[#allocation55_spill] sm:$0xff] %v12340_v0  ;;  %15717 = vst [vmem:[#allocation56_spill] sm:$0xff] %v12343_v24  ;;  %v1325_v3 = vsel %vm699_vm2, %v12356_v12, 0.0  ;;  %v1186_v30 = vadd.f32 %v12239_v27, %v1116_v21  ;;  %v12380_v1 = vmax.f32 %v1184_v42, 0.0  ;;  %v1118_v57 = vmul.f32 %v12180_v25, %v11673_v5  ;;  %v15723_v42 = vld [vmem:[#allocation11_spill] sm:$0xff]  ;;  %v15728_v24 = vld [vmem:[#allocation17_spill] sm:$0xff] }
 0x237   :  { %v1326_v22 = vsel %vm699_vm2, %v12361_v43, 0.0  ;;  %v1328_v48 = vsel %vm699_vm2, %v12366_v33, 0.0  ;;  %v1119_v45 = vmul.f32 %v12180_v25, %v11681_v11  ;;  %v1120_v38 = vmul.f32 %v12180_v25, %v11676_v9  ;;  %v15729_v0 = vld [vmem:[#allocation18_spill] sm:$0xff]  ;;  %v15734_v54 = vld [vmem:[#allocation24_spill] sm:$0xff] }
 0x238   :  { %v1327_v46 = vadd.f32 %v1326_v22, %v1325_v3  ;;  %v1187_v13 = vadd.f32 %v12239_v27, %v1117_v40  ;;  %v12391_v61 = vmax.f32 %v1185_v56, 0.0  ;;  %v1330_v51 = vsel %vm699_vm2, %v12373_v26, 0.0  ;;  %v15724_v22 = vld [vmem:[#allocation13_spill] sm:$0xff] }
 0x239   :  { %v1121_v39 = vmul.f32 %v12180_v25, %v11688_v15  ;;  %v1122_v5 = vmul.f32 %v12180_v25, %v15721_v36  ;;  %v1123_v11 = vmul.f32 %v12180_v25, %v15722_v23  ;;  %v1124_v9 = vmul.f32 %v12180_v25, %v15723_v42 }
 0x23a   :  { %v1329_v59 = vadd.f32 %v1328_v48, %v1327_v46  ;;  %v1188_v3 = vadd.f32 %v12239_v27, %v1118_v57  ;;  %v12404_v21 = vmax.f32 %v1186_v30, 0.0  ;;  %v1332_v56 = vsel %vm699_vm2, %v12380_v1, 0.0  ;;  %v15725_v46 = vld [vmem:[#allocation14_spill] sm:$0xff]  ;;  %v15726_v48 = vld [vmem:[#allocation16_spill] sm:$0xff] }
 0x23b   :  { %v1125_v15 = vmul.f32 %v12180_v25, %v15724_v22  ;;  %v1126_v40 = vmul.f32 %v12180_v25, %v15725_v46  ;;  %v1127_v36 = vmul.f32 %v12180_v25, %v15726_v48  ;;  %v1189_v57 = vadd.f32 %v12239_v27, %v1119_v45 }
 0x23c   :  { %v1331_v6 = vadd.f32 %v1330_v51, %v1329_v59  ;;  %v15727_v51 = vld [vmem:[#allocation15_spill] sm:$0xff]  ;;  %v12417_v30 = vmax.f32 %v1187_v13, 0.0  ;;  %v1334_v42 = vsel %vm699_vm2, %v12391_v61, 0.0  ;;  %v1129_v22 = vmul.f32 %v12180_v25, %v15728_v24 }
 0x23d   :  { %v1128_v23 = vmul.f32 %v12180_v25, %v15727_v51  ;;  %v1130_v46 = vmul.f32 %v12180_v25, %v15729_v0  ;;  %v1131_v48 = vmul.f32 %v12180_v25, %v15730_v44  ;;  %v1190_v45 = vadd.f32 %v12239_v27, %v1120_v38 }
 0x23e   :  { %v1333_v59 = vadd.f32 %v1332_v56, %v1331_v6  ;;  %v15731_v56 = vld [vmem:[#allocation19_spill] sm:$0xff]  ;;  %v12430_v13 = vmax.f32 %v1188_v3, 0.0  ;;  %v1336_v28 = vsel %vm699_vm2, %v12404_v21, 0.0  ;;  %v1133_v24 = vmul.f32 %v12180_v25, %v15732_v14 }
 0x23f   :  { %v1132_v51 = vmul.f32 %v12180_v25, %v15731_v56  ;;  %v1134_v0 = vmul.f32 %v12180_v25, %v15733_v7  ;;  %v1135_v44 = vmul.f32 %v12180_v25, %v15734_v54  ;;  %v1191_v38 = vadd.f32 %v12239_v27, %v1121_v39 }
 0x240   :  { %v1335_v6 = vadd.f32 %v1334_v42, %v1333_v59  ;;  %v15735_v42 = vld [vmem:[#allocation23_spill] sm:$0xff]  ;;  %v12443_v3 = vmax.f32 %v1189_v57, 0.0  ;;  %v1338_v60 = vsel %vm699_vm2, %v12417_v30, 0.0  ;;  %v1137_v14 = vmul.f32 %v12180_v25, %v15736_v8 }
 0x241   :  { %v1136_v56 = vmul.f32 %v12180_v25, %v15735_v42  ;;  %v1138_v7 = vmul.f32 %v12180_v25, %v15737_v63  ;;  %v12453_v54 = vmul.f32 %v12180_v25, %v15738_v58  ;;  %v1193_v39 = vadd.f32 %v12239_v27, %v1123_v11 }
 0x242   :  { %v1337_v59 = vadd.f32 %v1336_v28, %v1335_v6  ;;  %v1192_v6 = vadd.f32 %v12239_v27, %v1122_v5  ;;  %v12457_v57 = vmax.f32 %v1190_v45, 0.0  ;;  %v1340_v42 = vsel %vm699_vm2, %v12430_v13, 0.0 }
 0x243   :  { %v12463_v8 = vmul.f32 %v12180_v25, %v15739_v31  ;;  %v12467_v63 = vmul.f32 %v12180_v25, %v15740_v41  ;;  %v1194_v58 = vadd.f32 %v12239_v27, %v1124_v9  ;;  %v1195_v5 = vadd.f32 %v12239_v27, %v1125_v15 }
 0x244   :  { %v1339_v28 = vadd.f32 %v1338_v60, %v1337_v59  ;;  %v1196_v11 = vadd.f32 %v12239_v27, %v1126_v40  ;;  %v12472_v45 = vmax.f32 %v1191_v38, 0.0  ;;  %v1342_v59 = vsel %vm699_vm2, %v12443_v3, 0.0 }
 0x245   :  { %v1197_v55 = vadd.f32 %v12239_v27, %v1127_v36  ;;  %v1198_v31 = vadd.f32 %v12239_v27, %v1128_v23  ;;  %v12479_v29 = vadd.f32 %v12239_v27, %v1129_v22  ;;  %v12482_v41 = vadd.f32 %v12239_v27, %v1130_v46 }
 0x246   :  { %v1341_v60 = vadd.f32 %v1340_v42, %v1339_v28  ;;  %v12484_v9 = vmax.f32 %v1192_v6, 0.0  ;;  %v12486_v15 = vmax.f32 %v1193_v39, 0.0  ;;  %v1344_v40 = vsel %vm699_vm2, %v12457_v57, 0.0 }
 0x247   :  { %v12491_v38 = vadd.f32 %v12239_v27, %v1131_v48  ;;  %v12494_v36 = vadd.f32 %v12239_v27, %v1132_v51  ;;  %v12497_v23 = vadd.f32 %v12239_v27, %v1133_v24  ;;  %v12500_v46 = vadd.f32 %v12239_v27, %v1134_v0 }
 0x248   :  { %v1343_v25 = vadd.f32 %v1342_v59, %v1341_v60  ;;  %v12503_v28 = vadd.f32 %v12239_v27, %v1135_v44  ;;  %v12506_v6 = vadd.f32 %v12239_v27, %v1136_v56  ;;  %v1346_v48 = vsel %vm699_vm2, %v12472_v45, 0.0 }
 0x249   :  { %v12511_v39 = vadd.f32 %v12239_v27, %v1137_v14  ;;  %v12513_v51 = vmax.f32 %v1194_v58, 0.0  ;;  %v12515_v24 = vmax.f32 %v1195_v5, 0.0  ;;  %v12517_v60 = vmax.f32 %v1196_v11, 0.0 }
 0x24a   :  { %v1345_v22 = vadd.f32 %v1344_v40, %v1343_v25  ;;  %v1348_v0 = vsel %vm699_vm2, %v12484_v9, 0.0  ;;  %v1350_v44 = vsel %vm699_vm2, %v12486_v15, 0.0  ;;  %v1396_v56 = vsel %vm699_vm2, %v12356_v12, -inf }
 0x24b   :  { %v1397_v14 = vsel %vm699_vm2, %v12361_v43, -inf  ;;  %v1400_v58 = vsel %vm699_vm2, %v12380_v1, -inf  ;;  %v1402_v5 = vsel %vm699_vm2, %v12391_v61, -inf  ;;  %v1398_v11 = vsel %vm699_vm2, %v12366_v33, -inf }
 0x24c   :  { %v1347_v42 = vadd.f32 %v1346_v48, %v1345_v22  ;;  %v1399_v25 = vsel %vm699_vm2, %v12373_v26, -inf  ;;  %v1404_v40 = vsel %vm699_vm2, %v12404_v21, -inf  ;;  %v1406_v22 = vsel %vm699_vm2, %v12417_v30, -inf }
 0x24d   :  { %v12540_v48 = vadd.f32 %v12239_v27, %v1138_v7  ;;  %v1352_v34 = vsel %vm699_vm2, %v12513_v51, 0.0  ;;  %v1401_v47 = vmax.f32 %v1396_v56, %v1400_v58  ;;  %v1403_v62 = vmax.f32 %v1397_v14, %v1402_v5 }
 0x24e   :  { %v1349_v59 = vadd.f32 %v1348_v0, %v1347_v42  ;;  %v12542_v42 = vmax.f32 %v1197_v55, 0.0  ;;  %v12544_v0 = vmax.f32 %v1198_v31, 0.0  ;;  %v1354_v55 = vsel %vm699_vm2, %v12515_v24, 0.0 }
 0x24f   :  { %v1405_v31 = vmax.f32 %v1398_v11, %v1404_v40  ;;  %v1407_v53 = vmax.f32 %v1399_v25, %v1406_v22  ;;  %v1356_v56 = vsel %vm699_vm2, %v12517_v60, 0.0  ;;  %v12569_v14 = vpack.c.bf16 %v1466_v35, %v1465_v32 }
 0x250   :  { %v1351_v37 = vadd.f32 %v1350_v44, %v1349_v59  ;;  %v15624_v44 = vmov 0.0|0.0   ;;  %v1467_v59 = vld [vmem:[%s15554_s5 + $0x10] sm:$0xff]  ;;  %v1412_v5 = vsel %vm699_vm2, %v12457_v57, -inf  ;;  %v1414_v11 = vsel %vm699_vm2, %v12472_v45, -inf }
 0x251   :  { %10749 = vmatprep.subr.bf16.mxu1 %v15624_v44  ;;  %v12576_v22 = vpack.c.bf16 %v1468_v19, %v1467_v59  ;;  %v1413_v50 = vmax.f32 %v1405_v31, %v1412_v5  ;;  %v1415_v17 = vmax.f32 %v1407_v53, %v1414_v11  ;;  %v15626_v35 = vmov 0.0  }
 0x252   :  { %v1353_v7 = vadd.f32 %v1352_v34, %v1351_v37  ;;  %v1408_v34 = vsel %vm699_vm2, %v12430_v13, -inf  ;;  %v1410_v37 = vsel %vm699_vm2, %v12443_v3, -inf  ;;  %10751 = vmatpush3.bf16.msra.mxu1 %v12569_v14  ;;  %10321 = vmatprep.mubr.msk.f32.mxu1 %vm11390_vm3, %v15626_v35  ;;  %v1209_v32 = vadd.f32 %v12239_v27, %v12453_v54 }
 0x253   :  { %v1409_v25 = vmax.f32 %v1401_v47, %v1408_v34  ;;  %v1411_v40 = vmax.f32 %v1403_v62, %v1410_v37  ;;  %10752 = vmatprep.subr.bf16.mxu1 %v15741_v4  ;;  %v1210_v62 = vadd.f32 %v12239_v27, %v12463_v8  ;;  %v12586_v47 = vmax.f32 %v12479_v29, 0.0 }
 0x254   :  { %v1355_v58 = vadd.f32 %v1354_v55, %v1353_v7  ;;  %v1358_v19 = vsel %vm699_vm2, %v12542_v42, 0.0  ;;  %v12591_v53 = vmax.f32 %v12482_v41, 0.0  ;;  %v1360_v55 = vsel %vm699_vm2, %v12544_v0, 0.0 }
 0x255   :  { %v1416_v31 = vsel %vm699_vm2, %v12484_v9, -inf  ;;  %v1418_v8 = vsel %vm699_vm2, %v12486_v15, -inf  ;;  %v1420_v29 = vsel %vm699_vm2, %v12513_v51, -inf  ;;  %v1422_v59 = vsel %vm699_vm2, %v12515_v24, -inf }
 0x256   :  { %v1357_v44 = vadd.f32 %v1356_v56, %v1355_v58  ;;  %v1417_v54 = vmax.f32 %v1409_v25, %v1416_v31  ;;  %10754 = vmatpush3.bf16.msra.mxu1 %v12576_v22  ;;  %v1421_v56 = vmax.f32 %v1413_v50, %v1420_v29  ;;  %v1423_v34 = vmax.f32 %v1415_v17, %v1422_v59 }
 0x257   :  { %10755 = vmatprep.subr.bf16.mxu1 %v15741_v4  ;;  %v1211_v37 = vadd.f32 %v12239_v27, %v12467_v63  ;;  %v12608_v58 = vmax.f32 %v12491_v38, 0.0  ;;  %v12611_v5 = vmax.f32 %v12494_v36, 0.0  ;;  %v1362_v11 = vsel %vm699_vm2, %v12586_v47, 0.0 }
 0x258   :  { %v1359_v7 = vadd.f32 %v1358_v19, %v1357_v44  ;;  %v1419_v44 = vmax.f32 %v1411_v40, %v1418_v8  ;;  %v12616_v25 = vmax.f32 %v12497_v23, 0.0  ;;  %v1364_v17 = vsel %vm699_vm2, %v12591_v53, 0.0 }
 0x259   :  { %v1424_v50 = vsel %vm699_vm2, %v12517_v60, -inf  ;;  %v1426_v63 = vsel %vm699_vm2, %v12542_v42, -inf  ;;  %v1428_v38 = vsel %vm699_vm2, %v12544_v0, -inf  ;;  %v1430_v36 = vsel %vm699_vm2, %v12586_v47, -inf }
 0x25a   :  { %v1361_v41 = vadd.f32 %v1360_v55, %v1359_v7  ;;  %v1425_v27 = vmax.f32 %v1417_v54, %v1424_v50  ;;  %v1427_v23 = vmax.f32 %v1419_v44, %v1426_v63  ;;  %v1429_v7 = vmax.f32 %v1421_v56, %v1428_v38 }
 0x25b   :  { %v1431_v55 = vmax.f32 %v1423_v34, %v1430_v36  ;;  %v12629_v31 = vmax.f32 %v12500_v46, 0.0  ;;  %v12632_v8 = vmax.f32 %v12503_v28, 0.0  ;;  %v12635_v54 = vmax.f32 %v12506_v6, 0.0 }
 0x25c   :  { %v1363_v40 = vadd.f32 %v1362_v11, %v1361_v41  ;;  %v1366_v29 = vsel %vm699_vm2, %v12608_v58, 0.0  ;;  %v12640_v59 = vmax.f32 %v12511_v39, 0.0  ;;  %v1368_v44 = vsel %vm699_vm2, %v12611_v5, 0.0 }
 0x25d   :  { %v1432_v46 = vsel %vm699_vm2, %v12591_v53, -inf  ;;  %v1434_v28 = vsel %vm699_vm2, %v12608_v58, -inf  ;;  %v1436_v6 = vsel %vm699_vm2, %v12611_v5, -inf  ;;  %v1438_v34 = vsel %vm699_vm2, %v12616_v25, -inf }
 0x25e   :  { %v1365_v19 = vadd.f32 %v1364_v17, %v1363_v40  ;;  %v1433_v56 = vmax.f32 %v1425_v27, %v1432_v46  ;;  %v1435_v39 = vmax.f32 %v1427_v23, %v1434_v28  ;;  %v1437_v40 = vmax.f32 %v1429_v7, %v1436_v6 }
 0x25f   :  { %v1439_v17 = vmax.f32 %v1431_v55, %v1438_v34  ;;  %v12653_v50 = vmax.f32 %v12540_v48, 0.0  ;;  %v12655_v63 = vmax.f32 %v1209_v32, 0.0  ;;  %v12657_v38 = vmax.f32 %v1210_v62, 0.0 }
 0x260   :  { %v1367_v41 = vadd.f32 %v1366_v29, %v1365_v19  ;;  %v1370_v27 = vsel %vm699_vm2, %v12616_v25, 0.0  ;;  %v12661_v36 = vmax.f32 %v1211_v37, 0.0  ;;  %v1372_v29 = vsel %vm699_vm2, %v12629_v31, 0.0 }
 0x261   :  { %v1440_v23 = vsel %vm699_vm2, %v12629_v31, -inf  ;;  %v1442_v48 = vsel %vm699_vm2, %v12632_v8, -inf  ;;  %v1444_v32 = vsel %vm699_vm2, %v12635_v54, -inf  ;;  %v1446_v62 = vsel %vm699_vm2, %v12640_v59, -inf }
 0x262   :  { %v1369_v11 = vadd.f32 %v1368_v44, %v1367_v41  ;;  %v1441_v7 = vmax.f32 %v1433_v56, %v1440_v23  ;;  %v1443_v37 = vmax.f32 %v1435_v39, %v1442_v48  ;;  %v1445_v41 = vmax.f32 %v1437_v40, %v1444_v32 }
 0x263   :  { %v1447_v44 = vmax.f32 %v1439_v17, %v1446_v62  ;;  %v1374_v46 = vsel %vm699_vm2, %v12632_v8, 0.0  ;;  %v1376_v56 = vsel %vm699_vm2, %v12635_v54, 0.0  ;;  %v1448_v6 = vsel %vm699_vm2, %v12653_v50, -inf }
 0x264   :  { %v1371_v19 = vadd.f32 %v1370_v27, %v1369_v11  ;;  %v1449_v34 = vmax.f32 %v1441_v7, %v1448_v6  ;;  %v1450_v11 = vsel %vm699_vm2, %v12655_v63, -inf  ;;  %v1452_v27 = vsel %vm699_vm2, %v12657_v38, -inf }
 0x265   :  { %v1454_v39 = vsel %vm699_vm2, %v12661_v36, -inf  ;;  %v1451_v17 = vmax.f32 %v1443_v37, %v1450_v11  ;;  %v1378_v23 = vsel %vm699_vm2, %v12640_v59, 0.0  ;;  %v1380_v7 = vsel %vm699_vm2, %v12653_v50, 0.0 }
 0x266   :  { %v1373_v55 = vadd.f32 %v1372_v29, %v1371_v19  ;;  %v1453_v19 = vmax.f32 %v1445_v41, %v1452_v27  ;;  %v1455_v29 = vmax.f32 %v1447_v44, %v1454_v39  ;;  %v1386_v44 = vsel %vm699_vm2, %v12661_v36, 0.0 }
 0x267   :  { %v1456_v62 = vmax.f32 %v1449_v34, %v1451_v17 }
 0x268   :  { %v1375_v28 = vadd.f32 %v1374_v46, %v1373_v55  ;;  %v1457_v55 = vmax.f32 %v1453_v19, %v1455_v29  ;;  %v1382_v46 = vsel %vm699_vm2, %v12655_v63, 0.0 }
 0x26a   :  { %v1377_v40 = vadd.f32 %v1376_v56, %v1375_v28  ;;  %v1384_v28 = vsel %vm699_vm2, %v12657_v38, 0.0  ;;  %v1458_v41 = vmax.f32 %v1456_v62, %v1457_v55 }
 0x26c   :  { %v1379_v48 = vadd.f32 %v1378_v23, %v1377_v40  ;;  %v1459_v27 = vrot.slane %v1458_v41, 4 }
 0x26e   :  { %v1381_v32 = vadd.f32 %v1380_v7, %v1379_v48  ;;  %v1460_v23 = vmax.f32 %v1458_v41, %v1459_v27 }
 0x270   :  { %v1383_v6 = vadd.f32 %v1382_v46, %v1381_v32  ;;  %v1461_v19 = vrot.slane %v1460_v23, 2 }
 0x272   :  { %v1385_v37 = vadd.f32 %v1384_v28, %v1383_v6  ;;  %v1462_v7 = vmax.f32 %v1460_v23, %v1461_v19 }
 0x274   :  { %v1387_v56 = vadd.f32 %v1386_v44, %v1385_v37  ;;  %v1463_v32 = vrot.slane %v1462_v7, 1 }
 0x276   :  { %v1388_v11 = vrot.slane %v1387_v56, 4  ;;  %v1464_v62 = vmax.f32 %v1462_v7, %v1463_v32 }
 0x278   :  { %v1389_v39 = vadd.f32 %v1388_v11, %v1387_v56 }
 0x27a   :  { %v1390_v40 = vrot.slane %v1389_v39, 2 }
 0x27c   :  { %v1391_v34 = vadd.f32 %v1390_v40, %v1389_v39 }
 0x27e   :  { %v1392_v17 = vrot.slane %v1391_v34, 1 }
 0x280   :  { %v1393_v29 = vadd.f32 %v1392_v17, %v1391_v34 }
 0x282   :  { %v1395_v48 = vmul.f32 0.00390625, %v1393_v29 }
 0x284   :  { %10322 = vmatmul.mubr.msk.f32.vlgmr.msra.gmra.mrb[8].mxu1 %vm699_vm2, %v1395_v48 }
 0x285   :  { %10757 = vmatpush3.bf16.msra.mxu1 %v12569_v14  ;;  %10332 = vmatprep.mubr.msk.f32.mxu1 %vm11390_vm3, %v15626_v35  ;;  %v1543_v14 = vld [vmem:[%s15555_s6] sm:$0x3] }
 0x286   :  { %10758 = vmatprep.subr.bf16.mxu1 %v15741_v4 }
 0x289   :  { %10760 = vmatpush3.bf16.msra.mxu1 %v12576_v22 }
 0x28a   :  { %10335 = vmatprep.subr.mxu1 %v15626_v35 }
 0x28c   :  { %10333 = vmatmul.mubr.msk.f32.vlgmr.msra.gmra.mrb[10].mxu1 %vm699_vm2, %v1464_v62 }
 0x28d   :  { %10337 = vmatprep.mubr.msk.f32.mxu1 %vm11390_vm3, %v15626_v35  ;;  %10336 = vmatpush3.msk.msra.mxu1 %vm406_vm1, %v1543_v14 }
 0x28e   :  { %10340 = vmatprep.subr.mxu1 %v15626_v35 }
 0x357   :  { %v1538_v55 = vpop.f32.mrb[8].mxu1 }
 0x358   :  { %v10323_v46 = vpop.f32.mrb[9].mxu1  ;;  %v1542_v37 = vmax.f32 %v1538_v55, 0.0 }
 0x35f   :  { %v1613_v6 = vpop.f32.mrb[10].mxu1 }
 0x360   :  { %v1617_v22 = vmax.f32 %v1613_v6, 0.0  ;;  %v10334_v28 = vpop.f32.mrb[11].mxu1 }
 0x362   :  { %10338 = vmatmul.mubr.msk.f32.vlgmr.msra.gmra.mrb[12].mxu1 %vm1618_vm4, %v1617_v22 }
 0x363   :  { %10341 = vmatpush3.msk.msra.mxu1 %vm406_vm1, %v1543_v14  ;;  %10342 = vmatprep.mubr.msk.f32.mxu1 %vm11390_vm3, %v15626_v35 }
 0x36a   :  { %10343 = vmatmul.mubr.msk.f32.vlgmr.msra.gmra.mrb[12].mxu1 %vm1618_vm4, %v1542_v37 }
 0x43d   :  { %v1764_v41 = vpop.f32.mrb[12].mxu1 }
 0x43e   :  { %v9122_v44 = vmul.f32 -1.442695, %v1764_v41  ;;  %v10344_v56 = vpop.f32.mrb[13].mxu1 }
 0x440   :  { %11066 = vpow2.f32 %v9122_v44 }
 0x44a   :  { %v11067_v11 = vpop.eup %11066 }
 0x44b   :  { %v1771_v27 = vadd.f32 1.0, %v11067_v11 }
 0x44d   :  { %11068 = vrcp.f32 %v1771_v27 }
 0x457   :  { %v11069_v39 = vpop.eup %11068 }
 0x458   :  { %v12716_v40 = vrot.slane %v11069_v39, %v12173_v49 }
 0x45a   :  { %v12720_v23 = vmul.f32 %v12716_v40, %v12517_v60  ;;  %v12724_v34 = vmul.f32 %v12716_v40, %v12356_v12  ;;  %v12732_v29 = vmul.f32 %v12716_v40, %v12542_v42  ;;  %v12736_v48 = vmul.f32 %v12716_v40, %v12361_v43 }
 0x45b   :  { %v12752_v62 = vmul.f32 %v12716_v40, %v12544_v0  ;;  %v12756_v14 = vmul.f32 %v12716_v40, %v12586_v47  ;;  %v12764_v6 = vmul.f32 %v12716_v40, %v12366_v33  ;;  %v12768_v0 = vmul.f32 %v12716_v40, %v12373_v26 }
 0x45c   :  { %v1858_v17 = vsel %vm699_vm2, %v12720_v23, 0.0  ;;  %v1810_v19 = vsel %vm699_vm2, %v12724_v34, 0.0  ;;  %v1861_v12 = vsel %vm699_vm2, %v12732_v29, 0.0  ;;  %v1813_v60 = vsel %vm699_vm2, %v12736_v48, 0.0 }
 0x45d   :  { %1859 = vadd.xlane.f32.xlu0 %v1858_v17  ;;  %1811 = vadd.xlane.f32.xlu1 %v1810_v19  ;;  %v1987_v7 = vsel %vm699_vm2, %v12720_v23, -inf  ;;  %v1990_v42 = vsel %vm699_vm2, %v12732_v29, -inf  ;;  %v1939_v43 = vsel %vm699_vm2, %v12724_v34, -inf  ;;  %v1942_v32 = vsel %vm699_vm2, %v12736_v48, -inf }
 0x45e   :  { %v1864_v55 = vsel %vm699_vm2, %v12752_v62, 0.0  ;;  %v1867_v46 = vsel %vm699_vm2, %v12756_v14, 0.0  ;;  %v1816_v47 = vsel %vm699_vm2, %v12764_v6, 0.0  ;;  %v1819_v22 = vsel %vm699_vm2, %v12768_v0, 0.0 }
 0x45f   :  { %v1993_v28 = vsel %vm699_vm2, %v12752_v62, -inf  ;;  %v1996_v33 = vsel %vm699_vm2, %v12756_v14, -inf  ;;  %v1945_v26 = vsel %vm699_vm2, %v12764_v6, -inf  ;;  %v1948_v37 = vsel %vm699_vm2, %v12768_v0, -inf }
 0x460   :  { %v12784_v41 = vmul.f32 %v12716_v40, %v12591_v53  ;;  %v12788_v44 = vmul.f32 %v12716_v40, %v12608_v58  ;;  %v12796_v27 = vmul.f32 %v12716_v40, %v12380_v1  ;;  %v12800_v53 = vmul.f32 %v12716_v40, %v12391_v61 }
 0x461   :  { %1862 = vadd.xlane.f32.xlu0 %v1861_v12  ;;  %1814 = vadd.xlane.f32.xlu1 %v1813_v60  ;;  %v12816_v12 = vmul.f32 %v12716_v40, %v12611_v5  ;;  %v12820_v60 = vmul.f32 %v12716_v40, %v12616_v25  ;;  %v12832_v5 = vmul.f32 %v12716_v40, %v12417_v30 }
 0x462   :  { %v1870_v56 = vsel %vm699_vm2, %v12784_v41, 0.0  ;;  %v1873_v11 = vsel %vm699_vm2, %v12788_v44, 0.0  ;;  %v1822_v58 = vsel %vm699_vm2, %v12796_v27, 0.0  ;;  %v1825_v39 = vsel %vm699_vm2, %v12800_v53, 0.0 }
 0x463   :  { %v1999_v17 = vsel %vm699_vm2, %v12784_v41, -inf  ;;  %v2002_v1 = vsel %vm699_vm2, %v12788_v44, -inf  ;;  %v1951_v61 = vsel %vm699_vm2, %v12796_v27, -inf  ;;  %v1954_v19 = vsel %vm699_vm2, %v12800_v53, -inf }
 0x465   :  { %1988 = vmax.xlane.f32.xlu0 %v1987_v7  ;;  %1991 = vmax.xlane.f32.xlu1 %v1990_v42  ;;  %v1876_v7 = vsel %vm699_vm2, %v12816_v12, 0.0  ;;  %v1879_v42 = vsel %vm699_vm2, %v12820_v60, 0.0 }
 0x469   :  { %1940 = vmax.xlane.f32.xlu0 %v1939_v43  ;;  %1943 = vmax.xlane.f32.xlu1 %v1942_v32  ;;  %v12828_v43 = vmul.f32 %v12716_v40, %v12404_v21  ;;  %v1831_v32 = vsel %vm699_vm2, %v12832_v5, 0.0  ;;  %v2008_v21 = vsel %vm699_vm2, %v12820_v60, -inf }
 0x46b   :  { %v1828_v25 = vsel %vm699_vm2, %v12828_v43, 0.0  ;;  %v1957_v30 = vsel %vm699_vm2, %v12828_v43, -inf }
 0x46d   :  { %1865 = vadd.xlane.f32.xlu0 %v1864_v55  ;;  %1868 = vadd.xlane.f32.xlu1 %v1867_v46  ;;  %v2005_v55 = vsel %vm699_vm2, %v12816_v12, -inf  ;;  %v1960_v46 = vsel %vm699_vm2, %v12832_v5, -inf }
 0x471   :  { %1817 = vadd.xlane.f32.xlu0 %v1816_v47  ;;  %1820 = vadd.xlane.f32.xlu1 %v1819_v22  ;;  %v12848_v47 = vmul.f32 %v12716_v40, %v12629_v31  ;;  %v12852_v22 = vmul.f32 %v12716_v40, %v12632_v8  ;;  %v12864_v31 = vmul.f32 %v12716_v40, %v12443_v3 }
 0x475   :  { %1994 = vmax.xlane.f32.xlu0 %v1993_v28  ;;  %1997 = vmax.xlane.f32.xlu1 %v1996_v33  ;;  %v1882_v28 = vsel %vm699_vm2, %v12848_v47, 0.0  ;;  %v1885_v33 = vsel %vm699_vm2, %v12852_v22, 0.0 }
 0x479   :  { %1946 = vmax.xlane.f32.xlu0 %v1945_v26  ;;  %1949 = vmax.xlane.f32.xlu1 %v1948_v37  ;;  %v12860_v26 = vmul.f32 %v12716_v40, %v12430_v13  ;;  %v1837_v37 = vsel %vm699_vm2, %v12864_v31, 0.0  ;;  %v2014_v13 = vsel %vm699_vm2, %v12852_v22, -inf }
 0x47b   :  { %v1834_v8 = vsel %vm699_vm2, %v12860_v26, 0.0  ;;  %v1963_v3 = vsel %vm699_vm2, %v12860_v26, -inf }
 0x47d   :  { %1871 = vadd.xlane.f32.xlu0 %v1870_v56  ;;  %1874 = vadd.xlane.f32.xlu1 %v1873_v11  ;;  %v2011_v56 = vsel %vm699_vm2, %v12848_v47, -inf  ;;  %v1966_v11 = vsel %vm699_vm2, %v12864_v31, -inf }
 0x481   :  { %1823 = vadd.xlane.f32.xlu0 %v1822_v58  ;;  %1826 = vadd.xlane.f32.xlu1 %v1825_v39  ;;  %v12880_v58 = vmul.f32 %v12716_v40, %v12635_v54  ;;  %v12884_v39 = vmul.f32 %v12716_v40, %v12640_v59  ;;  %v12896_v54 = vmul.f32 %v12716_v40, %v12472_v45 }
 0x485   :  { %2000 = vmax.xlane.f32.xlu0 %v1999_v17  ;;  %2003 = vmax.xlane.f32.xlu1 %v2002_v1  ;;  %v1888_v17 = vsel %vm699_vm2, %v12880_v58, 0.0  ;;  %v1891_v1 = vsel %vm699_vm2, %v12884_v39, 0.0 }
 0x489   :  { %1952 = vmax.xlane.f32.xlu0 %v1951_v61  ;;  %1955 = vmax.xlane.f32.xlu1 %v1954_v19  ;;  %v12892_v61 = vmul.f32 %v12716_v40, %v12457_v57  ;;  %v1843_v19 = vsel %vm699_vm2, %v12896_v54, 0.0  ;;  %v2020_v57 = vsel %vm699_vm2, %v12884_v39, -inf }
 0x48b   :  { %v1840_v59 = vsel %vm699_vm2, %v12892_v61, 0.0  ;;  %v1969_v45 = vsel %vm699_vm2, %v12892_v61, -inf }
 0x48d   :  { %1877 = vadd.xlane.f32.xlu0 %v1876_v7  ;;  %1880 = vadd.xlane.f32.xlu1 %v1879_v42  ;;  %v2017_v7 = vsel %vm699_vm2, %v12880_v58, -inf  ;;  %v1972_v42 = vsel %vm699_vm2, %v12896_v54, -inf }
 0x491   :  { %1829 = vadd.xlane.f32.xlu0 %v1828_v25  ;;  %1832 = vadd.xlane.f32.xlu1 %v1831_v32  ;;  %v12912_v25 = vmul.f32 %v12716_v40, %v12653_v50  ;;  %v12916_v32 = vmul.f32 %v12716_v40, %v12655_v63  ;;  %v12928_v50 = vmul.f32 %v12716_v40, %v12486_v15 }
 0x495   :  { %2006 = vmax.xlane.f32.xlu0 %v2005_v55  ;;  %2009 = vmax.xlane.f32.xlu1 %v2008_v21  ;;  %v1894_v55 = vsel %vm699_vm2, %v12912_v25, 0.0  ;;  %v1897_v21 = vsel %vm699_vm2, %v12916_v32, 0.0 }
 0x499   :  { %1958 = vmax.xlane.f32.xlu0 %v1957_v30  ;;  %1961 = vmax.xlane.f32.xlu1 %v1960_v46  ;;  %v12924_v30 = vmul.f32 %v12716_v40, %v12484_v9  ;;  %v1849_v46 = vsel %vm699_vm2, %v12928_v50, 0.0  ;;  %v2026_v9 = vsel %vm699_vm2, %v12916_v32, -inf }
 0x49b   :  { %v1846_v63 = vsel %vm699_vm2, %v12924_v30, 0.0  ;;  %v1975_v15 = vsel %vm699_vm2, %v12924_v30, -inf }
 0x49d   :  { %1883 = vadd.xlane.f32.xlu0 %v1882_v28  ;;  %1886 = vadd.xlane.f32.xlu1 %v1885_v33  ;;  %v2023_v28 = vsel %vm699_vm2, %v12912_v25, -inf  ;;  %v1978_v33 = vsel %vm699_vm2, %v12928_v50, -inf }
 0x4a1   :  { %1835 = vadd.xlane.f32.xlu0 %v1834_v8  ;;  %1838 = vadd.xlane.f32.xlu1 %v1837_v37  ;;  %v12944_v8 = vmul.f32 %v12716_v40, %v12657_v38  ;;  %v12948_v37 = vmul.f32 %v12716_v40, %v12661_v36  ;;  %v12960_v38 = vmul.f32 %v12716_v40, %v12515_v24 }
 0x4a5   :  { %2012 = vmax.xlane.f32.xlu0 %v2011_v56  ;;  %2015 = vmax.xlane.f32.xlu1 %v2014_v13  ;;  %v1900_v56 = vsel %vm699_vm2, %v12944_v8, 0.0  ;;  %v1903_v13 = vsel %vm699_vm2, %v12948_v37, 0.0 }
 0x4a9   :  { %1964 = vmax.xlane.f32.xlu0 %v1963_v3  ;;  %1967 = vmax.xlane.f32.xlu1 %v1966_v11  ;;  %v12956_v3 = vmul.f32 %v12716_v40, %v12513_v51  ;;  %v1855_v11 = vsel %vm699_vm2, %v12960_v38, 0.0  ;;  %v2032_v51 = vsel %vm699_vm2, %v12948_v37, -inf  ;;  %v1984_v40 = vsel %vm699_vm2, %v12960_v38, -inf }
 0x4ab   :  { %v1852_v36 = vsel %vm699_vm2, %v12956_v3, 0.0  ;;  %v1981_v24 = vsel %vm699_vm2, %v12956_v3, -inf }
 0x4ad   :  { %1889 = vadd.xlane.f32.xlu0 %v1888_v17  ;;  %1892 = vadd.xlane.f32.xlu1 %v1891_v1  ;;  %v2029_v17 = vsel %vm699_vm2, %v12944_v8, -inf  ;;  %v10840_v1 = vld [vmem:[%s15556_s7 + $0x4] ss:$16 sps:$4 sm:$0xff]  }
 0x4ae   :  { %2483 = vmatprep.mubr.bf16.mxu1 %v10840_v1 }
 0x4b1   :  { %1841 = vadd.xlane.f32.xlu0 %v1840_v59  ;;  %1844 = vadd.xlane.f32.xlu1 %v1843_v19  ;;  %v10843_v59 = vld [vmem:[%s15556_s7 + $0xc] ss:$16 sps:$4 sm:$0xff]  }
 0x4b2   :  { %2644 = vmatprep.mubr.bf16.mxu0 %v10843_v59 }
 0x4b5   :  { %2018 = vmax.xlane.f32.xlu0 %v2017_v7  ;;  %2021 = vmax.xlane.f32.xlu1 %v2020_v57 }
 0x4b9   :  { %1970 = vmax.xlane.f32.xlu0 %v1969_v45  ;;  %1973 = vmax.xlane.f32.xlu1 %v1972_v42 }
 0x4bd   :  { %1895 = vadd.xlane.f32.xlu0 %v1894_v55  ;;  %1898 = vadd.xlane.f32.xlu1 %v1897_v21 }
 0x4c1   :  { %1847 = vadd.xlane.f32.xlu0 %v1846_v63  ;;  %1850 = vadd.xlane.f32.xlu1 %v1849_v46 }
 0x4c5   :  { %2024 = vmax.xlane.f32.xlu0 %v2023_v28  ;;  %2027 = vmax.xlane.f32.xlu1 %v2026_v9 }
 0x4c9   :  { %1976 = vmax.xlane.f32.xlu0 %v1975_v15  ;;  %1979 = vmax.xlane.f32.xlu1 %v1978_v33 }
 0x4cd   :  { %1901 = vadd.xlane.f32.xlu0 %v1900_v56  ;;  %1904 = vadd.xlane.f32.xlu1 %v1903_v13 }
 0x4d1   :  { %1853 = vadd.xlane.f32.xlu0 %v1852_v36  ;;  %1856 = vadd.xlane.f32.xlu1 %v1855_v11 }
 0x4d5   :  { %2030 = vmax.xlane.f32.xlu0 %v2029_v17  ;;  %2033 = vmax.xlane.f32.xlu1 %v2032_v51 }
 0x4d9   :  { %1982 = vmax.xlane.f32.xlu0 %v1981_v24  ;;  %1985 = vmax.xlane.f32.xlu1 %v1984_v40 }
 0x4ea   :  { %v1860_v19 = vpop.xlane.xlu0 %1859  ;;  %v1812_v7 = vpop.xlane.xlu1 %1811 }
 0x4eb   :  { %v1923_v42 = vmul.f32 0.03125, %v1860_v19  ;;  %v1907_v55 = vmul.f32 0.03125, %v1812_v7 }
 0x4ee   :  { %v1863_v57 = vpop.xlane.xlu0 %1862  ;;  %v1815_v45 = vpop.xlane.xlu1 %1814 }
 0x4ef   :  { %v1924_v21 = vmul.f32 0.03125, %v1863_v57  ;;  %v1908_v63 = vmul.f32 0.03125, %v1815_v45 }
 0x4f1   :  { %v2043_v46 = vpack.c.bf16 %v1924_v21, %v1923_v42  ;;  %v2035_v28 = vpack.c.bf16 %v1908_v63, %v1907_v55 }
 0x4f2   :  { %v1989_v9 = vpop.xlane.xlu0 %1988  ;;  %v1992_v15 = vpop.xlane.xlu1 %1991 }
 0x4f3   :  { %v2059_v33 = vpack.c.bf16 %v1992_v15, %v1989_v9  ;;  %9595 = vmatprep.subr.bf16.mxu1 %v2043_v46 }
 0x4f4   :  { %9596 = vmatpush3.bf16.msra.mxu1 %v2035_v28 }
 0x4f5   :  { %9707 = vmatprep.subr.bf16.mxu0 %v2059_v33 }
 0x4f6   :  { %v1941_v56 = vpop.xlane.xlu0 %1940  ;;  %v1944_v13 = vpop.xlane.xlu1 %1943 }
 0x4f7   :  { %v2051_v36 = vpack.c.bf16 %v1944_v13, %v1941_v56 }
 0x4f9   :  { %9708 = vmatpush3.bf16.msra.mxu0 %v2051_v36 }
 0x4fa   :  { %v1866_v11 = vpop.xlane.xlu0 %1865  ;;  %v1869_v17 = vpop.xlane.xlu1 %1868 }
 0x4fb   :  { %v1925_v51 = vmul.f32 0.03125, %v1866_v11  ;;  %v1926_v24 = vmul.f32 0.03125, %v1869_v17 }
 0x4fd   :  { %v2044_v40 = vpack.c.bf16 %v1926_v24, %v1925_v51 }
 0x4fe   :  { %v1818_v1 = vpop.xlane.xlu0 %1817  ;;  %v1821_v59 = vpop.xlane.xlu1 %1820 }
 0x4ff   :  { %v1909_v19 = vmul.f32 0.03125, %v1818_v1  ;;  %v1910_v7 = vmul.f32 0.03125, %v1821_v59  ;;  %9597 = vmatprep.subr.bf16.mxu1 %v2044_v40 }
 0x501   :  { %v2036_v57 = vpack.c.bf16 %v1910_v7, %v1909_v19 }
 0x502   :  { %v1995_v45 = vpop.xlane.xlu0 %1994  ;;  %v1998_v42 = vpop.xlane.xlu1 %1997 }
 0x503   :  { %v2060_v55 = vpack.c.bf16 %v1998_v42, %v1995_v45  ;;  %9598 = vmatpush3.bf16.msra.mxu1 %v2036_v57 }
 0x505   :  { %9709 = vmatprep.subr.bf16.mxu0 %v2060_v55 }
 0x506   :  { %v1947_v21 = vpop.xlane.xlu0 %1946  ;;  %v1950_v63 = vpop.xlane.xlu1 %1949 }
 0x507   :  { %v2052_v46 = vpack.c.bf16 %v1950_v63, %v1947_v21 }
 0x509   :  { %9710 = vmatpush3.bf16.msra.mxu0 %v2052_v46 }
 0x50a   :  { %v1872_v28 = vpop.xlane.xlu0 %1871  ;;  %v1875_v9 = vpop.xlane.xlu1 %1874 }
 0x50b   :  { %v1927_v15 = vmul.f32 0.03125, %v1872_v28  ;;  %v1928_v33 = vmul.f32 0.03125, %v1875_v9 }
 0x50d   :  { %v2045_v56 = vpack.c.bf16 %v1928_v33, %v1927_v15 }
 0x50e   :  { %v1824_v13 = vpop.xlane.xlu0 %1823  ;;  %v1827_v36 = vpop.xlane.xlu1 %1826 }
 0x50f   :  { %v1911_v11 = vmul.f32 0.03125, %v1824_v13  ;;  %v1912_v17 = vmul.f32 0.03125, %v1827_v36  ;;  %9599 = vmatprep.subr.bf16.mxu1 %v2045_v56 }
 0x511   :  { %v2037_v51 = vpack.c.bf16 %v1912_v17, %v1911_v11 }
 0x512   :  { %v2001_v24 = vpop.xlane.xlu0 %2000  ;;  %v2004_v40 = vpop.xlane.xlu1 %2003 }
 0x513   :  { %v2061_v1 = vpack.c.bf16 %v2004_v40, %v2001_v24  ;;  %9600 = vmatpush3.bf16.msra.mxu1 %v2037_v51 }
 0x515   :  { %9711 = vmatprep.subr.bf16.mxu0 %v2061_v1 }
 0x516   :  { %v1953_v59 = vpop.xlane.xlu0 %1952  ;;  %v1956_v19 = vpop.xlane.xlu1 %1955 }
 0x517   :  { %v2053_v7 = vpack.c.bf16 %v1956_v19, %v1953_v59 }
 0x519   :  { %9712 = vmatpush3.bf16.msra.mxu0 %v2053_v7 }
 0x51a   :  { %v1878_v57 = vpop.xlane.xlu0 %1877  ;;  %v1881_v45 = vpop.xlane.xlu1 %1880 }
 0x51b   :  { %v1929_v42 = vmul.f32 0.03125, %v1878_v57  ;;  %v1930_v55 = vmul.f32 0.03125, %v1881_v45 }
 0x51d   :  { %v2046_v21 = vpack.c.bf16 %v1930_v55, %v1929_v42 }
 0x51e   :  { %v1830_v63 = vpop.xlane.xlu0 %1829  ;;  %v1833_v46 = vpop.xlane.xlu1 %1832 }
 0x51f   :  { %v1913_v28 = vmul.f32 0.03125, %v1830_v63  ;;  %v1914_v9 = vmul.f32 0.03125, %v1833_v46  ;;  %9601 = vmatprep.subr.bf16.mxu1 %v2046_v21 }
 0x521   :  { %v2038_v15 = vpack.c.bf16 %v1914_v9, %v1913_v28 }
 0x522   :  { %v2007_v33 = vpop.xlane.xlu0 %2006  ;;  %v2010_v56 = vpop.xlane.xlu1 %2009 }
 0x523   :  { %v2062_v13 = vpack.c.bf16 %v2010_v56, %v2007_v33  ;;  %9602 = vmatpush3.bf16.msra.mxu1 %v2038_v15 }
 0x525   :  { %9713 = vmatprep.subr.bf16.mxu0 %v2062_v13 }
 0x526   :  { %v1959_v36 = vpop.xlane.xlu0 %1958  ;;  %v1962_v11 = vpop.xlane.xlu1 %1961 }
 0x527   :  { %v2054_v17 = vpack.c.bf16 %v1962_v11, %v1959_v36 }
 0x529   :  { %9714 = vmatpush3.bf16.msra.mxu0 %v2054_v17 }
 0x52a   :  { %v1884_v51 = vpop.xlane.xlu0 %1883  ;;  %v1887_v24 = vpop.xlane.xlu1 %1886 }
 0x52b   :  { %v1931_v40 = vmul.f32 0.03125, %v1884_v51  ;;  %v1932_v1 = vmul.f32 0.03125, %v1887_v24 }
 0x52d   :  { %v2047_v59 = vpack.c.bf16 %v1932_v1, %v1931_v40 }
 0x52e   :  { %v1836_v19 = vpop.xlane.xlu0 %1835  ;;  %v1839_v7 = vpop.xlane.xlu1 %1838 }
 0x52f   :  { %v1915_v57 = vmul.f32 0.03125, %v1836_v19  ;;  %v1916_v45 = vmul.f32 0.03125, %v1839_v7  ;;  %9603 = vmatprep.subr.bf16.mxu1 %v2047_v59 }
 0x531   :  { %v2039_v42 = vpack.c.bf16 %v1916_v45, %v1915_v57 }
 0x532   :  { %v2013_v55 = vpop.xlane.xlu0 %2012  ;;  %v2016_v21 = vpop.xlane.xlu1 %2015 }
 0x533   :  { %v2063_v63 = vpack.c.bf16 %v2016_v21, %v2013_v55  ;;  %9604 = vmatpush3.bf16.msra.mxu1 %v2039_v42 }
 0x535   :  { %9715 = vmatprep.subr.bf16.mxu0 %v2063_v63 }
 0x536   :  { %v1965_v46 = vpop.xlane.xlu0 %1964  ;;  %v1968_v28 = vpop.xlane.xlu1 %1967 }
 0x537   :  { %v2055_v9 = vpack.c.bf16 %v1968_v28, %v1965_v46 }
 0x539   :  { %9716 = vmatpush3.bf16.msra.mxu0 %v2055_v9 }
 0x53a   :  { %v1890_v15 = vpop.xlane.xlu0 %1889  ;;  %v1893_v33 = vpop.xlane.xlu1 %1892 }
 0x53b   :  { %v1933_v56 = vmul.f32 0.03125, %v1890_v15  ;;  %v1934_v13 = vmul.f32 0.03125, %v1893_v33 }
 0x53d   :  { %v2048_v36 = vpack.c.bf16 %v1934_v13, %v1933_v56 }
 0x53e   :  { %v1842_v11 = vpop.xlane.xlu0 %1841  ;;  %v1845_v17 = vpop.xlane.xlu1 %1844 }
 0x53f   :  { %v1917_v51 = vmul.f32 0.03125, %v1842_v11  ;;  %v1918_v24 = vmul.f32 0.03125, %v1845_v17  ;;  %9605 = vmatprep.subr.bf16.mxu1 %v2048_v36 }
 0x541   :  { %v2040_v40 = vpack.c.bf16 %v1918_v24, %v1917_v51 }
 0x542   :  { %v2019_v1 = vpop.xlane.xlu0 %2018  ;;  %v2022_v59 = vpop.xlane.xlu1 %2021 }
 0x543   :  { %v2064_v19 = vpack.c.bf16 %v2022_v59, %v2019_v1  ;;  %9606 = vmatpush3.bf16.msra.mxu1 %v2040_v40 }
 0x545   :  { %9717 = vmatprep.subr.bf16.mxu0 %v2064_v19 }
 0x546   :  { %v1971_v7 = vpop.xlane.xlu0 %1970  ;;  %v1974_v57 = vpop.xlane.xlu1 %1973 }
 0x547   :  { %v2056_v45 = vpack.c.bf16 %v1974_v57, %v1971_v7 }
 0x549   :  { %9718 = vmatpush3.bf16.msra.mxu0 %v2056_v45 }
 0x54a   :  { %v1896_v42 = vpop.xlane.xlu0 %1895  ;;  %v1899_v55 = vpop.xlane.xlu1 %1898 }
 0x54b   :  { %v1935_v21 = vmul.f32 0.03125, %v1896_v42  ;;  %v1936_v63 = vmul.f32 0.03125, %v1899_v55 }
 0x54d   :  { %v2049_v46 = vpack.c.bf16 %v1936_v63, %v1935_v21 }
 0x54e   :  { %v1848_v28 = vpop.xlane.xlu0 %1847  ;;  %v1851_v9 = vpop.xlane.xlu1 %1850 }
 0x54f   :  { %v1919_v15 = vmul.f32 0.03125, %v1848_v28  ;;  %v1920_v33 = vmul.f32 0.03125, %v1851_v9  ;;  %9607 = vmatprep.subr.bf16.mxu1 %v2049_v46  ;;  %v10838_v28 = vld [vmem:[%s15556_s7] ss:$16 sps:$4 sm:$0xff]  }
 0x551   :  { %v2041_v56 = vpack.c.bf16 %v1920_v33, %v1919_v15  ;;  %v10844_v15 = vld [vmem:[%s15556_s7 + $0x24] ss:$16 sps:$4 sm:$0xff]  }
 0x552   :  { %v2025_v13 = vpop.xlane.xlu0 %2024  ;;  %v2028_v36 = vpop.xlane.xlu1 %2027 }
 0x553   :  { %v2065_v11 = vpack.c.bf16 %v2028_v36, %v2025_v13  ;;  %9608 = vmatpush3.bf16.msra.mxu1 %v2041_v56  ;;  %v10841_v36 = vld [vmem:[%s15556_s7 + $0x8] ss:$16 sps:$4 sm:$0xff]  }
 0x555   :  { %9719 = vmatprep.subr.bf16.mxu0 %v2065_v11  ;;  %v10847_v11 = vld [vmem:[%s15556_s7 + $0x2c] ss:$16 sps:$4 sm:$0xff]  }
 0x556   :  { %v1977_v17 = vpop.xlane.xlu0 %1976  ;;  %v1980_v51 = vpop.xlane.xlu1 %1979 }
 0x557   :  { %v2057_v24 = vpack.c.bf16 %v1980_v51, %v1977_v17  ;;  %v10846_v17 = vld [vmem:[%s15556_s7 + $0x20] ss:$16 sps:$4 sm:$0xff]   ;;  %v10850_v51 = vld [vmem:[%s15556_s7 + $0x44] ss:$16 sps:$4 sm:$0xff]  }
 0x559   :  { %9720 = vmatpush3.bf16.msra.mxu0 %v2057_v24  ;;  %v10849_v24 = vld [vmem:[%s15556_s7 + $0x28] ss:$16 sps:$4 sm:$0xff]  }
 0x55a   :  { %v1902_v40 = vpop.xlane.xlu0 %1901  ;;  %v1905_v1 = vpop.xlane.xlu1 %1904 }
 0x55b   :  { %v1937_v59 = vmul.f32 0.03125, %v1902_v40  ;;  %v1938_v19 = vmul.f32 0.03125, %v1905_v1  ;;  %v10853_v40 = vld [vmem:[%s15556_s7 + $0x4c] ss:$16 sps:$4 sm:$0xff]   ;;  %v10852_v1 = vld [vmem:[%s15556_s7 + $0x40] ss:$16 sps:$4 sm:$0xff]  }
 0x55d   :  { %v2050_v7 = vpack.c.bf16 %v1938_v19, %v1937_v59  ;;  %v10856_v59 = vld [vmem:[%s15556_s7 + $0x64] ss:$16 sps:$4 sm:$0xff]   ;;  %v10855_v19 = vld [vmem:[%s15556_s7 + $0x48] ss:$16 sps:$4 sm:$0xff]  }
 0x55e   :  { %v1854_v57 = vpop.xlane.xlu0 %1853  ;;  %v1857_v45 = vpop.xlane.xlu1 %1856 }
 0x55f   :  { %v1921_v42 = vmul.f32 0.03125, %v1854_v57  ;;  %v1922_v55 = vmul.f32 0.03125, %v1857_v45  ;;  %9609 = vmatprep.subr.bf16.mxu1 %v2050_v7  ;;  %v10859_v7 = vld [vmem:[%s15556_s7 + $0x6c] ss:$16 sps:$4 sm:$0xff]   ;;  %v10858_v57 = vld [vmem:[%s15556_s7 + $0x60] ss:$16 sps:$4 sm:$0xff]  }
 0x560   :  { %v10862_v45 = vld [vmem:[%s15556_s7 + $0x84] ss:$16 sps:$4 sm:$0xff]  }
 0x561   :  { %v2042_v21 = vpack.c.bf16 %v1922_v55, %v1921_v42  ;;  %v10861_v42 = vld [vmem:[%s15556_s7 + $0x68] ss:$16 sps:$4 sm:$0xff]   ;;  %v10865_v55 = vld [vmem:[%s15556_s7 + $0x8c] ss:$16 sps:$4 sm:$0xff]  }
 0x562   :  { %v2031_v63 = vpop.xlane.xlu0 %2030  ;;  %v2034_v46 = vpop.xlane.xlu1 %2033 }
 0x563   :  { %v2066_v9 = vpack.c.bf16 %v2034_v46, %v2031_v63  ;;  %9610 = vmatpush3.bf16.msra.mxu1 %v2042_v21  ;;  %v10864_v21 = vld [vmem:[%s15556_s7 + $0x80] ss:$16 sps:$4 sm:$0xff]   ;;  %v10868_v63 = vld [vmem:[%s15556_s7 + $0xa4] ss:$16 sps:$4 sm:$0xff]   ;;  %v10867_v46 = vld [vmem:[%s15556_s7 + $0x88] ss:$16 sps:$4 sm:$0xff]  }
 0x565   :  { %9721 = vmatprep.subr.bf16.mxu0 %v2066_v9  ;;  %v10870_v9 = vld [vmem:[%s15556_s7 + $0xa0] ss:$16 sps:$4 sm:$0xff]  }
 0x566   :  { %v1983_v33 = vpop.xlane.xlu0 %1982  ;;  %v1986_v56 = vpop.xlane.xlu1 %1985  ;;  %2484 = vmatmul.mubr.bf16.vlgmr.msra.gmra.mrb[16].mxu1 %v10838_v28  ;;  %v10871_v28 = vld [vmem:[%s15556_s7 + $0xac] ss:$16 sps:$4 sm:$0xff]  }
 0x567   :  { %v2058_v13 = vpack.c.bf16 %v1986_v56, %v1983_v33  ;;  %2491 = vmatprep.mubr.bf16.mxu1 %v10844_v15  ;;  %v10874_v15 = vld [vmem:[%s15556_s7 + $0xc4] ss:$16 sps:$4 sm:$0xff]   ;;  %v10873_v33 = vld [vmem:[%s15556_s7 + $0xa8] ss:$16 sps:$4 sm:$0xff]   ;;  %v10877_v56 = vld [vmem:[%s15556_s7 + $0xcc] ss:$16 sps:$4 sm:$0xff]  }
 0x569   :  { %9722 = vmatpush3.bf16.msra.mxu0 %v2058_v13  ;;  %v10876_v13 = vld [vmem:[%s15556_s7 + $0xc0] ss:$16 sps:$4 sm:$0xff]  }
 0x56c   :  { %2645 = vmatmul.mubr.bf16.vlgmr.msra.gmra.mrb[56].mxu0 %v10841_v36  ;;  %v10880_v36 = vld [vmem:[%s15556_s7 + $0xe4] ss:$16 sps:$4 sm:$0xff]  }
 0x56d   :  { %2652 = vmatprep.mubr.bf16.mxu0 %v10847_v11  ;;  %v10879_v11 = vld [vmem:[%s15556_s7 + $0xc8] ss:$16 sps:$4 sm:$0xff]  }
 0x56e   :  { %2492 = vmatmul.mubr.bf16.gmra.mrb[20].mxu1 %v10846_v17  ;;  %v10883_v17 = vld [vmem:[%s15556_s7 + $0xec] ss:$16 sps:$4 sm:$0xff]  }
 0x56f   :  { %2499 = vmatprep.mubr.bf16.mxu1 %v10850_v51  ;;  %v10882_v51 = vld [vmem:[%s15556_s7 + $0xe0] ss:$16 sps:$4 sm:$0xff]  }
 0x574   :  { %2653 = vmatmul.mubr.bf16.gmra.mrb[60].mxu0 %v10849_v24  ;;  %v10886_v24 = vld [vmem:[%s15556_s7 + $0x104] ss:$16 sps:$4 sm:$0xff]  }
 0x575   :  { %2660 = vmatprep.mubr.bf16.mxu0 %v10853_v40  ;;  %v10885_v40 = vld [vmem:[%s15556_s7 + $0xe8] ss:$16 sps:$4 sm:$0xff]  }
 0x576   :  { %2500 = vmatmul.mubr.bf16.gmra.mrb[24].mxu1 %v10852_v1  ;;  %v10889_v1 = vld [vmem:[%s15556_s7 + $0x10c] ss:$16 sps:$4 sm:$0xff]  }
 0x577   :  { %2507 = vmatprep.mubr.bf16.mxu1 %v10856_v59  ;;  %v10888_v59 = vld [vmem:[%s15556_s7 + $0x100] ss:$16 sps:$4 sm:$0xff]  }
 0x57c   :  { %2661 = vmatmul.mubr.bf16.gmra.mrb[64].mxu0 %v10855_v19  ;;  %v10892_v19 = vld [vmem:[%s15556_s7 + $0x124] ss:$16 sps:$4 sm:$0xff]  }
 0x57d   :  { %2668 = vmatprep.mubr.bf16.mxu0 %v10859_v7  ;;  %v10891_v7 = vld [vmem:[%s15556_s7 + $0x108] ss:$16 sps:$4 sm:$0xff]  }
 0x57e   :  { %2508 = vmatmul.mubr.bf16.gmra.mrb[28].mxu1 %v10858_v57  ;;  %v10895_v57 = vld [vmem:[%s15556_s7 + $0x12c] ss:$16 sps:$4 sm:$0xff]  }
 0x57f   :  { %2515 = vmatprep.mubr.bf16.mxu1 %v10862_v45  ;;  %v10894_v45 = vld [vmem:[%s15556_s7 + $0x120] ss:$16 sps:$4 sm:$0xff]  }
 0x584   :  { %2669 = vmatmul.mubr.bf16.gmra.mrb[68].mxu0 %v10861_v42  ;;  %v10898_v42 = vld [vmem:[%s15556_s7 + $0x144] ss:$16 sps:$4 sm:$0xff]  }
 0x585   :  { %2676 = vmatprep.mubr.bf16.mxu0 %v10865_v55  ;;  %v10897_v55 = vld [vmem:[%s15556_s7 + $0x128] ss:$16 sps:$4 sm:$0xff]  }
 0x586   :  { %2516 = vmatmul.mubr.bf16.gmra.mrb[32].mxu1 %v10864_v21  ;;  %v10901_v21 = vld [vmem:[%s15556_s7 + $0x14c] ss:$16 sps:$4 sm:$0xff]  }
 0x587   :  { %2523 = vmatprep.mubr.bf16.mxu1 %v10868_v63  ;;  %v10900_v63 = vld [vmem:[%s15556_s7 + $0x140] ss:$16 sps:$4 sm:$0xff]  }
 0x58c   :  { %2677 = vmatmul.mubr.bf16.gmra.mrb[72].mxu0 %v10867_v46  ;;  %v10904_v46 = vld [vmem:[%s15556_s7 + $0x164] ss:$16 sps:$4 sm:$0xff]  }
 0x58d   :  { %2684 = vmatprep.mubr.bf16.mxu0 %v10871_v28  ;;  %v10903_v28 = vld [vmem:[%s15556_s7 + $0x148] ss:$16 sps:$4 sm:$0xff]  }
 0x58e   :  { %2524 = vmatmul.mubr.bf16.gmra.mrb[36].mxu1 %v10870_v9  ;;  %v10907_v9 = vld [vmem:[%s15556_s7 + $0x16c] ss:$16 sps:$4 sm:$0xff]  }
 0x58f   :  { %2531 = vmatprep.mubr.bf16.mxu1 %v10874_v15  ;;  %v10906_v15 = vld [vmem:[%s15556_s7 + $0x160] ss:$16 sps:$4 sm:$0xff]  }
 0x594   :  { %2685 = vmatmul.mubr.bf16.gmra.mrb[76].mxu0 %v10873_v33  ;;  %v10910_v33 = vld [vmem:[%s15556_s7 + $0x184] ss:$16 sps:$4 sm:$0xff]  }
 0x595   :  { %2692 = vmatprep.mubr.bf16.mxu0 %v10877_v56  ;;  %v10909_v56 = vld [vmem:[%s15556_s7 + $0x168] ss:$16 sps:$4 sm:$0xff]  }
 0x596   :  { %2532 = vmatmul.mubr.bf16.gmra.mrb[40].mxu1 %v10876_v13  ;;  %v10913_v13 = vld [vmem:[%s15556_s7 + $0x18c] ss:$16 sps:$4 sm:$0xff]  }
 0x597   :  { %2539 = vmatprep.mubr.bf16.mxu1 %v10880_v36  ;;  %v10912_v36 = vld [vmem:[%s15556_s7 + $0x180] ss:$16 sps:$4 sm:$0xff]  }
 0x59c   :  { %2693 = vmatmul.mubr.bf16.gmra.mrb[80].mxu0 %v10879_v11  ;;  %v10916_v11 = vld [vmem:[%s15556_s7 + $0x1a4] ss:$16 sps:$4 sm:$0xff]  }
 0x59d   :  { %2700 = vmatprep.mubr.bf16.mxu0 %v10883_v17  ;;  %v10915_v17 = vld [vmem:[%s15556_s7 + $0x188] ss:$16 sps:$4 sm:$0xff]  }
 0x59e   :  { %2540 = vmatmul.mubr.bf16.gmra.mrb[44].mxu1 %v10882_v51  ;;  %v10919_v51 = vld [vmem:[%s15556_s7 + $0x1ac] ss:$16 sps:$4 sm:$0xff]  }
 0x59f   :  { %2547 = vmatprep.mubr.bf16.mxu1 %v10886_v24  ;;  %v10918_v24 = vld [vmem:[%s15556_s7 + $0x1a0] ss:$16 sps:$4 sm:$0xff]  }
 0x5a4   :  { %2701 = vmatmul.mubr.bf16.gmra.mrb[84].mxu0 %v10885_v40  ;;  %v10922_v40 = vld [vmem:[%s15556_s7 + $0x1c4] ss:$16 sps:$4 sm:$0xff]  }
 0x5a5   :  { %2708 = vmatprep.mubr.bf16.mxu0 %v10889_v1  ;;  %v10921_v1 = vld [vmem:[%s15556_s7 + $0x1a8] ss:$16 sps:$4 sm:$0xff]  }
 0x5a6   :  { %2548 = vmatmul.mubr.bf16.gmra.mrb[48].mxu1 %v10888_v59  ;;  %v10925_v59 = vld [vmem:[%s15556_s7 + $0x1cc] ss:$16 sps:$4 sm:$0xff]  }
 0x5a7   :  { %2555 = vmatprep.mubr.bf16.mxu1 %v10892_v19  ;;  %v10924_v19 = vld [vmem:[%s15556_s7 + $0x1c0] ss:$16 sps:$4 sm:$0xff]  }
 0x5ac   :  { %2709 = vmatmul.mubr.bf16.gmra.mrb[88].mxu0 %v10891_v7  ;;  %v10928_v7 = vld [vmem:[%s15556_s7 + $0x1e4] ss:$16 sps:$4 sm:$0xff]  }
 0x5ad   :  { %2716 = vmatprep.mubr.bf16.mxu0 %v10895_v57  ;;  %v10927_v57 = vld [vmem:[%s15556_s7 + $0x1c8] ss:$16 sps:$4 sm:$0xff]  }
 0x5ae   :  { %2556 = vmatmul.mubr.bf16.gmra.mrb[52].mxu1 %v10894_v45  ;;  %v10931_v45 = vld [vmem:[%s15556_s7 + $0x1ec] ss:$16 sps:$4 sm:$0xff]  }
 0x5af   :  { %2563 = vmatprep.mubr.bf16.mxu1 %v10898_v42  ;;  %v10930_v42 = vld [vmem:[%s15556_s7 + $0x1e0] ss:$16 sps:$4 sm:$0xff]  }
 0x5b4   :  { %2717 = vmatmul.mubr.bf16.gmra.mrb[92].mxu0 %v10897_v55  ;;  %v10933_v55 = vld [vmem:[%s15556_s7 + $0x1e8] ss:$16 sps:$4 sm:$0xff]  }
 0x5b5   :  { %2724 = vmatprep.mubr.bf16.mxu0 %v10901_v21  ;;  %v15628_v21 = vmov 0  }
 0x5b6   :  { %2564 = vmatmul.mubr.bf16.gmra.mrb[56].mxu1 %v10900_v63  ;;  %10801 = vset.pattern.permute.xlu0 %v15628_v21 }
 0x5b7   :  { %2571 = vmatprep.mubr.bf16.mxu1 %v10904_v46  ;;  %10802 = vset.pattern.permute.xlu1 %v15628_v21 }
 0x5b8   :  { %3715 = vmatprep.subr.bf16.mxu0 %v15628_v21 }
 0x5bc   :  { %2725 = vmatmul.mubr.bf16.gmra.mrb[96].mxu0 %v10903_v28 }
 0x5bd   :  { %2732 = vmatprep.mubr.bf16.mxu0 %v10907_v9 }
 0x5be   :  { %2572 = vmatmul.mubr.bf16.gmra.mrb[60].mxu1 %v10906_v15 }
 0x5bf   :  { %2579 = vmatprep.mubr.bf16.mxu1 %v10910_v33 }
 0x5c4   :  { %2733 = vmatmul.mubr.bf16.gmra.mrb[100].mxu0 %v10909_v56 }
 0x5c5   :  { %2740 = vmatprep.mubr.bf16.mxu0 %v10913_v13 }
 0x5c6   :  { %2580 = vmatmul.mubr.bf16.gmra.mrb[64].mxu1 %v10912_v36 }
 0x5c7   :  { %2587 = vmatprep.mubr.bf16.mxu1 %v10916_v11 }
 0x5cc   :  { %2741 = vmatmul.mubr.bf16.gmra.mrb[104].mxu0 %v10915_v17 }
 0x5cd   :  { %2748 = vmatprep.mubr.bf16.mxu0 %v10919_v51 }
 0x5ce   :  { %2588 = vmatmul.mubr.bf16.gmra.mrb[68].mxu1 %v10918_v24 }
 0x5cf   :  { %2595 = vmatprep.mubr.bf16.mxu1 %v10922_v40 }
 0x5d4   :  { %2749 = vmatmul.mubr.bf16.gmra.mrb[108].mxu0 %v10921_v1 }
 0x5d5   :  { %2756 = vmatprep.mubr.bf16.mxu0 %v10925_v59 }
 0x5d6   :  { %2596 = vmatmul.mubr.bf16.gmra.mrb[72].mxu1 %v10924_v19 }
 0x5d7   :  { %2603 = vmatprep.mubr.bf16.mxu1 %v10928_v7 }
 0x5dc   :  { %2757 = vmatmul.mubr.bf16.gmra.mrb[112].mxu0 %v10927_v57 }
 0x5dd   :  { %2764 = vmatprep.mubr.bf16.mxu0 %v10931_v45 }
 0x5de   :  { %2604 = vmatmul.mubr.bf16.gmra.mrb[76].mxu1 %v10930_v42 }
 0x5e4   :  { %2765 = vmatmul.mubr.bf16.gmra.mrb[116].mxu0 %v10933_v55 }
 0x639   :  { %v9611_v63 = vpop.f32.mrb[16].mxu1 }
 0x63a   :  { %v9612_v46 = vpop.f32.mrb[17].mxu1 }
 0x63b   :  { %v9613_v28 = vadd.f32 %v9612_v46, %v9611_v63  ;;  %v9614_v9 = vpop.f32.mrb[18].mxu1 }
 0x63c   :  { %v9615_v15 = vpop.f32.mrb[19].mxu1 }
 0x63d   :  { %v9616_v33 = vadd.f32 %v9615_v15, %v9614_v9 }
 0x63f   :  { %v9723_v56 = vpop.f32.mrb[56].mxu0 }
 0x640   :  { %v9724_v13 = vpop.f32.mrb[57].mxu0 }
 0x641   :  { %v9725_v36 = vadd.f32 %v9724_v13, %v9723_v56  ;;  %v9726_v11 = vpop.f32.mrb[58].mxu0  ;;  %v9617_v17 = vpop.f32.mrb[20].mxu1 }
 0x642   :  { %v9727_v51 = vpop.f32.mrb[59].mxu0  ;;  %v9618_v24 = vpop.f32.mrb[21].mxu1 }
 0x643   :  { %v2647_v40 = vadd.f32 %v9725_v36, %v9613_v28  ;;  %v9728_v1 = vadd.f32 %v9727_v51, %v9726_v11  ;;  %v9619_v59 = vadd.f32 %v9618_v24, %v9617_v17  ;;  %v9620_v19 = vpop.f32.mrb[22].mxu1 }
 0x644   :  { %v9621_v7 = vpop.f32.mrb[23].mxu1 }
 0x645   :  { %v9187_v57 = vmul.f32 -1.442695, %v2647_v40  ;;  %v2650_v45 = vadd.f32 %v9728_v1, %v9616_v33  ;;  %v9622_v42 = vadd.f32 %v9621_v7, %v9620_v19 }
 0x647   :  { %11070 = vpow2.f32 %v9187_v57  ;;  %v9188_v55 = vmul.f32 -1.442695, %v2650_v45  ;;  %v9729_v63 = vpop.f32.mrb[60].mxu0 }
 0x648   :  { %v9730_v46 = vpop.f32.mrb[61].mxu0 }
 0x649   :  { %11072 = vpow2.f32 %v9188_v55  ;;  %v9731_v9 = vadd.f32 %v9730_v46, %v9729_v63  ;;  %v9732_v15 = vpop.f32.mrb[62].mxu0  ;;  %v9623_v56 = vpop.f32.mrb[24].mxu1 }
 0x64a   :  { %v9733_v13 = vpop.f32.mrb[63].mxu0  ;;  %v9624_v35 = vpop.f32.mrb[25].mxu1 }
 0x64b   :  { %v2655_v21 = vadd.f32 %v9731_v9, %v9619_v59  ;;  %v9734_v49 = vadd.f32 %v9733_v13, %v9732_v15  ;;  %v9625_v28 = vadd.f32 %v9624_v35, %v9623_v56  ;;  %v9626_v36 = vpop.f32.mrb[26].mxu1 }
 0x64c   :  { %v9627_v11 = vpop.f32.mrb[27].mxu1 }
 0x64d   :  { %v9189_v17 = vmul.f32 -1.442695, %v2655_v21  ;;  %v2658_v51 = vadd.f32 %v9734_v49, %v9622_v42  ;;  %v9628_v24 = vadd.f32 %v9627_v11, %v9626_v36 }
 0x64f   :  { %11074 = vpow2.f32 %v9189_v17  ;;  %v9190_v33 = vmul.f32 -1.442695, %v2658_v51  ;;  %v9735_v40 = vpop.f32.mrb[64].mxu0 }
 0x650   :  { %v9736_v1 = vpop.f32.mrb[65].mxu0 }
 0x651   :  { %v11071_v19 = vpop.eup %11070  ;;  %11076 = vpow2.f32 %v9190_v33  ;;  %v9737_v7 = vadd.f32 %v9736_v1, %v9735_v40  ;;  %v9738_v57 = vpop.f32.mrb[66].mxu0 }
 0x652   :  { %v9629_v45 = vpop.f32.mrb[28].mxu1  ;;  %v2869_v55 = vadd.f32 1.0, %v11071_v19  ;;  %v9739_v63 = vpop.f32.mrb[67].mxu0 }
 0x653   :  { %v9630_v46 = vpop.f32.mrb[29].mxu1  ;;  %v11073_v59 = vpop.eup %11072  ;;  %v2663_v9 = vadd.f32 %v9737_v7, %v9625_v28  ;;  %v9740_v35 = vadd.f32 %v9739_v63, %v9738_v57 }
 0x654   :  { %v9631_v15 = vadd.f32 %v9630_v46, %v9629_v45  ;;  %v9632_v56 = vpop.f32.mrb[30].mxu1  ;;  %11078 = vrcp.f32 %v2869_v55  ;;  %v2870_v49 = vadd.f32 1.0, %v11073_v59 }
 0x655   :  { %v9633_v21 = vpop.f32.mrb[31].mxu1  ;;  %v9191_v42 = vmul.f32 -1.442695, %v2663_v9  ;;  %v2666_v13 = vadd.f32 %v9740_v35, %v9628_v24 }
 0x656   :  { %v9634_v36 = vadd.f32 %v9633_v21, %v9632_v56  ;;  %11080 = vrcp.f32 %v2870_v49 }
 0x657   :  { %11082 = vpow2.f32 %v9191_v42  ;;  %v9192_v11 = vmul.f32 -1.442695, %v2666_v13  ;;  %v9741_v17 = vpop.f32.mrb[68].mxu0 }
 0x658   :  { %v9742_v51 = vpop.f32.mrb[69].mxu0 }
 0x659   :  { %v11075_v33 = vpop.eup %11074  ;;  %11084 = vpow2.f32 %v9192_v11  ;;  %v9743_v40 = vadd.f32 %v9742_v51, %v9741_v17  ;;  %v9744_v1 = vpop.f32.mrb[70].mxu0 }
 0x65a   :  { %v9635_v19 = vpop.f32.mrb[32].mxu1  ;;  %v2871_v28 = vadd.f32 1.0, %v11075_v33  ;;  %v9745_v7 = vpop.f32.mrb[71].mxu0 }
 0x65b   :  { %v9636_v57 = vpop.f32.mrb[33].mxu1  ;;  %v11077_v45 = vpop.eup %11076  ;;  %v2671_v55 = vadd.f32 %v9743_v40, %v9631_v15  ;;  %v9746_v63 = vadd.f32 %v9745_v7, %v9744_v1 }
 0x65c   :  { %v9637_v46 = vadd.f32 %v9636_v57, %v9635_v19  ;;  %v9638_v59 = vpop.f32.mrb[34].mxu1  ;;  %11086 = vrcp.f32 %v2871_v28  ;;  %v2872_v24 = vadd.f32 1.0, %v11077_v45 }
 0x65d   :  { %v9639_v9 = vpop.f32.mrb[35].mxu1  ;;  %v9193_v35 = vmul.f32 -1.442695, %v2671_v55  ;;  %v2674_v56 = vadd.f32 %v9746_v63, %v9634_v36  ;;  %v10934_v63 = vld [vmem:[%s15557_s8] sm:$0xff]  }
 0x65e   :  { %v9640_v49 = vadd.f32 %v9639_v9, %v9638_v59  ;;  %v11079_v21 = vpop.eup %11078  ;;  %10345 = vmatprep.subr.bf16.mxu1 %v10934_v63 }
 0x65f   :  { %11088 = vpow2.f32 %v9193_v35  ;;  %v9194_v42 = vmul.f32 -1.442695, %v2674_v56  ;;  %v9747_v13 = vpop.f32.mrb[72].mxu0  ;;  %2967 = vperm.xlu0 %10801, %v11079_v21   ;;  %10346 = vmatpush3.bf16.msra.mxu1 %v10934_v63 }
 0x660   :  { %v11081_v11 = vpop.eup %11080  ;;  %11090 = vrcp.f32 %v2872_v24  ;;  %v9748_v17 = vpop.f32.mrb[73].mxu0 }
 0x661   :  { %v11083_v51 = vpop.eup %11082  ;;  %11092 = vpow2.f32 %v9194_v42  ;;  %v9749_v15 = vadd.f32 %v9748_v17, %v9747_v13  ;;  %v9750_v33 = vpop.f32.mrb[74].mxu0  ;;  %2972 = vperm.xlu1 %10802, %v11081_v11  }
 0x662   :  { %v9641_v40 = vpop.f32.mrb[36].mxu1  ;;  %v2873_v1 = vadd.f32 1.0, %v11083_v51  ;;  %v9751_v19 = vpop.f32.mrb[75].mxu0 }
 0x663   :  { %v9642_v28 = vpop.f32.mrb[37].mxu1  ;;  %v11085_v7 = vpop.eup %11084  ;;  %v2679_v36 = vadd.f32 %v9749_v15, %v9637_v46  ;;  %v9752_v57 = vadd.f32 %v9751_v19, %v9750_v33 }
 0x664   :  { %v9643_v45 = vadd.f32 %v9642_v28, %v9641_v40  ;;  %v9644_v55 = vpop.f32.mrb[38].mxu1  ;;  %11094 = vrcp.f32 %v2873_v1  ;;  %v2874_v59 = vadd.f32 1.0, %v11085_v7 }
 0x665   :  { %v9645_v24 = vpop.f32.mrb[39].mxu1  ;;  %v9195_v9 = vmul.f32 -1.442695, %v2679_v36  ;;  %v2682_v35 = vadd.f32 %v9752_v57, %v9640_v49 }
 0x666   :  { %v9646_v56 = vadd.f32 %v9645_v24, %v9644_v55  ;;  %v11087_v21 = vpop.eup %11086 }
 0x667   :  { %11096 = vpow2.f32 %v9195_v9  ;;  %v9196_v42 = vmul.f32 -1.442695, %v2682_v35  ;;  %v9753_v13 = vpop.f32.mrb[76].mxu0  ;;  %2977 = vperm.xlu1 %10802, %v11087_v21   ;;  %v10935_v35 = vld [vmem:[%s15557_s8 + $0x8] sm:$0xff]  }
 0x668   :  { %11098 = vrcp.f32 %v2874_v59  ;;  %v9754_v46 = vpop.f32.mrb[77].mxu0  ;;  %10347 = vmatprep.subr.bf16.mxu1 %v10935_v35 }
 0x669   :  { %v11089_v11 = vpop.eup %11088  ;;  %11100 = vpow2.f32 %v9196_v42  ;;  %v9755_v17 = vadd.f32 %v9754_v46, %v9753_v13  ;;  %v9756_v51 = vpop.f32.mrb[78].mxu0  ;;  %10348 = vmatpush3.bf16.msra.mxu1 %v10935_v35 }
 0x66a   :  { %v9647_v15 = vpop.f32.mrb[40].mxu1  ;;  %v11091_v33 = vpop.eup %11090  ;;  %v2875_v40 = vadd.f32 1.0, %v11089_v11 }
 0x66b   :  { %v9757_v1 = vpop.f32.mrb[79].mxu0  ;;  %v9648_v19 = vpop.f32.mrb[41].mxu1  ;;  %v2687_v28 = vadd.f32 %v9755_v17, %v9643_v45  ;;  %2982 = vperm.xlu1 %10802, %v11091_v33  }
 0x66c   :  { %v11093_v49 = vpop.eup %11092  ;;  %v9758_v7 = vadd.f32 %v9757_v1, %v9756_v51  ;;  %v9649_v36 = vadd.f32 %v9648_v19, %v9647_v15  ;;  %v9650_v57 = vpop.f32.mrb[42].mxu1  ;;  %11102 = vrcp.f32 %v2875_v40 }
 0x66d   :  { %v2876_v55 = vadd.f32 1.0, %v11093_v49  ;;  %v9651_v63 = vpop.f32.mrb[43].mxu1  ;;  %v9197_v59 = vmul.f32 -1.442695, %v2687_v28 }
 0x66e   :  { %v2690_v24 = vadd.f32 %v9758_v7, %v9646_v56  ;;  %v9652_v9 = vadd.f32 %v9651_v63, %v9650_v57  ;;  %v11095_v21 = vpop.eup %11094 }
 0x66f   :  { %11104 = vpow2.f32 %v9197_v59  ;;  %v9759_v13 = vpop.f32.mrb[80].mxu0  ;;  %2987 = vperm.xlu1 %10802, %v11095_v21  }
 0x670   :  { %v9198_v42 = vmul.f32 -1.442695, %v2690_v24  ;;  %11106 = vrcp.f32 %v2876_v55  ;;  %v9760_v45 = vpop.f32.mrb[81].mxu0 }
 0x671   :  { %v11097_v46 = vpop.eup %11096  ;;  %v9761_v11 = vadd.f32 %v9760_v45, %v9759_v13  ;;  %v9762_v17 = vpop.f32.mrb[82].mxu0 }
 0x672   :  { %11108 = vpow2.f32 %v9198_v42  ;;  %v9653_v51 = vpop.f32.mrb[44].mxu1  ;;  %v11099_v56 = vpop.eup %11098  ;;  %v2877_v15 = vadd.f32 1.0, %v11097_v46 }
 0x673   :  { %v9763_v33 = vpop.f32.mrb[83].mxu0  ;;  %v9654_v40 = vpop.f32.mrb[45].mxu1  ;;  %v2695_v19 = vadd.f32 %v9761_v11, %v9649_v36  ;;  %2992 = vperm.xlu1 %10802, %v11099_v56  }
 0x674   :  { %v11101_v1 = vpop.eup %11100  ;;  %v9764_v49 = vadd.f32 %v9763_v33, %v9762_v17  ;;  %v9655_v28 = vadd.f32 %v9654_v40, %v9653_v51  ;;  %v9656_v7 = vpop.f32.mrb[46].mxu1  ;;  %11110 = vrcp.f32 %v2877_v15 }
 0x675   :  { %v2878_v57 = vadd.f32 1.0, %v11101_v1  ;;  %v9657_v55 = vpop.f32.mrb[47].mxu1  ;;  %v9199_v63 = vmul.f32 -1.442695, %v2695_v19 }
 0x676   :  { %v2698_v59 = vadd.f32 %v9764_v49, %v9652_v9  ;;  %v9658_v24 = vadd.f32 %v9657_v55, %v9656_v7  ;;  %v11103_v35 = vpop.eup %11102 }
 0x677   :  { %11112 = vrcp.f32 %v2878_v57  ;;  %v9765_v42 = vpop.f32.mrb[84].mxu0  ;;  %2997 = vperm.xlu1 %10802, %v11103_v35  }
 0x678   :  { %11114 = vpow2.f32 %v9199_v63  ;;  %v9200_v21 = vmul.f32 -1.442695, %v2698_v59  ;;  %v9766_v13 = vpop.f32.mrb[85].mxu0 }
 0x679   :  { %v11105_v45 = vpop.eup %11104  ;;  %v9767_v36 = vadd.f32 %v9766_v13, %v9765_v42  ;;  %v9768_v46 = vpop.f32.mrb[86].mxu0 }
 0x67a   :  { %11116 = vpow2.f32 %v9200_v21  ;;  %v9659_v11 = vpop.f32.mrb[48].mxu1  ;;  %v11107_v17 = vpop.eup %11106  ;;  %v2879_v51 = vadd.f32 1.0, %v11105_v45 }
 0x67b   :  { %v9769_v56 = vpop.f32.mrb[87].mxu0  ;;  %v9660_v15 = vpop.f32.mrb[49].mxu1  ;;  %v2703_v40 = vadd.f32 %v9767_v36, %v9655_v28  ;;  %3002 = vperm.xlu1 %10802, %v11107_v17  }
 0x67c   :  { %v11109_v33 = vpop.eup %11108  ;;  %v9770_v9 = vadd.f32 %v9769_v56, %v9768_v46  ;;  %v9661_v1 = vadd.f32 %v9660_v15, %v9659_v11  ;;  %v9662_v19 = vpop.f32.mrb[50].mxu1  ;;  %11118 = vrcp.f32 %v2879_v51 }
 0x67d   :  { %v2880_v49 = vadd.f32 1.0, %v11109_v33  ;;  %v9663_v7 = vpop.f32.mrb[51].mxu1  ;;  %v9201_v57 = vmul.f32 -1.442695, %v2703_v40 }
 0x67e   :  { %v2706_v55 = vadd.f32 %v9770_v9, %v9658_v24  ;;  %v9664_v63 = vadd.f32 %v9663_v7, %v9662_v19  ;;  %v11111_v59 = vpop.eup %11110 }
 0x67f   :  { %11120 = vrcp.f32 %v2880_v49  ;;  %v9771_v21 = vpop.f32.mrb[88].mxu0  ;;  %3007 = vperm.xlu1 %10802, %v11111_v59  }
 0x680   :  { %11122 = vpow2.f32 %v9201_v57  ;;  %v9202_v35 = vmul.f32 -1.442695, %v2706_v55  ;;  %v9772_v13 = vpop.f32.mrb[89].mxu0 }
 0x681   :  { %v11113_v42 = vpop.eup %11112  ;;  %v9773_v28 = vadd.f32 %v9772_v13, %v9771_v21  ;;  %v9774_v36 = vpop.f32.mrb[90].mxu0 }
 0x682   :  { %v11115_v45 = vpop.eup %11114  ;;  %11124 = vpow2.f32 %v9202_v35  ;;  %3012 = vperm.xlu0 %10801, %v11113_v42   ;;  %v9665_v46 = vpop.f32.mrb[52].mxu1 }
 0x683   :  { %v2881_v11 = vadd.f32 1.0, %v11115_v45  ;;  %v9775_v17 = vpop.f32.mrb[91].mxu0  ;;  %v9666_v51 = vpop.f32.mrb[53].mxu1  ;;  %v2711_v24 = vadd.f32 %v9773_v28, %v9661_v1 }
 0x684   :  { %v11117_v56 = vpop.eup %11116  ;;  %v9776_v15 = vadd.f32 %v9775_v17, %v9774_v36  ;;  %v9667_v33 = vadd.f32 %v9666_v51, %v9665_v46  ;;  %v9668_v40 = vpop.f32.mrb[54].mxu1 }
 0x685   :  { %11126 = vrcp.f32 %v2881_v11  ;;  %v2882_v9 = vadd.f32 1.0, %v11117_v56  ;;  %v9669_v19 = vpop.f32.mrb[55].mxu1  ;;  %v9203_v49 = vmul.f32 -1.442695, %v2711_v24 }
 0x686   :  { %v2714_v7 = vadd.f32 %v9776_v15, %v9664_v63  ;;  %v9670_v57 = vadd.f32 %v9669_v19, %v9668_v40  ;;  %v11119_v55 = vpop.eup %11118 }
 0x687   :  { %11128 = vrcp.f32 %v2882_v9  ;;  %v9777_v35 = vpop.f32.mrb[92].mxu0  ;;  %3017 = vperm.xlu1 %10802, %v11119_v55  }
 0x688   :  { %11130 = vpow2.f32 %v9203_v49  ;;  %v9204_v59 = vmul.f32 -1.442695, %v2714_v7  ;;  %v9778_v42 = vpop.f32.mrb[93].mxu0 }
 0x689   :  { %v11121_v21 = vpop.eup %11120  ;;  %v9779_v1 = vadd.f32 %v9778_v42, %v9777_v35  ;;  %v9780_v45 = vpop.f32.mrb[94].mxu0 }
 0x68a   :  { %v11123_v13 = vpop.eup %11122  ;;  %11132 = vpow2.f32 %v9204_v59  ;;  %3022 = vperm.xlu0 %10801, %v11121_v21   ;;  %v9671_v28 = vpop.f32.mrb[56].mxu1 }
 0x68b   :  { %v2883_v36 = vadd.f32 1.0, %v11123_v13  ;;  %v9781_v46 = vpop.f32.mrb[95].mxu0  ;;  %v9672_v11 = vpop.f32.mrb[57].mxu1  ;;  %v2719_v63 = vadd.f32 %v9779_v1, %v9667_v33 }
 0x68c   :  { %v11125_v17 = vpop.eup %11124  ;;  %v9782_v51 = vadd.f32 %v9781_v46, %v9780_v45  ;;  %v9673_v56 = vadd.f32 %v9672_v11, %v9671_v28  ;;  %v9674_v24 = vpop.f32.mrb[58].mxu1 }
 0x68d   :  { %11134 = vrcp.f32 %v2883_v36  ;;  %v2884_v15 = vadd.f32 1.0, %v11125_v17  ;;  %v9675_v40 = vpop.f32.mrb[59].mxu1  ;;  %v9205_v9 = vmul.f32 -1.442695, %v2719_v63 }
 0x68e   :  { %v2722_v19 = vadd.f32 %v9782_v51, %v9670_v57  ;;  %v9676_v49 = vadd.f32 %v9675_v40, %v9674_v24 }
 0x68f   :  { %v11127_v7 = vpop.eup %11126  ;;  %11136 = vrcp.f32 %v2884_v15  ;;  %v9783_v59 = vpop.f32.mrb[96].mxu0 }
 0x690   :  { %11138 = vpow2.f32 %v9205_v9  ;;  %v9206_v55 = vmul.f32 -1.442695, %v2722_v19  ;;  %3027 = vperm.xlu1 %10802, %v11127_v7   ;;  %v9784_v21 = vpop.f32.mrb[97].mxu0 }
 0x691   :  { %v11129_v35 = vpop.eup %11128  ;;  %v9785_v33 = vadd.f32 %v9784_v21, %v9783_v59  ;;  %v9786_v13 = vpop.f32.mrb[98].mxu0 }
 0x692   :  { %v11131_v42 = vpop.eup %11130  ;;  %11140 = vpow2.f32 %v9206_v55  ;;  %3032 = vperm.xlu0 %10801, %v11129_v35   ;;  %v9677_v1 = vpop.f32.mrb[60].mxu1 }
 0x693   :  { %v2885_v45 = vadd.f32 1.0, %v11131_v42  ;;  %v9787_v28 = vpop.f32.mrb[99].mxu0  ;;  %v9678_v36 = vpop.f32.mrb[61].mxu1  ;;  %v2727_v57 = vadd.f32 %v9785_v33, %v9673_v56 }
 0x694   :  { %v11133_v46 = vpop.eup %11132  ;;  %v9788_v11 = vadd.f32 %v9787_v28, %v9786_v13  ;;  %v9679_v17 = vadd.f32 %v9678_v36, %v9677_v1  ;;  %v9680_v63 = vpop.f32.mrb[62].mxu1 }
 0x695   :  { %11142 = vrcp.f32 %v2885_v45  ;;  %v2886_v51 = vadd.f32 1.0, %v11133_v46  ;;  %v9681_v24 = vpop.f32.mrb[63].mxu1  ;;  %v9207_v15 = vmul.f32 -1.442695, %v2727_v57 }
 0x696   :  { %v2730_v40 = vadd.f32 %v9788_v11, %v9676_v49  ;;  %v9682_v9 = vadd.f32 %v9681_v24, %v9680_v63 }
 0x697   :  { %v11135_v19 = vpop.eup %11134  ;;  %11144 = vrcp.f32 %v2886_v51  ;;  %v9789_v55 = vpop.f32.mrb[100].mxu0 }
 0x698   :  { %11146 = vpow2.f32 %v9207_v15  ;;  %v9208_v7 = vmul.f32 -1.442695, %v2730_v40  ;;  %3037 = vperm.xlu1 %10802, %v11135_v19   ;;  %v9790_v35 = vpop.f32.mrb[101].mxu0 }
 0x699   :  { %v11137_v59 = vpop.eup %11136  ;;  %v9791_v56 = vadd.f32 %v9790_v35, %v9789_v55  ;;  %v9792_v42 = vpop.f32.mrb[102].mxu0 }
 0x69a   :  { %v11139_v21 = vpop.eup %11138  ;;  %11148 = vpow2.f32 %v9208_v7  ;;  %3042 = vperm.xlu0 %10801, %v11137_v59   ;;  %v9683_v33 = vpop.f32.mrb[64].mxu1 }
 0x69b   :  { %v2887_v13 = vadd.f32 1.0, %v11139_v21  ;;  %v9793_v1 = vpop.f32.mrb[103].mxu0  ;;  %v9684_v45 = vpop.f32.mrb[65].mxu1  ;;  %v2735_v49 = vadd.f32 %v9791_v56, %v9679_v17 }
 0x69c   :  { %v11141_v28 = vpop.eup %11140  ;;  %v9794_v36 = vadd.f32 %v9793_v1, %v9792_v42  ;;  %v9685_v46 = vadd.f32 %v9684_v45, %v9683_v33  ;;  %v9686_v57 = vpop.f32.mrb[66].mxu1 }
 0x69d   :  { %11150 = vrcp.f32 %v2887_v13  ;;  %v2888_v11 = vadd.f32 1.0, %v11141_v28  ;;  %v9687_v63 = vpop.f32.mrb[67].mxu1  ;;  %v9209_v51 = vmul.f32 -1.442695, %v2735_v49 }
 0x69e   :  { %v2738_v24 = vadd.f32 %v9794_v36, %v9682_v9  ;;  %v9688_v15 = vadd.f32 %v9687_v63, %v9686_v57 }
 0x69f   :  { %v11143_v40 = vpop.eup %11142  ;;  %11152 = vrcp.f32 %v2888_v11  ;;  %v9795_v7 = vpop.f32.mrb[104].mxu0 }
 0x6a0   :  { %11154 = vpow2.f32 %v9209_v51  ;;  %v9210_v19 = vmul.f32 -1.442695, %v2738_v24  ;;  %3047 = vperm.xlu1 %10802, %v11143_v40   ;;  %v9796_v59 = vpop.f32.mrb[105].mxu0 }
 0x6a1   :  { %v11145_v55 = vpop.eup %11144  ;;  %v9797_v17 = vadd.f32 %v9796_v59, %v9795_v7  ;;  %v9798_v21 = vpop.f32.mrb[106].mxu0 }
 0x6a2   :  { %v11147_v35 = vpop.eup %11146  ;;  %11156 = vpow2.f32 %v9210_v19  ;;  %3052 = vperm.xlu0 %10801, %v11145_v55   ;;  %v9689_v56 = vpop.f32.mrb[68].mxu1 }
 0x6a3   :  { %v2889_v42 = vadd.f32 1.0, %v11147_v35  ;;  %v9799_v33 = vpop.f32.mrb[107].mxu0  ;;  %v9690_v13 = vpop.f32.mrb[69].mxu1  ;;  %v2743_v9 = vadd.f32 %v9797_v17, %v9685_v46 }
 0x6a4   :  { %v11149_v1 = vpop.eup %11148  ;;  %v9800_v45 = vadd.f32 %v9799_v33, %v9798_v21  ;;  %v9691_v28 = vadd.f32 %v9690_v13, %v9689_v56  ;;  %v9692_v49 = vpop.f32.mrb[70].mxu1 }
 0x6a5   :  { %11158 = vrcp.f32 %v2889_v42  ;;  %v2890_v36 = vadd.f32 1.0, %v11149_v1  ;;  %v9693_v57 = vpop.f32.mrb[71].mxu1  ;;  %v9211_v11 = vmul.f32 -1.442695, %v2743_v9 }
 0x6a6   :  { %v2746_v63 = vadd.f32 %v9800_v45, %v9688_v15  ;;  %v9694_v51 = vadd.f32 %v9693_v57, %v9692_v49 }
 0x6a7   :  { %v11151_v24 = vpop.eup %11150  ;;  %11160 = vrcp.f32 %v2890_v36  ;;  %v9801_v19 = vpop.f32.mrb[108].mxu0 }
 0x6a8   :  { %11162 = vpow2.f32 %v9211_v11  ;;  %v9212_v40 = vmul.f32 -1.442695, %v2746_v63  ;;  %3057 = vperm.xlu1 %10802, %v11151_v24   ;;  %v9802_v55 = vpop.f32.mrb[109].mxu0 }
 0x6a9   :  { %v11153_v7 = vpop.eup %11152  ;;  %v9803_v46 = vadd.f32 %v9802_v55, %v9801_v19  ;;  %v9804_v35 = vpop.f32.mrb[110].mxu0 }
 0x6aa   :  { %v11155_v59 = vpop.eup %11154  ;;  %11164 = vpow2.f32 %v9212_v40  ;;  %3062 = vperm.xlu0 %10801, %v11153_v7   ;;  %v9695_v17 = vpop.f32.mrb[72].mxu1 }
 0x6ab   :  { %v2891_v21 = vadd.f32 1.0, %v11155_v59  ;;  %v9805_v56 = vpop.f32.mrb[111].mxu0  ;;  %v9696_v42 = vpop.f32.mrb[73].mxu1  ;;  %v2751_v15 = vadd.f32 %v9803_v46, %v9691_v28 }
 0x6ac   :  { %v11157_v33 = vpop.eup %11156  ;;  %v9806_v13 = vadd.f32 %v9805_v56, %v9804_v35  ;;  %v9697_v1 = vadd.f32 %v9696_v42, %v9695_v17  ;;  %v9698_v9 = vpop.f32.mrb[74].mxu1 }
 0x6ad   :  { %11166 = vrcp.f32 %v2891_v21  ;;  %v2892_v45 = vadd.f32 1.0, %v11157_v33  ;;  %v9699_v49 = vpop.f32.mrb[75].mxu1  ;;  %v9213_v36 = vmul.f32 -1.442695, %v2751_v15 }
 0x6ae   :  { %v2754_v57 = vadd.f32 %v9806_v13, %v9694_v51  ;;  %v9700_v11 = vadd.f32 %v9699_v49, %v9698_v9 }
 0x6af   :  { %v11159_v63 = vpop.eup %11158  ;;  %11168 = vrcp.f32 %v2892_v45  ;;  %v9807_v40 = vpop.f32.mrb[112].mxu0 }
 0x6b0   :  { %11170 = vpow2.f32 %v9213_v36  ;;  %v9214_v24 = vmul.f32 -1.442695, %v2754_v57  ;;  %3067 = vperm.xlu1 %10802, %v11159_v63   ;;  %v9808_v7 = vpop.f32.mrb[113].mxu0 }
 0x6b1   :  { %v11161_v19 = vpop.eup %11160  ;;  %v9809_v28 = vadd.f32 %v9808_v7, %v9807_v40  ;;  %v9810_v59 = vpop.f32.mrb[114].mxu0 }
 0x6b2   :  { %v11163_v55 = vpop.eup %11162  ;;  %11172 = vpow2.f32 %v9214_v24  ;;  %3072 = vperm.xlu0 %10801, %v11161_v19   ;;  %v9701_v46 = vpop.f32.mrb[76].mxu1 }
 0x6b3   :  { %v2893_v35 = vadd.f32 1.0, %v11163_v55  ;;  %v9811_v17 = vpop.f32.mrb[115].mxu0  ;;  %v9702_v21 = vpop.f32.mrb[77].mxu1  ;;  %v2759_v51 = vadd.f32 %v9809_v28, %v9697_v1 }
 0x6b4   :  { %v11165_v56 = vpop.eup %11164  ;;  %v9812_v42 = vadd.f32 %v9811_v17, %v9810_v59  ;;  %v9703_v33 = vadd.f32 %v9702_v21, %v9701_v46  ;;  %v9704_v15 = vpop.f32.mrb[78].mxu1 }
 0x6b5   :  { %11174 = vrcp.f32 %v2893_v35  ;;  %v2894_v13 = vadd.f32 1.0, %v11165_v56  ;;  %v9705_v9 = vpop.f32.mrb[79].mxu1  ;;  %v9215_v45 = vmul.f32 -1.442695, %v2759_v51 }
 0x6b6   :  { %v2762_v49 = vadd.f32 %v9812_v42, %v9700_v11  ;;  %v9706_v36 = vadd.f32 %v9705_v9, %v9704_v15 }
 0x6b7   :  { %v11167_v57 = vpop.eup %11166  ;;  %11176 = vrcp.f32 %v2894_v13  ;;  %v9813_v24 = vpop.f32.mrb[116].mxu0 }
 0x6b8   :  { %11178 = vpow2.f32 %v9215_v45  ;;  %v9216_v63 = vmul.f32 -1.442695, %v2762_v49  ;;  %3077 = vperm.xlu1 %10802, %v11167_v57   ;;  %v9814_v19 = vpop.f32.mrb[117].mxu0 }
 0x6b9   :  { %v11169_v40 = vpop.eup %11168  ;;  %v9815_v1 = vadd.f32 %v9814_v19, %v9813_v24  ;;  %v9816_v55 = vpop.f32.mrb[118].mxu0 }
 0x6ba   :  { %v11171_v7 = vpop.eup %11170  ;;  %11180 = vpow2.f32 %v9216_v63  ;;  %3082 = vperm.xlu0 %10801, %v11169_v40   ;;  %v9817_v59 = vpop.f32.mrb[119].mxu0 }
 0x6bb   :  { %v2895_v28 = vadd.f32 1.0, %v11171_v7  ;;  %v2767_v35 = vadd.f32 %v9815_v1, %v9703_v33  ;;  %v9818_v17 = vadd.f32 %v9817_v59, %v9816_v55 }
 0x6bc   :  { %v11173_v46 = vpop.eup %11172 }
 0x6bd   :  { %11182 = vrcp.f32 %v2895_v28  ;;  %v2896_v11 = vadd.f32 1.0, %v11173_v46  ;;  %v9217_v21 = vmul.f32 -1.442695, %v2767_v35  ;;  %v2770_v56 = vadd.f32 %v9818_v17, %v9706_v36  ;;  %v10936_v28 = vld [vmem:[%s15559_s10] sm:$0xff]  }
 0x6be   :  { %10381 = vmatprep.subr.bf16.mxu1 %v10936_v28 }
 0x6bf   :  { %v11175_v51 = vpop.eup %11174  ;;  %11184 = vrcp.f32 %v2896_v11  ;;  %v9218_v42 = vmul.f32 -1.442695, %v2770_v56 }
 0x6c0   :  { %11186 = vpow2.f32 %v9217_v21  ;;  %3087 = vperm.xlu1 %10802, %v11175_v51  }
 0x6c1   :  { %v11177_v15 = vpop.eup %11176  ;;  %11188 = vpow2.f32 %v9218_v42 }
 0x6c2   :  { %v11179_v13 = vpop.eup %11178  ;;  %3092 = vperm.xlu0 %10801, %v11177_v15  }
 0x6c3   :  { %v2897_v9 = vadd.f32 1.0, %v11179_v13 }
 0x6c4   :  { %v11181_v45 = vpop.eup %11180 }
 0x6c5   :  { %11190 = vrcp.f32 %v2897_v9  ;;  %v2898_v49 = vadd.f32 1.0, %v11181_v45  ;;  %v15742_v45 = vmov 0  }
 0x6c7   :  { %v11183_v57 = vpop.eup %11182  ;;  %11192 = vrcp.f32 %v2898_v49 }
 0x6c8   :  { %3097 = vperm.xlu1 %10802, %v11183_v57  }
 0x6c9   :  { %v11185_v33 = vpop.eup %11184 }
 0x6ca   :  { %v11187_v63 = vpop.eup %11186  ;;  %3102 = vperm.xlu0 %10801, %v11185_v33  }
 0x6cb   :  { %v2899_v36 = vadd.f32 1.0, %v11187_v63  ;;  %v11189_v24 = vpop.eup %11188 }
 0x6cc   :  { %v2900_v40 = vadd.f32 1.0, %v11189_v24 }
 0x6cd   :  { %11194 = vrcp.f32 %v2899_v36 }
 0x6ce   :  { %11196 = vrcp.f32 %v2900_v40 }
 0x6cf   :  { %v11191_v19 = vpop.eup %11190 }
 0x6d0   :  { %3107 = vperm.xlu1 %10802, %v11191_v19  }
 0x6d1   :  { %v11193_v7 = vpop.eup %11192 }
 0x6d2   :  { %3112 = vperm.xlu0 %10801, %v11193_v7  }
 0x6d7   :  { %v11195_v1 = vpop.eup %11194 }
 0x6d8   :  { %3117 = vperm.xlu1 %10802, %v11195_v1   ;;  %v11197_v55 = vpop.eup %11196 }
 0x6d9   :  { %3122 = vperm.xlu0 %10801, %v11197_v55  }
 0x6de   :  { %v2968_v59 = vpop.permute.xlu0 %2967 }
 0x6df   :  { %v3125_v46 = vmul.f32 %v2968_v59, %v12724_v34 }
 0x6e0   :  { %v2973_v35 = vpop.permute.xlu1 %2972 }
 0x6e1   :  { %3157 = vst.msk [vmem:[#allocation2] sm:$0xff] %vm699_vm2, %v3125_v46  ;;  %v3126_v17 = vmul.f32 %v2973_v35, %v12736_v48  ;;  %v10937_v48 = vld [vmem:[%s15559_s10 + $0x8] sm:$0xff]  }
 0x6e3   :  { %3158 = vst.msk [vmem:[#allocation2 + $0x8] sm:$0xff] %vm699_vm2, %v3126_v17  ;;  %v13182_v11 = vpack.c.bf16 %v3126_v17, %v3125_v46 }
 0x6e5   :  { %10349 = vmatprep.mubr.msk.bf16.mxu1 %vm699_vm2, %v13182_v11 }
 0x6e6   :  { %v2978_v21 = vpop.permute.xlu1 %2977 }
 0x6e7   :  { %v3127_v56 = vmul.f32 %v2978_v21, %v12764_v6 }
 0x6e9   :  { %3159 = vst.msk [vmem:[#allocation2 + $0x10] sm:$0xff] %vm699_vm2, %v3127_v56 }
 0x6ea   :  { %v2983_v51 = vpop.permute.xlu1 %2982 }
 0x6eb   :  { %v3128_v34 = vmul.f32 %v2983_v51, %v12768_v0 }
 0x6ed   :  { %3160 = vst.msk [vmem:[#allocation2 + $0x18] sm:$0xff] %vm699_vm2, %v3128_v34  ;;  %v13190_v42 = vpack.c.bf16 %v3128_v34, %v3127_v56 }
 0x6ee   :  { %v2988_v15 = vpop.permute.xlu1 %2987 }
 0x6ef   :  { %v3129_v13 = vmul.f32 %v2988_v15, %v12796_v27  ;;  %10350 = vmatmul.mubr.msk.bf16.vlgmr.msra.gmra.mrb[80].mxu1 %vm699_vm2, %v13190_v42 }
 0x6f0   :  { %10382 = vmatpush3.bf16.msra.mxu1 %v10936_v28 }
 0x6f1   :  { %3161 = vst.msk [vmem:[#allocation2 + $0x20] sm:$0xff] %vm699_vm2, %v3129_v13  ;;  %10383 = vmatprep.subr.bf16.mxu1 %v10937_v48 }
 0x6f2   :  { %v2993_v6 = vpop.permute.xlu1 %2992 }
 0x6f3   :  { %v3130_v0 = vmul.f32 %v2993_v6, %v12800_v53 }
 0x6f4   :  { %10384 = vmatpush3.bf16.msra.mxu1 %v10937_v48 }
 0x6f5   :  { %3162 = vst.msk [vmem:[#allocation2 + $0x28] sm:$0xff] %vm699_vm2, %v3130_v0  ;;  %v13201_v9 = vpack.c.bf16 %v3130_v0, %v3129_v13  ;;  %3828 = vmatprep.subr.bf16.mxu1 %v15742_v45 }
 0x6f6   :  { %v2998_v49 = vpop.permute.xlu1 %2997 }
 0x6f7   :  { %v3131_v27 = vmul.f32 %v2998_v49, %v12828_v43  ;;  %10353 = vmatprep.mubr.msk.bf16.mxu1 %vm699_vm2, %v13201_v9 }
 0x6f9   :  { %3163 = vst.msk [vmem:[#allocation2 + $0x30] sm:$0xff] %vm699_vm2, %v3131_v27 }
 0x6fa   :  { %v3003_v57 = vpop.permute.xlu1 %3002 }
 0x6fb   :  { %v3132_v33 = vmul.f32 %v3003_v57, %v12832_v5 }
 0x6fd   :  { %3164 = vst.msk [vmem:[#allocation2 + $0x38] sm:$0xff] %vm699_vm2, %v3132_v33  ;;  %v13210_v53 = vpack.c.bf16 %v3132_v33, %v3131_v27 }
 0x6fe   :  { %v3008_v63 = vpop.permute.xlu1 %3007 }
 0x6ff   :  { %v3133_v36 = vmul.f32 %v3008_v63, %v12860_v26  ;;  %10354 = vmatmul.mubr.msk.bf16.gmra.mrb[84].mxu1 %vm699_vm2, %v13210_v53 }
 0x701   :  { %v3013_v24 = vpop.permute.xlu0 %3012  ;;  %3165 = vst.msk [vmem:[#allocation2 + $0x40] sm:$0xff] %vm699_vm2, %v3133_v36 }
 0x702   :  { %v3134_v43 = vmul.f32 %v3013_v24, %v12864_v31 }
 0x704   :  { %3166 = vst.msk [vmem:[#allocation2 + $0x48] sm:$0xff] %vm699_vm2, %v3134_v43  ;;  %v13218_v40 = vpack.c.bf16 %v3134_v43, %v3133_v36 }
 0x706   :  { %10357 = vmatprep.mubr.msk.bf16.mxu1 %vm699_vm2, %v13218_v40  ;;  %v3018_v5 = vpop.permute.xlu1 %3017 }
 0x707   :  { %v3135_v19 = vmul.f32 %v3018_v5, %v12892_v61 }
 0x709   :  { %v3023_v7 = vpop.permute.xlu0 %3022  ;;  %3167 = vst.msk [vmem:[#allocation2 + $0x50] sm:$0xff] %vm699_vm2, %v3135_v19 }
 0x70a   :  { %v3136_v26 = vmul.f32 %v3023_v7, %v12896_v54 }
 0x70c   :  { %3168 = vst.msk [vmem:[#allocation2 + $0x58] sm:$0xff] %vm699_vm2, %v3136_v26  ;;  %v13226_v1 = vpack.c.bf16 %v3136_v26, %v3135_v19 }
 0x70e   :  { %10358 = vmatmul.mubr.msk.bf16.gmra.mrb[88].mxu1 %vm699_vm2, %v13226_v1 }
 0x70f   :  { %v3028_v31 = vpop.permute.xlu1 %3027 }
 0x710   :  { %v3137_v55 = vmul.f32 %v3028_v31, %v12924_v30 }
 0x711   :  { %v3033_v28 = vpop.permute.xlu0 %3032 }
 0x712   :  { %3169 = vst.msk [vmem:[#allocation2 + $0x60] sm:$0xff] %vm699_vm2, %v3137_v55  ;;  %v3138_v61 = vmul.f32 %v3033_v28, %v12928_v50 }
 0x714   :  { %3170 = vst.msk [vmem:[#allocation2 + $0x68] sm:$0xff] %vm699_vm2, %v3138_v61  ;;  %v13234_v59 = vpack.c.bf16 %v3138_v61, %v3137_v55 }
 0x716   :  { %10361 = vmatprep.mubr.msk.bf16.mxu1 %vm699_vm2, %v13234_v59 }
 0x717   :  { %v3038_v54 = vpop.permute.xlu1 %3037 }
 0x718   :  { %v3139_v46 = vmul.f32 %v3038_v54, %v12956_v3 }
 0x719   :  { %v3043_v35 = vpop.permute.xlu0 %3042 }
 0x71a   :  { %3171 = vst.msk [vmem:[#allocation2 + $0x70] sm:$0xff] %vm699_vm2, %v3139_v46  ;;  %v3140_v30 = vmul.f32 %v3043_v35, %v12960_v38 }
 0x71c   :  { %3172 = vst.msk [vmem:[#allocation2 + $0x78] sm:$0xff] %vm699_vm2, %v3140_v30  ;;  %v13242_v17 = vpack.c.bf16 %v3140_v30, %v3139_v46 }
 0x71e   :  { %10362 = vmatmul.mubr.msk.bf16.gmra.mrb[92].mxu1 %vm699_vm2, %v13242_v17 }
 0x71f   :  { %v3048_v50 = vpop.permute.xlu1 %3047 }
 0x720   :  { %v3141_v21 = vmul.f32 %v3048_v50, %v12720_v23 }
 0x721   :  { %v3053_v56 = vpop.permute.xlu0 %3052 }
 0x722   :  { %3173 = vst.msk [vmem:[#allocation2 + $0x80] sm:$0xff] %vm699_vm2, %v3141_v21  ;;  %v3142_v3 = vmul.f32 %v3053_v56, %v12732_v29 }
 0x724   :  { %3174 = vst.msk [vmem:[#allocation2 + $0x88] sm:$0xff] %vm699_vm2, %v3142_v3  ;;  %v13250_v51 = vpack.c.bf16 %v3142_v3, %v3141_v21 }
 0x726   :  { %10365 = vmatprep.mubr.msk.bf16.mxu1 %vm699_vm2, %v13250_v51 }
 0x727   :  { %v3058_v38 = vpop.permute.xlu1 %3057 }
 0x728   :  { %v3143_v34 = vmul.f32 %v3058_v38, %v12752_v62 }
 0x729   :  { %v3063_v48 = vpop.permute.xlu0 %3062 }
 0x72a   :  { %3175 = vst.msk [vmem:[#allocation2 + $0x90] sm:$0xff] %vm699_vm2, %v3143_v34  ;;  %v3144_v23 = vmul.f32 %v3063_v48, %v12756_v14 }
 0x72c   :  { %3176 = vst.msk [vmem:[#allocation2 + $0x98] sm:$0xff] %vm699_vm2, %v3144_v23  ;;  %v3198_v15 = vpack.c.bf16 %v3144_v23, %v3143_v34 }
 0x72e   :  { %10366 = vmatmul.mubr.msk.bf16.gmra.mrb[96].mxu1 %vm699_vm2, %v3198_v15 }
 0x72f   :  { %v3068_v29 = vpop.permute.xlu1 %3067 }
 0x730   :  { %v3145_v13 = vmul.f32 %v3068_v29, %v12784_v41 }
 0x731   :  { %v3073_v6 = vpop.permute.xlu0 %3072 }
 0x732   :  { %3177 = vst.msk [vmem:[#allocation2 + $0xa0] sm:$0xff] %vm699_vm2, %v3145_v13  ;;  %v3146_v0 = vmul.f32 %v3073_v6, %v12788_v44 }
 0x734   :  { %3178 = vst.msk [vmem:[#allocation2 + $0xa8] sm:$0xff] %vm699_vm2, %v3146_v0  ;;  %v3199_v62 = vpack.c.bf16 %v3146_v0, %v3145_v13 }
 0x736   :  { %10369 = vmatprep.mubr.msk.bf16.mxu1 %vm699_vm2, %v3199_v62 }
 0x737   :  { %v3078_v49 = vpop.permute.xlu1 %3077 }
 0x738   :  { %v3147_v14 = vmul.f32 %v3078_v49, %v12816_v12 }
 0x739   :  { %v3083_v27 = vpop.permute.xlu0 %3082 }
 0x73a   :  { %3179 = vst.msk [vmem:[#allocation2 + $0xb0] sm:$0xff] %vm699_vm2, %v3147_v14  ;;  %v3148_v57 = vmul.f32 %v3083_v27, %v12820_v60 }
 0x73c   :  { %3180 = vst.msk [vmem:[#allocation2 + $0xb8] sm:$0xff] %vm699_vm2, %v3148_v57  ;;  %v3200_v41 = vpack.c.bf16 %v3148_v57, %v3147_v14 }
 0x73e   :  { %10370 = vmatmul.mubr.msk.bf16.gmra.mrb[100].mxu1 %vm699_vm2, %v3200_v41 }
 0x73f   :  { %v3088_v33 = vpop.permute.xlu1 %3087 }
 0x740   :  { %v3149_v44 = vmul.f32 %v3088_v33, %v12848_v47 }
 0x741   :  { %v3093_v63 = vpop.permute.xlu0 %3092 }
 0x742   :  { %3181 = vst.msk [vmem:[#allocation2 + $0xc0] sm:$0xff] %vm699_vm2, %v3149_v44  ;;  %v3150_v36 = vmul.f32 %v3093_v63, %v12852_v22 }
 0x744   :  { %3182 = vst.msk [vmem:[#allocation2 + $0xc8] sm:$0xff] %vm699_vm2, %v3150_v36  ;;  %v3201_v12 = vpack.c.bf16 %v3150_v36, %v3149_v44 }
 0x746   :  { %10373 = vmatprep.mubr.msk.bf16.mxu1 %vm699_vm2, %v3201_v12 }
 0x747   :  { %v3098_v24 = vpop.permute.xlu1 %3097 }
 0x748   :  { %v3151_v60 = vmul.f32 %v3098_v24, %v12880_v58  ;;  %v10940_v24 = vld [vmem:[%s15565_s16 + $0x4] ss:$8 sps:$4 sm:$0xff]  }
 0x749   :  { %v3103_v43 = vpop.permute.xlu0 %3102  ;;  %9265 = vmatprep.mubr.msk.bf16.mxu0 %vm3702_vm5, %v10940_v24 }
 0x74a   :  { %3183 = vst.msk [vmem:[#allocation2 + $0xd0] sm:$0xff] %vm699_vm2, %v3151_v60  ;;  %v3152_v5 = vmul.f32 %v3103_v43, %v12884_v39 }
 0x74c   :  { %3184 = vst.msk [vmem:[#allocation2 + $0xd8] sm:$0xff] %vm699_vm2, %v3152_v5  ;;  %v3202_v47 = vpack.c.bf16 %v3152_v5, %v3151_v60  ;;  %v10943_v60 = vld [vmem:[%s15565_s16 + $0x44] ss:$8 sps:$4 sm:$0xff]  }
 0x74e   :  { %10374 = vmatmul.mubr.msk.bf16.gmra.mrb[104].mxu1 %vm699_vm2, %v3202_v47 }
 0x74f   :  { %v3108_v19 = vpop.permute.xlu1 %3107 }
 0x750   :  { %v3153_v22 = vmul.f32 %v3108_v19, %v12912_v25 }
 0x751   :  { %v3113_v7 = vpop.permute.xlu0 %3112 }
 0x752   :  { %3185 = vst.msk [vmem:[#allocation2 + $0xe0] sm:$0xff] %vm699_vm2, %v3153_v22  ;;  %v3154_v26 = vmul.f32 %v3113_v7, %v12916_v32 }
 0x754   :  { %3186 = vst.msk [vmem:[#allocation2 + $0xe8] sm:$0xff] %vm699_vm2, %v3154_v26  ;;  %v3203_v58 = vpack.c.bf16 %v3154_v26, %v3153_v22 }
 0x756   :  { %10377 = vmatprep.mubr.msk.bf16.mxu1 %vm699_vm2, %v3203_v58 }
 0x757   :  { %v3118_v31 = vpop.permute.xlu1 %3117 }
 0x758   :  { %v3155_v39 = vmul.f32 %v3118_v31, %v12944_v8  ;;  %v3123_v55 = vpop.permute.xlu0 %3122  ;;  %v13317_v8 = vld [vmem:[%s15558_s9] ss:$0 sm:$0xff] }
 0x759   :  { %v3156_v28 = vmul.f32 %v3123_v55, %v12948_v37 }
 0x75a   :  { %3187 = vst.msk [vmem:[#allocation2 + $0xf0] sm:$0xff] %vm699_vm2, %v3155_v39 }
 0x75b   :  { %3188 = vst.msk [vmem:[#allocation2 + $0xf8] sm:$0xff] %vm699_vm2, %v3156_v28  ;;  %v3204_v25 = vpack.c.bf16 %v3156_v28, %v3155_v39 }
 0x75d   :  { %10378 = vmatmul.mubr.msk.bf16.gmra.mrb[108].mxu1 %vm699_vm2, %v3204_v25 }
 0x75e   :  { %10385 = vmatprep.mubr.msk.bf16.mxu1 %vm699_vm2, %v13182_v11 }
 0x765   :  { %10386 = vmatmul.mubr.msk.bf16.vlgmr.msra.gmra.mrb[112].mxu1 %vm699_vm2, %v13190_v42 }
 0x766   :  { %10389 = vmatprep.mubr.msk.bf16.mxu1 %vm699_vm2, %v13201_v9 }
 0x76d   :  { %10390 = vmatmul.mubr.msk.bf16.gmra.mrb[116].mxu1 %vm699_vm2, %v13210_v53 }
 0x76e   :  { %10393 = vmatprep.mubr.msk.bf16.mxu1 %vm699_vm2, %v13218_v40 }
 0x775   :  { %10394 = vmatmul.mubr.msk.bf16.gmra.mrb[120].mxu1 %vm699_vm2, %v13226_v1 }
 0x776   :  { %10397 = vmatprep.mubr.msk.bf16.mxu1 %vm699_vm2, %v13234_v59 }
 0x77d   :  { %10398 = vmatmul.mubr.msk.bf16.gmra.mrb[124].mxu1 %vm699_vm2, %v13242_v17 }
 0x77e   :  { %10401 = vmatprep.mubr.msk.bf16.mxu1 %vm699_vm2, %v13250_v51 }
 0x785   :  { %10402 = vmatmul.mubr.msk.bf16.gmra.mrb[128].mxu1 %vm699_vm2, %v3198_v15 }
 0x786   :  { %10405 = vmatprep.mubr.msk.bf16.mxu1 %vm699_vm2, %v3199_v62 }
 0x78d   :  { %10406 = vmatmul.mubr.msk.bf16.gmra.mrb[132].mxu1 %vm699_vm2, %v3200_v41 }
 0x78e   :  { %10409 = vmatprep.mubr.msk.bf16.mxu1 %vm699_vm2, %v3201_v12 }
 0x795   :  { %10410 = vmatmul.mubr.msk.bf16.gmra.mrb[136].mxu1 %vm699_vm2, %v3202_v47 }
 0x796   :  { %10413 = vmatprep.mubr.msk.bf16.mxu1 %vm699_vm2, %v3203_v58 }
 0x79d   :  { %10414 = vmatmul.mubr.msk.bf16.gmra.mrb[140].mxu1 %vm699_vm2, %v3204_v25 }
 0x79e   :  { %9277 = vmatprep.mubr.msk.bf16.mxu1 %vm3702_vm5, %v10943_v60 }
 0x7c2   :  { %v10351_v32 = vpop.f32.mrb[80].mxu1 }
 0x7c3   :  { %v3310_v37 = vpop.f32.mrb[81].mxu1  ;;  %v13320_v42 = vadd.f32 %v10351_v32, %v13317_v8 }
 0x7c4   :  { %v10352_v11 = vpop.f32.mrb[82].mxu1  ;;  %v13326_v40 = vadd.f32 %v13317_v8, %v3310_v37 }
 0x7c5   :  { %v13323_v9 = vadd.f32 %v10352_v11, %v13317_v8  ;;  %v3313_v53 = vpop.f32.mrb[83].mxu1 }
 0x7c6   :  { %v13329_v1 = vadd.f32 %v13317_v8, %v3313_v53 }
 0x7c7   :  { %v3906_v61 = vpack.c.bf16 %v13323_v9, %v13320_v42 }
 0x7c8   :  { %v3905_v59 = vpack.c.bf16 %v13329_v1, %v13326_v40 }
 0x7d2   :  { %v10355_v54 = vpop.f32.mrb[84].mxu1 }
 0x7d3   :  { %v3326_v46 = vpop.f32.mrb[85].mxu1  ;;  %v13336_v30 = vadd.f32 %v10355_v54, %v13317_v8 }
 0x7d4   :  { %v10356_v35 = vpop.f32.mrb[86].mxu1  ;;  %v13342_v21 = vadd.f32 %v13317_v8, %v3326_v46 }
 0x7d5   :  { %v13339_v17 = vadd.f32 %v10356_v35, %v13317_v8  ;;  %v3329_v50 = vpop.f32.mrb[87].mxu1 }
 0x7d6   :  { %v13345_v56 = vadd.f32 %v13317_v8, %v3329_v50 }
 0x7d8   :  { %v3907_v51 = vpack.c.bf16 %v13345_v56, %v13342_v21 }
 0x7e1   :  { %v10359_v38 = vpop.f32.mrb[88].mxu1 }
 0x7e2   :  { %v3342_v34 = vpop.f32.mrb[89].mxu1  ;;  %v13352_v23 = vadd.f32 %v10359_v38, %v13317_v8 }
 0x7e3   :  { %v10360_v48 = vpop.f32.mrb[90].mxu1  ;;  %v13358_v13 = vadd.f32 %v13317_v8, %v3342_v34 }
 0x7e4   :  { %v13355_v15 = vadd.f32 %v10360_v48, %v13317_v8  ;;  %v3345_v29 = vpop.f32.mrb[91].mxu1 }
 0x7e5   :  { %v13361_v6 = vadd.f32 %v13317_v8, %v3345_v29 }
 0x7e6   :  { %v15745_v42 = vpack.c.bf16 %v13355_v15, %v13352_v23 }
 0x7f1   :  { %v10363_v49 = vpop.f32.mrb[92].mxu1 }
 0x7f2   :  { %v3358_v14 = vpop.f32.mrb[93].mxu1  ;;  %v13368_v57 = vadd.f32 %v10363_v49, %v13317_v8 }
 0x7f3   :  { %v10364_v27 = vpop.f32.mrb[94].mxu1  ;;  %v13374_v44 = vadd.f32 %v13317_v8, %v3358_v14 }
 0x7f4   :  { %v13371_v41 = vadd.f32 %v10364_v27, %v13317_v8  ;;  %v3361_v33 = vpop.f32.mrb[95].mxu1 }
 0x7f5   :  { %v13377_v63 = vadd.f32 %v13317_v8, %v3361_v33 }
 0x7f7   :  { %v15746_v9 = vpack.c.bf16 %v13377_v63, %v13374_v44  ;;  %v13646_v63 = vmax.f32 %v12250_v10, 0.0 }
 0x801   :  { %v10367_v43 = vpop.f32.mrb[96].mxu1 }
 0x802   :  { %v3374_v5 = vpop.f32.mrb[97].mxu1  ;;  %v13392_v19 = vadd.f32 %v10367_v43, %v13317_v8 }
 0x803   :  { %v10368_v47 = vpop.f32.mrb[98].mxu1  ;;  %v13398_v26 = vadd.f32 %v13317_v8, %v3374_v5 }
 0x804   :  { %v13395_v22 = vadd.f32 %v10368_v47, %v13317_v8  ;;  %v3377_v7 = vpop.f32.mrb[99].mxu1 }
 0x805   :  { %v13401_v58 = vadd.f32 %v13317_v8, %v3377_v7 }
 0x811   :  { %v10371_v55 = vpop.f32.mrb[100].mxu1 }
 0x812   :  { %v3390_v28 = vpop.f32.mrb[101].mxu1  ;;  %v13408_v32 = vadd.f32 %v10371_v55, %v13317_v8 }
 0x813   :  { %v10372_v25 = vpop.f32.mrb[102].mxu1  ;;  %v13414_v53 = vadd.f32 %v13317_v8, %v3390_v28 }
 0x814   :  { %v13411_v37 = vadd.f32 %v10372_v25, %v13317_v8  ;;  %v3393_v11 = vpop.f32.mrb[103].mxu1 }
 0x815   :  { %v13417_v54 = vadd.f32 %v13317_v8, %v3393_v11 }
 0x816   :  { %v15751_v56 = vpack.c.bf16 %v13411_v37, %v13408_v32  ;;  %v13659_v37 = vmax.f32 %v12259_v20, 0.0  ;;  %v15756_v20 = vld [vmem:[#allocation31_spill] sm:$0xff] }
 0x817   :  { %v15750_v21 = vpack.c.bf16 %v13417_v54, %v13414_v53 }
 0x818   :  { %v4866_v54 = vsel %vm699_vm2, %v13659_v37, 0.0 }
 0x821   :  { %v10375_v50 = vpop.f32.mrb[104].mxu1 }
 0x822   :  { %v3406_v38 = vpop.f32.mrb[105].mxu1  ;;  %v13424_v48 = vadd.f32 %v10375_v50, %v13317_v8 }
 0x823   :  { %v10376_v34 = vpop.f32.mrb[106].mxu1  ;;  %v13430_v14 = vadd.f32 %v13317_v8, %v3406_v38  ;;  %v13458_v38 = vld [vmem:[%s15560_s11] ss:$0 sm:$0xff] }
 0x824   :  { %v13427_v29 = vadd.f32 %v10376_v34, %v13317_v8  ;;  %v3409_v49 = vpop.f32.mrb[107].mxu1 }
 0x825   :  { %v13433_v27 = vadd.f32 %v13317_v8, %v3409_v49 }
 0x826   :  { %v15753_v23 = vpack.c.bf16 %v13427_v29, %v13424_v48  ;;  %v13669_v29 = vmax.f32 %v12265_v2, 0.0  ;;  %v15758_v2 = vld [vmem:[#allocation32_spill] sm:$0xff] }
 0x830   :  { %v10379_v60 = vpop.f32.mrb[108].mxu1 }
 0x831   :  { %v3422_v43 = vpop.f32.mrb[109].mxu1  ;;  %v13440_v47 = vadd.f32 %v10379_v60, %v13317_v8 }
 0x832   :  { %v10380_v5 = vpop.f32.mrb[110].mxu1  ;;  %v13446_v28 = vadd.f32 %v13317_v8, %v3422_v43 }
 0x833   :  { %v13443_v7 = vadd.f32 %v10380_v5, %v13317_v8  ;;  %v3425_v55 = vpop.f32.mrb[111].mxu1 }
 0x834   :  { %v13449_v25 = vadd.f32 %v13317_v8, %v3425_v55 }
 0x836   :  { %v15754_v15 = vpack.c.bf16 %v13449_v25, %v13446_v28 }
 0x838   :  { %v10387_v34 = vpop.f32.mrb[112].mxu1 }
 0x839   :  { %v3503_v49 = vadd.f32 %v10387_v34, %v13458_v38  ;;  %v3494_v60 = vpop.f32.mrb[113].mxu1 }
 0x83a   :  { %v3495_v43 = vadd.f32 %v13458_v38, %v3494_v60  ;;  %v10388_v5 = vpop.f32.mrb[114].mxu1 }
 0x83b   :  { %v3506_v8 = vadd.f32 %v10388_v5, %v13458_v38  ;;  %v3497_v55 = vpop.f32.mrb[115].mxu1 }
 0x83c   :  { %v3621_v33 = vmax.f32 %v3495_v43, %v3503_v49  ;;  %v3498_v11 = vadd.f32 %v13458_v38, %v3497_v55 }
 0x83e   :  { %v3622_v24 = vmax.f32 %v3498_v11, %v3506_v8 }
 0x840   :  { %v10391_v50 = vpop.f32.mrb[116].mxu1  ;;  %v3651_v46 = vpack.c.bf16 %v3622_v24, %v3621_v33 }
 0x841   :  { %v3519_v35 = vadd.f32 %v10391_v50, %v13458_v38  ;;  %v3510_v31 = vpop.f32.mrb[117].mxu1 }
 0x842   :  { %v3511_v39 = vadd.f32 %v13458_v38, %v3510_v31  ;;  %v10392_v36 = vpop.f32.mrb[118].mxu1  ;;  %3716 = vmatpush1.bf16.msra.mxu0 %v3651_v46  ;;  %3829 = vmatpush1.bf16.msra.mxu1 %v3651_v46 }
 0x843   :  { %v3522_v34 = vadd.f32 %v10392_v36, %v13458_v38  ;;  %v3513_v60 = vpop.f32.mrb[119].mxu1  ;;  %3717 = vmatprep.subr.bf16.mxu0 %v15742_v45  ;;  %3830 = vmatprep.subr.bf16.mxu1 %v15742_v45 }
 0x844   :  { %v3623_v43 = vmax.f32 %v3503_v49, %v3511_v39  ;;  %v3625_v5 = vmax.f32 %v3511_v39, %v3519_v35  ;;  %v3514_v11 = vadd.f32 %v13458_v38, %v3513_v60 }
 0x846   :  { %v3624_v33 = vmax.f32 %v3506_v8, %v3514_v11  ;;  %v3626_v24 = vmax.f32 %v3514_v11, %v3522_v34 }
 0x848   :  { %v10395_v50 = vpop.f32.mrb[120].mxu1  ;;  %v3652_v55 = vpack.c.bf16 %v3624_v33, %v3623_v43  ;;  %v3653_v12 = vpack.c.bf16 %v3626_v24, %v3625_v5 }
 0x849   :  { %v3535_v31 = vadd.f32 %v10395_v50, %v13458_v38  ;;  %v3526_v0 = vpop.f32.mrb[121].mxu1 }
 0x84a   :  { %v3527_v46 = vadd.f32 %v13458_v38, %v3526_v0  ;;  %v10396_v36 = vpop.f32.mrb[122].mxu1  ;;  %3718 = vmatpush1.bf16.msra.mxu0 %v3652_v55  ;;  %3831 = vmatpush1.bf16.msra.mxu1 %v3652_v55 }
 0x84b   :  { %v3538_v62 = vadd.f32 %v10396_v36, %v13458_v38  ;;  %v3529_v3 = vpop.f32.mrb[123].mxu1  ;;  %3719 = vmatprep.subr.bf16.mxu0 %v15742_v45  ;;  %3832 = vmatprep.subr.bf16.mxu1 %v15742_v45 }
 0x84c   :  { %v3627_v39 = vmax.f32 %v3519_v35, %v3527_v46  ;;  %v3629_v49 = vmax.f32 %v3527_v46, %v3535_v31  ;;  %v3530_v8 = vadd.f32 %v13458_v38, %v3529_v3 }
 0x84e   :  { %v3628_v60 = vmax.f32 %v3522_v34, %v3530_v8  ;;  %v3630_v43 = vmax.f32 %v3530_v8, %v3538_v62  ;;  %3720 = vmatpush1.bf16.msra.mxu0 %v3653_v12  ;;  %3833 = vmatpush1.bf16.msra.mxu1 %v3653_v12 }
 0x84f   :  { %3721 = vmatprep.subr.bf16.mxu0 %v15742_v45  ;;  %3834 = vmatprep.subr.bf16.mxu1 %v15742_v45 }
 0x850   :  { %v3654_v0 = vpack.c.bf16 %v3628_v60, %v3627_v39  ;;  %v3655_v5 = vpack.c.bf16 %v3630_v43, %v3629_v49  ;;  %v10399_v11 = vpop.f32.mrb[124].mxu1 }
 0x851   :  { %v3551_v33 = vadd.f32 %v10399_v11, %v13458_v38  ;;  %v3542_v24 = vpop.f32.mrb[125].mxu1 }
 0x852   :  { %v3543_v50 = vadd.f32 %v13458_v38, %v3542_v24  ;;  %v10400_v35 = vpop.f32.mrb[126].mxu1  ;;  %3722 = vmatpush1.bf16.msra.mxu0 %v3654_v0  ;;  %3835 = vmatpush1.bf16.msra.mxu1 %v3654_v0 }
 0x853   :  { %v3554_v3 = vadd.f32 %v10400_v35, %v13458_v38  ;;  %v3545_v34 = vpop.f32.mrb[127].mxu1  ;;  %3723 = vmatprep.subr.bf16.mxu0 %v15742_v45  ;;  %3836 = vmatprep.subr.bf16.mxu1 %v15742_v45 }
 0x854   :  { %v3631_v12 = vmax.f32 %v3535_v31, %v3543_v50  ;;  %v3633_v55 = vmax.f32 %v3543_v50, %v3551_v33  ;;  %v3546_v46 = vadd.f32 %v13458_v38, %v3545_v34 }
 0x856   :  { %v3632_v36 = vmax.f32 %v3538_v62, %v3546_v46  ;;  %v3634_v39 = vmax.f32 %v3546_v46, %v3554_v3  ;;  %3724 = vmatpush1.bf16.msra.mxu0 %v3655_v5  ;;  %3837 = vmatpush1.bf16.msra.mxu1 %v3655_v5 }
 0x857   :  { %3725 = vmatprep.subr.bf16.mxu0 %v15742_v45  ;;  %3838 = vmatprep.subr.bf16.mxu1 %v15742_v45 }
 0x858   :  { %v3656_v49 = vpack.c.bf16 %v3632_v36, %v3631_v12  ;;  %v3657_v8 = vpack.c.bf16 %v3634_v39, %v3633_v55  ;;  %v10403_v60 = vpop.f32.mrb[128].mxu1 }
 0x859   :  { %v3567_v43 = vadd.f32 %v10403_v60, %v13458_v38  ;;  %v3558_v0 = vpop.f32.mrb[129].mxu1 }
 0x85a   :  { %v3559_v11 = vadd.f32 %v13458_v38, %v3558_v0  ;;  %v10404_v31 = vpop.f32.mrb[130].mxu1  ;;  %3726 = vmatpush1.bf16.msra.mxu0 %v3656_v49  ;;  %3839 = vmatpush1.bf16.msra.mxu1 %v3656_v49 }
 0x85b   :  { %v3570_v62 = vadd.f32 %v10404_v31, %v13458_v38  ;;  %v3561_v24 = vpop.f32.mrb[131].mxu1  ;;  %3727 = vmatprep.subr.bf16.mxu0 %v15742_v45  ;;  %3840 = vmatprep.subr.bf16.mxu1 %v15742_v45 }
 0x85c   :  { %v3635_v5 = vmax.f32 %v3551_v33, %v3559_v11  ;;  %v3637_v50 = vmax.f32 %v3559_v11, %v3567_v43  ;;  %v3562_v35 = vadd.f32 %v13458_v38, %v3561_v24 }
 0x85e   :  { %v3636_v34 = vmax.f32 %v3554_v3, %v3562_v35  ;;  %v3638_v12 = vmax.f32 %v3562_v35, %v3570_v62  ;;  %3728 = vmatpush1.bf16.msra.mxu0 %v3657_v8  ;;  %3841 = vmatpush1.bf16.msra.mxu1 %v3657_v8 }
 0x85f   :  { %3729 = vmatprep.subr.bf16.mxu0 %v15742_v45  ;;  %3842 = vmatprep.subr.bf16.mxu1 %v15742_v45 }
 0x860   :  { %v3658_v55 = vpack.c.bf16 %v3636_v34, %v3635_v5  ;;  %v3659_v46 = vpack.c.bf16 %v3638_v12, %v3637_v50  ;;  %v10407_v36 = vpop.f32.mrb[132].mxu1 }
 0x861   :  { %v3583_v39 = vadd.f32 %v10407_v36, %v13458_v38  ;;  %v3574_v49 = vpop.f32.mrb[133].mxu1 }
 0x862   :  { %v3575_v60 = vadd.f32 %v13458_v38, %v3574_v49  ;;  %v10408_v33 = vpop.f32.mrb[134].mxu1  ;;  %3730 = vmatpush1.bf16.msra.mxu0 %v3658_v55  ;;  %3843 = vmatpush1.bf16.msra.mxu1 %v3658_v55 }
 0x863   :  { %v3586_v3 = vadd.f32 %v10408_v33, %v13458_v38  ;;  %v3577_v0 = vpop.f32.mrb[135].mxu1  ;;  %3731 = vmatprep.subr.bf16.mxu0 %v15742_v45  ;;  %3844 = vmatprep.subr.bf16.mxu1 %v15742_v45 }
 0x864   :  { %v3639_v8 = vmax.f32 %v3567_v43, %v3575_v60  ;;  %v3641_v11 = vmax.f32 %v3575_v60, %v3583_v39  ;;  %v3578_v31 = vadd.f32 %v13458_v38, %v3577_v0 }
 0x866   :  { %v3640_v24 = vmax.f32 %v3570_v62, %v3578_v31  ;;  %v3642_v5 = vmax.f32 %v3578_v31, %v3586_v3  ;;  %3732 = vmatpush1.bf16.msra.mxu0 %v3659_v46  ;;  %3845 = vmatpush1.bf16.msra.mxu1 %v3659_v46 }
 0x867   :  { %3733 = vmatprep.subr.bf16.mxu0 %v15742_v45  ;;  %3846 = vmatprep.subr.bf16.mxu1 %v15742_v45 }
 0x868   :  { %v3660_v50 = vpack.c.bf16 %v3640_v24, %v3639_v8  ;;  %v3661_v35 = vpack.c.bf16 %v3642_v5, %v3641_v11  ;;  %v10411_v34 = vpop.f32.mrb[136].mxu1 }
 0x869   :  { %v3599_v12 = vadd.f32 %v10411_v34, %v13458_v38  ;;  %v3590_v55 = vpop.f32.mrb[137].mxu1 }
 0x86a   :  { %v3591_v36 = vadd.f32 %v13458_v38, %v3590_v55  ;;  %v10412_v43 = vpop.f32.mrb[138].mxu1  ;;  %3734 = vmatpush1.bf16.msra.mxu0 %v3660_v50  ;;  %3847 = vmatpush1.bf16.msra.mxu1 %v3660_v50 }
 0x86b   :  { %v3602_v62 = vadd.f32 %v10412_v43, %v13458_v38  ;;  %v3593_v49 = vpop.f32.mrb[139].mxu1  ;;  %3735 = vmatprep.subr.bf16.mxu0 %v15742_v45  ;;  %3848 = vmatprep.subr.bf16.mxu1 %v15742_v45 }
 0x86c   :  { %v3643_v46 = vmax.f32 %v3583_v39, %v3591_v36  ;;  %v3645_v60 = vmax.f32 %v3591_v36, %v3599_v12  ;;  %v3594_v33 = vadd.f32 %v13458_v38, %v3593_v49 }
 0x86e   :  { %v3644_v0 = vmax.f32 %v3586_v3, %v3594_v33  ;;  %v3646_v8 = vmax.f32 %v3594_v33, %v3602_v62  ;;  %3736 = vmatpush1.bf16.msra.mxu0 %v3661_v35  ;;  %3849 = vmatpush1.bf16.msra.mxu1 %v3661_v35 }
 0x86f   :  { %3737 = vmatprep.subr.bf16.mxu0 %v15742_v45  ;;  %3850 = vmatprep.subr.bf16.mxu1 %v15742_v45 }
 0x870   :  { %v3662_v11 = vpack.c.bf16 %v3644_v0, %v3643_v46  ;;  %v3663_v31 = vpack.c.bf16 %v3646_v8, %v3645_v60  ;;  %v10415_v24 = vpop.f32.mrb[140].mxu1  ;;  %v10946_v0 = vld [vmem:[%s15565_s16 + $0x54] ss:$8 sps:$4 sm:$0xff]   ;;  %v10948_v8 = vld [vmem:[%s15565_s16 + $0x10] ss:$8 sps:$4 sm:$0xff]  }
 0x871   :  { %v3615_v5 = vadd.f32 %v10415_v24, %v13458_v38  ;;  %v3606_v50 = vpop.f32.mrb[141].mxu1  ;;  %v10952_v24 = vld [vmem:[%s15565_s16 + $0x64] ss:$8 sps:$4 sm:$0xff]  }
 0x872   :  { %v3607_v34 = vadd.f32 %v13458_v38, %v3606_v50  ;;  %v10416_v39 = vpop.f32.mrb[142].mxu1  ;;  %3738 = vmatpush1.bf16.msra.mxu0 %v3662_v11  ;;  %3851 = vmatpush1.bf16.msra.mxu1 %v3662_v11  ;;  %v10949_v11 = vld [vmem:[%s15565_s16 + $0x50] ss:$8 sps:$4 sm:$0xff]   ;;  %v10955_v50 = vld [vmem:[%s15565_s16 + $0x60] ss:$8 sps:$4 sm:$0xff]  }
 0x873   :  { %v3618_v3 = vadd.f32 %v10416_v39, %v13458_v38  ;;  %v3609_v55 = vpop.f32.mrb[143].mxu1  ;;  %3739 = vmatprep.subr.bf16.mxu0 %v15742_v45  ;;  %3852 = vmatprep.subr.bf16.mxu1 %v15742_v45  ;;  %v10958_v39 = vld [vmem:[%s15565_s16 + $0x74] ss:$8 sps:$4 sm:$0xff]  }
 0x874   :  { %v3647_v35 = vmax.f32 %v3599_v12, %v3607_v34  ;;  %v3649_v36 = vmax.f32 %v3607_v34, %v3615_v5  ;;  %v3610_v43 = vadd.f32 %v13458_v38, %v3609_v55  ;;  %v10938_v38 = vld [vmem:[%s15565_s16] ss:$8 sps:$4 sm:$0xff]   ;;  %v10956_v34 = vld [vmem:[%s15565_s16 + $0x34] ss:$8 sps:$4 sm:$0xff]   ;;  %v10961_v55 = vld [vmem:[%s15565_s16 + $0x70] ss:$8 sps:$4 sm:$0xff]  }
 0x875   :  { %v10941_v12 = vld [vmem:[%s15565_s16 + $0x40] ss:$8 sps:$4 sm:$0xff]  }
 0x876   :  { %v3648_v49 = vmax.f32 %v3602_v62, %v3610_v43  ;;  %v3650_v46 = vmax.f32 %v3610_v43, %v3618_v3  ;;  %3740 = vmatpush1.bf16.msra.mxu0 %v3663_v31  ;;  %3853 = vmatpush1.bf16.msra.mxu1 %v3663_v31  ;;  %v10944_v62 = vld [vmem:[%s15565_s16 + $0x14] ss:$8 sps:$4 sm:$0xff]   ;;  %v10950_v31 = vld [vmem:[%s15565_s16 + $0x24] ss:$8 sps:$4 sm:$0xff]   ;;  %v10954_v5 = vld [vmem:[%s15565_s16 + $0x20] ss:$8 sps:$4 sm:$0xff]  }
 0x877   :  { %3741 = vmatprep.subr.bf16.mxu0 %v15742_v45  ;;  %3854 = vmatprep.subr.bf16.mxu1 %v15742_v45  ;;  %v10960_v3 = vld [vmem:[%s15565_s16 + $0x30] ss:$8 sps:$4 sm:$0xff]  }
 0x878   :  { %v3664_v60 = vpack.c.bf16 %v3648_v49, %v3647_v35  ;;  %v3665_v33 = vpack.c.bf16 %v3650_v46, %v3649_v36 }
 0x87a   :  { %3742 = vmatpush1.bf16.msra.mxu0 %v3664_v60  ;;  %3855 = vmatpush1.bf16.msra.mxu1 %v3664_v60 }
 0x87b   :  { %3743 = vmatprep.subr.bf16.mxu0 %v15742_v45  ;;  %3856 = vmatprep.subr.bf16.mxu1 %v15742_v45 }
 0x87e   :  { %3744 = vmatpush1.bf16.msra.mxu0 %v3665_v33  ;;  %3857 = vmatpush1.bf16.msra.mxu1 %v3665_v33 }
 0x881   :  { %3748 = vmatmul.mubr.bf16.vlgmr.msra.gmra.mrb[120].mxu0 %v10938_v38  ;;  %3861 = vmatmul.mubr.bf16.vlgmr.msra.gmra.mrb[144].mxu1 %v10941_v12 }
 0x882   :  { %9266 = vmatprep.mubr.msk.bf16.mxu0 %vm3702_vm5, %v10944_v62  ;;  %9278 = vmatprep.mubr.msk.bf16.mxu1 %vm3702_vm5, %v10946_v0 }
 0x889   :  { %3756 = vmatmul.mubr.bf16.gmra.mrb[124].mxu0 %v10948_v8  ;;  %3869 = vmatmul.mubr.bf16.gmra.mrb[148].mxu1 %v10949_v11 }
 0x88a   :  { %9267 = vmatprep.mubr.msk.bf16.mxu0 %vm3702_vm5, %v10950_v31  ;;  %9279 = vmatprep.mubr.msk.bf16.mxu1 %vm3702_vm5, %v10952_v24 }
 0x891   :  { %3764 = vmatmul.mubr.bf16.gmra.mrb[128].mxu0 %v10954_v5  ;;  %3877 = vmatmul.mubr.bf16.gmra.mrb[152].mxu1 %v10955_v50 }
 0x892   :  { %9268 = vmatprep.mubr.msk.bf16.mxu0 %vm3702_vm5, %v10956_v34  ;;  %9280 = vmatprep.mubr.msk.bf16.mxu1 %vm3702_vm5, %v10958_v39 }
 0x899   :  { %3772 = vmatmul.mubr.bf16.gmra.mrb[132].mxu0 %v10960_v3  ;;  %3885 = vmatmul.mubr.bf16.gmra.mrb[156].mxu1 %v10961_v55 }
 0x89a   :  { %10425 = vmatprep.mubr.msk.bf16.mxu0 %vm3921_vm6, %v3905_v59 }
 0x954   :  { %v3749_v35 = vpop.f32.mrb[120].mxu0  ;;  %v3862_v36 = vpop.f32.mrb[144].mxu1 }
 0x955   :  { %v3893_v43 = vmax.f32 %v3749_v35, %v3862_v36  ;;  %v3751_v49 = vpop.f32.mrb[121].mxu0  ;;  %v3864_v46 = vpop.f32.mrb[145].mxu1 }
 0x956   :  { %v3752_v60 = vpop.f32.mrb[122].mxu0  ;;  %v3865_v33 = vpop.f32.mrb[146].mxu1 }
 0x957   :  { %v3894_v38 = vmax.f32 %v3752_v60, %v3865_v33  ;;  %v3754_v12 = vpop.f32.mrb[123].mxu0  ;;  %v3867_v62 = vpop.f32.mrb[147].mxu1 }
 0x959   :  { %v3901_v0 = vpack.c.bf16 %v3894_v38, %v3893_v43 }
 0x95b   :  { %10785 = vmatprep.subr.msk.bf16.mxu0 %vm3921_vm6, %v3901_v0  ;;  %v3971_v8 = vsel %vm3921_vm6, %v3901_v0, 0  ;;  %4195 = vrot.lane.b32.xlu1 %v3901_v0, %s11393_s29 }
 0x95c   :  { %v3757_v40 = vpop.f32.mrb[124].mxu0  ;;  %v3870_v1 = vpop.f32.mrb[148].mxu1  ;;  %10418 = vmatpush3.bf16.xpose.msra.mxu0 %v3971_v8 }
 0x95d   :  { %v3895_v59 = vmax.f32 %v3757_v40, %v3870_v1  ;;  %v3759_v11 = vpop.f32.mrb[125].mxu0  ;;  %v3872_v31 = vpop.f32.mrb[149].mxu1 }
 0x95e   :  { %v3760_v24 = vpop.f32.mrb[126].mxu0  ;;  %v3873_v5 = vpop.f32.mrb[150].mxu1 }
 0x95f   :  { %v3896_v50 = vmax.f32 %v3760_v24, %v3873_v5  ;;  %v3762_v34 = vpop.f32.mrb[127].mxu0  ;;  %v3875_v39 = vpop.f32.mrb[151].mxu1 }
 0x961   :  { %v3902_v3 = vpack.c.bf16 %v3896_v50, %v3895_v59 }
 0x963   :  { %10786 = vmatprep.subr.msk.bf16.mxu0 %vm3921_vm6, %v3902_v3  ;;  %v3974_v55 = vsel %vm3921_vm6, %v3902_v3, 0  ;;  %4197 = vrot.lane.b32.xlu0 %v3902_v3, %s11393_s29 }
 0x964   :  { %v3765_v35 = vpop.f32.mrb[128].mxu0  ;;  %v3878_v36 = vpop.f32.mrb[152].mxu1  ;;  %10420 = vmatpush3.bf16.xpose.msra.mxu0 %v3974_v55 }
 0x965   :  { %v3897_v43 = vmax.f32 %v3765_v35, %v3878_v36  ;;  %v3767_v49 = vpop.f32.mrb[129].mxu0  ;;  %v3880_v46 = vpop.f32.mrb[153].mxu1  ;;  %v15743_v35 = vpack.c.bf16 %v13339_v17, %v13336_v30  ;;  %v15744_v36 = vpack.c.bf16 %v13361_v6, %v13358_v13  ;;  %v15748_v30 = vpack.c.bf16 %v13401_v58, %v13398_v26 }
 0x966   :  { %v3768_v60 = vpop.f32.mrb[130].mxu0  ;;  %v3881_v33 = vpop.f32.mrb[154].mxu1  ;;  %v15749_v17 = vpack.c.bf16 %v13395_v22, %v13392_v19  ;;  %v15755_v13 = vpack.c.bf16 %v13443_v7, %v13440_v47  ;;  %v13649_v19 = vmax.f32 %v12253_v18, 0.0  ;;  %v4861_v22 = vsel %vm699_vm2, %v13646_v63, 0.0 }
 0x967   :  { %v3898_v38 = vmax.f32 %v3768_v60, %v3881_v33  ;;  %v3770_v12 = vpop.f32.mrb[131].mxu0  ;;  %v3883_v62 = vpop.f32.mrb[155].mxu1  ;;  %v13656_v58 = vmax.f32 %v12256_v16, 0.0  ;;  %v13664_v18 = vmax.f32 %v12262_v52, 0.0  ;;  %v4870_v47 = vsel %vm699_vm2, %v13669_v29, 0.0  ;;  %v15757_v52 = vld [vmem:[#allocation33_spill] sm:$0xff] }
 0x968   :  { %v4862_v26 = vsel %vm699_vm2, %v13649_v19, 0.0  ;;  %v13679_v28 = vmax.f32 %v15757_v52, 0.0  ;;  %v13684_v49 = vmax.f32 %v15758_v2, 0.0  ;;  %v15759_v33 = vld [vmem:[#allocation34_spill] sm:$0xff] }
 0x969   :  { %v3903_v0 = vpack.c.bf16 %v3898_v38, %v3897_v43  ;;  %v4863_v32 = vadd.f32 %v4862_v26, %v4861_v22  ;;  %v4864_v10 = vsel %vm699_vm2, %v13656_v58, 0.0  ;;  %v4868_v16 = vsel %vm699_vm2, %v13664_v18, 0.0  ;;  %v15769_v2 = vld [vmem:[#allocation46_spill] sm:$0xff] }
 0x96a   :  { %v4874_v46 = vsel %vm699_vm2, %v13679_v28, 0.0  ;;  %v13689_v38 = vmax.f32 %v15759_v33, 0.0  ;;  %v4876_v12 = vsel %vm699_vm2, %v13684_v49, 0.0 }
 0x96b   :  { %10787 = vmatprep.subr.msk.bf16.mxu0 %vm3921_vm6, %v3903_v0  ;;  %v3977_v8 = vsel %vm3921_vm6, %v3903_v0, 0  ;;  %4199 = vrot.lane.b32.xlu1 %v3903_v0, %s11393_s29  ;;  %v4865_v53 = vadd.f32 %v4864_v10, %v4863_v32  ;;  %v15760_v0 = vld [vmem:[#allocation35_spill] sm:$0xff]  ;;  %v15766_v10 = vld [vmem:[#allocation41_spill] sm:$0xff] }
 0x96c   :  { %v3773_v40 = vpop.f32.mrb[132].mxu0  ;;  %v3886_v1 = vpop.f32.mrb[156].mxu1  ;;  %10422 = vmatpush3.bf16.xpose.msra.mxu0 %v3977_v8  ;;  %v13694_v8 = vmax.f32 %v15760_v0, 0.0 }
 0x96d   :  { %v3899_v59 = vmax.f32 %v3773_v40, %v3886_v1  ;;  %v3775_v11 = vpop.f32.mrb[133].mxu0  ;;  %v3888_v31 = vpop.f32.mrb[157].mxu1  ;;  %v4867_v48 = vadd.f32 %v4866_v54, %v4865_v53  ;;  %v4878_v40 = vsel %vm699_vm2, %v13689_v38, 0.0  ;;  %v13736_v53 = vmax.f32 %v15766_v10, 0.0  ;;  %v15767_v54 = vld [vmem:[#allocation42_spill] sm:$0xff] }
 0x96e   :  { %v3776_v24 = vpop.f32.mrb[134].mxu0  ;;  %v3889_v5 = vpop.f32.mrb[158].mxu1  ;;  %v4880_v31 = vsel %vm699_vm2, %v13694_v8, 0.0 }
 0x96f   :  { %v3900_v50 = vmax.f32 %v3776_v24, %v3889_v5  ;;  %v3778_v34 = vpop.f32.mrb[135].mxu0  ;;  %v3891_v39 = vpop.f32.mrb[159].mxu1  ;;  %v15762_v5 = vld [vmem:[#allocation36_spill] sm:$0xff]  ;;  %v4959_v33 = vsel %vm699_vm2, %v13736_v53, -inf }
 0x971   :  { %v3904_v3 = vpack.c.bf16 %v3900_v50, %v3899_v59  ;;  %v15761_v59 = vld [vmem:[#allocation37_spill] sm:$0xff]  ;;  %v13704_v50 = vmax.f32 %v15762_v5, 0.0  ;;  %v15772_v5 = vld [vmem:[#allocation50_spill] sm:$0xff] }
 0x972   :  { %v13699_v11 = vmax.f32 %v15761_v59, 0.0 }
 0x973   :  { %10788 = vmatprep.subr.msk.bf16.mxu0 %vm3921_vm6, %v3904_v3  ;;  %v3980_v55 = vsel %vm3921_vm6, %v3904_v3, 0  ;;  %4201 = vrot.lane.b32.xlu0 %v3904_v3, %s11393_s29  ;;  %v15763_v3 = vld [vmem:[#allocation38_spill] sm:$0xff] }
 0x974   :  { %10424 = vmatpush3.bf16.xpose.msra.mxu0 %v3980_v55  ;;  %v4882_v34 = vsel %vm699_vm2, %v13699_v11, 0.0  ;;  %v13709_v55 = vmax.f32 %v15763_v3, 0.0 }
 0x97b   :  { %10426 = vmatmul.mubr.msk.bf16.vlgmr.msra.gmra.mrb[136].mxu0 %vm3921_vm6, %v3906_v61  ;;  %v15747_v61 = vpack.c.bf16 %v13371_v41, %v13368_v57 }
 0x97c   :  { %10429 = vmatprep.mubr.msk.bf16.mxu0 %vm3921_vm6, %v3907_v51  ;;  %v15752_v51 = vpack.c.bf16 %v13433_v27, %v13430_v14  ;;  %v4869_v14 = vadd.f32 %v4868_v16, %v4867_v48  ;;  %v13674_v27 = vmax.f32 %v15756_v20, 0.0  ;;  %v13739_v48 = vmax.f32 %v15767_v54, 0.0 }
 0x97d   :  { %v4953_v20 = vsel %vm699_vm2, %v13709_v55, -inf }
 0x97e   :  { %v4871_v7 = vadd.f32 %v4870_v47, %v4869_v14  ;;  %v4872_v25 = vsel %vm699_vm2, %v13674_v27, 0.0  ;;  %v4951_v14 = vsel %vm699_vm2, %v13704_v50, -inf }
 0x980   :  { %v4873_v43 = vadd.f32 %v4872_v25, %v4871_v7  ;;  %v15768_v25 = vld [vmem:[#allocation45_spill] sm:$0xff] }
 0x982   :  { %v4875_v60 = vadd.f32 %v4874_v46, %v4873_v43  ;;  %v13748_v43 = vmax.f32 %v15768_v25, 0.0  ;;  %v13751_v46 = vmax.f32 %v15769_v2, 0.0  ;;  %v15776_v2 = vld [vmem:[#allocation47_spill] sm:$0xff] }
 0x983   :  { %10430 = vmatmul.mubr.msk.bf16.gmra.mrb[140].mxu0 %vm3921_vm6, %v15743_v35  ;;  %v4884_v35 = vsel %vm699_vm2, %v13704_v50, 0.0 }
 0x984   :  { %10433 = vmatprep.mubr.msk.bf16.mxu0 %vm3921_vm6, %v15744_v36  ;;  %v4877_v62 = vadd.f32 %v4876_v12, %v4875_v60  ;;  %v4892_v60 = vsel %vm699_vm2, %v13736_v53, 0.0  ;;  %v4961_v12 = vsel %vm699_vm2, %v13739_v48, -inf  ;;  %v4967_v3 = vsel %vm699_vm2, %v13748_v43, -inf }
 0x986   :  { %v4879_v1 = vadd.f32 %v4878_v40, %v4877_v62 }
 0x988   :  { %v4881_v24 = vadd.f32 %v4880_v31, %v4879_v1  ;;  %v15770_v1 = vld [vmem:[#allocation43_spill] sm:$0xff]  ;;  %v15771_v31 = vld [vmem:[#allocation49_spill] sm:$0xff] }
 0x989   :  { %v13760_v59 = vmax.f32 %v15770_v1, 0.0 }
 0x98a   :  { %v4883_v39 = vadd.f32 %v4882_v34, %v4881_v24  ;;  %v13763_v24 = vmax.f32 %v15771_v31, 0.0  ;;  %v13766_v34 = vmax.f32 %v15772_v5, 0.0 }
 0x98b   :  { %10434 = vmatmul.mubr.msk.bf16.gmra.mrb[144].mxu0 %vm3921_vm6, %v15745_v42  ;;  %v4931_v42 = vsel %vm699_vm2, %v13646_v63, -inf }
 0x98c   :  { %10437 = vmatprep.mubr.msk.bf16.mxu0 %vm3921_vm6, %v15746_v9  ;;  %v4885_v36 = vadd.f32 %v4884_v35, %v4883_v39  ;;  %v4932_v9 = vsel %vm699_vm2, %v13649_v19, -inf  ;;  %v4894_v39 = vsel %vm699_vm2, %v13739_v48, 0.0  ;;  %v4969_v35 = vsel %vm699_vm2, %v13751_v46, -inf }
 0x993   :  { %10438 = vmatmul.mubr.msk.bf16.gmra.mrb[148].mxu0 %vm3921_vm6, %v15747_v61  ;;  %v4935_v61 = vsel %vm699_vm2, %v13664_v18, -inf }
 0x994   :  { %10441 = vmatprep.mubr.msk.bf16.mxu0 %vm3921_vm6, %v15748_v30  ;;  %v4937_v30 = vsel %vm699_vm2, %v13669_v29, -inf }
 0x99b   :  { %10442 = vmatmul.mubr.msk.bf16.gmra.mrb[152].mxu0 %vm3921_vm6, %v15749_v17  ;;  %v15764_v17 = vld [vmem:[#allocation39_spill] sm:$0xff] }
 0x99c   :  { %10445 = vmatprep.mubr.msk.bf16.mxu0 %vm3921_vm6, %v15750_v21  ;;  %v13722_v21 = vmax.f32 %v15764_v17, 0.0  ;;  %v15774_v17 = vld [vmem:[#allocation53_spill] sm:$0xff] }
 0x9a3   :  { %10446 = vmatmul.mubr.msk.bf16.gmra.mrb[156].mxu0 %vm3921_vm6, %v15751_v56  ;;  %v4886_v56 = vsel %vm699_vm2, %v13709_v55, 0.0 }
 0x9a4   :  { %10449 = vmatprep.mubr.msk.bf16.mxu0 %vm3921_vm6, %v15752_v51  ;;  %v4887_v51 = vadd.f32 %v4886_v56, %v4885_v36  ;;  %v13778_v56 = vmax.f32 %v15774_v17, 0.0 }
 0x9ab   :  { %10450 = vmatmul.mubr.msk.bf16.gmra.mrb[160].mxu0 %vm3921_vm6, %v15753_v23  ;;  %v4936_v23 = vmax.f32 %v4931_v42, %v4935_v61  ;;  %v15773_v61 = vld [vmem:[#allocation44_spill] sm:$0xff] }
 0x9ac   :  { %10453 = vmatprep.mubr.msk.bf16.mxu0 %vm3921_vm6, %v15754_v15  ;;  %v4938_v15 = vmax.f32 %v4932_v9, %v4937_v30  ;;  %v13775_v30 = vmax.f32 %v15773_v61, 0.0 }
 0x9b3   :  { %10454 = vmatmul.mubr.msk.bf16.gmra.mrb[164].mxu0 %vm3921_vm6, %v15755_v13  ;;  %v15765_v13 = vld [vmem:[#allocation40_spill] sm:$0xff] }
 0x9cd   :  { %v4196_v6 = vpop.permute.xlu1 %4195 }
 0x9ce   :  { %10457 = vmatprep.subr.bf16.mxu1 %v4196_v6 }
 0x9cf   :  { %10458 = vmatpush3.bf16.msra.mxu1 %v4196_v6  ;;  %v13727_v6 = vmax.f32 %v15765_v13, 0.0  ;;  %v4975_v13 = vsel %vm699_vm2, %v13763_v24, -inf }
 0x9d1   :  { %v4890_v16 = vsel %vm699_vm2, %v13727_v6, 0.0 }
 0x9d5   :  { %v4198_v57 = vpop.permute.xlu0 %4197 }
 0x9d6   :  { %10459 = vmatprep.subr.bf16.mxu1 %v4198_v57 }
 0x9d7   :  { %10460 = vmatpush3.bf16.msra.mxu1 %v4198_v57  ;;  %v4888_v57 = vsel %vm699_vm2, %v13722_v21, 0.0 }
 0x9d8   :  { %v4889_v22 = vadd.f32 %v4888_v57, %v4887_v51  ;;  %v15775_v51 = vld [vmem:[#allocation54_spill] sm:$0xff]  ;;  %v4977_v57 = vsel %vm699_vm2, %v13766_v34, -inf }
 0x9da   :  { %v4891_v47 = vadd.f32 %v4890_v16, %v4889_v22 }
 0x9dc   :  { %v4893_v62 = vadd.f32 %v4892_v60, %v4891_v47  ;;  %v13798_v60 = vmax.f32 %v15776_v2, 0.0 }
 0x9dd   :  { %v4200_v41 = vpop.permute.xlu1 %4199 }
 0x9de   :  { %10461 = vmatprep.subr.bf16.mxu1 %v4200_v41  ;;  %v4895_v36 = vadd.f32 %v4894_v39, %v4893_v62  ;;  %v5000_v39 = vld [vmem:[%s15554_s5] sm:$0xff]  ;;  %v4904_v17 = vsel %vm699_vm2, %v13798_v60, 0.0 }
 0x9df   :  { %10462 = vmatpush3.bf16.msra.mxu1 %v4200_v41  ;;  %v4943_v41 = vsel %vm699_vm2, %v13684_v49, -inf }
 0x9e0   :  { %v4944_v26 = vmax.f32 %v4936_v23, %v4943_v41  ;;  %v13781_v23 = vmax.f32 %v15775_v51, 0.0  ;;  %v4949_v51 = vsel %vm699_vm2, %v13699_v11, -inf }
 0x9e2   :  { %v4952_v7 = vmax.f32 %v4944_v26, %v4951_v14  ;;  %v4898_v26 = vsel %vm699_vm2, %v13775_v30, 0.0  ;;  %v4985_v10 = vsel %vm699_vm2, %v13781_v23, -inf }
 0x9e4   :  { %v4960_v0 = vmax.f32 %v4952_v7, %v4959_v33  ;;  %v4902_v33 = vsel %vm699_vm2, %v13751_v46, 0.0 }
 0x9e5   :  { %v4202_v44 = vpop.permute.xlu0 %4201 }
 0x9e6   :  { %10463 = vmatprep.subr.bf16.mxu1 %v4202_v44  ;;  %v4968_v42 = vmax.f32 %v4960_v0, %v4967_v3  ;;  %v5001_v3 = vld [vmem:[%s15554_s5 + $0x8] sm:$0xff] }
 0x9e7   :  { %10464 = vmatpush3.bf16.msra.mxu1 %v4202_v44  ;;  %v4945_v44 = vsel %vm699_vm2, %v13689_v38, -inf }
 0x9e8   :  { %10761 = vmatprep.subr.bf16.mxu1 %v15741_v4  ;;  %v4946_v32 = vmax.f32 %v4938_v15, %v4945_v44  ;;  %v4896_v15 = vsel %vm699_vm2, %v13760_v59, 0.0  ;;  %v4976_v44 = vmax.f32 %v4968_v42, %v4975_v13  ;;  %v15777_v42 = vld [vmem:[#allocation48_spill] sm:$0xff]  ;;  %v13817_v13 = vpack.c.bf16 %v5001_v3, %v5000_v39  ;;  %v15778_v3 = vld [vmem:[#allocation51_spill] sm:$0xff] }
 0x9e9   :  { %v4897_v41 = vadd.f32 %v4896_v15, %v4895_v36 }
 0x9ea   :  { %v4954_v52 = vmax.f32 %v4946_v32, %v4953_v20  ;;  %v4983_v32 = vsel %vm699_vm2, %v13778_v56, -inf  ;;  %v4900_v20 = vsel %vm699_vm2, %v13748_v43, 0.0 }
 0x9eb   :  { %v4899_v54 = vadd.f32 %v4898_v26, %v4897_v41  ;;  %v4984_v16 = vmax.f32 %v4976_v44, %v4983_v32  ;;  %v5002_v44 = vld [vmem:[%s15554_s5 + $0x10] sm:$0xff] }
 0x9ec   :  { %v4962_v40 = vmax.f32 %v4954_v52, %v4961_v12  ;;  %v4947_v12 = vsel %vm699_vm2, %v13694_v8, -inf }
 0x9ed   :  { %v4901_v47 = vadd.f32 %v4900_v20, %v4899_v54  ;;  %v4955_v54 = vsel %vm699_vm2, %v13722_v21, -inf }
 0x9ee   :  { %v4970_v9 = vmax.f32 %v4962_v40, %v4969_v35 }
 0x9ef   :  { %v4903_v0 = vadd.f32 %v4902_v33, %v4901_v47 }
 0x9f0   :  { %v4978_v22 = vmax.f32 %v4970_v9, %v4977_v57  ;;  %v13811_v9 = vmax.f32 %v15777_v42, 0.0  ;;  %v4963_v42 = vsel %vm699_vm2, %v13760_v59, -inf }
 0x9f1   :  { %v4905_v57 = vadd.f32 %v4904_v17, %v4903_v0  ;;  %v4957_v0 = vsel %vm699_vm2, %v13727_v6, -inf }
 0x9f2   :  { %v4986_v14 = vmax.f32 %v4978_v22, %v4985_v10  ;;  %v5003_v22 = vld [vmem:[%s15554_s5 + $0x18] sm:$0xff]  ;;  %v4906_v10 = vsel %vm699_vm2, %v13811_v9, 0.0 }
 0x9f3   :  { %v4907_v20 = vadd.f32 %v4906_v10, %v4905_v57 }
 0x9f4   :  { %v4991_v7 = vmax.f32 %v4984_v16, %v4986_v14  ;;  %v13832_v14 = vpack.c.bf16 %v5003_v22, %v5002_v44 }
 0x9f6   :  { %v4948_v40 = vmax.f32 %v4991_v7, %v4947_v12 }
 0x9f8   :  { %v4950_v41 = vmax.f32 %v4948_v40, %v4949_v51 }
 0x9fa   :  { %v4956_v47 = vmax.f32 %v4950_v41, %v4955_v54 }
 0xa4e   :  { %v10427_v52 = vpop.f32.mrb[136].mxu0 }
 0xa4f   :  { %v4016_v25 = vpop.f32.mrb[137].mxu0  ;;  %v4145_v1 = vmul.f32 0.015625, %v10427_v52 }
 0xa50   :  { %v10428_v62 = vpop.f32.mrb[138].mxu0  ;;  %v4143_v35 = vmul.f32 0.015625, %v4016_v25 }
 0xa51   :  { %v4146_v31 = vmul.f32 0.015625, %v10428_v62  ;;  %v4019_v5 = vpop.f32.mrb[139].mxu0  ;;  %v4908_v62 = vsel %vm699_vm2, %v13763_v24, 0.0 }
 0xa52   :  { %v4144_v36 = vmul.f32 0.015625, %v4019_v5 }
 0xa53   :  { %v4176_v61 = vpack.c.bf16 %v4146_v31, %v4145_v1  ;;  %v4909_v1 = vadd.f32 %v4908_v62, %v4907_v20  ;;  %v4958_v31 = vmax.f32 %v4956_v47, %v4957_v0 }
 0xa54   :  { %v4175_v15 = vpack.c.bf16 %v4144_v36, %v4143_v35  ;;  %v13844_v35 = vmax.f32 %v15778_v3, 0.0  ;;  %v4910_v36 = vsel %vm699_vm2, %v13766_v34, 0.0 }
 0xa55   :  { %v4911_v17 = vadd.f32 %v4910_v36, %v4909_v1  ;;  %v4964_v51 = vmax.f32 %v4958_v31, %v4963_v42  ;;  %v4916_v36 = vsel %vm699_vm2, %v13778_v56, 0.0  ;;  %v4973_v42 = vsel %vm699_vm2, %v13811_v9, -inf }
 0xa56   :  { %v10431_v26 = vpop.f32.mrb[140].mxu0  ;;  %10465 = vmatprep.mubr.msk.bf16.mxu1 %vm4207_vm7, %v4175_v15  ;;  %v4912_v54 = vsel %vm699_vm2, %v13844_v35, 0.0 }
 0xa57   :  { %v4032_v32 = vpop.f32.mrb[141].mxu0  ;;  %10466 = vmatmul.mubr.msk.bf16.vlgmr.msra.gmra.mrb[160].mxu1 %vm4207_vm7, %v4176_v61  ;;  %v4149_v7 = vmul.f32 0.015625, %v10431_v26  ;;  %v4913_v47 = vadd.f32 %v4912_v54, %v4911_v17 }
 0xa58   :  { %v10432_v16 = vpop.f32.mrb[142].mxu0  ;;  %10763 = vmatpush3.bf16.msra.mxu1 %v13817_v13  ;;  %v4147_v2 = vmul.f32 0.015625, %v4032_v32  ;;  %v15779_v32 = vld [vmem:[#allocation52_spill] sm:$0xff] }
 0xa59   :  { %v4150_v52 = vmul.f32 0.015625, %v10432_v16  ;;  %v4035_v25 = vpop.f32.mrb[143].mxu0  ;;  %10764 = vmatprep.subr.bf16.mxu1 %v15741_v4  ;;  %v13851_v10 = vmax.f32 %v15779_v32, 0.0  ;;  %v4965_v16 = vsel %vm699_vm2, %v13775_v30, -inf }
 0xa5a   :  { %v4148_v33 = vmul.f32 0.015625, %v4035_v25 }
 0xa5b   :  { %v4178_v12 = vpack.c.bf16 %v4150_v52, %v4149_v7  ;;  %v4966_v7 = vmax.f32 %v4964_v51, %v4965_v16 }
 0xa5c   :  { %v4177_v40 = vpack.c.bf16 %v4148_v33, %v4147_v2  ;;  %10766 = vmatpush3.bf16.msra.mxu1 %v13832_v14  ;;  %v4914_v2 = vsel %vm699_vm2, %v13851_v10, 0.0  ;;  %v4971_v33 = vsel %vm699_vm2, %v13798_v60, -inf }
 0xa5d   :  { %10767 = vmatprep.subr.bf16.mxu1 %v15741_v4  ;;  %v4915_v62 = vadd.f32 %v4914_v2, %v4913_v47  ;;  %v4972_v0 = vmax.f32 %v4966_v7, %v4971_v33  ;;  %v15781_v33 = vld [vmem:[#allocation56_spill] sm:$0xff] }
 0xa5e   :  { %v10435_v5 = vpop.f32.mrb[144].mxu0  ;;  %10469 = vmatprep.mubr.msk.bf16.mxu1 %vm4207_vm7, %v4177_v40 }
 0xa5f   :  { %v4048_v39 = vpop.f32.mrb[145].mxu0  ;;  %10470 = vmatmul.mubr.msk.bf16.gmra.mrb[164].mxu1 %vm4207_vm7, %v4178_v12  ;;  %v4153_v15 = vmul.f32 0.015625, %v10435_v5  ;;  %v4917_v17 = vadd.f32 %v4916_v36, %v4915_v62  ;;  %v4974_v51 = vmax.f32 %v4972_v0, %v4973_v42  ;;  %v4981_v0 = vsel %vm699_vm2, %v13851_v10, -inf }
 0xa60   :  { %v10436_v61 = vpop.f32.mrb[146].mxu0  ;;  %v4151_v44 = vmul.f32 0.015625, %v4048_v39 }
 0xa61   :  { %v4154_v57 = vmul.f32 0.015625, %v10436_v61  ;;  %v4051_v41 = vpop.f32.mrb[147].mxu0 }
 0xa62   :  { %v4152_v22 = vmul.f32 0.015625, %v4051_v41  ;;  %v15780_v41 = vld [vmem:[#allocation55_spill] sm:$0xff] }
 0xa63   :  { %v4180_v26 = vpack.c.bf16 %v4154_v57, %v4153_v15 }
 0xa64   :  { %v4179_v20 = vpack.c.bf16 %v4152_v22, %v4151_v44  ;;  %v13870_v44 = vmax.f32 %v15780_v41, 0.0  ;;  %v4918_v22 = vsel %vm699_vm2, %v13781_v23, 0.0 }
 0xa65   :  { %v4919_v54 = vadd.f32 %v4918_v22, %v4917_v17 }
 0xa66   :  { %v10439_v52 = vpop.f32.mrb[148].mxu0  ;;  %10473 = vmatprep.mubr.msk.bf16.mxu1 %vm4207_vm7, %v4179_v20  ;;  %v4920_v62 = vsel %vm699_vm2, %v13870_v44, 0.0  ;;  %v4987_v36 = vsel %vm699_vm2, %v13870_v44, -inf }
 0xa67   :  { %v4064_v25 = vpop.f32.mrb[149].mxu0  ;;  %10474 = vmatmul.mubr.msk.bf16.gmra.mrb[168].mxu1 %vm4207_vm7, %v4180_v26  ;;  %v4157_v40 = vmul.f32 0.015625, %v10439_v52  ;;  %v4979_v26 = vsel %vm699_vm2, %v13844_v35, -inf }
 0xa68   :  { %v10440_v12 = vpop.f32.mrb[150].mxu0  ;;  %v4155_v5 = vmul.f32 0.015625, %v4064_v25  ;;  %v4980_v16 = vmax.f32 %v4974_v51, %v4979_v26 }
 0xa69   :  { %v4158_v1 = vmul.f32 0.015625, %v10440_v12  ;;  %v4067_v31 = vpop.f32.mrb[151].mxu0  ;;  %v13877_v12 = vmax.f32 %v15781_v33, 0.0  ;;  %v4934_v33 = vsel %vm699_vm2, %v13659_v37, -inf }
 0xa6a   :  { %v4156_v39 = vmul.f32 0.015625, %v4067_v31  ;;  %v4982_v31 = vmax.f32 %v4980_v16, %v4981_v0 }
 0xa6b   :  { %v4182_v3 = vpack.c.bf16 %v4158_v1, %v4157_v40  ;;  %v4921_v1 = vadd.f32 %v4920_v62, %v4919_v54  ;;  %v4939_v54 = vsel %vm699_vm2, %v13674_v27, -inf  ;;  %v4989_v16 = vsel %vm699_vm2, %v13877_v12, -inf }
 0xa6c   :  { %v4181_v61 = vpack.c.bf16 %v4156_v39, %v4155_v5  ;;  %v4988_v17 = vmax.f32 %v4982_v31, %v4987_v36  ;;  %v4941_v62 = vsel %vm699_vm2, %v13679_v28, -inf }
 0xa6e   :  { %v10443_v15 = vpop.f32.mrb[152].mxu0  ;;  %10477 = vmatprep.mubr.msk.bf16.mxu1 %vm4207_vm7, %v4181_v61 }
 0xa6f   :  { %v4080_v57 = vpop.f32.mrb[153].mxu0  ;;  %10478 = vmatmul.mubr.msk.bf16.gmra.mrb[172].mxu1 %vm4207_vm7, %v4182_v3  ;;  %v4161_v20 = vmul.f32 0.015625, %v10443_v15  ;;  %v4922_v3 = vsel %vm699_vm2, %v13877_v12, 0.0 }
 0xa70   :  { %v10444_v32 = vpop.f32.mrb[154].mxu0  ;;  %v4159_v52 = vmul.f32 0.015625, %v4080_v57  ;;  %v4923_v61 = vadd.f32 %v4922_v3, %v4921_v1 }
 0xa71   :  { %v4162_v47 = vmul.f32 0.015625, %v10444_v32  ;;  %v4083_v7 = vpop.f32.mrb[155].mxu0  ;;  %v4933_v32 = vsel %vm699_vm2, %v13656_v58, -inf }
 0xa72   :  { %v4160_v25 = vmul.f32 0.015625, %v4083_v7  ;;  %v4990_v7 = vmax.f32 %v4988_v17, %v4989_v16 }
 0xa73   :  { %v4184_v2 = vpack.c.bf16 %v4162_v47, %v4161_v20  ;;  %v4924_v47 = vrot.slane %v4923_v61, 4 }
 0xa74   :  { %v4183_v40 = vpack.c.bf16 %v4160_v25, %v4159_v52  ;;  %v4940_v25 = vmax.f32 %v4933_v32, %v4939_v54 }
 0xa76   :  { %v10447_v5 = vpop.f32.mrb[156].mxu0  ;;  %10481 = vmatprep.mubr.msk.bf16.mxu1 %vm4207_vm7, %v4183_v40  ;;  %v4992_v40 = vmax.f32 %v4940_v25, %v4990_v7 }
 0xa77   :  { %v4096_v39 = vpop.f32.mrb[157].mxu0  ;;  %10482 = vmatmul.mubr.msk.bf16.gmra.mrb[176].mxu1 %vm4207_vm7, %v4184_v2  ;;  %v4165_v51 = vmul.f32 0.015625, %v10447_v5 }
 0xa78   :  { %v10448_v42 = vpop.f32.mrb[158].mxu0  ;;  %v4163_v41 = vmul.f32 0.015625, %v4096_v39  ;;  %v4925_v39 = vadd.f32 %v4924_v47, %v4923_v61 }
 0xa79   :  { %v4166_v15 = vmul.f32 0.015625, %v10448_v42  ;;  %v4099_v57 = vpop.f32.mrb[159].mxu0  ;;  %v4942_v42 = vmax.f32 %v4934_v33, %v4941_v62  ;;  %v15782_v62 = vmov 0.0  }
 0xa7a   :  { %v4164_v22 = vmul.f32 0.015625, %v4099_v57  ;;  %v4926_v57 = vrot.slane %v4925_v39, 2 }
 0xa7b   :  { %v4186_v26 = vpack.c.bf16 %v4166_v15, %v4165_v51  ;;  %v4993_v15 = vmax.f32 %v4942_v42, %v4992_v40 }
 0xa7c   :  { %v4185_v20 = vpack.c.bf16 %v4164_v22, %v4163_v41 }
 0xa7d   :  { %v4994_v7 = vrot.slane %v4993_v15, 4 }
 0xa7e   :  { %v10451_v52 = vpop.f32.mrb[160].mxu0  ;;  %10485 = vmatprep.mubr.msk.bf16.mxu1 %vm4207_vm7, %v4185_v20  ;;  %v4927_v20 = vadd.f32 %v4926_v57, %v4925_v39 }
 0xa7f   :  { %v4112_v2 = vpop.f32.mrb[161].mxu0  ;;  %10486 = vmatmul.mubr.msk.bf16.gmra.mrb[180].mxu1 %vm4207_vm7, %v4186_v26  ;;  %v4169_v1 = vmul.f32 0.015625, %v10451_v52  ;;  %v4995_v33 = vmax.f32 %v4993_v15, %v4994_v7 }
 0xa80   :  { %v10452_v0 = vpop.f32.mrb[162].mxu0  ;;  %v4167_v3 = vmul.f32 0.015625, %v4112_v2  ;;  %v4928_v2 = vrot.slane %v4927_v20, 1 }
 0xa81   :  { %v4170_v31 = vmul.f32 0.015625, %v10452_v0  ;;  %v4115_v5 = vpop.f32.mrb[163].mxu0  ;;  %v4996_v40 = vrot.slane %v4995_v33, 2 }
 0xa82   :  { %v4168_v36 = vmul.f32 0.015625, %v4115_v5  ;;  %v4929_v0 = vadd.f32 %v4928_v2, %v4927_v20 }
 0xa83   :  { %v4188_v17 = vpack.c.bf16 %v4170_v31, %v4169_v1  ;;  %v4997_v31 = vmax.f32 %v4995_v33, %v4996_v40 }
 0xa84   :  { %v4187_v51 = vpack.c.bf16 %v4168_v36, %v4167_v3  ;;  %v4930_v1 = vmul.f32 0.00390625, %v4929_v0 }
 0xa85   :  { %v4998_v5 = vrot.slane %v4997_v31, 1 }
 0xa86   :  { %v10455_v41 = vpop.f32.mrb[164].mxu0  ;;  %10489 = vmatprep.mubr.msk.bf16.mxu1 %vm4207_vm7, %v4187_v51 }
 0xa87   :  { %v4128_v22 = vpop.f32.mrb[165].mxu0  ;;  %10490 = vmatmul.mubr.msk.bf16.gmra.mrb[184].mxu1 %vm4207_vm7, %v4188_v17  ;;  %v4173_v32 = vmul.f32 0.015625, %v10455_v41  ;;  %v4999_v39 = vmax.f32 %v4997_v31, %v4998_v5 }
 0xa88   :  { %v10456_v26 = vpop.f32.mrb[166].mxu0  ;;  %v4171_v61 = vmul.f32 0.015625, %v4128_v22 }
 0xa89   :  { %v4174_v54 = vmul.f32 0.015625, %v10456_v26  ;;  %v4131_v16 = vpop.f32.mrb[167].mxu0 }
 0xa8a   :  { %v4172_v47 = vmul.f32 0.015625, %v4131_v16 }
 0xa8b   :  { %v4190_v52 = vpack.c.bf16 %v4174_v54, %v4173_v32 }
 0xa8c   :  { %v4189_v25 = vpack.c.bf16 %v4172_v47, %v4171_v61 }
 0xa8e   :  { %10493 = vmatprep.mubr.msk.bf16.mxu1 %vm4207_vm7, %v4189_v25 }
 0xa8f   :  { %10494 = vmatmul.mubr.msk.bf16.gmra.mrb[188].mxu1 %vm4207_vm7, %v4190_v52 }
 0xa90   :  { %10539 = vmatprep.mubr.msk.f32.mxu1 %vm11390_vm3, %v15782_v62 }
 0xa97   :  { %10540 = vmatmul.mubr.msk.f32.vlgmr.msra.gmra.mrb[14].mxu1 %vm699_vm2, %v4930_v1 }
 0xa98   :  { %10769 = vmatpush3.bf16.msra.mxu1 %v13817_v13  ;;  %10550 = vmatprep.mubr.msk.f32.mxu1 %vm11390_vm3, %v15782_v62  ;;  %v10962_v13 = vld [vmem:[%s15561_s12] sm:$0xff]  }
 0xa99   :  { %10770 = vmatprep.subr.bf16.mxu1 %v15741_v4  ;;  %10497 = vmatprep.subr.bf16.mxu0 %v10962_v13  ;;  %v13923_v4 = vld [vmem:[%s15555_s6] sm:$0x3] }
 0xa9a   :  { %10498 = vmatpush3.bf16.msra.mxu0 %v10962_v13 }
 0xa9c   :  { %10772 = vmatpush3.bf16.msra.mxu1 %v13832_v14 }
 0xa9d   :  { %10553 = vmatprep.subr.mxu1 %v15782_v62 }
 0xa9f   :  { %10551 = vmatmul.mubr.msk.f32.vlgmr.msra.gmra.mrb[192].mxu1 %vm699_vm2, %v4999_v39 }
 0xaa0   :  { %10555 = vmatprep.mubr.msk.f32.mxu1 %vm11390_vm3, %v15782_v62  ;;  %10554 = vmatpush3.msk.msra.mxu1 %vm406_vm1, %v13923_v4 }
 0xaa1   :  { %10558 = vmatprep.subr.mxu1 %v15782_v62 }
 0xb2a   :  { %v10467_v14 = vpop.f32.mrb[160].mxu1 }
 0xb2b   :  { %v4290_v3 = vpop.f32.mrb[161].mxu1 }
 0xb2c   :  { %v10468_v36 = vpop.f32.mrb[162].mxu1 }
 0xb2d   :  { %v4418_v42 = vpack.c.bf16 %v10468_v36, %v10467_v14  ;;  %v4293_v17 = vpop.f32.mrb[163].mxu1 }
 0xb2e   :  { %v4417_v51 = vpack.c.bf16 %v4293_v17, %v4290_v3 }
 0xb30   :  { %10499 = vmatprep.mubr.msk.bf16.mxu0 %vm3921_vm6, %v4417_v51 }
 0xb31   :  { %10500 = vmatmul.mubr.msk.bf16.vlgmr.msra.gmra.mrb[168].mxu0 %vm3921_vm6, %v4418_v42 }
 0xb32   :  { %v10471_v15 = vpop.f32.mrb[164].mxu1 }
 0xb33   :  { %v4306_v57 = vpop.f32.mrb[165].mxu1 }
 0xb34   :  { %v10472_v41 = vpop.f32.mrb[166].mxu1 }
 0xb35   :  { %v4420_v22 = vpack.c.bf16 %v10472_v41, %v10471_v15  ;;  %v4309_v26 = vpop.f32.mrb[167].mxu1 }
 0xb36   :  { %v4419_v32 = vpack.c.bf16 %v4309_v26, %v4306_v57 }
 0xb38   :  { %10503 = vmatprep.mubr.msk.bf16.mxu0 %vm3921_vm6, %v4419_v32 }
 0xb39   :  { %10504 = vmatmul.mubr.msk.bf16.gmra.mrb[172].mxu0 %vm3921_vm6, %v4420_v22 }
 0xb3a   :  { %v10475_v54 = vpop.f32.mrb[168].mxu1 }
 0xb3b   :  { %v4322_v16 = vpop.f32.mrb[169].mxu1 }
 0xb3c   :  { %v10476_v20 = vpop.f32.mrb[170].mxu1 }
 0xb3d   :  { %v4422_v7 = vpack.c.bf16 %v10476_v20, %v10475_v54  ;;  %v4325_v61 = vpop.f32.mrb[171].mxu1 }
 0xb3e   :  { %v4421_v47 = vpack.c.bf16 %v4325_v61, %v4322_v16 }
 0xb40   :  { %10507 = vmatprep.mubr.msk.bf16.mxu0 %vm3921_vm6, %v4421_v47 }
 0xb41   :  { %10508 = vmatmul.mubr.msk.bf16.gmra.mrb[176].mxu0 %vm3921_vm6, %v4422_v7 }
 0xb42   :  { %v10479_v52 = vpop.f32.mrb[172].mxu1 }
 0xb43   :  { %v4338_v25 = vpop.f32.mrb[173].mxu1 }
 0xb44   :  { %v10480_v2 = vpop.f32.mrb[174].mxu1 }
 0xb45   :  { %v4424_v33 = vpack.c.bf16 %v10480_v2, %v10479_v52  ;;  %v4341_v0 = vpop.f32.mrb[175].mxu1 }
 0xb46   :  { %v4423_v40 = vpack.c.bf16 %v4341_v0, %v4338_v25 }
 0xb48   :  { %10511 = vmatprep.mubr.msk.bf16.mxu0 %vm3921_vm6, %v4423_v40 }
 0xb49   :  { %10512 = vmatmul.mubr.msk.bf16.gmra.mrb[180].mxu0 %vm3921_vm6, %v4424_v33 }
 0xb4a   :  { %v10483_v1 = vpop.f32.mrb[176].mxu1 }
 0xb4b   :  { %v4354_v31 = vpop.f32.mrb[177].mxu1 }
 0xb4c   :  { %v10484_v5 = vpop.f32.mrb[178].mxu1 }
 0xb4d   :  { %v4426_v39 = vpack.c.bf16 %v10484_v5, %v10483_v1  ;;  %v4357_v13 = vpop.f32.mrb[179].mxu1 }
 0xb4e   :  { %v4425_v14 = vpack.c.bf16 %v4357_v13, %v4354_v31  ;;  %v13953_v31 = vld [vmem:[%s15562_s13] ss:$0 sm:$0xff] }
 0xb50   :  { %10515 = vmatprep.mubr.msk.bf16.mxu0 %vm3921_vm6, %v4425_v14 }
 0xb51   :  { %10516 = vmatmul.mubr.msk.bf16.gmra.mrb[184].mxu0 %vm3921_vm6, %v4426_v39 }
 0xb52   :  { %v10487_v3 = vpop.f32.mrb[180].mxu1 }
 0xb53   :  { %v4370_v36 = vpop.f32.mrb[181].mxu1 }
 0xb54   :  { %v10488_v42 = vpop.f32.mrb[182].mxu1 }
 0xb55   :  { %v4428_v17 = vpack.c.bf16 %v10488_v42, %v10487_v3  ;;  %v4373_v51 = vpop.f32.mrb[183].mxu1 }
 0xb56   :  { %v4427_v15 = vpack.c.bf16 %v4373_v51, %v4370_v36 }
 0xb58   :  { %10519 = vmatprep.mubr.msk.bf16.mxu0 %vm3921_vm6, %v4427_v15 }
 0xb59   :  { %10520 = vmatmul.mubr.msk.bf16.gmra.mrb[188].mxu0 %vm3921_vm6, %v4428_v17 }
 0xb5a   :  { %v10491_v57 = vpop.f32.mrb[184].mxu1 }
 0xb5b   :  { %v4386_v41 = vpop.f32.mrb[185].mxu1 }
 0xb5c   :  { %v10492_v22 = vpop.f32.mrb[186].mxu1 }
 0xb5d   :  { %v4430_v26 = vpack.c.bf16 %v10492_v22, %v10491_v57  ;;  %v4389_v32 = vpop.f32.mrb[187].mxu1 }
 0xb5e   :  { %v4429_v54 = vpack.c.bf16 %v4389_v32, %v4386_v41 }
 0xb60   :  { %10523 = vmatprep.mubr.msk.bf16.mxu0 %vm3921_vm6, %v4429_v54 }
 0xb61   :  { %10524 = vmatmul.mubr.msk.bf16.gmra.mrb[192].mxu0 %vm3921_vm6, %v4430_v26 }
 0xb62   :  { %v10495_v16 = vpop.f32.mrb[188].mxu1 }
 0xb63   :  { %v4402_v20 = vpop.f32.mrb[189].mxu1 }
 0xb64   :  { %v10496_v7 = vpop.f32.mrb[190].mxu1 }
 0xb65   :  { %v4432_v61 = vpack.c.bf16 %v10496_v7, %v10495_v16  ;;  %v4405_v47 = vpop.f32.mrb[191].mxu1 }
 0xb66   :  { %v4431_v52 = vpack.c.bf16 %v4405_v47, %v4402_v20 }
 0xb68   :  { %10527 = vmatprep.mubr.msk.bf16.mxu0 %vm3921_vm6, %v4431_v52 }
 0xb69   :  { %10528 = vmatmul.mubr.msk.bf16.gmra.mrb[196].mxu0 %vm3921_vm6, %v4432_v61 }
 0xb6a   :  { %v5073_v25 = vpop.f32.mrb[14].mxu1 }
 0xb6b   :  { %v10541_v2 = vpop.f32.mrb[15].mxu1  ;;  %v5077_v1 = vmax.f32 %v5073_v25, 0.0 }
 0xb72   :  { %v5148_v33 = vpop.f32.mrb[192].mxu1 }
 0xb73   :  { %v5152_v0 = vmax.f32 %v5148_v33, 0.0  ;;  %v10552_v40 = vpop.f32.mrb[193].mxu1 }
 0xb75   :  { %10556 = vmatmul.mubr.msk.f32.vlgmr.msra.gmra.mrb[194].mxu1 %vm1618_vm4, %v5152_v0 }
 0xb76   :  { %10559 = vmatpush3.msk.msra.mxu1 %vm406_vm1, %v13923_v4  ;;  %10560 = vmatprep.mubr.msk.f32.mxu1 %vm11390_vm3, %v15782_v62 }
 0xb7d   :  { %10561 = vmatmul.mubr.msk.f32.vlgmr.msra.gmra.mrb[194].mxu1 %vm1618_vm4, %v5077_v1 }
 0xc04   :  { %v10501_v5 = vpop.f32.mrb[168].mxu0 }
 0xc05   :  { %v4539_v39 = vadd.f32 %v10501_v5, %v13953_v31  ;;  %v4530_v13 = vpop.f32.mrb[169].mxu0 }
 0xc06   :  { %v4531_v14 = vadd.f32 %v13953_v31, %v4530_v13  ;;  %v10502_v3 = vpop.f32.mrb[170].mxu0 }
 0xc07   :  { %4659 = vst.msk [vmem:[#allocation3 + $0x10] sm:$0xff] %vm699_vm2, %v4539_v39  ;;  %v4542_v4 = vadd.f32 %v10502_v3, %v13953_v31  ;;  %v4533_v62 = vpop.f32.mrb[171].mxu0  ;;  %v4761_v17 = vmul.f32 %v4539_v39, %v4539_v39  ;;  %v4692_v26 = vsel %vm699_vm2, %v4539_v39, 0.0 }
 0xc08   :  { %4657 = vst.msk [vmem:[#allocation3] sm:$0xff] %vm699_vm2, %v4531_v14  ;;  %v4759_v36 = vmul.f32 %v4531_v14, %v4531_v14  ;;  %v4534_v42 = vadd.f32 %v13953_v31, %v4533_v62  ;;  %v4689_v51 = vsel %vm699_vm2, %v4531_v14, 0.0 }
 0xc09   :  { %4660 = vst.msk [vmem:[#allocation3 + $0x18] sm:$0xff] %vm699_vm2, %v4542_v4  ;;  %v4762_v41 = vmul.f32 %v4542_v4, %v4542_v4  ;;  %v4794_v52 = vsel %vm699_vm2, %v4761_v17, 0.0  ;;  %v4694_v25 = vsel %vm699_vm2, %v4542_v4, 0.0 }
 0xc0a   :  { %4658 = vst.msk [vmem:[#allocation3 + $0x8] sm:$0xff] %vm699_vm2, %v4534_v42  ;;  %v4690_v15 = vsel %vm699_vm2, %v4534_v42, 0.0  ;;  %v4760_v57 = vmul.f32 %v4534_v42, %v4534_v42  ;;  %v4791_v32 = vsel %vm699_vm2, %v4759_v36, 0.0 }
 0xc0b   :  { %v4691_v22 = vadd.f32 %v4690_v15, %v4689_v51  ;;  %v4796_v0 = vsel %vm699_vm2, %v4762_v41, 0.0 }
 0xc0c   :  { %v4792_v54 = vsel %vm699_vm2, %v4760_v57, 0.0  ;;  %v10505_v16 = vpop.f32.mrb[172].mxu0 }
 0xc0d   :  { %v4693_v20 = vadd.f32 %v4692_v26, %v4691_v22  ;;  %v4793_v7 = vadd.f32 %v4792_v54, %v4791_v32  ;;  %v4555_v61 = vadd.f32 %v10505_v16, %v13953_v31  ;;  %v4546_v47 = vpop.f32.mrb[173].mxu0 }
 0xc0e   :  { %v4547_v2 = vadd.f32 %v13953_v31, %v4546_v47  ;;  %v10506_v33 = vpop.f32.mrb[174].mxu0 }
 0xc0f   :  { %v4795_v40 = vadd.f32 %v4794_v52, %v4793_v7  ;;  %4663 = vst.msk [vmem:[#allocation3 + $0x30] sm:$0xff] %vm699_vm2, %v4555_v61  ;;  %v4695_v1 = vadd.f32 %v4694_v25, %v4693_v20  ;;  %v4549_v5 = vpop.f32.mrb[175].mxu0  ;;  %v4558_v14 = vadd.f32 %v10506_v33, %v13953_v31  ;;  %v4765_v17 = vmul.f32 %v4555_v61, %v4555_v61 }
 0xc10   :  { %4661 = vst.msk [vmem:[#allocation3 + $0x20] sm:$0xff] %vm699_vm2, %v4547_v2  ;;  %v4696_v39 = vsel %vm699_vm2, %v4547_v2, 0.0  ;;  %v4763_v13 = vmul.f32 %v4547_v2, %v4547_v2  ;;  %v4550_v3 = vadd.f32 %v13953_v31, %v4549_v5  ;;  %v4700_v41 = vsel %vm699_vm2, %v4555_v61, 0.0 }
 0xc11   :  { %v4697_v4 = vadd.f32 %v4696_v39, %v4695_v1  ;;  %v4797_v62 = vadd.f32 %v4796_v0, %v4795_v40  ;;  %4664 = vst.msk [vmem:[#allocation3 + $0x38] sm:$0xff] %vm699_vm2, %v4558_v14  ;;  %v4766_v26 = vmul.f32 %v4558_v14, %v4558_v14  ;;  %v4702_v7 = vsel %vm699_vm2, %v4558_v14, 0.0 }
 0xc12   :  { %v4798_v36 = vsel %vm699_vm2, %v4763_v13, 0.0  ;;  %4662 = vst.msk [vmem:[#allocation3 + $0x28] sm:$0xff] %vm699_vm2, %v4550_v3  ;;  %v4698_v42 = vsel %vm699_vm2, %v4550_v3, 0.0  ;;  %v4764_v57 = vmul.f32 %v4550_v3, %v4550_v3  ;;  %v4802_v2 = vsel %vm699_vm2, %v4765_v17, 0.0 }
 0xc13   :  { %v4799_v51 = vadd.f32 %v4798_v36, %v4797_v62  ;;  %v4699_v15 = vadd.f32 %v4698_v42, %v4697_v4  ;;  %v4804_v13 = vsel %vm699_vm2, %v4766_v26, 0.0 }
 0xc14   :  { %v10509_v22 = vpop.f32.mrb[176].mxu0  ;;  %v4800_v54 = vsel %vm699_vm2, %v4764_v57, 0.0 }
 0xc15   :  { %v4701_v32 = vadd.f32 %v4700_v41, %v4699_v15  ;;  %v4571_v16 = vadd.f32 %v10509_v22, %v13953_v31  ;;  %v4562_v20 = vpop.f32.mrb[177].mxu0  ;;  %v4801_v47 = vadd.f32 %v4800_v54, %v4799_v51 }
 0xc16   :  { %v4563_v52 = vadd.f32 %v13953_v31, %v4562_v20  ;;  %v10510_v25 = vpop.f32.mrb[178].mxu0 }
 0xc17   :  { %4667 = vst.msk [vmem:[#allocation3 + $0x50] sm:$0xff] %vm699_vm2, %v4571_v16  ;;  %v4703_v33 = vadd.f32 %v4702_v7, %v4701_v32  ;;  %v4574_v61 = vadd.f32 %v10510_v25, %v13953_v31  ;;  %v4565_v0 = vpop.f32.mrb[179].mxu0  ;;  %v4803_v40 = vadd.f32 %v4802_v2, %v4801_v47  ;;  %v4769_v42 = vmul.f32 %v4571_v16, %v4571_v16 }
 0xc18   :  { %4665 = vst.msk [vmem:[#allocation3 + $0x40] sm:$0xff] %vm699_vm2, %v4563_v52  ;;  %v4704_v1 = vsel %vm699_vm2, %v4563_v52, 0.0  ;;  %v4767_v5 = vmul.f32 %v4563_v52, %v4563_v52  ;;  %v4566_v39 = vadd.f32 %v13953_v31, %v4565_v0  ;;  %v4708_v51 = vsel %vm699_vm2, %v4571_v16, 0.0 }
 0xc19   :  { %v4705_v14 = vadd.f32 %v4704_v1, %v4703_v33  ;;  %4668 = vst.msk [vmem:[#allocation3 + $0x58] sm:$0xff] %vm699_vm2, %v4574_v61  ;;  %v4805_v3 = vadd.f32 %v4804_v13, %v4803_v40  ;;  %v4770_v22 = vmul.f32 %v4574_v61, %v4574_v61  ;;  %v4710_v20 = vsel %vm699_vm2, %v4574_v61, 0.0 }
 0xc1a   :  { %v4806_v4 = vsel %vm699_vm2, %v4767_v5, 0.0  ;;  %4666 = vst.msk [vmem:[#allocation3 + $0x48] sm:$0xff] %vm699_vm2, %v4566_v39  ;;  %v4706_v62 = vsel %vm699_vm2, %v4566_v39, 0.0  ;;  %v4768_v36 = vmul.f32 %v4566_v39, %v4566_v39  ;;  %v4810_v25 = vsel %vm699_vm2, %v4769_v42, 0.0 }
 0xc1b   :  { %v4707_v17 = vadd.f32 %v4706_v62, %v4705_v14  ;;  %v4807_v15 = vadd.f32 %v4806_v4, %v4805_v3  ;;  %v4812_v5 = vsel %vm699_vm2, %v4770_v22, 0.0 }
 0xc1c   :  { %v4808_v57 = vsel %vm699_vm2, %v4768_v36, 0.0  ;;  %v10513_v41 = vpop.f32.mrb[180].mxu0 }
 0xc1d   :  { %v4709_v26 = vadd.f32 %v4708_v51, %v4707_v17  ;;  %v4587_v32 = vadd.f32 %v10513_v41, %v13953_v31  ;;  %v4578_v54 = vpop.f32.mrb[181].mxu0  ;;  %v4809_v7 = vadd.f32 %v4808_v57, %v4807_v15 }
 0xc1e   :  { %v4579_v47 = vadd.f32 %v13953_v31, %v4578_v54  ;;  %v10514_v52 = vpop.f32.mrb[182].mxu0 }
 0xc1f   :  { %4671 = vst.msk [vmem:[#allocation3 + $0x70] sm:$0xff] %vm699_vm2, %v4587_v32  ;;  %v4711_v16 = vadd.f32 %v4710_v20, %v4709_v26  ;;  %v4590_v2 = vadd.f32 %v10514_v52, %v13953_v31  ;;  %v4581_v33 = vpop.f32.mrb[183].mxu0  ;;  %v4811_v0 = vadd.f32 %v4810_v25, %v4809_v7  ;;  %v4773_v62 = vmul.f32 %v4587_v32, %v4587_v32 }
 0xc20   :  { %4669 = vst.msk [vmem:[#allocation3 + $0x60] sm:$0xff] %vm699_vm2, %v4579_v47  ;;  %v4712_v40 = vsel %vm699_vm2, %v4579_v47, 0.0  ;;  %v4771_v1 = vmul.f32 %v4579_v47, %v4579_v47  ;;  %v4582_v61 = vadd.f32 %v13953_v31, %v4581_v33  ;;  %v4716_v42 = vsel %vm699_vm2, %v4587_v32, 0.0 }
 0xc21   :  { %v4713_v39 = vadd.f32 %v4712_v40, %v4711_v16  ;;  %4672 = vst.msk [vmem:[#allocation3 + $0x78] sm:$0xff] %vm699_vm2, %v4590_v2  ;;  %v4813_v13 = vadd.f32 %v4812_v5, %v4811_v0  ;;  %v4774_v57 = vmul.f32 %v4590_v2, %v4590_v2  ;;  %v4718_v54 = vsel %vm699_vm2, %v4590_v2, 0.0 }
 0xc22   :  { %v4814_v14 = vsel %vm699_vm2, %v4771_v1, 0.0  ;;  %4670 = vst.msk [vmem:[#allocation3 + $0x68] sm:$0xff] %vm699_vm2, %v4582_v61  ;;  %v4714_v3 = vsel %vm699_vm2, %v4582_v61, 0.0  ;;  %v4772_v4 = vmul.f32 %v4582_v61, %v4582_v61  ;;  %v4818_v52 = vsel %vm699_vm2, %v4773_v62, 0.0 }
 0xc23   :  { %v4715_v36 = vadd.f32 %v4714_v3, %v4713_v39  ;;  %v4815_v17 = vadd.f32 %v4814_v14, %v4813_v13  ;;  %v4820_v1 = vsel %vm699_vm2, %v4774_v57, 0.0 }
 0xc24   :  { %v4816_v51 = vsel %vm699_vm2, %v4772_v4, 0.0  ;;  %v10517_v15 = vpop.f32.mrb[184].mxu0 }
 0xc25   :  { %v4717_v41 = vadd.f32 %v4716_v42, %v4715_v36  ;;  %v4603_v22 = vadd.f32 %v10517_v15, %v13953_v31  ;;  %v4594_v26 = vpop.f32.mrb[185].mxu0  ;;  %v4817_v20 = vadd.f32 %v4816_v51, %v4815_v17 }
 0xc26   :  { %v4595_v7 = vadd.f32 %v13953_v31, %v4594_v26  ;;  %v10518_v47 = vpop.f32.mrb[186].mxu0 }
 0xc27   :  { %4675 = vst.msk [vmem:[#allocation3 + $0x90] sm:$0xff] %vm699_vm2, %v4603_v22  ;;  %v4719_v32 = vadd.f32 %v4718_v54, %v4717_v41  ;;  %v4606_v25 = vadd.f32 %v10518_v47, %v13953_v31  ;;  %v4597_v16 = vpop.f32.mrb[187].mxu0  ;;  %v4819_v33 = vadd.f32 %v4818_v52, %v4817_v20  ;;  %v4777_v3 = vmul.f32 %v4603_v22, %v4603_v22 }
 0xc28   :  { %4673 = vst.msk [vmem:[#allocation3 + $0x80] sm:$0xff] %vm699_vm2, %v4595_v7  ;;  %v4720_v0 = vsel %vm699_vm2, %v4595_v7, 0.0  ;;  %v4775_v40 = vmul.f32 %v4595_v7, %v4595_v7  ;;  %v4598_v2 = vadd.f32 %v13953_v31, %v4597_v16  ;;  %v4724_v62 = vsel %vm699_vm2, %v4603_v22, 0.0 }
 0xc29   :  { %v4721_v61 = vadd.f32 %v4720_v0, %v4719_v32  ;;  %4676 = vst.msk [vmem:[#allocation3 + $0x98] sm:$0xff] %vm699_vm2, %v4606_v25  ;;  %v4821_v5 = vadd.f32 %v4820_v1, %v4819_v33  ;;  %v4778_v51 = vmul.f32 %v4606_v25, %v4606_v25  ;;  %v4726_v26 = vsel %vm699_vm2, %v4606_v25, 0.0 }
 0xc2a   :  { %v4822_v39 = vsel %vm699_vm2, %v4775_v40, 0.0  ;;  %4674 = vst.msk [vmem:[#allocation3 + $0x88] sm:$0xff] %vm699_vm2, %v4598_v2  ;;  %v4722_v13 = vsel %vm699_vm2, %v4598_v2, 0.0  ;;  %v4776_v14 = vmul.f32 %v4598_v2, %v4598_v2  ;;  %v4826_v47 = vsel %vm699_vm2, %v4777_v3, 0.0 }
 0xc2b   :  { %v4723_v4 = vadd.f32 %v4722_v13, %v4721_v61  ;;  %v4823_v36 = vadd.f32 %v4822_v39, %v4821_v5  ;;  %v4828_v40 = vsel %vm699_vm2, %v4778_v51, 0.0 }
 0xc2c   :  { %v4824_v42 = vsel %vm699_vm2, %v4776_v14, 0.0  ;;  %v10521_v17 = vpop.f32.mrb[188].mxu0 }
 0xc2d   :  { %v4725_v15 = vadd.f32 %v4724_v62, %v4723_v4  ;;  %v4619_v57 = vadd.f32 %v10521_v17, %v13953_v31  ;;  %v4610_v41 = vpop.f32.mrb[189].mxu0  ;;  %v4825_v54 = vadd.f32 %v4824_v42, %v4823_v36 }
 0xc2e   :  { %v4611_v20 = vadd.f32 %v13953_v31, %v4610_v41  ;;  %v10522_v7 = vpop.f32.mrb[190].mxu0 }
 0xc2f   :  { %4679 = vst.msk [vmem:[#allocation3 + $0xb0] sm:$0xff] %vm699_vm2, %v4619_v57  ;;  %v4727_v22 = vadd.f32 %v4726_v26, %v4725_v15  ;;  %v4622_v52 = vadd.f32 %v10522_v7, %v13953_v31  ;;  %v4613_v32 = vpop.f32.mrb[191].mxu0  ;;  %v4827_v16 = vadd.f32 %v4826_v47, %v4825_v54  ;;  %v4781_v13 = vmul.f32 %v4619_v57, %v4619_v57 }
 0xc30   :  { %4677 = vst.msk [vmem:[#allocation3 + $0xa0] sm:$0xff] %vm699_vm2, %v4611_v20  ;;  %v4728_v33 = vsel %vm699_vm2, %v4611_v20, 0.0  ;;  %v4779_v0 = vmul.f32 %v4611_v20, %v4611_v20  ;;  %v4614_v25 = vadd.f32 %v13953_v31, %v4613_v32  ;;  %v4732_v3 = vsel %vm699_vm2, %v4619_v57, 0.0 }
 0xc31   :  { %v4729_v2 = vadd.f32 %v4728_v33, %v4727_v22  ;;  %4680 = vst.msk [vmem:[#allocation3 + $0xb8] sm:$0xff] %vm699_vm2, %v4622_v52  ;;  %v4829_v1 = vadd.f32 %v4828_v40, %v4827_v16  ;;  %v4782_v42 = vmul.f32 %v4622_v52, %v4622_v52  ;;  %v4734_v41 = vsel %vm699_vm2, %v4622_v52, 0.0 }
 0xc32   :  { %v4830_v61 = vsel %vm699_vm2, %v4779_v0, 0.0  ;;  %4678 = vst.msk [vmem:[#allocation3 + $0xa8] sm:$0xff] %vm699_vm2, %v4614_v25  ;;  %v4730_v5 = vsel %vm699_vm2, %v4614_v25, 0.0  ;;  %v4780_v39 = vmul.f32 %v4614_v25, %v4614_v25  ;;  %v4834_v7 = vsel %vm699_vm2, %v4781_v13, 0.0 }
 0xc33   :  { %v4731_v14 = vadd.f32 %v4730_v5, %v4729_v2  ;;  %v4831_v4 = vadd.f32 %v4830_v61, %v4829_v1  ;;  %v4836_v0 = vsel %vm699_vm2, %v4782_v42, 0.0 }
 0xc34   :  { %v4832_v62 = vsel %vm699_vm2, %v4780_v39, 0.0  ;;  %v10525_v36 = vpop.f32.mrb[192].mxu0 }
 0xc35   :  { %v4733_v17 = vadd.f32 %v4732_v3, %v4731_v14  ;;  %v4635_v51 = vadd.f32 %v10525_v36, %v13953_v31  ;;  %v4626_v15 = vpop.f32.mrb[193].mxu0  ;;  %v4833_v26 = vadd.f32 %v4832_v62, %v4831_v4 }
 0xc36   :  { %v4627_v54 = vadd.f32 %v13953_v31, %v4626_v15  ;;  %v10526_v20 = vpop.f32.mrb[194].mxu0 }
 0xc37   :  { %4683 = vst.msk [vmem:[#allocation3 + $0xd0] sm:$0xff] %vm699_vm2, %v4635_v51  ;;  %v4735_v57 = vadd.f32 %v4734_v41, %v4733_v17  ;;  %v4638_v47 = vadd.f32 %v10526_v20, %v13953_v31  ;;  %v4629_v22 = vpop.f32.mrb[195].mxu0  ;;  %v4835_v32 = vadd.f32 %v4834_v7, %v4833_v26  ;;  %v4785_v5 = vmul.f32 %v4635_v51, %v4635_v51 }
 0xc38   :  { %4681 = vst.msk [vmem:[#allocation3 + $0xc0] sm:$0xff] %vm699_vm2, %v4627_v54  ;;  %v4736_v16 = vsel %vm699_vm2, %v4627_v54, 0.0  ;;  %v4783_v33 = vmul.f32 %v4627_v54, %v4627_v54  ;;  %v4630_v52 = vadd.f32 %v13953_v31, %v4629_v22  ;;  %v4740_v13 = vsel %vm699_vm2, %v4635_v51, 0.0 }
 0xc39   :  { %v4737_v25 = vadd.f32 %v4736_v16, %v4735_v57  ;;  %4684 = vst.msk [vmem:[#allocation3 + $0xd8] sm:$0xff] %vm699_vm2, %v4638_v47  ;;  %v4837_v40 = vadd.f32 %v4836_v0, %v4835_v32  ;;  %v4786_v62 = vmul.f32 %v4638_v47, %v4638_v47  ;;  %v4742_v15 = vsel %vm699_vm2, %v4638_v47, 0.0 }
 0xc3a   :  { %v4838_v2 = vsel %vm699_vm2, %v4783_v33, 0.0  ;;  %4682 = vst.msk [vmem:[#allocation3 + $0xc8] sm:$0xff] %vm699_vm2, %v4630_v52  ;;  %v4738_v1 = vsel %vm699_vm2, %v4630_v52, 0.0  ;;  %v4784_v61 = vmul.f32 %v4630_v52, %v4630_v52  ;;  %v4842_v20 = vsel %vm699_vm2, %v4785_v5, 0.0 }
 0xc3b   :  { %v4739_v39 = vadd.f32 %v4738_v1, %v4737_v25  ;;  %v4839_v14 = vadd.f32 %v4838_v2, %v4837_v40  ;;  %v4844_v33 = vsel %vm699_vm2, %v4786_v62, 0.0 }
 0xc3c   :  { %v4840_v3 = vsel %vm699_vm2, %v4784_v61, 0.0  ;;  %v10529_v4 = vpop.f32.mrb[196].mxu0 }
 0xc3d   :  { %v4741_v36 = vadd.f32 %v4740_v13, %v4739_v39  ;;  %v4651_v42 = vadd.f32 %v10529_v4, %v13953_v31  ;;  %v4642_v17 = vpop.f32.mrb[197].mxu0  ;;  %v4841_v41 = vadd.f32 %v4840_v3, %v4839_v14 }
 0xc3e   :  { %v4643_v26 = vadd.f32 %v13953_v31, %v4642_v17  ;;  %v10530_v54 = vpop.f32.mrb[198].mxu0 }
 0xc3f   :  { %4687 = vst.msk [vmem:[#allocation3 + $0xf0] sm:$0xff] %vm699_vm2, %v4651_v42  ;;  %v4743_v51 = vadd.f32 %v4742_v15, %v4741_v36  ;;  %v4654_v7 = vadd.f32 %v10530_v54, %v13953_v31  ;;  %v4645_v57 = vpop.f32.mrb[199].mxu0  ;;  %v4843_v22 = vadd.f32 %v4842_v20, %v4841_v41  ;;  %v4789_v1 = vmul.f32 %v4651_v42, %v4651_v42 }
 0xc40   :  { %4685 = vst.msk [vmem:[#allocation3 + $0xe0] sm:$0xff] %vm699_vm2, %v4643_v26  ;;  %v4744_v32 = vsel %vm699_vm2, %v4643_v26, 0.0  ;;  %v4787_v16 = vmul.f32 %v4643_v26, %v4643_v26  ;;  %v4646_v47 = vadd.f32 %v13953_v31, %v4645_v57  ;;  %v4748_v5 = vsel %vm699_vm2, %v4651_v42, 0.0 }
 0xc41   :  { %v4745_v52 = vadd.f32 %v4744_v32, %v4743_v51  ;;  %4688 = vst.msk [vmem:[#allocation3 + $0xf8] sm:$0xff] %vm699_vm2, %v4654_v7  ;;  %v4845_v0 = vadd.f32 %v4844_v33, %v4843_v22  ;;  %v4790_v13 = vmul.f32 %v4654_v7, %v4654_v7  ;;  %v4750_v3 = vsel %vm699_vm2, %v4654_v7, 0.0  ;;  %v15783_v22 = vld [vmem:[#allocation30_spill] sm:$0xff] }
 0xc42   :  { %v4846_v25 = vsel %vm699_vm2, %v4787_v16, 0.0  ;;  %4686 = vst.msk [vmem:[#allocation3 + $0xe8] sm:$0xff] %vm699_vm2, %v4646_v47  ;;  %v4746_v40 = vsel %vm699_vm2, %v4646_v47, 0.0  ;;  %v4788_v2 = vmul.f32 %v4646_v47, %v4646_v47  ;;  %v4850_v62 = vsel %vm699_vm2, %v4789_v1, 0.0 }
 0xc43   :  { %v4747_v61 = vadd.f32 %v4746_v40, %v4745_v52  ;;  %v4847_v39 = vadd.f32 %v4846_v25, %v4845_v0  ;;  %v4852_v15 = vsel %vm699_vm2, %v4790_v13, 0.0 }
 0xc44   :  { %v4848_v31 = vsel %vm699_vm2, %v4788_v2, 0.0 }
 0xc45   :  { %v4749_v14 = vadd.f32 %v4748_v5, %v4747_v61  ;;  %v4849_v4 = vadd.f32 %v4848_v31, %v4847_v39 }
 0xc47   :  { %v14082_v36 = vadd.f32 %v4750_v3, %v4749_v14  ;;  %v4851_v17 = vadd.f32 %v4850_v62, %v4849_v4 }
 0xc49   :  { %v14085_v41 = vadd.f32 %v4852_v15, %v4851_v17 }
 0xc50   :  { %v5298_v26 = vpop.f32.mrb[194].mxu1 }
 0xc51   :  { %v9337_v54 = vmul.f32 -1.442695, %v5298_v26  ;;  %v10562_v42 = vpop.f32.mrb[195].mxu1 }
 0xc53   :  { %11198 = vpow2.f32 %v9337_v54 }
 0xc5d   :  { %v11199_v20 = vpop.eup %11198 }
 0xc5e   :  { %v5305_v51 = vadd.f32 1.0, %v11199_v20 }
 0xc60   :  { %11200 = vrcp.f32 %v5305_v51 }
 0xc6a   :  { %v11201_v57 = vpop.eup %11200 }
 0xc6b   :  { %v14088_v7 = vrot.slane %v11201_v57, %v15783_v22 }
 0xc6d   :  { %v14092_v32 = vmul.f32 %v14088_v7, %v13739_v48  ;;  %v14096_v16 = vmul.f32 %v14088_v7, %v13736_v53  ;;  %v14104_v52 = vmul.f32 %v14088_v7, %v13649_v19  ;;  %v14108_v0 = vmul.f32 %v14088_v7, %v13646_v63 }
 0xc6e   :  { %v14124_v2 = vmul.f32 %v14088_v7, %v13775_v30  ;;  %v14128_v1 = vmul.f32 %v14088_v7, %v13760_v59  ;;  %v14136_v39 = vmul.f32 %v14088_v7, %v13659_v37  ;;  %v14140_v30 = vmul.f32 %v14088_v7, %v13656_v58 }
 0xc6f   :  { %v5395_v47 = vsel %vm699_vm2, %v14092_v32, 0.0  ;;  %v5392_v33 = vsel %vm699_vm2, %v14096_v16, 0.0  ;;  %v5347_v53 = vsel %vm699_vm2, %v14104_v52, 0.0  ;;  %v5344_v48 = vsel %vm699_vm2, %v14108_v0, 0.0 }
 0xc70   :  { %5396 = vadd.xlane.f32.xlu0 %v5395_v47  ;;  %5393 = vadd.xlane.f32.xlu1 %v5392_v33  ;;  %v5523_v25 = vsel %vm699_vm2, %v14092_v32, -inf  ;;  %v5520_v19 = vsel %vm699_vm2, %v14096_v16, -inf  ;;  %v5475_v63 = vsel %vm699_vm2, %v14104_v52, -inf  ;;  %v5472_v40 = vsel %vm699_vm2, %v14108_v0, -inf }
 0xc71   :  { %v5401_v61 = vsel %vm699_vm2, %v14124_v2, 0.0  ;;  %v5398_v5 = vsel %vm699_vm2, %v14128_v1, 0.0  ;;  %v5353_v59 = vsel %vm699_vm2, %v14136_v39, 0.0  ;;  %v5350_v31 = vsel %vm699_vm2, %v14140_v30, 0.0 }
 0xc72   :  { %v5529_v13 = vsel %vm699_vm2, %v14124_v2, -inf  ;;  %v5526_v37 = vsel %vm699_vm2, %v14128_v1, -inf  ;;  %v5481_v58 = vsel %vm699_vm2, %v14136_v39, -inf  ;;  %v5478_v14 = vsel %vm699_vm2, %v14140_v30, -inf }
 0xc73   :  { %v14156_v3 = vmul.f32 %v14088_v7, %v13751_v46  ;;  %v14160_v4 = vmul.f32 %v14088_v7, %v13748_v43  ;;  %v14168_v15 = vmul.f32 %v14088_v7, %v13669_v29  ;;  %v14172_v46 = vmul.f32 %v14088_v7, %v13664_v18 }
 0xc74   :  { %5348 = vadd.xlane.f32.xlu1 %v5347_v53  ;;  %5345 = vadd.xlane.f32.xlu0 %v5344_v48  ;;  %v14188_v20 = vmul.f32 %v14088_v7, %v13811_v9  ;;  %v14192_v51 = vmul.f32 %v14088_v7, %v13798_v60  ;;  %v14200_v33 = vmul.f32 %v14088_v7, %v13679_v28 }
 0xc75   :  { %v5407_v62 = vsel %vm699_vm2, %v14156_v3, 0.0  ;;  %v5404_v17 = vsel %vm699_vm2, %v14160_v4, 0.0  ;;  %v5359_v43 = vsel %vm699_vm2, %v14168_v15, 0.0  ;;  %v5356_v26 = vsel %vm699_vm2, %v14172_v46, 0.0 }
 0xc76   :  { %v5535_v54 = vsel %vm699_vm2, %v14156_v3, -inf  ;;  %v5532_v29 = vsel %vm699_vm2, %v14160_v4, -inf  ;;  %v5487_v18 = vsel %vm699_vm2, %v14168_v15, -inf  ;;  %v5484_v42 = vsel %vm699_vm2, %v14172_v46, -inf }
 0xc77   :  { %v5413_v57 = vsel %vm699_vm2, %v14188_v20, 0.0  ;;  %v5410_v47 = vsel %vm699_vm2, %v14192_v51, 0.0  ;;  %v14204_v9 = vmul.f32 %v14088_v7, %v13674_v27  ;;  %v5365_v60 = vsel %vm699_vm2, %v14200_v33, 0.0 }
 0xc78   :  { %5524 = vmax.xlane.f32.xlu1 %v5523_v25  ;;  %5521 = vmax.xlane.f32.xlu0 %v5520_v19  ;;  %v5541_v48 = vsel %vm699_vm2, %v14188_v20, -inf  ;;  %v5538_v28 = vsel %vm699_vm2, %v14192_v51, -inf  ;;  %v5493_v27 = vsel %vm699_vm2, %v14200_v33, -inf  ;;  %v14220_v19 = vmul.f32 %v14088_v7, %v13766_v34 }
 0xc79   :  { %v5362_v53 = vsel %vm699_vm2, %v14204_v9, 0.0  ;;  %v5490_v25 = vsel %vm699_vm2, %v14204_v9, -inf  ;;  %v14236_v34 = vmul.f32 %v14088_v7, %v13684_v49 }
 0xc7c   :  { %5476 = vmax.xlane.f32.xlu1 %v5475_v63  ;;  %5473 = vmax.xlane.f32.xlu0 %v5472_v40  ;;  %v14224_v63 = vmul.f32 %v14088_v7, %v13763_v24  ;;  %v5419_v40 = vsel %vm699_vm2, %v14220_v19, 0.0 }
 0xc80   :  { %5402 = vadd.xlane.f32.xlu1 %v5401_v61  ;;  %5399 = vadd.xlane.f32.xlu0 %v5398_v5  ;;  %v5416_v61 = vsel %vm699_vm2, %v14224_v63, 0.0  ;;  %v14232_v5 = vmul.f32 %v14088_v7, %v13689_v38  ;;  %v5544_v38 = vsel %vm699_vm2, %v14224_v63, -inf }
 0xc82   :  { %v5371_v24 = vsel %vm699_vm2, %v14232_v5, 0.0  ;;  %v5499_v49 = vsel %vm699_vm2, %v14232_v5, -inf }
 0xc84   :  { %5354 = vadd.xlane.f32.xlu1 %v5353_v59  ;;  %5351 = vadd.xlane.f32.xlu0 %v5350_v31  ;;  %v5368_v59 = vsel %vm699_vm2, %v14236_v34, 0.0  ;;  %v5547_v31 = vsel %vm699_vm2, %v14220_v19, -inf }
 0xc88   :  { %5530 = vmax.xlane.f32.xlu1 %v5529_v13  ;;  %5527 = vmax.xlane.f32.xlu0 %v5526_v37  ;;  %v5496_v13 = vsel %vm699_vm2, %v14236_v34, -inf  ;;  %v14252_v37 = vmul.f32 %v14088_v7, %v13851_v10  ;;  %v14268_v10 = vmul.f32 %v14088_v7, %v13694_v8 }
 0xc8c   :  { %5482 = vmax.xlane.f32.xlu1 %v5481_v58  ;;  %5479 = vmax.xlane.f32.xlu0 %v5478_v14  ;;  %v14256_v58 = vmul.f32 %v14088_v7, %v13844_v35  ;;  %v5425_v14 = vsel %vm699_vm2, %v14252_v37, 0.0 }
 0xc90   :  { %5408 = vadd.xlane.f32.xlu1 %v5407_v62  ;;  %5405 = vadd.xlane.f32.xlu0 %v5404_v17  ;;  %v5422_v62 = vsel %vm699_vm2, %v14256_v58, 0.0  ;;  %v14264_v17 = vmul.f32 %v14088_v7, %v13699_v11  ;;  %v5550_v11 = vsel %vm699_vm2, %v14256_v58, -inf }
 0xc92   :  { %v5377_v35 = vsel %vm699_vm2, %v14264_v17, 0.0  ;;  %v5505_v8 = vsel %vm699_vm2, %v14264_v17, -inf }
 0xc94   :  { %5360 = vadd.xlane.f32.xlu1 %v5359_v43  ;;  %5357 = vadd.xlane.f32.xlu0 %v5356_v26  ;;  %v5374_v43 = vsel %vm699_vm2, %v14268_v10, 0.0  ;;  %v5553_v26 = vsel %vm699_vm2, %v14252_v37, -inf }
 0xc98   :  { %5536 = vmax.xlane.f32.xlu1 %v5535_v54  ;;  %5533 = vmax.xlane.f32.xlu0 %v5532_v29  ;;  %v5502_v54 = vsel %vm699_vm2, %v14268_v10, -inf  ;;  %v14284_v29 = vmul.f32 %v14088_v7, %v13781_v23  ;;  %v14300_v23 = vmul.f32 %v14088_v7, %v13704_v50 }
 0xc9c   :  { %5488 = vmax.xlane.f32.xlu1 %v5487_v18  ;;  %5485 = vmax.xlane.f32.xlu0 %v5484_v42  ;;  %v14288_v18 = vmul.f32 %v14088_v7, %v13778_v56  ;;  %v5431_v42 = vsel %vm699_vm2, %v14284_v29, 0.0 }
 0xca0   :  { %5414 = vadd.xlane.f32.xlu1 %v5413_v57  ;;  %5411 = vadd.xlane.f32.xlu0 %v5410_v47  ;;  %v5428_v57 = vsel %vm699_vm2, %v14288_v18, 0.0  ;;  %v14296_v47 = vmul.f32 %v14088_v7, %v13709_v55  ;;  %v5556_v55 = vsel %vm699_vm2, %v14288_v18, -inf }
 0xca2   :  { %v5383_v56 = vsel %vm699_vm2, %v14296_v47, 0.0  ;;  %v5511_v50 = vsel %vm699_vm2, %v14296_v47, -inf }
 0xca4   :  { %5366 = vadd.xlane.f32.xlu1 %v5365_v60  ;;  %5363 = vadd.xlane.f32.xlu0 %v5362_v53  ;;  %v5380_v60 = vsel %vm699_vm2, %v14300_v23, 0.0  ;;  %v5559_v53 = vsel %vm699_vm2, %v14284_v29, -inf }
 0xca8   :  { %5542 = vmax.xlane.f32.xlu1 %v5541_v48  ;;  %5539 = vmax.xlane.f32.xlu0 %v5538_v28  ;;  %v5508_v48 = vsel %vm699_vm2, %v14300_v23, -inf  ;;  %v14316_v28 = vmul.f32 %v14088_v7, %v13877_v12  ;;  %v14332_v12 = vmul.f32 %v14088_v7, %v13722_v21 }
 0xcac   :  { %5494 = vmax.xlane.f32.xlu1 %v5493_v27  ;;  %5491 = vmax.xlane.f32.xlu0 %v5490_v25  ;;  %v14320_v27 = vmul.f32 %v14088_v7, %v13870_v44  ;;  %v5437_v25 = vsel %vm699_vm2, %v14316_v28, 0.0 }
 0xcb0   :  { %5420 = vadd.xlane.f32.xlu1 %v5419_v40  ;;  %5417 = vadd.xlane.f32.xlu0 %v5416_v61  ;;  %v5434_v40 = vsel %vm699_vm2, %v14320_v27, 0.0  ;;  %v14328_v61 = vmul.f32 %v14088_v7, %v13727_v6  ;;  %v5562_v6 = vsel %vm699_vm2, %v14320_v27, -inf  ;;  %v5514_v7 = vsel %vm699_vm2, %v14332_v12, -inf }
 0xcb2   :  { %v5389_v44 = vsel %vm699_vm2, %v14328_v61, 0.0  ;;  %v5517_v21 = vsel %vm699_vm2, %v14328_v61, -inf }
 0xcb4   :  { %5372 = vadd.xlane.f32.xlu1 %v5371_v24  ;;  %5369 = vadd.xlane.f32.xlu0 %v5368_v59  ;;  %v5386_v24 = vsel %vm699_vm2, %v14332_v12, 0.0  ;;  %v5565_v59 = vsel %vm699_vm2, %v14316_v28, -inf }
 0xcb8   :  { %5548 = vmax.xlane.f32.xlu1 %v5547_v31  ;;  %5545 = vmax.xlane.f32.xlu0 %v5544_v38  ;;  %v10965_v31 = vld [vmem:[%s15556_s7 + $0x4] ss:$16 sps:$4 sm:$0xff]  }
 0xcb9   :  { %6016 = vmatprep.mubr.bf16.mxu0 %v10965_v31 }
 0xcbc   :  { %5500 = vmax.xlane.f32.xlu1 %v5499_v49  ;;  %5497 = vmax.xlane.f32.xlu0 %v5496_v13  ;;  %v10968_v13 = vld [vmem:[%s15556_s7 + $0xc] ss:$16 sps:$4 sm:$0xff]  }
 0xcbd   :  { %6177 = vmatprep.mubr.bf16.mxu1 %v10968_v13 }
 0xcc0   :  { %5426 = vadd.xlane.f32.xlu1 %v5425_v14  ;;  %5423 = vadd.xlane.f32.xlu0 %v5422_v62 }
 0xcc4   :  { %5378 = vadd.xlane.f32.xlu1 %v5377_v35  ;;  %5375 = vadd.xlane.f32.xlu0 %v5374_v43 }
 0xcc8   :  { %5554 = vmax.xlane.f32.xlu1 %v5553_v26  ;;  %5551 = vmax.xlane.f32.xlu0 %v5550_v11 }
 0xccc   :  { %5506 = vmax.xlane.f32.xlu1 %v5505_v8  ;;  %5503 = vmax.xlane.f32.xlu0 %v5502_v54 }
 0xcd0   :  { %5432 = vadd.xlane.f32.xlu1 %v5431_v42  ;;  %5429 = vadd.xlane.f32.xlu0 %v5428_v57 }
 0xcd4   :  { %5384 = vadd.xlane.f32.xlu1 %v5383_v56  ;;  %5381 = vadd.xlane.f32.xlu0 %v5380_v60 }
 0xcd8   :  { %5560 = vmax.xlane.f32.xlu1 %v5559_v53  ;;  %5557 = vmax.xlane.f32.xlu0 %v5556_v55 }
 0xcdc   :  { %5512 = vmax.xlane.f32.xlu1 %v5511_v50  ;;  %5509 = vmax.xlane.f32.xlu0 %v5508_v48 }
 0xce0   :  { %5438 = vadd.xlane.f32.xlu1 %v5437_v25  ;;  %5435 = vadd.xlane.f32.xlu0 %v5434_v40 }
 0xce4   :  { %5390 = vadd.xlane.f32.xlu1 %v5389_v44  ;;  %5387 = vadd.xlane.f32.xlu0 %v5386_v24 }
 0xce8   :  { %5566 = vmax.xlane.f32.xlu1 %v5565_v59  ;;  %5563 = vmax.xlane.f32.xlu0 %v5562_v6 }
 0xcec   :  { %5518 = vmax.xlane.f32.xlu1 %v5517_v21  ;;  %5515 = vmax.xlane.f32.xlu0 %v5514_v7 }
 0xcfd   :  { %v5397_v38 = vpop.xlane.xlu0 %5396  ;;  %v5394_v49 = vpop.xlane.xlu1 %5393 }
 0xcfe   :  { %v5457_v14 = vmul.f32 0.03125, %v5397_v38  ;;  %v5456_v62 = vmul.f32 0.03125, %v5394_v49 }
 0xd00   :  { %v5576_v35 = vpack.c.bf16 %v5457_v14, %v5456_v62 }
 0xd01   :  { %v5349_v43 = vpop.xlane.xlu1 %5348  ;;  %v5346_v26 = vpop.xlane.xlu0 %5345 }
 0xd02   :  { %v5441_v11 = vmul.f32 0.03125, %v5349_v43  ;;  %v5440_v8 = vmul.f32 0.03125, %v5346_v26  ;;  %9926 = vmatprep.subr.bf16.mxu0 %v5576_v35 }
 0xd04   :  { %v5568_v54 = vpack.c.bf16 %v5441_v11, %v5440_v8 }
 0xd05   :  { %v5525_v42 = vpop.xlane.xlu1 %5524  ;;  %v5522_v57 = vpop.xlane.xlu0 %5521 }
 0xd06   :  { %v5592_v56 = vpack.c.bf16 %v5525_v42, %v5522_v57  ;;  %9927 = vmatpush3.bf16.msra.mxu0 %v5568_v54 }
 0xd08   :  { %10038 = vmatprep.subr.bf16.mxu1 %v5592_v56 }
 0xd09   :  { %v5477_v60 = vpop.xlane.xlu1 %5476  ;;  %v5474_v53 = vpop.xlane.xlu0 %5473 }
 0xd0a   :  { %v5584_v55 = vpack.c.bf16 %v5477_v60, %v5474_v53 }
 0xd0c   :  { %10039 = vmatpush3.bf16.msra.mxu1 %v5584_v55 }
 0xd0d   :  { %v5403_v50 = vpop.xlane.xlu1 %5402  ;;  %v5400_v48 = vpop.xlane.xlu0 %5399 }
 0xd0e   :  { %v5459_v25 = vmul.f32 0.03125, %v5403_v50  ;;  %v5458_v40 = vmul.f32 0.03125, %v5400_v48 }
 0xd10   :  { %v5577_v44 = vpack.c.bf16 %v5459_v25, %v5458_v40 }
 0xd11   :  { %v5355_v24 = vpop.xlane.xlu1 %5354  ;;  %v5352_v59 = vpop.xlane.xlu0 %5351 }
 0xd12   :  { %v5443_v6 = vmul.f32 0.03125, %v5355_v24  ;;  %v5442_v21 = vmul.f32 0.03125, %v5352_v59  ;;  %9928 = vmatprep.subr.bf16.mxu0 %v5577_v44 }
 0xd14   :  { %v5569_v7 = vpack.c.bf16 %v5443_v6, %v5442_v21 }
 0xd15   :  { %v5531_v31 = vpop.xlane.xlu1 %5530  ;;  %v5528_v38 = vpop.xlane.xlu0 %5527 }
 0xd16   :  { %v5593_v49 = vpack.c.bf16 %v5531_v31, %v5528_v38  ;;  %9929 = vmatpush3.bf16.msra.mxu0 %v5569_v7 }
 0xd18   :  { %10040 = vmatprep.subr.bf16.mxu1 %v5593_v49 }
 0xd19   :  { %v5483_v13 = vpop.xlane.xlu1 %5482  ;;  %v5480_v14 = vpop.xlane.xlu0 %5479 }
 0xd1a   :  { %v5585_v62 = vpack.c.bf16 %v5483_v13, %v5480_v14 }
 0xd1c   :  { %10041 = vmatpush3.bf16.msra.mxu1 %v5585_v62 }
 0xd1d   :  { %v5409_v35 = vpop.xlane.xlu1 %5408  ;;  %v5406_v43 = vpop.xlane.xlu0 %5405 }
 0xd1e   :  { %v5461_v26 = vmul.f32 0.03125, %v5409_v35  ;;  %v5460_v11 = vmul.f32 0.03125, %v5406_v43 }
 0xd20   :  { %v5578_v8 = vpack.c.bf16 %v5461_v26, %v5460_v11 }
 0xd21   :  { %v5361_v54 = vpop.xlane.xlu1 %5360  ;;  %v5358_v42 = vpop.xlane.xlu0 %5357 }
 0xd22   :  { %v5445_v57 = vmul.f32 0.03125, %v5361_v54  ;;  %v5444_v56 = vmul.f32 0.03125, %v5358_v42  ;;  %9930 = vmatprep.subr.bf16.mxu0 %v5578_v8 }
 0xd24   :  { %v5570_v60 = vpack.c.bf16 %v5445_v57, %v5444_v56 }
 0xd25   :  { %v5537_v53 = vpop.xlane.xlu1 %5536  ;;  %v5534_v55 = vpop.xlane.xlu0 %5533 }
 0xd26   :  { %v5594_v50 = vpack.c.bf16 %v5537_v53, %v5534_v55  ;;  %9931 = vmatpush3.bf16.msra.mxu0 %v5570_v60 }
 0xd28   :  { %10042 = vmatprep.subr.bf16.mxu1 %v5594_v50 }
 0xd29   :  { %v5489_v48 = vpop.xlane.xlu1 %5488  ;;  %v5486_v25 = vpop.xlane.xlu0 %5485 }
 0xd2a   :  { %v5586_v40 = vpack.c.bf16 %v5489_v48, %v5486_v25 }
 0xd2c   :  { %10043 = vmatpush3.bf16.msra.mxu1 %v5586_v40 }
 0xd2d   :  { %v5415_v44 = vpop.xlane.xlu1 %5414  ;;  %v5412_v24 = vpop.xlane.xlu0 %5411 }
 0xd2e   :  { %v5463_v59 = vmul.f32 0.03125, %v5415_v44  ;;  %v5462_v6 = vmul.f32 0.03125, %v5412_v24 }
 0xd30   :  { %v5579_v21 = vpack.c.bf16 %v5463_v59, %v5462_v6 }
 0xd31   :  { %v5367_v7 = vpop.xlane.xlu1 %5366  ;;  %v5364_v31 = vpop.xlane.xlu0 %5363 }
 0xd32   :  { %v5447_v38 = vmul.f32 0.03125, %v5367_v7  ;;  %v5446_v49 = vmul.f32 0.03125, %v5364_v31  ;;  %9932 = vmatprep.subr.bf16.mxu0 %v5579_v21 }
 0xd34   :  { %v5571_v13 = vpack.c.bf16 %v5447_v38, %v5446_v49 }
 0xd35   :  { %v5543_v14 = vpop.xlane.xlu1 %5542  ;;  %v5540_v62 = vpop.xlane.xlu0 %5539 }
 0xd36   :  { %v5595_v35 = vpack.c.bf16 %v5543_v14, %v5540_v62  ;;  %9933 = vmatpush3.bf16.msra.mxu0 %v5571_v13 }
 0xd38   :  { %10044 = vmatprep.subr.bf16.mxu1 %v5595_v35 }
 0xd39   :  { %v5495_v43 = vpop.xlane.xlu1 %5494  ;;  %v5492_v26 = vpop.xlane.xlu0 %5491 }
 0xd3a   :  { %v5587_v11 = vpack.c.bf16 %v5495_v43, %v5492_v26 }
 0xd3c   :  { %10045 = vmatpush3.bf16.msra.mxu1 %v5587_v11 }
 0xd3d   :  { %v5421_v8 = vpop.xlane.xlu1 %5420  ;;  %v5418_v54 = vpop.xlane.xlu0 %5417 }
 0xd3e   :  { %v5465_v42 = vmul.f32 0.03125, %v5421_v8  ;;  %v5464_v57 = vmul.f32 0.03125, %v5418_v54 }
 0xd40   :  { %v5580_v56 = vpack.c.bf16 %v5465_v42, %v5464_v57 }
 0xd41   :  { %v5373_v60 = vpop.xlane.xlu1 %5372  ;;  %v5370_v53 = vpop.xlane.xlu0 %5369 }
 0xd42   :  { %v5449_v55 = vmul.f32 0.03125, %v5373_v60  ;;  %v5448_v50 = vmul.f32 0.03125, %v5370_v53  ;;  %9934 = vmatprep.subr.bf16.mxu0 %v5580_v56 }
 0xd44   :  { %v5572_v48 = vpack.c.bf16 %v5449_v55, %v5448_v50 }
 0xd45   :  { %v5549_v25 = vpop.xlane.xlu1 %5548  ;;  %v5546_v40 = vpop.xlane.xlu0 %5545 }
 0xd46   :  { %v5596_v44 = vpack.c.bf16 %v5549_v25, %v5546_v40  ;;  %9935 = vmatpush3.bf16.msra.mxu0 %v5572_v48 }
 0xd48   :  { %10046 = vmatprep.subr.bf16.mxu1 %v5596_v44 }
 0xd49   :  { %v5501_v24 = vpop.xlane.xlu1 %5500  ;;  %v5498_v59 = vpop.xlane.xlu0 %5497 }
 0xd4a   :  { %v5588_v6 = vpack.c.bf16 %v5501_v24, %v5498_v59 }
 0xd4c   :  { %10047 = vmatpush3.bf16.msra.mxu1 %v5588_v6 }
 0xd4d   :  { %v5427_v21 = vpop.xlane.xlu1 %5426  ;;  %v5424_v7 = vpop.xlane.xlu0 %5423 }
 0xd4e   :  { %v5467_v31 = vmul.f32 0.03125, %v5427_v21  ;;  %v5466_v38 = vmul.f32 0.03125, %v5424_v7 }
 0xd50   :  { %v5581_v49 = vpack.c.bf16 %v5467_v31, %v5466_v38 }
 0xd51   :  { %v5379_v13 = vpop.xlane.xlu1 %5378  ;;  %v5376_v14 = vpop.xlane.xlu0 %5375 }
 0xd52   :  { %v5451_v62 = vmul.f32 0.03125, %v5379_v13  ;;  %v5450_v35 = vmul.f32 0.03125, %v5376_v14  ;;  %9936 = vmatprep.subr.bf16.mxu0 %v5581_v49 }
 0xd54   :  { %v5573_v43 = vpack.c.bf16 %v5451_v62, %v5450_v35 }
 0xd55   :  { %v5555_v26 = vpop.xlane.xlu1 %5554  ;;  %v5552_v11 = vpop.xlane.xlu0 %5551 }
 0xd56   :  { %v5597_v8 = vpack.c.bf16 %v5555_v26, %v5552_v11  ;;  %9937 = vmatpush3.bf16.msra.mxu0 %v5573_v43 }
 0xd58   :  { %10048 = vmatprep.subr.bf16.mxu1 %v5597_v8 }
 0xd59   :  { %v5507_v54 = vpop.xlane.xlu1 %5506  ;;  %v5504_v42 = vpop.xlane.xlu0 %5503 }
 0xd5a   :  { %v5589_v57 = vpack.c.bf16 %v5507_v54, %v5504_v42 }
 0xd5c   :  { %10049 = vmatpush3.bf16.msra.mxu1 %v5589_v57 }
 0xd5d   :  { %v5433_v56 = vpop.xlane.xlu1 %5432  ;;  %v5430_v60 = vpop.xlane.xlu0 %5429 }
 0xd5e   :  { %v5469_v53 = vmul.f32 0.03125, %v5433_v56  ;;  %v5468_v55 = vmul.f32 0.03125, %v5430_v60  ;;  %v10963_v56 = vld [vmem:[%s15556_s7] ss:$16 sps:$4 sm:$0xff]  }
 0xd60   :  { %v5582_v50 = vpack.c.bf16 %v5469_v53, %v5468_v55  ;;  %v10969_v53 = vld [vmem:[%s15556_s7 + $0x24] ss:$16 sps:$4 sm:$0xff]  }
 0xd61   :  { %v5385_v48 = vpop.xlane.xlu1 %5384  ;;  %v5382_v25 = vpop.xlane.xlu0 %5381 }
 0xd62   :  { %v5453_v40 = vmul.f32 0.03125, %v5385_v48  ;;  %v5452_v44 = vmul.f32 0.03125, %v5382_v25  ;;  %9938 = vmatprep.subr.bf16.mxu0 %v5582_v50  ;;  %v10966_v25 = vld [vmem:[%s15556_s7 + $0x8] ss:$16 sps:$4 sm:$0xff]  }
 0xd64   :  { %v5574_v24 = vpack.c.bf16 %v5453_v40, %v5452_v44  ;;  %v10971_v40 = vld [vmem:[%s15556_s7 + $0x2c] ss:$16 sps:$4 sm:$0xff]   ;;  %v10973_v44 = vld [vmem:[%s15556_s7 + $0x20] ss:$16 sps:$4 sm:$0xff]  }
 0xd65   :  { %v5561_v59 = vpop.xlane.xlu1 %5560  ;;  %v5558_v6 = vpop.xlane.xlu0 %5557 }
 0xd66   :  { %v5598_v21 = vpack.c.bf16 %v5561_v59, %v5558_v6  ;;  %9939 = vmatpush3.bf16.msra.mxu0 %v5574_v24  ;;  %v10975_v24 = vld [vmem:[%s15556_s7 + $0x44] ss:$16 sps:$4 sm:$0xff]   ;;  %v10974_v59 = vld [vmem:[%s15556_s7 + $0x28] ss:$16 sps:$4 sm:$0xff]   ;;  %v10977_v6 = vld [vmem:[%s15556_s7 + $0x4c] ss:$16 sps:$4 sm:$0xff]  }
 0xd68   :  { %10050 = vmatprep.subr.bf16.mxu1 %v5598_v21  ;;  %v10979_v21 = vld [vmem:[%s15556_s7 + $0x40] ss:$16 sps:$4 sm:$0xff]  }
 0xd69   :  { %v5513_v7 = vpop.xlane.xlu1 %5512  ;;  %v5510_v31 = vpop.xlane.xlu0 %5509 }
 0xd6a   :  { %v5590_v38 = vpack.c.bf16 %v5513_v7, %v5510_v31  ;;  %v10981_v7 = vld [vmem:[%s15556_s7 + $0x64] ss:$16 sps:$4 sm:$0xff]   ;;  %v10980_v31 = vld [vmem:[%s15556_s7 + $0x48] ss:$16 sps:$4 sm:$0xff]  }
 0xd6c   :  { %10051 = vmatpush3.bf16.msra.mxu1 %v5590_v38  ;;  %v10983_v38 = vld [vmem:[%s15556_s7 + $0x6c] ss:$16 sps:$4 sm:$0xff]  }
 0xd6d   :  { %v5439_v49 = vpop.xlane.xlu1 %5438  ;;  %v5436_v13 = vpop.xlane.xlu0 %5435 }
 0xd6e   :  { %v5471_v14 = vmul.f32 0.03125, %v5439_v49  ;;  %v5470_v62 = vmul.f32 0.03125, %v5436_v13  ;;  %v10985_v49 = vld [vmem:[%s15556_s7 + $0x60] ss:$16 sps:$4 sm:$0xff]   ;;  %v10987_v13 = vld [vmem:[%s15556_s7 + $0x84] ss:$16 sps:$4 sm:$0xff]  }
 0xd70   :  { %v5583_v35 = vpack.c.bf16 %v5471_v14, %v5470_v62  ;;  %v10986_v14 = vld [vmem:[%s15556_s7 + $0x68] ss:$16 sps:$4 sm:$0xff]   ;;  %v10989_v62 = vld [vmem:[%s15556_s7 + $0x8c] ss:$16 sps:$4 sm:$0xff]  }
 0xd71   :  { %v5391_v43 = vpop.xlane.xlu1 %5390  ;;  %v5388_v26 = vpop.xlane.xlu0 %5387 }
 0xd72   :  { %v5455_v11 = vmul.f32 0.03125, %v5391_v43  ;;  %v5454_v8 = vmul.f32 0.03125, %v5388_v26  ;;  %9940 = vmatprep.subr.bf16.mxu0 %v5583_v35  ;;  %v10991_v35 = vld [vmem:[%s15556_s7 + $0x80] ss:$16 sps:$4 sm:$0xff]   ;;  %v10993_v43 = vld [vmem:[%s15556_s7 + $0xa4] ss:$16 sps:$4 sm:$0xff]  }
 0xd73   :  { %v10992_v26 = vld [vmem:[%s15556_s7 + $0x88] ss:$16 sps:$4 sm:$0xff]  }
 0xd74   :  { %v5575_v54 = vpack.c.bf16 %v5455_v11, %v5454_v8  ;;  %v10995_v11 = vld [vmem:[%s15556_s7 + $0xac] ss:$16 sps:$4 sm:$0xff]   ;;  %v10997_v8 = vld [vmem:[%s15556_s7 + $0xa0] ss:$16 sps:$4 sm:$0xff]  }
 0xd75   :  { %v5567_v42 = vpop.xlane.xlu1 %5566  ;;  %v5564_v57 = vpop.xlane.xlu0 %5563 }
 0xd76   :  { %v5599_v60 = vpack.c.bf16 %v5567_v42, %v5564_v57  ;;  %9941 = vmatpush3.bf16.msra.mxu0 %v5575_v54  ;;  %v10999_v54 = vld [vmem:[%s15556_s7 + $0xc4] ss:$16 sps:$4 sm:$0xff]   ;;  %v10998_v42 = vld [vmem:[%s15556_s7 + $0xa8] ss:$16 sps:$4 sm:$0xff]   ;;  %v11001_v57 = vld [vmem:[%s15556_s7 + $0xcc] ss:$16 sps:$4 sm:$0xff]  }
 0xd78   :  { %10052 = vmatprep.subr.bf16.mxu1 %v5599_v60  ;;  %v11005_v60 = vld [vmem:[%s15556_s7 + $0xe4] ss:$16 sps:$4 sm:$0xff]  }
 0xd79   :  { %v5519_v55 = vpop.xlane.xlu1 %5518  ;;  %v5516_v50 = vpop.xlane.xlu0 %5515  ;;  %6017 = vmatmul.mubr.bf16.vlgmr.msra.gmra.mrb[200].mxu0 %v10963_v56  ;;  %v11003_v56 = vld [vmem:[%s15556_s7 + $0xc0] ss:$16 sps:$4 sm:$0xff]  }
 0xd7a   :  { %v5591_v48 = vpack.c.bf16 %v5519_v55, %v5516_v50  ;;  %6024 = vmatprep.mubr.bf16.mxu0 %v10969_v53  ;;  %v11004_v53 = vld [vmem:[%s15556_s7 + $0xc8] ss:$16 sps:$4 sm:$0xff]   ;;  %v11007_v55 = vld [vmem:[%s15556_s7 + $0xec] ss:$16 sps:$4 sm:$0xff]   ;;  %v11009_v50 = vld [vmem:[%s15556_s7 + $0xe0] ss:$16 sps:$4 sm:$0xff]  }
 0xd7c   :  { %10053 = vmatpush3.bf16.msra.mxu1 %v5591_v48  ;;  %v11011_v48 = vld [vmem:[%s15556_s7 + $0x104] ss:$16 sps:$4 sm:$0xff]  }
 0xd7f   :  { %6178 = vmatmul.mubr.bf16.vlgmr.msra.gmra.mrb[196].mxu1 %v10966_v25  ;;  %v11010_v25 = vld [vmem:[%s15556_s7 + $0xe8] ss:$16 sps:$4 sm:$0xff]  }
 0xd80   :  { %6185 = vmatprep.mubr.bf16.mxu1 %v10971_v40  ;;  %v11013_v40 = vld [vmem:[%s15556_s7 + $0x10c] ss:$16 sps:$4 sm:$0xff]  }
 0xd81   :  { %6025 = vmatmul.mubr.bf16.gmra.mrb[204].mxu0 %v10973_v44  ;;  %v11015_v44 = vld [vmem:[%s15556_s7 + $0x100] ss:$16 sps:$4 sm:$0xff]  }
 0xd82   :  { %6032 = vmatprep.mubr.bf16.mxu0 %v10975_v24  ;;  %v11017_v24 = vld [vmem:[%s15556_s7 + $0x124] ss:$16 sps:$4 sm:$0xff]  }
 0xd87   :  { %6186 = vmatmul.mubr.bf16.gmra.mrb[200].mxu1 %v10974_v59  ;;  %v11016_v59 = vld [vmem:[%s15556_s7 + $0x108] ss:$16 sps:$4 sm:$0xff]  }
 0xd88   :  { %6193 = vmatprep.mubr.bf16.mxu1 %v10977_v6  ;;  %v11019_v6 = vld [vmem:[%s15556_s7 + $0x12c] ss:$16 sps:$4 sm:$0xff]  }
 0xd89   :  { %6033 = vmatmul.mubr.bf16.gmra.mrb[208].mxu0 %v10979_v21  ;;  %v11021_v21 = vld [vmem:[%s15556_s7 + $0x120] ss:$16 sps:$4 sm:$0xff]  }
 0xd8a   :  { %6040 = vmatprep.mubr.bf16.mxu0 %v10981_v7  ;;  %v11023_v7 = vld [vmem:[%s15556_s7 + $0x144] ss:$16 sps:$4 sm:$0xff]  }
 0xd8f   :  { %6194 = vmatmul.mubr.bf16.gmra.mrb[204].mxu1 %v10980_v31  ;;  %v11022_v31 = vld [vmem:[%s15556_s7 + $0x128] ss:$16 sps:$4 sm:$0xff]  }
 0xd90   :  { %6201 = vmatprep.mubr.bf16.mxu1 %v10983_v38  ;;  %v11025_v38 = vld [vmem:[%s15556_s7 + $0x14c] ss:$16 sps:$4 sm:$0xff]  }
 0xd91   :  { %6041 = vmatmul.mubr.bf16.gmra.mrb[212].mxu0 %v10985_v49  ;;  %v11027_v49 = vld [vmem:[%s15556_s7 + $0x140] ss:$16 sps:$4 sm:$0xff]  }
 0xd92   :  { %6048 = vmatprep.mubr.bf16.mxu0 %v10987_v13  ;;  %v11029_v13 = vld [vmem:[%s15556_s7 + $0x164] ss:$16 sps:$4 sm:$0xff]  }
 0xd97   :  { %6202 = vmatmul.mubr.bf16.gmra.mrb[208].mxu1 %v10986_v14  ;;  %v11028_v14 = vld [vmem:[%s15556_s7 + $0x148] ss:$16 sps:$4 sm:$0xff]  }
 0xd98   :  { %6209 = vmatprep.mubr.bf16.mxu1 %v10989_v62  ;;  %v11031_v62 = vld [vmem:[%s15556_s7 + $0x16c] ss:$16 sps:$4 sm:$0xff]  }
 0xd99   :  { %6049 = vmatmul.mubr.bf16.gmra.mrb[216].mxu0 %v10991_v35  ;;  %v11033_v35 = vld [vmem:[%s15556_s7 + $0x160] ss:$16 sps:$4 sm:$0xff]  }
 0xd9a   :  { %6056 = vmatprep.mubr.bf16.mxu0 %v10993_v43  ;;  %v11035_v43 = vld [vmem:[%s15556_s7 + $0x184] ss:$16 sps:$4 sm:$0xff]  }
 0xd9f   :  { %6210 = vmatmul.mubr.bf16.gmra.mrb[212].mxu1 %v10992_v26  ;;  %v11034_v26 = vld [vmem:[%s15556_s7 + $0x168] ss:$16 sps:$4 sm:$0xff]  }
 0xda0   :  { %6217 = vmatprep.mubr.bf16.mxu1 %v10995_v11  ;;  %v11037_v11 = vld [vmem:[%s15556_s7 + $0x18c] ss:$16 sps:$4 sm:$0xff]  }
 0xda1   :  { %6057 = vmatmul.mubr.bf16.gmra.mrb[220].mxu0 %v10997_v8  ;;  %v11039_v8 = vld [vmem:[%s15556_s7 + $0x180] ss:$16 sps:$4 sm:$0xff]  }
 0xda2   :  { %6064 = vmatprep.mubr.bf16.mxu0 %v10999_v54  ;;  %v11041_v54 = vld [vmem:[%s15556_s7 + $0x1a4] ss:$16 sps:$4 sm:$0xff]  }
 0xda7   :  { %6218 = vmatmul.mubr.bf16.gmra.mrb[216].mxu1 %v10998_v42  ;;  %v11040_v42 = vld [vmem:[%s15556_s7 + $0x188] ss:$16 sps:$4 sm:$0xff]  }
 0xda8   :  { %6225 = vmatprep.mubr.bf16.mxu1 %v11001_v57  ;;  %v11043_v57 = vld [vmem:[%s15556_s7 + $0x1ac] ss:$16 sps:$4 sm:$0xff]  }
 0xda9   :  { %6065 = vmatmul.mubr.bf16.gmra.mrb[224].mxu0 %v11003_v56  ;;  %v11045_v56 = vld [vmem:[%s15556_s7 + $0x1a0] ss:$16 sps:$4 sm:$0xff]  }
 0xdaa   :  { %6072 = vmatprep.mubr.bf16.mxu0 %v11005_v60  ;;  %v11049_v60 = vld [vmem:[%s15556_s7 + $0x1c4] ss:$16 sps:$4 sm:$0xff]  }
 0xdaf   :  { %6226 = vmatmul.mubr.bf16.gmra.mrb[220].mxu1 %v11004_v53  ;;  %v11046_v53 = vld [vmem:[%s15556_s7 + $0x1a8] ss:$16 sps:$4 sm:$0xff]  }
 0xdb0   :  { %6233 = vmatprep.mubr.bf16.mxu1 %v11007_v55  ;;  %v11050_v55 = vld [vmem:[%s15556_s7 + $0x1cc] ss:$16 sps:$4 sm:$0xff]  }
 0xdb1   :  { %6073 = vmatmul.mubr.bf16.gmra.mrb[228].mxu0 %v11009_v50  ;;  %v11047_v50 = vld [vmem:[%s15556_s7 + $0x1c0] ss:$16 sps:$4 sm:$0xff]  }
 0xdb2   :  { %6080 = vmatprep.mubr.bf16.mxu0 %v11011_v48  ;;  %v11055_v48 = vld [vmem:[%s15556_s7 + $0x1e4] ss:$16 sps:$4 sm:$0xff]  }
 0xdb7   :  { %6234 = vmatmul.mubr.bf16.gmra.mrb[224].mxu1 %v11010_v25  ;;  %v11052_v25 = vld [vmem:[%s15556_s7 + $0x1c8] ss:$16 sps:$4 sm:$0xff]  }
 0xdb8   :  { %6241 = vmatprep.mubr.bf16.mxu1 %v11013_v40  ;;  %v11058_v40 = vld [vmem:[%s15556_s7 + $0x1ec] ss:$16 sps:$4 sm:$0xff]  }
 0xdb9   :  { %6081 = vmatmul.mubr.bf16.gmra.mrb[232].mxu0 %v11015_v44  ;;  %v11053_v44 = vld [vmem:[%s15556_s7 + $0x1e0] ss:$16 sps:$4 sm:$0xff]  }
 0xdba   :  { %6088 = vmatprep.mubr.bf16.mxu0 %v11017_v24  ;;  %v11056_v24 = vld [vmem:[%s15556_s7 + $0x1e8] ss:$16 sps:$4 sm:$0xff]  }
 0xdbf   :  { %6242 = vmatmul.mubr.bf16.gmra.mrb[228].mxu1 %v11016_v59 }
 0xdc0   :  { %6249 = vmatprep.mubr.bf16.mxu1 %v11019_v6 }
 0xdc1   :  { %6089 = vmatmul.mubr.bf16.gmra.mrb[236].mxu0 %v11021_v21 }
 0xdc2   :  { %6096 = vmatprep.mubr.bf16.mxu0 %v11023_v7 }
 0xdc7   :  { %6250 = vmatmul.mubr.bf16.gmra.mrb[232].mxu1 %v11022_v31 }
 0xdc8   :  { %6257 = vmatprep.mubr.bf16.mxu1 %v11025_v38 }
 0xdc9   :  { %6097 = vmatmul.mubr.bf16.gmra.mrb[240].mxu0 %v11027_v49 }
 0xdca   :  { %6104 = vmatprep.mubr.bf16.mxu0 %v11029_v13 }
 0xdcf   :  { %6258 = vmatmul.mubr.bf16.gmra.mrb[236].mxu1 %v11028_v14 }
 0xdd0   :  { %6265 = vmatprep.mubr.bf16.mxu1 %v11031_v62 }
 0xdd1   :  { %6105 = vmatmul.mubr.bf16.gmra.mrb[244].mxu0 %v11033_v35 }
 0xdd2   :  { %6112 = vmatprep.mubr.bf16.mxu0 %v11035_v43 }
 0xdd7   :  { %6266 = vmatmul.mubr.bf16.gmra.mrb[240].mxu1 %v11034_v26 }
 0xdd8   :  { %6273 = vmatprep.mubr.bf16.mxu1 %v11037_v11 }
 0xdd9   :  { %6113 = vmatmul.mubr.bf16.gmra.mrb[248].mxu0 %v11039_v8 }
 0xdda   :  { %6120 = vmatprep.mubr.bf16.mxu0 %v11041_v54 }
 0xddf   :  { %6274 = vmatmul.mubr.bf16.gmra.mrb[244].mxu1 %v11040_v42 }
 0xde0   :  { %6281 = vmatprep.mubr.bf16.mxu1 %v11043_v57 }
 0xde1   :  { %6121 = vmatmul.mubr.bf16.gmra.mrb[252].mxu0 %v11045_v56 }
 0xde2   :  { %6128 = vmatprep.mubr.bf16.mxu0 %v11049_v60 }
 0xde7   :  { %6282 = vmatmul.mubr.bf16.gmra.mrb[248].mxu1 %v11046_v53 }
 0xde8   :  { %6289 = vmatprep.mubr.bf16.mxu1 %v11050_v55 }
 0xde9   :  { %6129 = vmatmul.mubr.bf16.gmra.mrb[0].mxu0 %v11047_v50 }
 0xdea   :  { %6136 = vmatprep.mubr.bf16.mxu0 %v11055_v48 }
 0xdef   :  { %6290 = vmatmul.mubr.bf16.gmra.mrb[252].mxu1 %v11052_v25 }
 0xdf0   :  { %6297 = vmatprep.mubr.bf16.mxu1 %v11058_v40 }
 0xdf1   :  { %6137 = vmatmul.mubr.bf16.gmra.mrb[4].mxu0 %v11053_v44 }
 0xdf7   :  { %6298 = vmatmul.mubr.bf16.gmra.mrb[0].mxu1 %v11056_v24 }
 0xe4c   :  { %v9942_v59 = vpop.f32.mrb[200].mxu0 }
 0xe4d   :  { %v9943_v6 = vpop.f32.mrb[201].mxu0 }
 0xe4e   :  { %v9944_v21 = vadd.f32 %v9943_v6, %v9942_v59  ;;  %v9945_v7 = vpop.f32.mrb[202].mxu0 }
 0xe4f   :  { %v9946_v31 = vpop.f32.mrb[203].mxu0 }
 0xe50   :  { %v9947_v38 = vadd.f32 %v9946_v31, %v9945_v7 }
 0xe52   :  { %v10054_v49 = vpop.f32.mrb[196].mxu1 }
 0xe53   :  { %v10055_v13 = vpop.f32.mrb[197].mxu1 }
 0xe54   :  { %v10056_v14 = vadd.f32 %v10055_v13, %v10054_v49  ;;  %v10057_v62 = vpop.f32.mrb[198].mxu1  ;;  %v9948_v35 = vpop.f32.mrb[204].mxu0 }
 0xe55   :  { %v10058_v43 = vpop.f32.mrb[199].mxu1  ;;  %v9949_v26 = vpop.f32.mrb[205].mxu0 }
 0xe56   :  { %v6180_v11 = vadd.f32 %v10056_v14, %v9944_v21  ;;  %v10059_v8 = vadd.f32 %v10058_v43, %v10057_v62  ;;  %v9950_v54 = vadd.f32 %v9949_v26, %v9948_v35  ;;  %v9951_v42 = vpop.f32.mrb[206].mxu0 }
 0xe57   :  { %v9952_v57 = vpop.f32.mrb[207].mxu0 }
 0xe58   :  { %v9402_v56 = vmul.f32 -1.442695, %v6180_v11  ;;  %v6183_v60 = vadd.f32 %v10059_v8, %v9947_v38  ;;  %v9953_v53 = vadd.f32 %v9952_v57, %v9951_v42 }
 0xe5a   :  { %11202 = vpow2.f32 %v9402_v56  ;;  %v9403_v55 = vmul.f32 -1.442695, %v6183_v60  ;;  %v10060_v50 = vpop.f32.mrb[200].mxu1 }
 0xe5b   :  { %v10061_v48 = vpop.f32.mrb[201].mxu1 }
 0xe5c   :  { %11204 = vpow2.f32 %v9403_v55  ;;  %v10062_v25 = vadd.f32 %v10061_v48, %v10060_v50  ;;  %v10063_v40 = vpop.f32.mrb[202].mxu1  ;;  %v9954_v44 = vpop.f32.mrb[208].mxu0 }
 0xe5d   :  { %v10064_v24 = vpop.f32.mrb[203].mxu1  ;;  %v9955_v59 = vpop.f32.mrb[209].mxu0 }
 0xe5e   :  { %v6188_v6 = vadd.f32 %v10062_v25, %v9950_v54  ;;  %v10065_v7 = vadd.f32 %v10064_v24, %v10063_v40  ;;  %v9956_v21 = vadd.f32 %v9955_v59, %v9954_v44  ;;  %v9957_v31 = vpop.f32.mrb[210].mxu0 }
 0xe5f   :  { %v9958_v49 = vpop.f32.mrb[211].mxu0 }
 0xe60   :  { %v9404_v13 = vmul.f32 -1.442695, %v6188_v6  ;;  %v6191_v14 = vadd.f32 %v10065_v7, %v9953_v53  ;;  %v9959_v62 = vadd.f32 %v9958_v49, %v9957_v31 }
 0xe62   :  { %11206 = vpow2.f32 %v9404_v13  ;;  %v9405_v38 = vmul.f32 -1.442695, %v6191_v14  ;;  %v10066_v35 = vpop.f32.mrb[204].mxu1 }
 0xe63   :  { %v10067_v43 = vpop.f32.mrb[205].mxu1 }
 0xe64   :  { %v11203_v26 = vpop.eup %11202  ;;  %11208 = vpow2.f32 %v9405_v38  ;;  %v10068_v11 = vadd.f32 %v10067_v43, %v10066_v35  ;;  %v10069_v8 = vpop.f32.mrb[206].mxu1 }
 0xe65   :  { %v9960_v42 = vpop.f32.mrb[212].mxu0  ;;  %v6402_v57 = vadd.f32 1.0, %v11203_v26  ;;  %v10070_v56 = vpop.f32.mrb[207].mxu1 }
 0xe66   :  { %v9961_v60 = vpop.f32.mrb[213].mxu0  ;;  %v11205_v54 = vpop.eup %11204  ;;  %v6196_v55 = vadd.f32 %v10068_v11, %v9956_v21  ;;  %v10071_v50 = vadd.f32 %v10070_v56, %v10069_v8 }
 0xe67   :  { %v9962_v48 = vadd.f32 %v9961_v60, %v9960_v42  ;;  %v9963_v25 = vpop.f32.mrb[214].mxu0  ;;  %11210 = vrcp.f32 %v6402_v57  ;;  %v6403_v53 = vadd.f32 1.0, %v11205_v54 }
 0xe68   :  { %v9964_v40 = vpop.f32.mrb[215].mxu0  ;;  %v9406_v44 = vmul.f32 -1.442695, %v6196_v55  ;;  %v6199_v24 = vadd.f32 %v10071_v50, %v9959_v62 }
 0xe69   :  { %v9965_v59 = vadd.f32 %v9964_v40, %v9963_v25  ;;  %11212 = vrcp.f32 %v6403_v53 }
 0xe6a   :  { %11214 = vpow2.f32 %v9406_v44  ;;  %v9407_v6 = vmul.f32 -1.442695, %v6199_v24  ;;  %v10072_v7 = vpop.f32.mrb[208].mxu1 }
 0xe6b   :  { %v10073_v31 = vpop.f32.mrb[209].mxu1 }
 0xe6c   :  { %v11207_v49 = vpop.eup %11206  ;;  %11216 = vpow2.f32 %v9407_v6  ;;  %v10074_v13 = vadd.f32 %v10073_v31, %v10072_v7  ;;  %v10075_v14 = vpop.f32.mrb[210].mxu1 }
 0xe6d   :  { %v9966_v38 = vpop.f32.mrb[216].mxu0  ;;  %v6404_v21 = vadd.f32 1.0, %v11207_v49  ;;  %v10076_v35 = vpop.f32.mrb[211].mxu1 }
 0xe6e   :  { %v9967_v43 = vpop.f32.mrb[217].mxu0  ;;  %v11209_v26 = vpop.eup %11208  ;;  %v6204_v11 = vadd.f32 %v10074_v13, %v9962_v48  ;;  %v10077_v8 = vadd.f32 %v10076_v35, %v10075_v14 }
 0xe6f   :  { %v9968_v42 = vadd.f32 %v9967_v43, %v9966_v38  ;;  %v9969_v57 = vpop.f32.mrb[218].mxu0  ;;  %11218 = vrcp.f32 %v6404_v21  ;;  %v6405_v62 = vadd.f32 1.0, %v11209_v26  ;;  %v11059_v43 = vld [vmem:[%s15557_s8] sm:$0xff]  }
 0xe70   :  { %v9970_v56 = vpop.f32.mrb[219].mxu0  ;;  %v9408_v60 = vmul.f32 -1.442695, %v6204_v11  ;;  %v6207_v54 = vadd.f32 %v10077_v8, %v9965_v59  ;;  %10563 = vmatprep.subr.bf16.mxu0 %v11059_v43 }
 0xe71   :  { %v9971_v55 = vadd.f32 %v9970_v56, %v9969_v57  ;;  %v11211_v50 = vpop.eup %11210  ;;  %11220 = vrcp.f32 %v6405_v62  ;;  %v11060_v56 = vld [vmem:[%s15559_s10] sm:$0xff]   ;;  %10564 = vmatpush3.bf16.msra.mxu0 %v11059_v43 }
 0xe72   :  { %11222 = vpow2.f32 %v9408_v60  ;;  %v9409_v25 = vmul.f32 -1.442695, %v6207_v54  ;;  %v10078_v53 = vpop.f32.mrb[212].mxu1  ;;  %6500 = vperm.xlu0 %10801, %v11211_v50   ;;  %10599 = vmatprep.subr.bf16.mxu1 %v11060_v56 }
 0xe73   :  { %v11213_v40 = vpop.eup %11212  ;;  %v10079_v44 = vpop.f32.mrb[213].mxu1  ;;  %10600 = vmatpush3.bf16.msra.mxu1 %v11060_v56 }
 0xe74   :  { %v11215_v24 = vpop.eup %11214  ;;  %11224 = vpow2.f32 %v9409_v25  ;;  %v10080_v48 = vadd.f32 %v10079_v44, %v10078_v53  ;;  %v10081_v6 = vpop.f32.mrb[214].mxu1  ;;  %6505 = vperm.xlu1 %10802, %v11213_v40  }
 0xe75   :  { %v9972_v7 = vpop.f32.mrb[220].mxu0  ;;  %v6406_v31 = vadd.f32 1.0, %v11215_v24  ;;  %v10082_v49 = vpop.f32.mrb[215].mxu1 }
 0xe76   :  { %v9973_v13 = vpop.f32.mrb[221].mxu0  ;;  %v11217_v14 = vpop.eup %11216  ;;  %v6212_v59 = vadd.f32 %v10080_v48, %v9968_v42  ;;  %v10083_v38 = vadd.f32 %v10082_v49, %v10081_v6 }
 0xe77   :  { %v9974_v21 = vadd.f32 %v9973_v13, %v9972_v7  ;;  %v9975_v35 = vpop.f32.mrb[222].mxu0  ;;  %11226 = vrcp.f32 %v6406_v31  ;;  %v6407_v26 = vadd.f32 1.0, %v11217_v14 }
 0xe78   :  { %v9976_v11 = vpop.f32.mrb[223].mxu0  ;;  %v9410_v8 = vmul.f32 -1.442695, %v6212_v59  ;;  %v6215_v57 = vadd.f32 %v10083_v38, %v9971_v55  ;;  %v11061_v59 = vld [vmem:[%s15557_s8 + $0x8] sm:$0xff]  }
 0xe79   :  { %v9977_v62 = vadd.f32 %v9976_v11, %v9975_v35  ;;  %v11219_v60 = vpop.eup %11218  ;;  %11228 = vrcp.f32 %v6407_v26  ;;  %v11062_v38 = vld [vmem:[%s15559_s10 + $0x8] sm:$0xff]   ;;  %10565 = vmatprep.subr.bf16.mxu0 %v11061_v59 }
 0xe7a   :  { %11230 = vpow2.f32 %v9410_v8  ;;  %v9411_v42 = vmul.f32 -1.442695, %v6215_v57  ;;  %v10084_v54 = vpop.f32.mrb[216].mxu1  ;;  %6510 = vperm.xlu1 %10802, %v11219_v60   ;;  %10601 = vmatprep.subr.bf16.mxu1 %v11062_v38 }
 0xe7b   :  { %v11221_v50 = vpop.eup %11220  ;;  %v10085_v25 = vpop.f32.mrb[217].mxu1  ;;  %10566 = vmatpush3.bf16.msra.mxu0 %v11061_v59  ;;  %10602 = vmatpush3.bf16.msra.mxu1 %v11062_v38 }
 0xe7c   :  { %v11223_v53 = vpop.eup %11222  ;;  %11232 = vpow2.f32 %v9411_v42  ;;  %v10086_v55 = vadd.f32 %v10085_v25, %v10084_v54  ;;  %v10087_v40 = vpop.f32.mrb[218].mxu1  ;;  %6515 = vperm.xlu0 %10801, %v11221_v50   ;;  %7200 = vmatprep.subr.bf16.mxu0 %v15742_v45 }
 0xe7d   :  { %v9978_v44 = vpop.f32.mrb[224].mxu0  ;;  %v6408_v24 = vadd.f32 1.0, %v11223_v53  ;;  %v10088_v48 = vpop.f32.mrb[219].mxu1  ;;  %7265 = vmatprep.subr.bf16.mxu1 %v15742_v45 }
 0xe7e   :  { %v9979_v6 = vpop.f32.mrb[225].mxu0  ;;  %v11225_v7 = vpop.eup %11224  ;;  %v6220_v31 = vadd.f32 %v10086_v55, %v9974_v21  ;;  %v10089_v49 = vadd.f32 %v10088_v48, %v10087_v40 }
 0xe7f   :  { %v9980_v13 = vadd.f32 %v9979_v6, %v9978_v44  ;;  %v9981_v14 = vpop.f32.mrb[226].mxu0  ;;  %11234 = vrcp.f32 %v6408_v24  ;;  %v6409_v35 = vadd.f32 1.0, %v11225_v7 }
 0xe80   :  { %v9982_v43 = vpop.f32.mrb[227].mxu0  ;;  %v9412_v26 = vmul.f32 -1.442695, %v6220_v31  ;;  %v6223_v11 = vadd.f32 %v10089_v49, %v9977_v62 }
 0xe81   :  { %v9983_v8 = vadd.f32 %v9982_v43, %v9981_v14  ;;  %v11227_v21 = vpop.eup %11226  ;;  %11236 = vrcp.f32 %v6409_v35 }
 0xe82   :  { %11238 = vpow2.f32 %v9412_v26  ;;  %v9413_v57 = vmul.f32 -1.442695, %v6223_v11  ;;  %v10090_v56 = vpop.f32.mrb[220].mxu1  ;;  %6520 = vperm.xlu1 %10802, %v11227_v21  }
 0xe83   :  { %v11229_v60 = vpop.eup %11228  ;;  %v10091_v42 = vpop.f32.mrb[221].mxu1 }
 0xe84   :  { %v11231_v54 = vpop.eup %11230  ;;  %11240 = vpow2.f32 %v9413_v57  ;;  %v10092_v62 = vadd.f32 %v10091_v42, %v10090_v56  ;;  %v10093_v50 = vpop.f32.mrb[222].mxu1  ;;  %6525 = vperm.xlu0 %10801, %v11229_v60  }
 0xe85   :  { %v9984_v25 = vpop.f32.mrb[228].mxu0  ;;  %v6410_v53 = vadd.f32 1.0, %v11231_v54  ;;  %v10094_v55 = vpop.f32.mrb[223].mxu1 }
 0xe86   :  { %v9985_v40 = vpop.f32.mrb[229].mxu0  ;;  %v11233_v44 = vpop.eup %11232  ;;  %v6228_v24 = vadd.f32 %v10092_v62, %v9980_v13  ;;  %v10095_v48 = vadd.f32 %v10094_v55, %v10093_v50 }
 0xe87   :  { %v9986_v6 = vadd.f32 %v9985_v40, %v9984_v25  ;;  %v9987_v7 = vpop.f32.mrb[230].mxu0  ;;  %11242 = vrcp.f32 %v6410_v53  ;;  %v6411_v31 = vadd.f32 1.0, %v11233_v44 }
 0xe88   :  { %v9988_v49 = vpop.f32.mrb[231].mxu0  ;;  %v9414_v14 = vmul.f32 -1.442695, %v6228_v24  ;;  %v6231_v59 = vadd.f32 %v10095_v48, %v9983_v8 }
 0xe89   :  { %v9989_v38 = vadd.f32 %v9988_v49, %v9987_v7  ;;  %v11235_v35 = vpop.eup %11234  ;;  %11244 = vrcp.f32 %v6411_v31 }
 0xe8a   :  { %11246 = vpow2.f32 %v9414_v14  ;;  %v9415_v43 = vmul.f32 -1.442695, %v6231_v59  ;;  %v10096_v26 = vpop.f32.mrb[224].mxu1  ;;  %6530 = vperm.xlu1 %10802, %v11235_v35  }
 0xe8b   :  { %v11237_v11 = vpop.eup %11236  ;;  %v10097_v21 = vpop.f32.mrb[225].mxu1 }
 0xe8c   :  { %v11239_v57 = vpop.eup %11238  ;;  %11248 = vpow2.f32 %v9415_v43  ;;  %v10098_v13 = vadd.f32 %v10097_v21, %v10096_v26  ;;  %v10099_v56 = vpop.f32.mrb[226].mxu1  ;;  %6535 = vperm.xlu0 %10801, %v11237_v11  }
 0xe8d   :  { %v9990_v60 = vpop.f32.mrb[232].mxu0  ;;  %v6412_v42 = vadd.f32 1.0, %v11239_v57  ;;  %v10100_v54 = vpop.f32.mrb[227].mxu1 }
 0xe8e   :  { %v9991_v62 = vpop.f32.mrb[233].mxu0  ;;  %v11241_v50 = vpop.eup %11240  ;;  %v6236_v8 = vadd.f32 %v10098_v13, %v9986_v6  ;;  %v10101_v25 = vadd.f32 %v10100_v54, %v10099_v56 }
 0xe8f   :  { %v9992_v53 = vadd.f32 %v9991_v62, %v9990_v60  ;;  %v9993_v55 = vpop.f32.mrb[234].mxu0  ;;  %11250 = vrcp.f32 %v6412_v42  ;;  %v6413_v40 = vadd.f32 1.0, %v11241_v50 }
 0xe90   :  { %v9994_v44 = vpop.f32.mrb[235].mxu0  ;;  %v9416_v24 = vmul.f32 -1.442695, %v6236_v8  ;;  %v6239_v48 = vadd.f32 %v10101_v25, %v9989_v38 }
 0xe91   :  { %v9995_v7 = vadd.f32 %v9994_v44, %v9993_v55  ;;  %v11243_v31 = vpop.eup %11242  ;;  %11252 = vrcp.f32 %v6413_v40 }
 0xe92   :  { %11254 = vpow2.f32 %v9416_v24  ;;  %v9417_v49 = vmul.f32 -1.442695, %v6239_v48  ;;  %v10102_v14 = vpop.f32.mrb[228].mxu1  ;;  %6540 = vperm.xlu1 %10802, %v11243_v31  }
 0xe93   :  { %v11245_v59 = vpop.eup %11244  ;;  %v10103_v35 = vpop.f32.mrb[229].mxu1 }
 0xe94   :  { %v11247_v43 = vpop.eup %11246  ;;  %11256 = vpow2.f32 %v9417_v49  ;;  %v10104_v6 = vadd.f32 %v10103_v35, %v10102_v14  ;;  %v10105_v26 = vpop.f32.mrb[230].mxu1  ;;  %6545 = vperm.xlu0 %10801, %v11245_v59  }
 0xe95   :  { %v9996_v11 = vpop.f32.mrb[236].mxu0  ;;  %v6414_v21 = vadd.f32 1.0, %v11247_v43  ;;  %v10106_v57 = vpop.f32.mrb[231].mxu1 }
 0xe96   :  { %v9997_v13 = vpop.f32.mrb[237].mxu0  ;;  %v11249_v56 = vpop.eup %11248  ;;  %v6244_v38 = vadd.f32 %v10104_v6, %v9992_v53  ;;  %v10107_v60 = vadd.f32 %v10106_v57, %v10105_v26 }
 0xe97   :  { %v9998_v42 = vadd.f32 %v9997_v13, %v9996_v11  ;;  %v9999_v54 = vpop.f32.mrb[238].mxu0  ;;  %11258 = vrcp.f32 %v6414_v21  ;;  %v6415_v62 = vadd.f32 1.0, %v11249_v56 }
 0xe98   :  { %v10000_v50 = vpop.f32.mrb[239].mxu0  ;;  %v9418_v8 = vmul.f32 -1.442695, %v6244_v38  ;;  %v6247_v25 = vadd.f32 %v10107_v60, %v9995_v7 }
 0xe99   :  { %v10001_v55 = vadd.f32 %v10000_v50, %v9999_v54  ;;  %v11251_v40 = vpop.eup %11250  ;;  %11260 = vrcp.f32 %v6415_v62 }
 0xe9a   :  { %11262 = vpow2.f32 %v9418_v8  ;;  %v9419_v44 = vmul.f32 -1.442695, %v6247_v25  ;;  %v10108_v24 = vpop.f32.mrb[232].mxu1  ;;  %6550 = vperm.xlu1 %10802, %v11251_v40  }
 0xe9b   :  { %v11253_v48 = vpop.eup %11252  ;;  %v10109_v31 = vpop.f32.mrb[233].mxu1 }
 0xe9c   :  { %v11255_v49 = vpop.eup %11254  ;;  %11264 = vpow2.f32 %v9419_v44  ;;  %v10110_v53 = vadd.f32 %v10109_v31, %v10108_v24  ;;  %v10111_v14 = vpop.f32.mrb[234].mxu1  ;;  %6555 = vperm.xlu0 %10801, %v11253_v48  }
 0xe9d   :  { %v10002_v59 = vpop.f32.mrb[240].mxu0  ;;  %v6416_v35 = vadd.f32 1.0, %v11255_v49  ;;  %v10112_v43 = vpop.f32.mrb[235].mxu1 }
 0xe9e   :  { %v10003_v6 = vpop.f32.mrb[241].mxu0  ;;  %v11257_v26 = vpop.eup %11256  ;;  %v6252_v7 = vadd.f32 %v10110_v53, %v9998_v42  ;;  %v10113_v11 = vadd.f32 %v10112_v43, %v10111_v14 }
 0xe9f   :  { %v10004_v21 = vadd.f32 %v10003_v6, %v10002_v59  ;;  %v10005_v57 = vpop.f32.mrb[242].mxu0  ;;  %11266 = vrcp.f32 %v6416_v35  ;;  %v6417_v13 = vadd.f32 1.0, %v11257_v26 }
 0xea0   :  { %v10006_v56 = vpop.f32.mrb[243].mxu0  ;;  %v9420_v38 = vmul.f32 -1.442695, %v6252_v7  ;;  %v6255_v60 = vadd.f32 %v10113_v11, %v10001_v55 }
 0xea1   :  { %v10007_v54 = vadd.f32 %v10006_v56, %v10005_v57  ;;  %v11259_v62 = vpop.eup %11258  ;;  %11268 = vrcp.f32 %v6417_v13 }
 0xea2   :  { %11270 = vpow2.f32 %v9420_v38  ;;  %v9421_v50 = vmul.f32 -1.442695, %v6255_v60  ;;  %v10114_v8 = vpop.f32.mrb[236].mxu1  ;;  %6560 = vperm.xlu1 %10802, %v11259_v62  }
 0xea3   :  { %v11261_v25 = vpop.eup %11260  ;;  %v10115_v40 = vpop.f32.mrb[237].mxu1 }
 0xea4   :  { %v11263_v44 = vpop.eup %11262  ;;  %11272 = vpow2.f32 %v9421_v50  ;;  %v10116_v42 = vadd.f32 %v10115_v40, %v10114_v8  ;;  %v10117_v24 = vpop.f32.mrb[238].mxu1  ;;  %6565 = vperm.xlu0 %10801, %v11261_v25  }
 0xea5   :  { %v10008_v48 = vpop.f32.mrb[244].mxu0  ;;  %v6418_v31 = vadd.f32 1.0, %v11263_v44  ;;  %v10118_v49 = vpop.f32.mrb[239].mxu1 }
 0xea6   :  { %v10009_v53 = vpop.f32.mrb[245].mxu0  ;;  %v11265_v14 = vpop.eup %11264  ;;  %v6260_v55 = vadd.f32 %v10116_v42, %v10004_v21  ;;  %v10119_v59 = vadd.f32 %v10118_v49, %v10117_v24 }
 0xea7   :  { %v10010_v35 = vadd.f32 %v10009_v53, %v10008_v48  ;;  %v10011_v43 = vpop.f32.mrb[246].mxu0  ;;  %11274 = vrcp.f32 %v6418_v31  ;;  %v6419_v6 = vadd.f32 1.0, %v11265_v14 }
 0xea8   :  { %v10012_v26 = vpop.f32.mrb[247].mxu0  ;;  %v9422_v7 = vmul.f32 -1.442695, %v6260_v55  ;;  %v6263_v11 = vadd.f32 %v10119_v59, %v10007_v54 }
 0xea9   :  { %v10013_v57 = vadd.f32 %v10012_v26, %v10011_v43  ;;  %v11267_v13 = vpop.eup %11266  ;;  %11276 = vrcp.f32 %v6419_v6 }
 0xeaa   :  { %11278 = vpow2.f32 %v9422_v7  ;;  %v9423_v56 = vmul.f32 -1.442695, %v6263_v11  ;;  %v10120_v38 = vpop.f32.mrb[240].mxu1  ;;  %6570 = vperm.xlu1 %10802, %v11267_v13  }
 0xeab   :  { %v11269_v60 = vpop.eup %11268  ;;  %v10121_v62 = vpop.f32.mrb[241].mxu1 }
 0xeac   :  { %v11271_v50 = vpop.eup %11270  ;;  %11280 = vpow2.f32 %v9423_v56  ;;  %v10122_v21 = vadd.f32 %v10121_v62, %v10120_v38  ;;  %v10123_v8 = vpop.f32.mrb[242].mxu1  ;;  %6575 = vperm.xlu0 %10801, %v11269_v60  }
 0xead   :  { %v10014_v25 = vpop.f32.mrb[248].mxu0  ;;  %v6420_v40 = vadd.f32 1.0, %v11271_v50  ;;  %v10124_v44 = vpop.f32.mrb[243].mxu1 }
 0xeae   :  { %v10015_v42 = vpop.f32.mrb[249].mxu0  ;;  %v11273_v24 = vpop.eup %11272  ;;  %v6268_v54 = vadd.f32 %v10122_v21, %v10010_v35  ;;  %v10125_v48 = vadd.f32 %v10124_v44, %v10123_v8 }
 0xeaf   :  { %v10016_v31 = vadd.f32 %v10015_v42, %v10014_v25  ;;  %v10017_v49 = vpop.f32.mrb[250].mxu0  ;;  %11282 = vrcp.f32 %v6420_v40  ;;  %v6421_v53 = vadd.f32 1.0, %v11273_v24 }
 0xeb0   :  { %v10018_v14 = vpop.f32.mrb[251].mxu0  ;;  %v9424_v55 = vmul.f32 -1.442695, %v6268_v54  ;;  %v6271_v59 = vadd.f32 %v10125_v48, %v10013_v57 }
 0xeb1   :  { %v10019_v43 = vadd.f32 %v10018_v14, %v10017_v49  ;;  %v11275_v6 = vpop.eup %11274  ;;  %11284 = vrcp.f32 %v6421_v53 }
 0xeb2   :  { %11286 = vpow2.f32 %v9424_v55  ;;  %v9425_v26 = vmul.f32 -1.442695, %v6271_v59  ;;  %v10126_v7 = vpop.f32.mrb[244].mxu1  ;;  %6580 = vperm.xlu1 %10802, %v11275_v6  }
 0xeb3   :  { %v11277_v11 = vpop.eup %11276  ;;  %v10127_v13 = vpop.f32.mrb[245].mxu1 }
 0xeb4   :  { %v11279_v56 = vpop.eup %11278  ;;  %11288 = vpow2.f32 %v9425_v26  ;;  %v10128_v35 = vadd.f32 %v10127_v13, %v10126_v7  ;;  %v10129_v38 = vpop.f32.mrb[246].mxu1  ;;  %6585 = vperm.xlu0 %10801, %v11277_v11  }
 0xeb5   :  { %v10020_v60 = vpop.f32.mrb[252].mxu0  ;;  %v6422_v62 = vadd.f32 1.0, %v11279_v56  ;;  %v10130_v50 = vpop.f32.mrb[247].mxu1 }
 0xeb6   :  { %v10021_v21 = vpop.f32.mrb[253].mxu0  ;;  %v11281_v8 = vpop.eup %11280  ;;  %v6276_v57 = vadd.f32 %v10128_v35, %v10016_v31  ;;  %v10131_v25 = vadd.f32 %v10130_v50, %v10129_v38 }
 0xeb7   :  { %v10022_v40 = vadd.f32 %v10021_v21, %v10020_v60  ;;  %v10023_v44 = vpop.f32.mrb[254].mxu0  ;;  %11290 = vrcp.f32 %v6422_v62  ;;  %v6423_v42 = vadd.f32 1.0, %v11281_v8 }
 0xeb8   :  { %v10024_v24 = vpop.f32.mrb[255].mxu0  ;;  %v9426_v54 = vmul.f32 -1.442695, %v6276_v57  ;;  %v6279_v48 = vadd.f32 %v10131_v25, %v10019_v43 }
 0xeb9   :  { %v10025_v49 = vadd.f32 %v10024_v24, %v10023_v44  ;;  %v11283_v53 = vpop.eup %11282  ;;  %11292 = vrcp.f32 %v6423_v42 }
 0xeba   :  { %11294 = vpow2.f32 %v9426_v54  ;;  %v9427_v14 = vmul.f32 -1.442695, %v6279_v48  ;;  %v10132_v55 = vpop.f32.mrb[248].mxu1  ;;  %6590 = vperm.xlu1 %10802, %v11283_v53  }
 0xebb   :  { %v11285_v59 = vpop.eup %11284  ;;  %v10133_v6 = vpop.f32.mrb[249].mxu1 }
 0xebc   :  { %v11287_v26 = vpop.eup %11286  ;;  %11296 = vpow2.f32 %v9427_v14  ;;  %v10134_v31 = vadd.f32 %v10133_v6, %v10132_v55  ;;  %v10135_v7 = vpop.f32.mrb[250].mxu1  ;;  %6595 = vperm.xlu0 %10801, %v11285_v59  }
 0xebd   :  { %v10026_v11 = vpop.f32.mrb[0].mxu0  ;;  %v6424_v13 = vadd.f32 1.0, %v11287_v26  ;;  %v10136_v56 = vpop.f32.mrb[251].mxu1 }
 0xebe   :  { %v10027_v35 = vpop.f32.mrb[1].mxu0  ;;  %v11289_v38 = vpop.eup %11288  ;;  %v6284_v43 = vadd.f32 %v10134_v31, %v10022_v40  ;;  %v10137_v60 = vadd.f32 %v10136_v56, %v10135_v7 }
 0xebf   :  { %v10028_v62 = vadd.f32 %v10027_v35, %v10026_v11  ;;  %v10029_v50 = vpop.f32.mrb[2].mxu0  ;;  %11298 = vrcp.f32 %v6424_v13  ;;  %v6425_v21 = vadd.f32 1.0, %v11289_v38 }
 0xec0   :  { %v10030_v8 = vpop.f32.mrb[3].mxu0  ;;  %v9428_v57 = vmul.f32 -1.442695, %v6284_v43  ;;  %v6287_v25 = vadd.f32 %v10137_v60, %v10025_v49 }
 0xec1   :  { %v10031_v44 = vadd.f32 %v10030_v8, %v10029_v50  ;;  %v11291_v42 = vpop.eup %11290  ;;  %11300 = vrcp.f32 %v6425_v21 }
 0xec2   :  { %11302 = vpow2.f32 %v9428_v57  ;;  %v9429_v24 = vmul.f32 -1.442695, %v6287_v25  ;;  %v10138_v54 = vpop.f32.mrb[252].mxu1  ;;  %6600 = vperm.xlu1 %10802, %v11291_v42  }
 0xec3   :  { %v11293_v48 = vpop.eup %11292  ;;  %v10139_v53 = vpop.f32.mrb[253].mxu1 }
 0xec4   :  { %v11295_v14 = vpop.eup %11294  ;;  %11304 = vpow2.f32 %v9429_v24  ;;  %v10140_v40 = vadd.f32 %v10139_v53, %v10138_v54  ;;  %v10141_v55 = vpop.f32.mrb[254].mxu1  ;;  %6605 = vperm.xlu0 %10801, %v11293_v48  }
 0xec5   :  { %v10032_v59 = vpop.f32.mrb[4].mxu0  ;;  %v6426_v6 = vadd.f32 1.0, %v11295_v14  ;;  %v10142_v26 = vpop.f32.mrb[255].mxu1 }
 0xec6   :  { %v10033_v31 = vpop.f32.mrb[5].mxu0  ;;  %v11297_v7 = vpop.eup %11296  ;;  %v6292_v49 = vadd.f32 %v10140_v40, %v10028_v62  ;;  %v10143_v11 = vadd.f32 %v10142_v26, %v10141_v55 }
 0xec7   :  { %v10034_v13 = vadd.f32 %v10033_v31, %v10032_v59  ;;  %v10035_v56 = vpop.f32.mrb[6].mxu0  ;;  %11306 = vrcp.f32 %v6426_v6  ;;  %v6427_v35 = vadd.f32 1.0, %v11297_v7 }
 0xec8   :  { %v10036_v38 = vpop.f32.mrb[7].mxu0  ;;  %v9430_v43 = vmul.f32 -1.442695, %v6292_v49  ;;  %v6295_v60 = vadd.f32 %v10143_v11, %v10031_v44 }
 0xec9   :  { %v10037_v50 = vadd.f32 %v10036_v38, %v10035_v56  ;;  %v11299_v21 = vpop.eup %11298  ;;  %11308 = vrcp.f32 %v6427_v35 }
 0xeca   :  { %11310 = vpow2.f32 %v9430_v43  ;;  %v9431_v8 = vmul.f32 -1.442695, %v6295_v60  ;;  %v10144_v57 = vpop.f32.mrb[0].mxu1  ;;  %6610 = vperm.xlu1 %10802, %v11299_v21  }
 0xecb   :  { %v11301_v25 = vpop.eup %11300  ;;  %v10145_v42 = vpop.f32.mrb[1].mxu1 }
 0xecc   :  { %v11303_v24 = vpop.eup %11302  ;;  %11312 = vpow2.f32 %v9431_v8  ;;  %v10146_v62 = vadd.f32 %v10145_v42, %v10144_v57  ;;  %v10147_v54 = vpop.f32.mrb[2].mxu1  ;;  %6615 = vperm.xlu0 %10801, %v11301_v25  }
 0xecd   :  { %v6428_v48 = vadd.f32 1.0, %v11303_v24  ;;  %v10148_v53 = vpop.f32.mrb[3].mxu1 }
 0xece   :  { %v11305_v14 = vpop.eup %11304  ;;  %v6300_v40 = vadd.f32 %v10146_v62, %v10034_v13  ;;  %v10149_v55 = vadd.f32 %v10148_v53, %v10147_v54 }
 0xecf   :  { %11314 = vrcp.f32 %v6428_v48  ;;  %v6429_v44 = vadd.f32 1.0, %v11305_v14 }
 0xed0   :  { %v9432_v59 = vmul.f32 -1.442695, %v6300_v40  ;;  %v6303_v6 = vadd.f32 %v10149_v55, %v10037_v50 }
 0xed1   :  { %v11307_v26 = vpop.eup %11306  ;;  %11316 = vrcp.f32 %v6429_v44 }
 0xed2   :  { %11318 = vpow2.f32 %v9432_v59  ;;  %v9433_v31 = vmul.f32 -1.442695, %v6303_v6  ;;  %6620 = vperm.xlu1 %10802, %v11307_v26  }
 0xed3   :  { %v11309_v7 = vpop.eup %11308 }
 0xed4   :  { %v11311_v49 = vpop.eup %11310  ;;  %11320 = vpow2.f32 %v9433_v31  ;;  %6625 = vperm.xlu0 %10801, %v11309_v7  }
 0xed5   :  { %v6430_v11 = vadd.f32 1.0, %v11311_v49 }
 0xed6   :  { %v11313_v56 = vpop.eup %11312 }
 0xed7   :  { %11322 = vrcp.f32 %v6430_v11  ;;  %v6431_v35 = vadd.f32 1.0, %v11313_v56 }
 0xed9   :  { %v11315_v38 = vpop.eup %11314  ;;  %11324 = vrcp.f32 %v6431_v35 }
 0xeda   :  { %6630 = vperm.xlu1 %10802, %v11315_v38  }
 0xedb   :  { %v11317_v13 = vpop.eup %11316 }
 0xedc   :  { %v11319_v43 = vpop.eup %11318  ;;  %6635 = vperm.xlu0 %10801, %v11317_v13  }
 0xedd   :  { %v6432_v60 = vadd.f32 1.0, %v11319_v43 }
 0xede   :  { %v11321_v50 = vpop.eup %11320 }
 0xedf   :  { %11326 = vrcp.f32 %v6432_v60  ;;  %v6433_v21 = vadd.f32 1.0, %v11321_v50 }
 0xee1   :  { %v11323_v8 = vpop.eup %11322  ;;  %11328 = vrcp.f32 %v6433_v21 }
 0xee2   :  { %6640 = vperm.xlu1 %10802, %v11323_v8  }
 0xee3   :  { %v11325_v57 = vpop.eup %11324 }
 0xee4   :  { %6645 = vperm.xlu0 %10801, %v11325_v57  }
 0xee9   :  { %v11327_v25 = vpop.eup %11326 }
 0xeea   :  { %6650 = vperm.xlu1 %10802, %v11327_v25  }
 0xeeb   :  { %v11329_v42 = vpop.eup %11328 }
 0xeec   :  { %6655 = vperm.xlu0 %10801, %v11329_v42  }
 0xef1   :  { %v6501_v24 = vpop.permute.xlu0 %6500 }
 0xef2   :  { %v6658_v62 = vmul.f32 %v6501_v24, %v14108_v0 }
 0xef3   :  { %v6506_v54 = vpop.permute.xlu1 %6505 }
 0xef4   :  { %6691 = vst.msk [vmem:[#allocation2 + $0x100] sm:$0xff] %vm699_vm2, %v6658_v62  ;;  %v6659_v48 = vmul.f32 %v6506_v54, %v14104_v52 }
 0xef6   :  { %6692 = vst.msk [vmem:[#allocation2 + $0x108] sm:$0xff] %vm699_vm2, %v6659_v48  ;;  %v6723_v53 = vpack.c.bf16 %v6659_v48, %v6658_v62 }
 0xef8   :  { %10567 = vmatprep.mubr.msk.bf16.mxu0 %vm699_vm2, %v6723_v53  ;;  %10603 = vmatprep.mubr.msk.bf16.mxu1 %vm699_vm2, %v6723_v53 }
 0xef9   :  { %v6511_v14 = vpop.permute.xlu1 %6510 }
 0xefa   :  { %v6660_v40 = vmul.f32 %v6511_v14, %v14140_v30 }
 0xefb   :  { %v6516_v55 = vpop.permute.xlu0 %6515 }
 0xefc   :  { %6693 = vst.msk [vmem:[#allocation2 + $0x110] sm:$0xff] %vm699_vm2, %v6660_v40  ;;  %v6661_v0 = vmul.f32 %v6516_v55, %v14136_v39 }
 0xefe   :  { %6694 = vst.msk [vmem:[#allocation2 + $0x118] sm:$0xff] %vm699_vm2, %v6661_v0  ;;  %v6724_v44 = vpack.c.bf16 %v6661_v0, %v6660_v40 }
 0xf00   :  { %10568 = vmatmul.mubr.msk.bf16.vlgmr.msra.gmra.mrb[8].mxu0 %vm699_vm2, %v6724_v44  ;;  %10604 = vmatmul.mubr.msk.bf16.vlgmr.msra.gmra.mrb[4].mxu1 %vm699_vm2, %v6724_v44 }
 0xf01   :  { %v6521_v52 = vpop.permute.xlu1 %6520 }
 0xf02   :  { %v6662_v59 = vmul.f32 %v6521_v52, %v14172_v46 }
 0xf03   :  { %v6526_v6 = vpop.permute.xlu0 %6525 }
 0xf04   :  { %6695 = vst.msk [vmem:[#allocation2 + $0x120] sm:$0xff] %vm699_vm2, %v6662_v59  ;;  %v6663_v30 = vmul.f32 %v6526_v6, %v14168_v15 }
 0xf06   :  { %6696 = vst.msk [vmem:[#allocation2 + $0x128] sm:$0xff] %vm699_vm2, %v6663_v30  ;;  %v6725_v26 = vpack.c.bf16 %v6663_v30, %v6662_v59 }
 0xf08   :  { %10571 = vmatprep.mubr.msk.bf16.mxu0 %vm699_vm2, %v6725_v26  ;;  %10607 = vmatprep.mubr.msk.bf16.mxu1 %vm699_vm2, %v6725_v26 }
 0xf09   :  { %v6531_v39 = vpop.permute.xlu1 %6530 }
 0xf0a   :  { %v6664_v31 = vmul.f32 %v6531_v39, %v14204_v9 }
 0xf0b   :  { %v6536_v7 = vpop.permute.xlu0 %6535 }
 0xf0c   :  { %6697 = vst.msk [vmem:[#allocation2 + $0x130] sm:$0xff] %vm699_vm2, %v6664_v31  ;;  %v6665_v46 = vmul.f32 %v6536_v7, %v14200_v33 }
 0xf0e   :  { %6698 = vst.msk [vmem:[#allocation2 + $0x138] sm:$0xff] %vm699_vm2, %v6665_v46  ;;  %v6726_v49 = vpack.c.bf16 %v6665_v46, %v6664_v31 }
 0xf10   :  { %10572 = vmatmul.mubr.msk.bf16.gmra.mrb[12].mxu0 %vm699_vm2, %v6726_v49  ;;  %10608 = vmatmul.mubr.msk.bf16.gmra.mrb[8].mxu1 %vm699_vm2, %v6726_v49 }
 0xf11   :  { %v6541_v15 = vpop.permute.xlu1 %6540 }
 0xf12   :  { %v6666_v11 = vmul.f32 %v6541_v15, %v14236_v34 }
 0xf13   :  { %v6546_v56 = vpop.permute.xlu0 %6545 }
 0xf14   :  { %6699 = vst.msk [vmem:[#allocation2 + $0x140] sm:$0xff] %vm699_vm2, %v6666_v11  ;;  %v6667_v9 = vmul.f32 %v6546_v56, %v14232_v5 }
 0xf16   :  { %6700 = vst.msk [vmem:[#allocation2 + $0x148] sm:$0xff] %vm699_vm2, %v6667_v9  ;;  %v6727_v35 = vpack.c.bf16 %v6667_v9, %v6666_v11 }
 0xf18   :  { %10575 = vmatprep.mubr.msk.bf16.mxu0 %vm699_vm2, %v6727_v35  ;;  %10611 = vmatprep.mubr.msk.bf16.mxu1 %vm699_vm2, %v6727_v35  ;;  %v14667_v35 = vld [vmem:[%s15558_s9] ss:$0 sm:$0xff] }
 0xf19   :  { %v6551_v33 = vpop.permute.xlu1 %6550 }
 0xf1a   :  { %v6668_v38 = vmul.f32 %v6551_v33, %v14268_v10 }
 0xf1b   :  { %v6556_v13 = vpop.permute.xlu0 %6555 }
 0xf1c   :  { %6701 = vst.msk [vmem:[#allocation2 + $0x150] sm:$0xff] %vm699_vm2, %v6668_v38  ;;  %v6669_v34 = vmul.f32 %v6556_v13, %v14264_v17 }
 0xf1e   :  { %6702 = vst.msk [vmem:[#allocation2 + $0x158] sm:$0xff] %vm699_vm2, %v6669_v34  ;;  %v6728_v43 = vpack.c.bf16 %v6669_v34, %v6668_v38 }
 0xf20   :  { %10576 = vmatmul.mubr.msk.bf16.gmra.mrb[16].mxu0 %vm699_vm2, %v6728_v43  ;;  %10612 = vmatmul.mubr.msk.bf16.gmra.mrb[16].mxu1 %vm699_vm2, %v6728_v43 }
 0xf21   :  { %v6561_v5 = vpop.permute.xlu1 %6560 }
 0xf22   :  { %v6670_v60 = vmul.f32 %v6561_v5, %v14300_v23 }
 0xf23   :  { %v6566_v50 = vpop.permute.xlu0 %6565 }
 0xf24   :  { %6703 = vst.msk [vmem:[#allocation2 + $0x160] sm:$0xff] %vm699_vm2, %v6670_v60  ;;  %v6671_v10 = vmul.f32 %v6566_v50, %v14296_v47 }
 0xf26   :  { %6704 = vst.msk [vmem:[#allocation2 + $0x168] sm:$0xff] %vm699_vm2, %v6671_v10  ;;  %v6729_v21 = vpack.c.bf16 %v6671_v10, %v6670_v60 }
 0xf28   :  { %10579 = vmatprep.mubr.msk.bf16.mxu0 %vm699_vm2, %v6729_v21  ;;  %10615 = vmatprep.mubr.msk.bf16.mxu1 %vm699_vm2, %v6729_v21 }
 0xf29   :  { %v6571_v17 = vpop.permute.xlu1 %6570 }
 0xf2a   :  { %v6672_v8 = vmul.f32 %v6571_v17, %v14332_v12 }
 0xf2b   :  { %v6576_v57 = vpop.permute.xlu0 %6575 }
 0xf2c   :  { %6705 = vst.msk [vmem:[#allocation2 + $0x170] sm:$0xff] %vm699_vm2, %v6672_v8  ;;  %v6673_v23 = vmul.f32 %v6576_v57, %v14328_v61 }
 0xf2e   :  { %6706 = vst.msk [vmem:[#allocation2 + $0x178] sm:$0xff] %vm699_vm2, %v6673_v23  ;;  %v6730_v25 = vpack.c.bf16 %v6673_v23, %v6672_v8 }
 0xf30   :  { %10580 = vmatmul.mubr.msk.bf16.gmra.mrb[20].mxu0 %vm699_vm2, %v6730_v25  ;;  %10616 = vmatmul.mubr.msk.bf16.gmra.mrb[20].mxu1 %vm699_vm2, %v6730_v25 }
 0xf31   :  { %v6581_v47 = vpop.permute.xlu1 %6580 }
 0xf32   :  { %v6674_v42 = vmul.f32 %v6581_v47, %v14096_v16 }
 0xf33   :  { %v6586_v24 = vpop.permute.xlu0 %6585 }
 0xf34   :  { %6707 = vst.msk [vmem:[#allocation2 + $0x180] sm:$0xff] %vm699_vm2, %v6674_v42  ;;  %v6675_v12 = vmul.f32 %v6586_v24, %v14092_v32 }
 0xf36   :  { %6708 = vst.msk [vmem:[#allocation2 + $0x188] sm:$0xff] %vm699_vm2, %v6675_v12  ;;  %v6731_v62 = vpack.c.bf16 %v6675_v12, %v6674_v42 }
 0xf38   :  { %10583 = vmatprep.mubr.msk.bf16.mxu0 %vm699_vm2, %v6731_v62  ;;  %10619 = vmatprep.mubr.msk.bf16.mxu1 %vm699_vm2, %v6731_v62 }
 0xf39   :  { %v6591_v61 = vpop.permute.xlu1 %6590 }
 0xf3a   :  { %v6676_v54 = vmul.f32 %v6591_v61, %v14128_v1 }
 0xf3b   :  { %v6596_v48 = vpop.permute.xlu0 %6595 }
 0xf3c   :  { %6709 = vst.msk [vmem:[#allocation2 + $0x190] sm:$0xff] %vm699_vm2, %v6676_v54  ;;  %v6677_v16 = vmul.f32 %v6596_v48, %v14124_v2 }
 0xf3e   :  { %6710 = vst.msk [vmem:[#allocation2 + $0x198] sm:$0xff] %vm699_vm2, %v6677_v16  ;;  %v6732_v53 = vpack.c.bf16 %v6677_v16, %v6676_v54 }
 0xf40   :  { %10584 = vmatmul.mubr.msk.bf16.gmra.mrb[24].mxu0 %vm699_vm2, %v6732_v53  ;;  %10620 = vmatmul.mubr.msk.bf16.gmra.mrb[24].mxu1 %vm699_vm2, %v6732_v53 }
 0xf41   :  { %v6601_v32 = vpop.permute.xlu1 %6600 }
 0xf42   :  { %v6678_v14 = vmul.f32 %v6601_v32, %v14160_v4 }
 0xf43   :  { %v6606_v40 = vpop.permute.xlu0 %6605 }
 0xf44   :  { %6711 = vst.msk [vmem:[#allocation2 + $0x1a0] sm:$0xff] %vm699_vm2, %v6678_v14  ;;  %v6679_v1 = vmul.f32 %v6606_v40, %v14156_v3 }
 0xf46   :  { %6712 = vst.msk [vmem:[#allocation2 + $0x1a8] sm:$0xff] %vm699_vm2, %v6679_v1  ;;  %v6733_v55 = vpack.c.bf16 %v6679_v1, %v6678_v14 }
 0xf48   :  { %10587 = vmatprep.mubr.msk.bf16.mxu0 %vm699_vm2, %v6733_v55  ;;  %10623 = vmatprep.mubr.msk.bf16.mxu1 %vm699_vm2, %v6733_v55 }
 0xf49   :  { %v6611_v2 = vpop.permute.xlu1 %6610 }
 0xf4a   :  { %v6680_v0 = vmul.f32 %v6611_v2, %v14192_v51 }
 0xf4b   :  { %v6616_v44 = vpop.permute.xlu0 %6615 }
 0xf4c   :  { %6713 = vst.msk [vmem:[#allocation2 + $0x1b0] sm:$0xff] %vm699_vm2, %v6680_v0  ;;  %v6681_v4 = vmul.f32 %v6616_v44, %v14188_v20 }
 0xf4e   :  { %6714 = vst.msk [vmem:[#allocation2 + $0x1b8] sm:$0xff] %vm699_vm2, %v6681_v4  ;;  %v6734_v52 = vpack.c.bf16 %v6681_v4, %v6680_v0 }
 0xf50   :  { %10588 = vmatmul.mubr.msk.bf16.gmra.mrb[28].mxu0 %vm699_vm2, %v6734_v52  ;;  %10624 = vmatmul.mubr.msk.bf16.gmra.mrb[28].mxu1 %vm699_vm2, %v6734_v52 }
 0xf51   :  { %v6621_v3 = vpop.permute.xlu1 %6620 }
 0xf52   :  { %v6682_v59 = vmul.f32 %v6621_v3, %v14224_v63 }
 0xf53   :  { %v6626_v6 = vpop.permute.xlu0 %6625 }
 0xf54   :  { %6715 = vst.msk [vmem:[#allocation2 + $0x1c0] sm:$0xff] %vm699_vm2, %v6682_v59  ;;  %v6683_v51 = vmul.f32 %v6626_v6, %v14220_v19 }
 0xf56   :  { %6716 = vst.msk [vmem:[#allocation2 + $0x1c8] sm:$0xff] %vm699_vm2, %v6683_v51  ;;  %v6735_v30 = vpack.c.bf16 %v6683_v51, %v6682_v59 }
 0xf58   :  { %10591 = vmatprep.mubr.msk.bf16.mxu0 %vm699_vm2, %v6735_v30  ;;  %10627 = vmatprep.mubr.msk.bf16.mxu1 %vm699_vm2, %v6735_v30 }
 0xf59   :  { %v6631_v20 = vpop.permute.xlu1 %6630 }
 0xf5a   :  { %v6684_v26 = vmul.f32 %v6631_v20, %v14256_v58 }
 0xf5b   :  { %v6636_v39 = vpop.permute.xlu0 %6635 }
 0xf5c   :  { %6717 = vst.msk [vmem:[#allocation2 + $0x1d0] sm:$0xff] %vm699_vm2, %v6684_v26  ;;  %v6685_v63 = vmul.f32 %v6636_v39, %v14252_v37 }
 0xf5e   :  { %6718 = vst.msk [vmem:[#allocation2 + $0x1d8] sm:$0xff] %vm699_vm2, %v6685_v63  ;;  %v6736_v31 = vpack.c.bf16 %v6685_v63, %v6684_v26 }
 0xf60   :  { %10592 = vmatmul.mubr.msk.bf16.gmra.mrb[32].mxu0 %vm699_vm2, %v6736_v31  ;;  %10628 = vmatmul.mubr.msk.bf16.gmra.mrb[32].mxu1 %vm699_vm2, %v6736_v31 }
 0xf61   :  { %v6641_v19 = vpop.permute.xlu1 %6640 }
 0xf62   :  { %v6686_v7 = vmul.f32 %v6641_v19, %v14288_v18 }
 0xf63   :  { %v6646_v46 = vpop.permute.xlu0 %6645 }
 0xf64   :  { %6719 = vst.msk [vmem:[#allocation2 + $0x1e0] sm:$0xff] %vm699_vm2, %v6686_v7  ;;  %v6687_v58 = vmul.f32 %v6646_v46, %v14284_v29  ;;  %v14651_v29 = vld [vmem:[%s15565_s16 + $0x4] ss:$8 sps:$4 sm:$0xff]  }
 0xf66   :  { %6720 = vst.msk [vmem:[#allocation2 + $0x1e8] sm:$0xff] %vm699_vm2, %v6687_v58  ;;  %v6737_v49 = vpack.c.bf16 %v6687_v58, %v6686_v7 }
 0xf68   :  { %10595 = vmatprep.mubr.msk.bf16.mxu0 %vm699_vm2, %v6737_v49  ;;  %10631 = vmatprep.mubr.msk.bf16.mxu1 %vm699_vm2, %v6737_v49 }
 0xf69   :  { %v6651_v37 = vpop.permute.xlu1 %6650 }
 0xf6a   :  { %v6688_v15 = vmul.f32 %v6651_v37, %v14320_v27  ;;  %v11333_v27 = vld [vmem:[%s15565_s16 + $0x44] ss:$8 sps:$4 sm:$0xff]  }
 0xf6b   :  { %v6656_v11 = vpop.permute.xlu0 %6655 }
 0xf6c   :  { %6721 = vst.msk [vmem:[#allocation2 + $0x1f0] sm:$0xff] %vm699_vm2, %v6688_v15  ;;  %v6689_v18 = vmul.f32 %v6656_v11, %v14316_v28  ;;  %v14662_v28 = vld [vmem:[%s15560_s11] ss:$0 sm:$0xff] }
 0xf6e   :  { %6722 = vst.msk [vmem:[#allocation2 + $0x1f8] sm:$0xff] %vm699_vm2, %v6689_v18  ;;  %v6738_v56 = vpack.c.bf16 %v6689_v18, %v6688_v15 }
 0xf70   :  { %10596 = vmatmul.mubr.msk.bf16.gmra.mrb[36].mxu0 %vm699_vm2, %v6738_v56  ;;  %10632 = vmatmul.mubr.msk.bf16.gmra.mrb[36].mxu1 %vm699_vm2, %v6738_v56 }
 0xf71   :  { %9472 = vmatprep.mubr.msk.bf16.mxu0 %vm3702_vm5, %v14651_v29  ;;  %9476 = vmatprep.mubr.msk.bf16.mxu1 %vm3702_vm5, %v11333_v27 }
 0xfd3   :  { %v10569_v9 = vpop.f32.mrb[8].mxu0  ;;  %v10605_v33 = vpop.f32.mrb[4].mxu1 }
 0xfd4   :  { %v7037_v38 = vadd.f32 %v10605_v33, %v14662_v28  ;;  %v6844_v13 = vpop.f32.mrb[9].mxu0  ;;  %v7028_v34 = vpop.f32.mrb[5].mxu1  ;;  %v14672_v50 = vadd.f32 %v10569_v9, %v14667_v35 }
 0xfd5   :  { %v7029_v43 = vadd.f32 %v14662_v28, %v7028_v34  ;;  %v10570_v5 = vpop.f32.mrb[10].mxu0  ;;  %v10606_v60 = vpop.f32.mrb[6].mxu1  ;;  %v14679_v57 = vadd.f32 %v14667_v35, %v6844_v13 }
 0xfd6   :  { %v14675_v10 = vadd.f32 %v10570_v5, %v14667_v35  ;;  %v7040_v21 = vadd.f32 %v10606_v60, %v14662_v28  ;;  %v6847_v17 = vpop.f32.mrb[11].mxu0  ;;  %v7031_v8 = vpop.f32.mrb[7].mxu1 }
 0xfd7   :  { %v7155_v23 = vmax.f32 %v7029_v43, %v7037_v38  ;;  %v14682_v25 = vadd.f32 %v14667_v35, %v6847_v17  ;;  %v7032_v47 = vadd.f32 %v14662_v28, %v7031_v8 }
 0xfd8   :  { %v7343_v42 = vpack.c.bf16 %v14675_v10, %v14672_v50 }
 0xfd9   :  { %v7342_v24 = vpack.c.bf16 %v14682_v25, %v14679_v57  ;;  %v7156_v12 = vmax.f32 %v7032_v47, %v7040_v21 }
 0xfdb   :  { %v7185_v62 = vpack.c.bf16 %v7156_v12, %v7155_v23 }
 0xfdd   :  { %7201 = vmatpush1.bf16.msra.mxu0 %v7185_v62  ;;  %7266 = vmatpush1.bf16.msra.mxu1 %v7185_v62 }
 0xfde   :  { %7202 = vmatprep.subr.bf16.mxu0 %v15742_v45  ;;  %7267 = vmatprep.subr.bf16.mxu1 %v15742_v45 }
 0xfe3   :  { %v10573_v61 = vpop.f32.mrb[12].mxu0  ;;  %v10609_v54 = vpop.f32.mrb[8].mxu1 }
 0xfe4   :  { %v7053_v48 = vadd.f32 %v10609_v54, %v14662_v28  ;;  %v6860_v16 = vpop.f32.mrb[13].mxu0  ;;  %v7044_v53 = vpop.f32.mrb[9].mxu1  ;;  %v14694_v1 = vadd.f32 %v10573_v61, %v14667_v35 }
 0xfe5   :  { %v7045_v32 = vadd.f32 %v14662_v28, %v7044_v53  ;;  %v10574_v14 = vpop.f32.mrb[14].mxu0  ;;  %v10610_v40 = vpop.f32.mrb[10].mxu1  ;;  %v14697_v55 = vadd.f32 %v14667_v35, %v6860_v16 }
 0xfe6   :  { %v14700_v2 = vadd.f32 %v10574_v14, %v14667_v35  ;;  %v7056_v0 = vadd.f32 %v10610_v40, %v14662_v28  ;;  %v6863_v44 = vpop.f32.mrb[15].mxu0  ;;  %v7047_v4 = vpop.f32.mrb[11].mxu1 }
 0xfe7   :  { %v7157_v52 = vmax.f32 %v7037_v38, %v7045_v32  ;;  %v7159_v3 = vmax.f32 %v7045_v32, %v7053_v48  ;;  %v14704_v59 = vadd.f32 %v14667_v35, %v6863_v44  ;;  %v7048_v6 = vadd.f32 %v14662_v28, %v7047_v4 }
 0xfe8   :  { %v7345_v51 = vpack.c.bf16 %v14700_v2, %v14694_v1 }
 0xfe9   :  { %v7344_v30 = vpack.c.bf16 %v14704_v59, %v14697_v55  ;;  %v7158_v20 = vmax.f32 %v7040_v21, %v7048_v6  ;;  %v7160_v26 = vmax.f32 %v7048_v6, %v7056_v0 }
 0xfeb   :  { %v7186_v39 = vpack.c.bf16 %v7158_v20, %v7157_v52  ;;  %v7187_v63 = vpack.c.bf16 %v7160_v26, %v7159_v3 }
 0xfed   :  { %7203 = vmatpush1.bf16.msra.mxu0 %v7186_v39  ;;  %7268 = vmatpush1.bf16.msra.mxu1 %v7186_v39 }
 0xfee   :  { %7204 = vmatprep.subr.bf16.mxu0 %v15742_v45  ;;  %7269 = vmatprep.subr.bf16.mxu1 %v15742_v45 }
 0xff1   :  { %7205 = vmatpush1.bf16.msra.mxu0 %v7187_v63  ;;  %7270 = vmatpush1.bf16.msra.mxu1 %v7187_v63 }
 0xff2   :  { %7206 = vmatprep.subr.bf16.mxu0 %v15742_v45  ;;  %7271 = vmatprep.subr.bf16.mxu1 %v15742_v45 }
 0xff3   :  { %v10577_v31 = vpop.f32.mrb[16].mxu0  ;;  %v10613_v19 = vpop.f32.mrb[16].mxu1 }
 0xff4   :  { %v7069_v7 = vadd.f32 %v10613_v19, %v14662_v28  ;;  %v6876_v46 = vpop.f32.mrb[17].mxu0  ;;  %v7060_v58 = vpop.f32.mrb[17].mxu1  ;;  %v14718_v11 = vadd.f32 %v10577_v31, %v14667_v35 }
 0xff5   :  { %v7061_v49 = vadd.f32 %v14662_v28, %v7060_v58  ;;  %v10578_v37 = vpop.f32.mrb[18].mxu0  ;;  %v10614_v15 = vpop.f32.mrb[18].mxu1  ;;  %v14721_v18 = vadd.f32 %v14667_v35, %v6876_v46 }
 0xff6   :  { %v14724_v56 = vadd.f32 %v10578_v37, %v14667_v35  ;;  %v7072_v27 = vadd.f32 %v10614_v15, %v14662_v28  ;;  %v6879_v9 = vpop.f32.mrb[19].mxu0  ;;  %v7063_v33 = vpop.f32.mrb[19].mxu1 }
 0xff7   :  { %v7161_v38 = vmax.f32 %v7053_v48, %v7061_v49  ;;  %v7163_v13 = vmax.f32 %v7061_v49, %v7069_v7  ;;  %v14728_v34 = vadd.f32 %v14667_v35, %v6879_v9  ;;  %v7064_v43 = vadd.f32 %v14662_v28, %v7063_v33 }
 0xff8   :  { %v7347_v5 = vpack.c.bf16 %v14724_v56, %v14718_v11 }
 0xff9   :  { %v7346_v60 = vpack.c.bf16 %v14728_v34, %v14721_v18  ;;  %v7162_v21 = vmax.f32 %v7056_v0, %v7064_v43  ;;  %v7164_v17 = vmax.f32 %v7064_v43, %v7072_v27 }
 0xffb   :  { %v7188_v8 = vpack.c.bf16 %v7162_v21, %v7161_v38  ;;  %v7189_v23 = vpack.c.bf16 %v7164_v17, %v7163_v13 }
 0xffd   :  { %7207 = vmatpush1.bf16.msra.mxu0 %v7188_v8  ;;  %7272 = vmatpush1.bf16.msra.mxu1 %v7188_v8 }
 0xffe   :  { %7208 = vmatprep.subr.bf16.mxu0 %v15742_v45  ;;  %7273 = vmatprep.subr.bf16.mxu1 %v15742_v45 }
0x1001   :  { %7209 = vmatpush1.bf16.msra.mxu0 %v7189_v23  ;;  %7274 = vmatpush1.bf16.msra.mxu1 %v7189_v23 }
0x1002   :  { %7210 = vmatprep.subr.bf16.mxu0 %v15742_v45  ;;  %7275 = vmatprep.subr.bf16.mxu1 %v15742_v45 }
0x1003   :  { %v10581_v47 = vpop.f32.mrb[20].mxu0  ;;  %v10617_v12 = vpop.f32.mrb[20].mxu1 }
0x1004   :  { %v7085_v62 = vadd.f32 %v10617_v12, %v14662_v28  ;;  %v6892_v61 = vpop.f32.mrb[21].mxu0  ;;  %v7076_v54 = vpop.f32.mrb[21].mxu1  ;;  %v14742_v32 = vadd.f32 %v10581_v47, %v14667_v35 }
0x1005   :  { %v7077_v48 = vadd.f32 %v14662_v28, %v7076_v54  ;;  %v10582_v16 = vpop.f32.mrb[22].mxu0  ;;  %v10618_v53 = vpop.f32.mrb[22].mxu1  ;;  %v14745_v14 = vadd.f32 %v14667_v35, %v6892_v61 }
0x1006   :  { %v14748_v40 = vadd.f32 %v10582_v16, %v14667_v35  ;;  %v7088_v0 = vadd.f32 %v10618_v53, %v14662_v28  ;;  %v6895_v44 = vpop.f32.mrb[23].mxu0  ;;  %v7079_v4 = vpop.f32.mrb[23].mxu1 }
0x1007   :  { %v7165_v52 = vmax.f32 %v7069_v7, %v7077_v48  ;;  %v7167_v3 = vmax.f32 %v7077_v48, %v7085_v62  ;;  %v14752_v6 = vadd.f32 %v14667_v35, %v6895_v44  ;;  %v7080_v20 = vadd.f32 %v14662_v28, %v7079_v4 }
0x1008   :  { %v7349_v26 = vpack.c.bf16 %v14748_v40, %v14742_v32 }
0x1009   :  { %v7348_v39 = vpack.c.bf16 %v14752_v6, %v14745_v14  ;;  %v7166_v63 = vmax.f32 %v7072_v27, %v7080_v20  ;;  %v7168_v31 = vmax.f32 %v7080_v20, %v7088_v0 }
0x100b   :  { %v7190_v19 = vpack.c.bf16 %v7166_v63, %v7165_v52  ;;  %v7191_v46 = vpack.c.bf16 %v7168_v31, %v7167_v3 }
0x100d   :  { %7211 = vmatpush1.bf16.msra.mxu0 %v7190_v19  ;;  %7276 = vmatpush1.bf16.msra.mxu1 %v7190_v19 }
0x100e   :  { %7212 = vmatprep.subr.bf16.mxu0 %v15742_v45  ;;  %7277 = vmatprep.subr.bf16.mxu1 %v15742_v45 }
0x1011   :  { %7213 = vmatpush1.bf16.msra.mxu0 %v7191_v46  ;;  %7278 = vmatpush1.bf16.msra.mxu1 %v7191_v46 }
0x1012   :  { %7214 = vmatprep.subr.bf16.mxu0 %v15742_v45  ;;  %7279 = vmatprep.subr.bf16.mxu1 %v15742_v45 }
0x1013   :  { %v10585_v7 = vpop.f32.mrb[24].mxu0  ;;  %v10621_v58 = vpop.f32.mrb[24].mxu1 }
0x1014   :  { %v7101_v49 = vadd.f32 %v10621_v58, %v14662_v28  ;;  %v6908_v37 = vpop.f32.mrb[25].mxu0  ;;  %v7092_v15 = vpop.f32.mrb[25].mxu1  ;;  %v14766_v38 = vadd.f32 %v10585_v7, %v14667_v35 }
0x1015   :  { %v7093_v27 = vadd.f32 %v14662_v28, %v7092_v15  ;;  %v10586_v9 = vpop.f32.mrb[26].mxu0  ;;  %v10622_v33 = vpop.f32.mrb[26].mxu1  ;;  %v14769_v13 = vadd.f32 %v14667_v35, %v6908_v37 }
0x1016   :  { %v14772_v43 = vadd.f32 %v10586_v9, %v14667_v35  ;;  %v7104_v21 = vadd.f32 %v10622_v33, %v14662_v28  ;;  %v6911_v17 = vpop.f32.mrb[27].mxu0  ;;  %v7095_v8 = vpop.f32.mrb[27].mxu1 }
0x1017   :  { %v7169_v23 = vmax.f32 %v7085_v62, %v7093_v27  ;;  %v7171_v47 = vmax.f32 %v7093_v27, %v7101_v49  ;;  %v14776_v12 = vadd.f32 %v14667_v35, %v6911_v17  ;;  %v7096_v61 = vadd.f32 %v14662_v28, %v7095_v8 }
0x1018   :  { %v15785_v10 = vpack.c.bf16 %v14772_v43, %v14766_v38 }
0x1019   :  { %v7170_v16 = vmax.f32 %v7088_v0, %v7096_v61  ;;  %v7172_v53 = vmax.f32 %v7096_v61, %v7104_v21  ;;  %v15784_v50 = vpack.c.bf16 %v14776_v12, %v14769_v13 }
0x101b   :  { %v7192_v44 = vpack.c.bf16 %v7170_v16, %v7169_v23  ;;  %v7193_v4 = vpack.c.bf16 %v7172_v53, %v7171_v47 }
0x101d   :  { %7215 = vmatpush1.bf16.msra.mxu0 %v7192_v44  ;;  %7280 = vmatpush1.bf16.msra.mxu1 %v7192_v44 }
0x101e   :  { %7216 = vmatprep.subr.bf16.mxu0 %v15742_v45  ;;  %7281 = vmatprep.subr.bf16.mxu1 %v15742_v45 }
0x1021   :  { %7217 = vmatpush1.bf16.msra.mxu0 %v7193_v4  ;;  %7282 = vmatpush1.bf16.msra.mxu1 %v7193_v4 }
0x1022   :  { %7218 = vmatprep.subr.bf16.mxu0 %v15742_v45  ;;  %7283 = vmatprep.subr.bf16.mxu1 %v15742_v45 }
0x1023   :  { %v10589_v62 = vpop.f32.mrb[28].mxu0  ;;  %v10625_v52 = vpop.f32.mrb[28].mxu1 }
0x1024   :  { %v7117_v3 = vadd.f32 %v10625_v52, %v14662_v28  ;;  %v6924_v0 = vpop.f32.mrb[29].mxu0  ;;  %v7108_v20 = vpop.f32.mrb[29].mxu1  ;;  %v14790_v46 = vadd.f32 %v10589_v62, %v14667_v35 }
0x1025   :  { %v7109_v63 = vadd.f32 %v14662_v28, %v7108_v20  ;;  %v10590_v31 = vpop.f32.mrb[30].mxu0  ;;  %v10626_v19 = vpop.f32.mrb[30].mxu1  ;;  %v14793_v7 = vadd.f32 %v14667_v35, %v6924_v0 }
0x1026   :  { %v14796_v58 = vadd.f32 %v10590_v31, %v14667_v35  ;;  %v7120_v37 = vadd.f32 %v10626_v19, %v14662_v28  ;;  %v6927_v15 = vpop.f32.mrb[31].mxu0  ;;  %v7111_v27 = vpop.f32.mrb[31].mxu1 }
0x1027   :  { %v7173_v9 = vmax.f32 %v7101_v49, %v7109_v63  ;;  %v7175_v33 = vmax.f32 %v7109_v63, %v7117_v3  ;;  %v14800_v17 = vadd.f32 %v14667_v35, %v6927_v15  ;;  %v7112_v8 = vadd.f32 %v14662_v28, %v7111_v27 }
0x1028   :  { %v15787_v1 = vpack.c.bf16 %v14796_v58, %v14790_v46 }
0x1029   :  { %v7174_v61 = vmax.f32 %v7104_v21, %v7112_v8  ;;  %v7176_v16 = vmax.f32 %v7112_v8, %v7120_v37 }
0x102b   :  { %v7194_v53 = vpack.c.bf16 %v7174_v61, %v7173_v9  ;;  %v7195_v44 = vpack.c.bf16 %v7176_v16, %v7175_v33 }
0x102d   :  { %7219 = vmatpush1.bf16.msra.mxu0 %v7194_v53  ;;  %7284 = vmatpush1.bf16.msra.mxu1 %v7194_v53 }
0x102e   :  { %7220 = vmatprep.subr.bf16.mxu0 %v15742_v45  ;;  %7285 = vmatprep.subr.bf16.mxu1 %v15742_v45 }
0x1031   :  { %7221 = vmatpush1.bf16.msra.mxu0 %v7195_v44  ;;  %7286 = vmatpush1.bf16.msra.mxu1 %v7195_v44 }
0x1032   :  { %7222 = vmatprep.subr.bf16.mxu0 %v15742_v45  ;;  %7287 = vmatprep.subr.bf16.mxu1 %v15742_v45 }
0x1033   :  { %v10593_v49 = vpop.f32.mrb[32].mxu0  ;;  %v10629_v4 = vpop.f32.mrb[32].mxu1 }
0x1034   :  { %v7133_v62 = vadd.f32 %v10629_v4, %v14662_v28  ;;  %v6940_v21 = vpop.f32.mrb[33].mxu0  ;;  %v7124_v52 = vpop.f32.mrb[33].mxu1  ;;  %v14814_v31 = vadd.f32 %v10593_v49, %v14667_v35 }
0x1035   :  { %v7125_v0 = vadd.f32 %v14662_v28, %v7124_v52  ;;  %v10594_v20 = vpop.f32.mrb[34].mxu0  ;;  %v10630_v63 = vpop.f32.mrb[34].mxu1  ;;  %v14817_v19 = vadd.f32 %v14667_v35, %v6940_v21 }
0x1036   :  { %v14820_v15 = vadd.f32 %v10594_v20, %v14667_v35  ;;  %v7136_v27 = vadd.f32 %v10630_v63, %v14662_v28  ;;  %v6943_v9 = vpop.f32.mrb[35].mxu0  ;;  %v7127_v33 = vpop.f32.mrb[35].mxu1 }
0x1037   :  { %v7177_v8 = vmax.f32 %v7117_v3, %v7125_v0  ;;  %v7179_v61 = vmax.f32 %v7125_v0, %v7133_v62  ;;  %v14824_v16 = vadd.f32 %v14667_v35, %v6943_v9  ;;  %v7128_v53 = vadd.f32 %v14662_v28, %v7127_v33 }
0x1038   :  { %v15789_v2 = vpack.c.bf16 %v14820_v15, %v14814_v31 }
0x1039   :  { %v7178_v4 = vmax.f32 %v7120_v37, %v7128_v53  ;;  %v7180_v21 = vmax.f32 %v7128_v53, %v7136_v27  ;;  %v15788_v55 = vpack.c.bf16 %v14824_v16, %v14817_v19 }
0x103b   :  { %v7196_v52 = vpack.c.bf16 %v7178_v4, %v7177_v8  ;;  %v7197_v20 = vpack.c.bf16 %v7180_v21, %v7179_v61 }
0x103d   :  { %7223 = vmatpush1.bf16.msra.mxu0 %v7196_v52  ;;  %7288 = vmatpush1.bf16.msra.mxu1 %v7196_v52 }
0x103e   :  { %7224 = vmatprep.subr.bf16.mxu0 %v15742_v45  ;;  %7289 = vmatprep.subr.bf16.mxu1 %v15742_v45 }
0x1041   :  { %7225 = vmatpush1.bf16.msra.mxu0 %v7197_v20  ;;  %7290 = vmatpush1.bf16.msra.mxu1 %v7197_v20 }
0x1042   :  { %7226 = vmatprep.subr.bf16.mxu0 %v15742_v45  ;;  %7291 = vmatprep.subr.bf16.mxu1 %v15742_v45 }
0x1043   :  { %v10597_v3 = vpop.f32.mrb[36].mxu0  ;;  %v10633_v0 = vpop.f32.mrb[36].mxu1 }
0x1044   :  { %v7149_v63 = vadd.f32 %v10633_v0, %v14662_v28  ;;  %v6956_v37 = vpop.f32.mrb[37].mxu0  ;;  %v7140_v9 = vpop.f32.mrb[37].mxu1  ;;  %v14838_v53 = vadd.f32 %v10597_v3, %v14667_v35 }
0x1045   :  { %v7141_v33 = vadd.f32 %v14662_v28, %v7140_v9  ;;  %v10598_v8 = vpop.f32.mrb[38].mxu0  ;;  %v10634_v61 = vpop.f32.mrb[38].mxu1  ;;  %v14841_v4 = vadd.f32 %v14667_v35, %v6956_v37 }
0x1046   :  { %v14844_v21 = vadd.f32 %v10598_v8, %v14667_v35  ;;  %v7152_v52 = vadd.f32 %v10634_v61, %v14662_v28  ;;  %v6959_v20 = vpop.f32.mrb[39].mxu0  ;;  %v7143_v44 = vpop.f32.mrb[39].mxu1  ;;  %v11345_v61 = vld [vmem:[%s15565_s16 + $0x74] ss:$8 sps:$4 sm:$0xff]  }
0x1047   :  { %v7181_v0 = vmax.f32 %v7133_v62, %v7141_v33  ;;  %v7183_v49 = vmax.f32 %v7141_v33, %v7149_v63  ;;  %v14848_v23 = vadd.f32 %v14667_v35, %v6959_v20  ;;  %v7144_v9 = vadd.f32 %v14662_v28, %v7143_v44  ;;  %v11334_v28 = vld [vmem:[%s15565_s16] ss:$8 sps:$4 sm:$0xff]   ;;  %v11339_v62 = vld [vmem:[%s15565_s16 + $0x50] ss:$8 sps:$4 sm:$0xff]   ;;  %v11341_v44 = vld [vmem:[%s15565_s16 + $0x64] ss:$8 sps:$4 sm:$0xff]  }
0x1048   :  { %v7357_v3 = vpack.c.bf16 %v14844_v21, %v14838_v53  ;;  %v11335_v35 = vld [vmem:[%s15565_s16 + $0x40] ss:$8 sps:$4 sm:$0xff]   ;;  %v11344_v33 = vld [vmem:[%s15565_s16 + $0x34] ss:$8 sps:$4 sm:$0xff]   ;;  %v11347_v20 = vld [vmem:[%s15565_s16 + $0x70] ss:$8 sps:$4 sm:$0xff]  }
0x1049   :  { %v7356_v37 = vpack.c.bf16 %v14848_v23, %v14841_v4  ;;  %v7182_v47 = vmax.f32 %v7136_v27, %v7144_v9  ;;  %v7184_v8 = vmax.f32 %v7144_v9, %v7152_v52  ;;  %v11340_v27 = vld [vmem:[%s15565_s16 + $0x24] ss:$8 sps:$4 sm:$0xff]   ;;  %v11343_v63 = vld [vmem:[%s15565_s16 + $0x60] ss:$8 sps:$4 sm:$0xff]   ;;  %v11346_v52 = vld [vmem:[%s15565_s16 + $0x30] ss:$8 sps:$4 sm:$0xff]  }
0x104b   :  { %v7198_v54 = vpack.c.bf16 %v7182_v47, %v7181_v0  ;;  %v7199_v48 = vpack.c.bf16 %v7184_v8, %v7183_v49  ;;  %v11338_v47 = vld [vmem:[%s15565_s16 + $0x10] ss:$8 sps:$4 sm:$0xff]   ;;  %v11342_v49 = vld [vmem:[%s15565_s16 + $0x20] ss:$8 sps:$4 sm:$0xff]  }
0x104d   :  { %7227 = vmatpush1.bf16.msra.mxu0 %v7198_v54  ;;  %7292 = vmatpush1.bf16.msra.mxu1 %v7198_v54  ;;  %v11336_v54 = vld [vmem:[%s15565_s16 + $0x14] ss:$8 sps:$4 sm:$0xff]  }
0x104e   :  { %7228 = vmatprep.subr.bf16.mxu0 %v15742_v45  ;;  %7293 = vmatprep.subr.bf16.mxu1 %v15742_v45 }
0x1051   :  { %7229 = vmatpush1.bf16.msra.mxu0 %v7199_v48  ;;  %7294 = vmatpush1.bf16.msra.mxu1 %v7199_v48  ;;  %v11337_v48 = vld [vmem:[%s15565_s16 + $0x54] ss:$8 sps:$4 sm:$0xff]  }
0x1054   :  { %7233 = vmatmul.mubr.bf16.vlgmr.msra.gmra.mrb[40].mxu0 %v11334_v28  ;;  %7298 = vmatmul.mubr.bf16.vlgmr.msra.gmra.mrb[40].mxu1 %v11335_v35 }
0x1055   :  { %9473 = vmatprep.mubr.msk.bf16.mxu0 %vm3702_vm5, %v11336_v54  ;;  %9477 = vmatprep.mubr.msk.bf16.mxu1 %vm3702_vm5, %v11337_v48 }
0x105c   :  { %7241 = vmatmul.mubr.bf16.gmra.mrb[44].mxu0 %v11338_v47  ;;  %7306 = vmatmul.mubr.bf16.gmra.mrb[44].mxu1 %v11339_v62 }
0x105d   :  { %9474 = vmatprep.mubr.msk.bf16.mxu0 %vm3702_vm5, %v11340_v27  ;;  %9478 = vmatprep.mubr.msk.bf16.mxu1 %vm3702_vm5, %v11341_v44 }
0x1064   :  { %7249 = vmatmul.mubr.bf16.gmra.mrb[48].mxu0 %v11342_v49  ;;  %7314 = vmatmul.mubr.bf16.gmra.mrb[48].mxu1 %v11343_v63 }
0x1065   :  { %9475 = vmatprep.mubr.msk.bf16.mxu0 %vm3702_vm5, %v11344_v33  ;;  %9479 = vmatprep.mubr.msk.bf16.mxu1 %vm3702_vm5, %v11345_v61 }
0x106c   :  { %7257 = vmatmul.mubr.bf16.gmra.mrb[52].mxu0 %v11346_v52  ;;  %7322 = vmatmul.mubr.bf16.gmra.mrb[52].mxu1 %v11347_v20 }
0x106d   :  { %10643 = vmatprep.mubr.msk.bf16.mxu0 %vm3921_vm6, %v7342_v24 }
0x1127   :  { %v7234_v0 = vpop.f32.mrb[40].mxu0  ;;  %v7299_v9 = vpop.f32.mrb[40].mxu1 }
0x1128   :  { %v7330_v8 = vmax.f32 %v7234_v0, %v7299_v9  ;;  %v7236_v28 = vpop.f32.mrb[41].mxu0  ;;  %v7301_v35 = vpop.f32.mrb[41].mxu1 }
0x1129   :  { %v7237_v54 = vpop.f32.mrb[42].mxu0  ;;  %v7302_v48 = vpop.f32.mrb[42].mxu1 }
0x112a   :  { %v7331_v47 = vmax.f32 %v7237_v54, %v7302_v48  ;;  %v7239_v62 = vpop.f32.mrb[43].mxu0  ;;  %v7304_v27 = vpop.f32.mrb[43].mxu1 }
0x112c   :  { %v7338_v44 = vpack.c.bf16 %v7331_v47, %v7330_v8 }
0x112e   :  { %10789 = vmatprep.subr.msk.bf16.mxu0 %vm3921_vm6, %v7338_v44  ;;  %v7407_v49 = vsel %vm3921_vm6, %v7338_v44, 0  ;;  %7631 = vrot.lane.b32.xlu1 %v7338_v44, %s11393_s29 }
0x112f   :  { %v7242_v57 = vpop.f32.mrb[44].mxu0  ;;  %v7307_v25 = vpop.f32.mrb[44].mxu1  ;;  %10636 = vmatpush3.bf16.xpose.msra.mxu0 %v7407_v49 }
0x1130   :  { %v7332_v24 = vmax.f32 %v7242_v57, %v7307_v25  ;;  %v7244_v63 = vpop.f32.mrb[45].mxu0  ;;  %v7309_v33 = vpop.f32.mrb[45].mxu1 }
0x1131   :  { %v7245_v61 = vpop.f32.mrb[46].mxu0  ;;  %v7310_v52 = vpop.f32.mrb[46].mxu1 }
0x1132   :  { %v7333_v20 = vmax.f32 %v7245_v61, %v7310_v52  ;;  %v7247_v0 = vpop.f32.mrb[47].mxu0  ;;  %v7312_v9 = vpop.f32.mrb[47].mxu1 }
0x1134   :  { %v7339_v28 = vpack.c.bf16 %v7333_v20, %v7332_v24 }
0x1136   :  { %10790 = vmatprep.subr.msk.bf16.mxu0 %vm3921_vm6, %v7339_v28  ;;  %v7410_v8 = vsel %vm3921_vm6, %v7339_v28, 0  ;;  %7633 = vrot.lane.b32.xlu0 %v7339_v28, %s11393_s29 }
0x1137   :  { %v7250_v35 = vpop.f32.mrb[48].mxu0  ;;  %v7315_v54 = vpop.f32.mrb[48].mxu1  ;;  %10638 = vmatpush3.bf16.xpose.msra.mxu0 %v7410_v8 }
0x1138   :  { %v7334_v48 = vmax.f32 %v7250_v35, %v7315_v54  ;;  %v7252_v47 = vpop.f32.mrb[49].mxu0  ;;  %v7317_v62 = vpop.f32.mrb[49].mxu1 }
0x1139   :  { %v7253_v27 = vpop.f32.mrb[50].mxu0  ;;  %v7318_v44 = vpop.f32.mrb[50].mxu1 }
0x113a   :  { %v7335_v49 = vmax.f32 %v7253_v27, %v7318_v44  ;;  %v7255_v57 = vpop.f32.mrb[51].mxu0  ;;  %v7320_v25 = vpop.f32.mrb[51].mxu1 }
0x113c   :  { %v7340_v63 = vpack.c.bf16 %v7335_v49, %v7334_v48 }
0x113e   :  { %10791 = vmatprep.subr.msk.bf16.mxu0 %vm3921_vm6, %v7340_v63  ;;  %v7413_v24 = vsel %vm3921_vm6, %v7340_v63, 0  ;;  %7635 = vrot.lane.b32.xlu1 %v7340_v63, %s11393_s29 }
0x113f   :  { %v7258_v33 = vpop.f32.mrb[52].mxu0  ;;  %v7323_v61 = vpop.f32.mrb[52].mxu1  ;;  %10640 = vmatpush3.bf16.xpose.msra.mxu0 %v7413_v24 }
0x1140   :  { %v7336_v52 = vmax.f32 %v7258_v33, %v7323_v61  ;;  %v7260_v20 = vpop.f32.mrb[53].mxu0  ;;  %v7325_v0 = vpop.f32.mrb[53].mxu1 }
0x1141   :  { %v7261_v9 = vpop.f32.mrb[54].mxu0  ;;  %v7326_v28 = vpop.f32.mrb[54].mxu1 }
0x1142   :  { %v7337_v8 = vmax.f32 %v7261_v9, %v7326_v28  ;;  %v7263_v35 = vpop.f32.mrb[55].mxu0  ;;  %v7328_v54 = vpop.f32.mrb[55].mxu1 }
0x1144   :  { %v7341_v47 = vpack.c.bf16 %v7337_v8, %v7336_v52 }
0x1146   :  { %10792 = vmatprep.subr.msk.bf16.mxu0 %vm3921_vm6, %v7341_v47  ;;  %v7416_v48 = vsel %vm3921_vm6, %v7341_v47, 0  ;;  %7637 = vrot.lane.b32.xlu0 %v7341_v47, %s11393_s29 }
0x1147   :  { %10642 = vmatpush3.bf16.xpose.msra.mxu0 %v7416_v48 }
0x114e   :  { %10644 = vmatmul.mubr.msk.bf16.vlgmr.msra.gmra.mrb[56].mxu0 %vm3921_vm6, %v7343_v42  ;;  %v15786_v42 = vpack.c.bf16 %v14800_v17, %v14793_v7 }
0x114f   :  { %10647 = vmatprep.mubr.msk.bf16.mxu0 %vm3921_vm6, %v7344_v30 }
0x1156   :  { %10648 = vmatmul.mubr.msk.bf16.gmra.mrb[60].mxu0 %vm3921_vm6, %v7345_v51 }
0x1157   :  { %10651 = vmatprep.mubr.msk.bf16.mxu0 %vm3921_vm6, %v7346_v60 }
0x115e   :  { %10652 = vmatmul.mubr.msk.bf16.gmra.mrb[64].mxu0 %vm3921_vm6, %v7347_v5 }
0x115f   :  { %10655 = vmatprep.mubr.msk.bf16.mxu0 %vm3921_vm6, %v7348_v39 }
0x1166   :  { %10656 = vmatmul.mubr.msk.bf16.gmra.mrb[68].mxu0 %vm3921_vm6, %v7349_v26 }
0x1167   :  { %10659 = vmatprep.mubr.msk.bf16.mxu0 %vm3921_vm6, %v15784_v50 }
0x116e   :  { %10660 = vmatmul.mubr.msk.bf16.gmra.mrb[72].mxu0 %vm3921_vm6, %v15785_v10 }
0x116f   :  { %10663 = vmatprep.mubr.msk.bf16.mxu0 %vm3921_vm6, %v15786_v42 }
0x1176   :  { %10664 = vmatmul.mubr.msk.bf16.gmra.mrb[76].mxu0 %vm3921_vm6, %v15787_v1 }
0x1177   :  { %10667 = vmatprep.mubr.msk.bf16.mxu0 %vm3921_vm6, %v15788_v55 }
0x117e   :  { %10668 = vmatmul.mubr.msk.bf16.gmra.mrb[80].mxu0 %vm3921_vm6, %v15789_v2 }
0x117f   :  { %10671 = vmatprep.mubr.msk.bf16.mxu0 %vm3921_vm6, %v7356_v37 }
0x1186   :  { %10672 = vmatmul.mubr.msk.bf16.gmra.mrb[84].mxu0 %vm3921_vm6, %v7357_v3 }
0x11a0   :  { %v7632_v59 = vpop.permute.xlu1 %7631 }
0x11a1   :  { %10675 = vmatprep.subr.bf16.mxu1 %v7632_v59 }
0x11a2   :  { %10676 = vmatpush3.bf16.msra.mxu1 %v7632_v59 }
0x11a8   :  { %v7634_v51 = vpop.permute.xlu0 %7633 }
0x11a9   :  { %10677 = vmatprep.subr.bf16.mxu1 %v7634_v51 }
0x11aa   :  { %10678 = vmatpush3.bf16.msra.mxu1 %v7634_v51 }
0x11b0   :  { %v7636_v30 = vpop.permute.xlu1 %7635 }
0x11b1   :  { %10679 = vmatprep.subr.bf16.mxu1 %v7636_v30 }
0x11b2   :  { %10680 = vmatpush3.bf16.msra.mxu1 %v7636_v30 }
0x11b8   :  { %v7638_v11 = vpop.permute.xlu0 %7637 }
0x11b9   :  { %10681 = vmatprep.subr.bf16.mxu1 %v7638_v11 }
0x11ba   :  { %10682 = vmatpush3.bf16.msra.mxu1 %v7638_v11 }
0x11bb   :  { %8526 = vmatprep.subr.bf16.mxu1 %v15742_v45 }
0x1221   :  { %v10645_v18 = vpop.f32.mrb[56].mxu0 }
0x1222   :  { %v7452_v56 = vpop.f32.mrb[57].mxu0  ;;  %v7581_v5 = vmul.f32 0.015625, %v10645_v18 }
0x1223   :  { %v10646_v34 = vpop.f32.mrb[58].mxu0  ;;  %v7579_v14 = vmul.f32 0.015625, %v7452_v56 }
0x1224   :  { %v7582_v60 = vmul.f32 0.015625, %v10646_v34  ;;  %v7455_v32 = vpop.f32.mrb[59].mxu0 }
0x1225   :  { %v7580_v40 = vmul.f32 0.015625, %v7455_v32 }
0x1226   :  { %v7612_v6 = vpack.c.bf16 %v7582_v60, %v7581_v5 }
0x1227   :  { %v7611_v26 = vpack.c.bf16 %v7580_v40, %v7579_v14 }
0x1229   :  { %v10649_v39 = vpop.f32.mrb[60].mxu0  ;;  %10683 = vmatprep.mubr.msk.bf16.mxu1 %vm4207_vm7, %v7611_v26 }
0x122a   :  { %v7468_v38 = vpop.f32.mrb[61].mxu0  ;;  %10684 = vmatmul.mubr.msk.bf16.vlgmr.msra.gmra.mrb[56].mxu1 %vm4207_vm7, %v7612_v6  ;;  %v7585_v43 = vmul.f32 0.015625, %v10649_v39 }
0x122b   :  { %v10650_v13 = vpop.f32.mrb[62].mxu0  ;;  %v7583_v7 = vmul.f32 0.015625, %v7468_v38 }
0x122c   :  { %v7586_v12 = vmul.f32 0.015625, %v10650_v13  ;;  %v7471_v46 = vpop.f32.mrb[63].mxu0 }
0x122d   :  { %v7584_v58 = vmul.f32 0.015625, %v7471_v46 }
0x122e   :  { %v7614_v17 = vpack.c.bf16 %v7586_v12, %v7585_v43 }
0x122f   :  { %v7613_v23 = vpack.c.bf16 %v7584_v58, %v7583_v7 }
0x1231   :  { %v10653_v31 = vpop.f32.mrb[64].mxu0  ;;  %10687 = vmatprep.mubr.msk.bf16.mxu1 %vm4207_vm7, %v7613_v23 }
0x1232   :  { %v7484_v19 = vpop.f32.mrb[65].mxu0  ;;  %10688 = vmatmul.mubr.msk.bf16.gmra.mrb[60].mxu1 %vm4207_vm7, %v7614_v17  ;;  %v7589_v16 = vmul.f32 0.015625, %v10653_v31 }
0x1233   :  { %v10654_v15 = vpop.f32.mrb[66].mxu0  ;;  %v7587_v21 = vmul.f32 0.015625, %v7484_v19  ;;  %v11063_v19 = vld [vmem:[%s15561_s12] sm:$0xff]  }
0x1234   :  { %v7590_v53 = vmul.f32 0.015625, %v10654_v15  ;;  %v7487_v4 = vpop.f32.mrb[67].mxu0  ;;  %10715 = vmatprep.subr.bf16.mxu0 %v11063_v19 }
0x1235   :  { %v7588_v3 = vmul.f32 0.015625, %v7487_v4  ;;  %10716 = vmatpush3.bf16.msra.mxu0 %v11063_v19 }
0x1236   :  { %v7616_v37 = vpack.c.bf16 %v7590_v53, %v7589_v16  ;;  %8591 = vmatprep.subr.bf16.mxu0 %v15742_v45 }
0x1237   :  { %v7615_v62 = vpack.c.bf16 %v7588_v3, %v7587_v21 }
0x1239   :  { %v10657_v27 = vpop.f32.mrb[68].mxu0  ;;  %10691 = vmatprep.mubr.msk.bf16.mxu1 %vm4207_vm7, %v7615_v62 }
0x123a   :  { %v7500_v44 = vpop.f32.mrb[69].mxu0  ;;  %10692 = vmatmul.mubr.msk.bf16.gmra.mrb[64].mxu1 %vm4207_vm7, %v7616_v37  ;;  %v7593_v57 = vmul.f32 0.015625, %v10657_v27 }
0x123b   :  { %v10658_v49 = vpop.f32.mrb[70].mxu0  ;;  %v7591_v24 = vmul.f32 0.015625, %v7500_v44 }
0x123c   :  { %v7594_v25 = vmul.f32 0.015625, %v10658_v49  ;;  %v7503_v63 = vpop.f32.mrb[71].mxu0 }
0x123d   :  { %v7592_v33 = vmul.f32 0.015625, %v7503_v63 }
0x123e   :  { %v7618_v61 = vpack.c.bf16 %v7594_v25, %v7593_v57 }
0x123f   :  { %v7617_v52 = vpack.c.bf16 %v7592_v33, %v7591_v24 }
0x1241   :  { %v10661_v20 = vpop.f32.mrb[72].mxu0  ;;  %10695 = vmatprep.mubr.msk.bf16.mxu1 %vm4207_vm7, %v7617_v52 }
0x1242   :  { %v7516_v0 = vpop.f32.mrb[73].mxu0  ;;  %10696 = vmatmul.mubr.msk.bf16.gmra.mrb[68].mxu1 %vm4207_vm7, %v7618_v61  ;;  %v7597_v28 = vmul.f32 0.015625, %v10661_v20 }
0x1243   :  { %v10662_v9 = vpop.f32.mrb[74].mxu0  ;;  %v7595_v54 = vmul.f32 0.015625, %v7516_v0 }
0x1244   :  { %v7598_v8 = vmul.f32 0.015625, %v10662_v9  ;;  %v7519_v35 = vpop.f32.mrb[75].mxu0 }
0x1245   :  { %v7596_v47 = vmul.f32 0.015625, %v7519_v35 }
0x1246   :  { %v7620_v48 = vpack.c.bf16 %v7598_v8, %v7597_v28 }
0x1247   :  { %v7619_v50 = vpack.c.bf16 %v7596_v47, %v7595_v54 }
0x1249   :  { %v10665_v10 = vpop.f32.mrb[76].mxu0  ;;  %10699 = vmatprep.mubr.msk.bf16.mxu1 %vm4207_vm7, %v7619_v50 }
0x124a   :  { %v7532_v42 = vpop.f32.mrb[77].mxu0  ;;  %10700 = vmatmul.mubr.msk.bf16.gmra.mrb[72].mxu1 %vm4207_vm7, %v7620_v48  ;;  %v7601_v55 = vmul.f32 0.015625, %v10665_v10 }
0x124b   :  { %v10666_v1 = vpop.f32.mrb[78].mxu0  ;;  %v7599_v51 = vmul.f32 0.015625, %v7532_v42 }
0x124c   :  { %v7602_v2 = vmul.f32 0.015625, %v10666_v1  ;;  %v7535_v59 = vpop.f32.mrb[79].mxu0 }
0x124d   :  { %v7600_v30 = vmul.f32 0.015625, %v7535_v59 }
0x124e   :  { %v7622_v11 = vpack.c.bf16 %v7602_v2, %v7601_v55 }
0x124f   :  { %v7621_v18 = vpack.c.bf16 %v7600_v30, %v7599_v51 }
0x1251   :  { %v10669_v56 = vpop.f32.mrb[80].mxu0  ;;  %10703 = vmatprep.mubr.msk.bf16.mxu1 %vm4207_vm7, %v7621_v18 }
0x1252   :  { %v7548_v34 = vpop.f32.mrb[81].mxu0  ;;  %10704 = vmatmul.mubr.msk.bf16.gmra.mrb[76].mxu1 %vm4207_vm7, %v7622_v11  ;;  %v7605_v60 = vmul.f32 0.015625, %v10669_v56 }
0x1253   :  { %v10670_v5 = vpop.f32.mrb[82].mxu0  ;;  %v7603_v40 = vmul.f32 0.015625, %v7548_v34 }
0x1254   :  { %v7606_v32 = vmul.f32 0.015625, %v10670_v5  ;;  %v7551_v14 = vpop.f32.mrb[83].mxu0 }
0x1255   :  { %v7604_v6 = vmul.f32 0.015625, %v7551_v14 }
0x1256   :  { %v7624_v26 = vpack.c.bf16 %v7606_v32, %v7605_v60 }
0x1257   :  { %v7623_v39 = vpack.c.bf16 %v7604_v6, %v7603_v40 }
0x1259   :  { %v10673_v38 = vpop.f32.mrb[84].mxu0  ;;  %10707 = vmatprep.mubr.msk.bf16.mxu1 %vm4207_vm7, %v7623_v39  ;;  %v11348_v39 = vld [vmem:[%s15565_s16 + $0x44] ss:$8 sps:$4 sm:$0xff]  }
0x125a   :  { %v7564_v13 = vpop.f32.mrb[85].mxu0  ;;  %10708 = vmatmul.mubr.msk.bf16.gmra.mrb[80].mxu1 %vm4207_vm7, %v7624_v26  ;;  %v7609_v12 = vmul.f32 0.015625, %v10673_v38  ;;  %v15027_v38 = vld [vmem:[%s15562_s13] ss:$0 sm:$0xff] }
0x125b   :  { %v10674_v43 = vpop.f32.mrb[86].mxu0  ;;  %v7607_v58 = vmul.f32 0.015625, %v7564_v13 }
0x125c   :  { %v7610_v46 = vmul.f32 0.015625, %v10674_v43  ;;  %v7567_v7 = vpop.f32.mrb[87].mxu0 }
0x125d   :  { %v7608_v17 = vmul.f32 0.015625, %v7567_v7 }
0x125e   :  { %v7626_v23 = vpack.c.bf16 %v7610_v46, %v7609_v12 }
0x125f   :  { %v7625_v31 = vpack.c.bf16 %v7608_v17, %v7607_v58 }
0x1261   :  { %10711 = vmatprep.mubr.msk.bf16.mxu1 %vm4207_vm7, %v7625_v31 }
0x1262   :  { %10712 = vmatmul.mubr.msk.bf16.gmra.mrb[84].mxu1 %vm4207_vm7, %v7626_v23 }
0x1263   :  { %9530 = vmatprep.mubr.msk.bf16.mxu1 %vm3702_vm5, %v14651_v29 }
0x12fd   :  { %v10685_v15 = vpop.f32.mrb[56].mxu1 }
0x12fe   :  { %v7725_v16 = vpop.f32.mrb[57].mxu1 }
0x12ff   :  { %v10686_v53 = vpop.f32.mrb[58].mxu1 }
0x1300   :  { %v7853_v4 = vpack.c.bf16 %v10686_v53, %v10685_v15  ;;  %v7728_v21 = vpop.f32.mrb[59].mxu1 }
0x1301   :  { %v7852_v3 = vpack.c.bf16 %v7728_v21, %v7725_v16 }
0x1303   :  { %10717 = vmatprep.mubr.msk.bf16.mxu0 %vm3921_vm6, %v7852_v3 }
0x1304   :  { %10718 = vmatmul.mubr.msk.bf16.vlgmr.msra.gmra.mrb[88].mxu0 %vm3921_vm6, %v7853_v4 }
0x1305   :  { %v10689_v37 = vpop.f32.mrb[60].mxu1 }
0x1306   :  { %v7741_v29 = vpop.f32.mrb[61].mxu1 }
0x1307   :  { %v10690_v62 = vpop.f32.mrb[62].mxu1 }
0x1308   :  { %v7855_v27 = vpack.c.bf16 %v10690_v62, %v10689_v37  ;;  %v7744_v44 = vpop.f32.mrb[63].mxu1 }
0x1309   :  { %v7854_v49 = vpack.c.bf16 %v7744_v44, %v7741_v29 }
0x130b   :  { %10721 = vmatprep.mubr.msk.bf16.mxu0 %vm3921_vm6, %v7854_v49 }
0x130c   :  { %10722 = vmatmul.mubr.msk.bf16.gmra.mrb[92].mxu0 %vm3921_vm6, %v7855_v27 }
0x130d   :  { %v10693_v57 = vpop.f32.mrb[64].mxu1 }
0x130e   :  { %v7757_v25 = vpop.f32.mrb[65].mxu1 }
0x130f   :  { %v10694_v63 = vpop.f32.mrb[66].mxu1 }
0x1310   :  { %v7857_v24 = vpack.c.bf16 %v10694_v63, %v10693_v57  ;;  %v7760_v33 = vpop.f32.mrb[67].mxu1 }
0x1311   :  { %v7856_v61 = vpack.c.bf16 %v7760_v33, %v7757_v25 }
0x1313   :  { %10725 = vmatprep.mubr.msk.bf16.mxu0 %vm3921_vm6, %v7856_v61 }
0x1314   :  { %10726 = vmatmul.mubr.msk.bf16.gmra.mrb[96].mxu0 %vm3921_vm6, %v7857_v24 }
0x1315   :  { %v10697_v52 = vpop.f32.mrb[68].mxu1 }
0x1316   :  { %v7773_v20 = vpop.f32.mrb[69].mxu1 }
0x1317   :  { %v10698_v0 = vpop.f32.mrb[70].mxu1 }
0x1318   :  { %v7859_v9 = vpack.c.bf16 %v10698_v0, %v10697_v52  ;;  %v7776_v28 = vpop.f32.mrb[71].mxu1 }
0x1319   :  { %v7858_v8 = vpack.c.bf16 %v7776_v28, %v7773_v20 }
0x131b   :  { %10729 = vmatprep.mubr.msk.bf16.mxu0 %vm3921_vm6, %v7858_v8 }
0x131c   :  { %10730 = vmatmul.mubr.msk.bf16.gmra.mrb[100].mxu0 %vm3921_vm6, %v7859_v9 }
0x131d   :  { %v10701_v35 = vpop.f32.mrb[72].mxu1 }
0x131e   :  { %v7789_v54 = vpop.f32.mrb[73].mxu1 }
0x131f   :  { %v10702_v47 = vpop.f32.mrb[74].mxu1 }
0x1320   :  { %v7861_v48 = vpack.c.bf16 %v10702_v47, %v10701_v35  ;;  %v7792_v50 = vpop.f32.mrb[75].mxu1 }
0x1321   :  { %v7860_v10 = vpack.c.bf16 %v7792_v50, %v7789_v54 }
0x1323   :  { %10733 = vmatprep.mubr.msk.bf16.mxu0 %vm3921_vm6, %v7860_v10 }
0x1324   :  { %10734 = vmatmul.mubr.msk.bf16.gmra.mrb[104].mxu0 %vm3921_vm6, %v7861_v48 }
0x1325   :  { %v10705_v42 = vpop.f32.mrb[76].mxu1 }
0x1326   :  { %v7805_v1 = vpop.f32.mrb[77].mxu1 }
0x1327   :  { %v10706_v55 = vpop.f32.mrb[78].mxu1 }
0x1328   :  { %v7863_v2 = vpack.c.bf16 %v10706_v55, %v10705_v42  ;;  %v7808_v59 = vpop.f32.mrb[79].mxu1 }
0x1329   :  { %v7862_v51 = vpack.c.bf16 %v7808_v59, %v7805_v1 }
0x132b   :  { %10737 = vmatprep.mubr.msk.bf16.mxu0 %vm3921_vm6, %v7862_v51 }
0x132c   :  { %10738 = vmatmul.mubr.msk.bf16.gmra.mrb[108].mxu0 %vm3921_vm6, %v7863_v2 }
0x132d   :  { %v10709_v30 = vpop.f32.mrb[80].mxu1 }
0x132e   :  { %v7821_v11 = vpop.f32.mrb[81].mxu1 }
0x132f   :  { %v10710_v18 = vpop.f32.mrb[82].mxu1 }
0x1330   :  { %v7865_v56 = vpack.c.bf16 %v10710_v18, %v10709_v30  ;;  %v7824_v34 = vpop.f32.mrb[83].mxu1 }
0x1331   :  { %v7864_v5 = vpack.c.bf16 %v7824_v34, %v7821_v11 }
0x1333   :  { %10741 = vmatprep.mubr.msk.bf16.mxu0 %vm3921_vm6, %v7864_v5 }
0x1334   :  { %10742 = vmatmul.mubr.msk.bf16.gmra.mrb[112].mxu0 %vm3921_vm6, %v7865_v56 }
0x1335   :  { %v10713_v60 = vpop.f32.mrb[84].mxu1 }
0x1336   :  { %v7837_v32 = vpop.f32.mrb[85].mxu1 }
0x1337   :  { %v10714_v14 = vpop.f32.mrb[86].mxu1 }
0x1338   :  { %v7867_v40 = vpack.c.bf16 %v10714_v14, %v10713_v60  ;;  %v7840_v6 = vpop.f32.mrb[87].mxu1 }
0x1339   :  { %v7866_v26 = vpack.c.bf16 %v7840_v6, %v7837_v32 }
0x133b   :  { %10745 = vmatprep.mubr.msk.bf16.mxu0 %vm3921_vm6, %v7866_v26 }
0x133c   :  { %10746 = vmatmul.mubr.msk.bf16.gmra.mrb[116].mxu0 %vm3921_vm6, %v7867_v40 }
0x133d   :  { %9534 = vmatprep.mubr.msk.bf16.mxu0 %vm3702_vm5, %v11348_v39 }
0x13d7   :  { %v10719_v13 = vpop.f32.mrb[88].mxu0 }
0x13d8   :  { %v7974_v43 = vadd.f32 %v10719_v13, %v15027_v38  ;;  %v7965_v12 = vpop.f32.mrb[89].mxu0 }
0x13d9   :  { %v7966_v46 = vadd.f32 %v15027_v38, %v7965_v12  ;;  %v10720_v7 = vpop.f32.mrb[90].mxu0 }
0x13da   :  { %8095 = vst.msk [vmem:[#allocation3 + $0x110] sm:$0xff] %vm699_vm2, %v7974_v43  ;;  %v7977_v58 = vadd.f32 %v10720_v7, %v15027_v38  ;;  %v7968_v17 = vpop.f32.mrb[91].mxu0  ;;  %v8197_v19 = vmul.f32 %v7974_v43, %v7974_v43  ;;  %v8128_v3 = vsel %vm699_vm2, %v7974_v43, 0.0 }
0x13db   :  { %8093 = vst.msk [vmem:[#allocation3 + $0x100] sm:$0xff] %vm699_vm2, %v7966_v46  ;;  %v8195_v23 = vmul.f32 %v7966_v46, %v7966_v46  ;;  %v7969_v31 = vadd.f32 %v15027_v38, %v7968_v17  ;;  %v8125_v15 = vsel %vm699_vm2, %v7966_v46, 0.0 }
0x13dc   :  { %8096 = vst.msk [vmem:[#allocation3 + $0x118] sm:$0xff] %vm699_vm2, %v7977_v58  ;;  %v8198_v4 = vmul.f32 %v7977_v58, %v7977_v58  ;;  %v8230_v25 = vsel %vm699_vm2, %v8197_v19, 0.0  ;;  %v8130_v63 = vsel %vm699_vm2, %v7977_v58, 0.0 }
0x13dd   :  { %8094 = vst.msk [vmem:[#allocation3 + $0x108] sm:$0xff] %vm699_vm2, %v7969_v31  ;;  %v8126_v16 = vsel %vm699_vm2, %v7969_v31, 0.0  ;;  %v8196_v53 = vmul.f32 %v7969_v31, %v7969_v31  ;;  %v8227_v37 = vsel %vm699_vm2, %v8195_v23, 0.0 }
0x13de   :  { %v8127_v21 = vadd.f32 %v8126_v16, %v8125_v15  ;;  %v8232_v61 = vsel %vm699_vm2, %v8198_v4, 0.0 }
0x13df   :  { %v8228_v29 = vsel %vm699_vm2, %v8196_v53, 0.0  ;;  %v10723_v62 = vpop.f32.mrb[92].mxu0 }
0x13e0   :  { %v8129_v27 = vadd.f32 %v8128_v3, %v8127_v21  ;;  %v8229_v44 = vadd.f32 %v8228_v29, %v8227_v37  ;;  %v7990_v49 = vadd.f32 %v10723_v62, %v15027_v38  ;;  %v7981_v57 = vpop.f32.mrb[93].mxu0 }
0x13e1   :  { %v7982_v24 = vadd.f32 %v15027_v38, %v7981_v57  ;;  %v10724_v33 = vpop.f32.mrb[94].mxu0 }
0x13e2   :  { %v8231_v52 = vadd.f32 %v8230_v25, %v8229_v44  ;;  %8099 = vst.msk [vmem:[#allocation3 + $0x130] sm:$0xff] %vm699_vm2, %v7990_v49  ;;  %v8131_v20 = vadd.f32 %v8130_v63, %v8129_v27  ;;  %v7984_v0 = vpop.f32.mrb[95].mxu0  ;;  %v7993_v8 = vadd.f32 %v10724_v33, %v15027_v38  ;;  %v8201_v10 = vmul.f32 %v7990_v49, %v7990_v49 }
0x13e3   :  { %8097 = vst.msk [vmem:[#allocation3 + $0x120] sm:$0xff] %vm699_vm2, %v7982_v24  ;;  %v8132_v9 = vsel %vm699_vm2, %v7982_v24, 0.0  ;;  %v8199_v28 = vmul.f32 %v7982_v24, %v7982_v24  ;;  %v7985_v35 = vadd.f32 %v15027_v38, %v7984_v0  ;;  %v8136_v2 = vsel %vm699_vm2, %v7990_v49, 0.0 }
0x13e4   :  { %v8133_v54 = vadd.f32 %v8132_v9, %v8131_v20  ;;  %v8233_v47 = vadd.f32 %v8232_v61, %v8231_v52  ;;  %8100 = vst.msk [vmem:[#allocation3 + $0x138] sm:$0xff] %vm699_vm2, %v7993_v8  ;;  %v8202_v51 = vmul.f32 %v7993_v8, %v7993_v8  ;;  %v8138_v34 = vsel %vm699_vm2, %v7993_v8, 0.0 }
0x13e5   :  { %v8234_v48 = vsel %vm699_vm2, %v8199_v28, 0.0  ;;  %8098 = vst.msk [vmem:[#allocation3 + $0x128] sm:$0xff] %vm699_vm2, %v7985_v35  ;;  %v8134_v50 = vsel %vm699_vm2, %v7985_v35, 0.0  ;;  %v8200_v55 = vmul.f32 %v7985_v35, %v7985_v35  ;;  %v8238_v14 = vsel %vm699_vm2, %v8201_v10, 0.0 }
0x13e6   :  { %v8235_v42 = vadd.f32 %v8234_v48, %v8233_v47  ;;  %v8135_v1 = vadd.f32 %v8134_v50, %v8133_v54  ;;  %v8240_v46 = vsel %vm699_vm2, %v8202_v51, 0.0 }
0x13e7   :  { %v10727_v59 = vpop.f32.mrb[96].mxu0  ;;  %v8236_v11 = vsel %vm699_vm2, %v8200_v55, 0.0 }
0x13e8   :  { %v8137_v30 = vadd.f32 %v8136_v2, %v8135_v1  ;;  %v8006_v18 = vadd.f32 %v10727_v59, %v15027_v38  ;;  %v7997_v56 = vpop.f32.mrb[97].mxu0  ;;  %v8237_v5 = vadd.f32 %v8236_v11, %v8235_v42 }
0x13e9   :  { %v7998_v60 = vadd.f32 %v15027_v38, %v7997_v56  ;;  %v10728_v32 = vpop.f32.mrb[98].mxu0 }
0x13ea   :  { %8103 = vst.msk [vmem:[#allocation3 + $0x150] sm:$0xff] %vm699_vm2, %v8006_v18  ;;  %v8139_v40 = vadd.f32 %v8138_v34, %v8137_v30  ;;  %v8009_v6 = vadd.f32 %v10728_v32, %v15027_v38  ;;  %v8000_v26 = vpop.f32.mrb[99].mxu0  ;;  %v8239_v39 = vadd.f32 %v8238_v14, %v8237_v5  ;;  %v8205_v19 = vmul.f32 %v8006_v18, %v8006_v18 }
0x13eb   :  { %8101 = vst.msk [vmem:[#allocation3 + $0x140] sm:$0xff] %vm699_vm2, %v7998_v60  ;;  %v8140_v13 = vsel %vm699_vm2, %v7998_v60, 0.0  ;;  %v8203_v43 = vmul.f32 %v7998_v60, %v7998_v60  ;;  %v8001_v12 = vadd.f32 %v15027_v38, %v8000_v26  ;;  %v8144_v16 = vsel %vm699_vm2, %v8006_v18, 0.0 }
0x13ec   :  { %v8141_v7 = vadd.f32 %v8140_v13, %v8139_v40  ;;  %8104 = vst.msk [vmem:[#allocation3 + $0x158] sm:$0xff] %vm699_vm2, %v8009_v6  ;;  %v8241_v58 = vadd.f32 %v8240_v46, %v8239_v39  ;;  %v8206_v3 = vmul.f32 %v8009_v6, %v8009_v6  ;;  %v8146_v27 = vsel %vm699_vm2, %v8009_v6, 0.0 }
0x13ed   :  { %v8242_v17 = vsel %vm699_vm2, %v8203_v43, 0.0  ;;  %8102 = vst.msk [vmem:[#allocation3 + $0x148] sm:$0xff] %vm699_vm2, %v8001_v12  ;;  %v8142_v23 = vsel %vm699_vm2, %v8001_v12, 0.0  ;;  %v8204_v31 = vmul.f32 %v8001_v12, %v8001_v12  ;;  %v8246_v25 = vsel %vm699_vm2, %v8205_v19, 0.0 }
0x13ee   :  { %v8143_v15 = vadd.f32 %v8142_v23, %v8141_v7  ;;  %v8243_v53 = vadd.f32 %v8242_v17, %v8241_v58  ;;  %v8248_v9 = vsel %vm699_vm2, %v8206_v3, 0.0 }
0x13ef   :  { %v8244_v4 = vsel %vm699_vm2, %v8204_v31, 0.0  ;;  %v10731_v21 = vpop.f32.mrb[100].mxu0 }
0x13f0   :  { %v8145_v37 = vadd.f32 %v8144_v16, %v8143_v15  ;;  %v8022_v29 = vadd.f32 %v10731_v21, %v15027_v38  ;;  %v8013_v62 = vpop.f32.mrb[101].mxu0  ;;  %v8245_v44 = vadd.f32 %v8244_v4, %v8243_v53 }
0x13f1   :  { %v8014_v49 = vadd.f32 %v15027_v38, %v8013_v62  ;;  %v10732_v57 = vpop.f32.mrb[102].mxu0 }
0x13f2   :  { %8107 = vst.msk [vmem:[#allocation3 + $0x170] sm:$0xff] %vm699_vm2, %v8022_v29  ;;  %v8147_v63 = vadd.f32 %v8146_v27, %v8145_v37  ;;  %v8025_v24 = vadd.f32 %v10732_v57, %v15027_v38  ;;  %v8016_v33 = vpop.f32.mrb[103].mxu0  ;;  %v8247_v61 = vadd.f32 %v8246_v25, %v8245_v44  ;;  %v8209_v48 = vmul.f32 %v8022_v29, %v8022_v29 }
0x13f3   :  { %8105 = vst.msk [vmem:[#allocation3 + $0x160] sm:$0xff] %vm699_vm2, %v8014_v49  ;;  %v8148_v52 = vsel %vm699_vm2, %v8014_v49, 0.0  ;;  %v8207_v20 = vmul.f32 %v8014_v49, %v8014_v49  ;;  %v8017_v0 = vadd.f32 %v15027_v38, %v8016_v33  ;;  %v8152_v10 = vsel %vm699_vm2, %v8022_v29, 0.0 }
0x13f4   :  { %v8149_v28 = vadd.f32 %v8148_v52, %v8147_v63  ;;  %8108 = vst.msk [vmem:[#allocation3 + $0x178] sm:$0xff] %vm699_vm2, %v8025_v24  ;;  %v8249_v8 = vadd.f32 %v8248_v9, %v8247_v61  ;;  %v8210_v2 = vmul.f32 %v8025_v24, %v8025_v24  ;;  %v8154_v11 = vsel %vm699_vm2, %v8025_v24, 0.0 }
0x13f5   :  { %v8250_v35 = vsel %vm699_vm2, %v8207_v20, 0.0  ;;  %8106 = vst.msk [vmem:[#allocation3 + $0x168] sm:$0xff] %vm699_vm2, %v8017_v0  ;;  %v8150_v54 = vsel %vm699_vm2, %v8017_v0, 0.0  ;;  %v8208_v47 = vmul.f32 %v8017_v0, %v8017_v0  ;;  %v8254_v5 = vsel %vm699_vm2, %v8209_v48, 0.0 }
0x13f6   :  { %v8151_v50 = vadd.f32 %v8150_v54, %v8149_v28  ;;  %v8251_v42 = vadd.f32 %v8250_v35, %v8249_v8  ;;  %v8256_v13 = vsel %vm699_vm2, %v8210_v2, 0.0 }
0x13f7   :  { %v8252_v1 = vsel %vm699_vm2, %v8208_v47, 0.0  ;;  %v10735_v55 = vpop.f32.mrb[104].mxu0 }
0x13f8   :  { %v8153_v59 = vadd.f32 %v8152_v10, %v8151_v50  ;;  %v8038_v51 = vadd.f32 %v10735_v55, %v15027_v38  ;;  %v8029_v30 = vpop.f32.mrb[105].mxu0  ;;  %v8253_v18 = vadd.f32 %v8252_v1, %v8251_v42 }
0x13f9   :  { %v8030_v56 = vadd.f32 %v15027_v38, %v8029_v30  ;;  %v10736_v34 = vpop.f32.mrb[106].mxu0 }
0x13fa   :  { %8111 = vst.msk [vmem:[#allocation3 + $0x190] sm:$0xff] %vm699_vm2, %v8038_v51  ;;  %v8155_v60 = vadd.f32 %v8154_v11, %v8153_v59  ;;  %v8041_v32 = vadd.f32 %v10736_v34, %v15027_v38  ;;  %v8032_v14 = vpop.f32.mrb[107].mxu0  ;;  %v8255_v40 = vadd.f32 %v8254_v5, %v8253_v18  ;;  %v8213_v17 = vmul.f32 %v8038_v51, %v8038_v51 }
0x13fb   :  { %8109 = vst.msk [vmem:[#allocation3 + $0x180] sm:$0xff] %vm699_vm2, %v8030_v56  ;;  %v8156_v6 = vsel %vm699_vm2, %v8030_v56, 0.0  ;;  %v8211_v26 = vmul.f32 %v8030_v56, %v8030_v56  ;;  %v8033_v39 = vadd.f32 %v15027_v38, %v8032_v14  ;;  %v8160_v31 = vsel %vm699_vm2, %v8038_v51, 0.0 }
0x13fc   :  { %v8157_v43 = vadd.f32 %v8156_v6, %v8155_v60  ;;  %8112 = vst.msk [vmem:[#allocation3 + $0x198] sm:$0xff] %vm699_vm2, %v8041_v32  ;;  %v8257_v12 = vadd.f32 %v8256_v13, %v8255_v40  ;;  %v8214_v53 = vmul.f32 %v8041_v32, %v8041_v32  ;;  %v8162_v37 = vsel %vm699_vm2, %v8041_v32, 0.0 }
0x13fd   :  { %v8258_v46 = vsel %vm699_vm2, %v8211_v26, 0.0  ;;  %8110 = vst.msk [vmem:[#allocation3 + $0x188] sm:$0xff] %vm699_vm2, %v8033_v39  ;;  %v8158_v7 = vsel %vm699_vm2, %v8033_v39, 0.0  ;;  %v8212_v58 = vmul.f32 %v8033_v39, %v8033_v39  ;;  %v8262_v44 = vsel %vm699_vm2, %v8213_v17, 0.0 }
0x13fe   :  { %v8159_v23 = vadd.f32 %v8158_v7, %v8157_v43  ;;  %v8259_v19 = vadd.f32 %v8258_v46, %v8257_v12  ;;  %v8264_v52 = vsel %vm699_vm2, %v8214_v53, 0.0 }
0x13ff   :  { %v8260_v15 = vsel %vm699_vm2, %v8212_v58, 0.0  ;;  %v10739_v16 = vpop.f32.mrb[108].mxu0 }
0x1400   :  { %v8161_v4 = vadd.f32 %v8160_v31, %v8159_v23  ;;  %v8054_v21 = vadd.f32 %v10739_v16, %v15027_v38  ;;  %v8045_v3 = vpop.f32.mrb[109].mxu0  ;;  %v8261_v29 = vadd.f32 %v8260_v15, %v8259_v19 }
0x1401   :  { %v8046_v62 = vadd.f32 %v15027_v38, %v8045_v3  ;;  %v10740_v27 = vpop.f32.mrb[110].mxu0 }
0x1402   :  { %8115 = vst.msk [vmem:[#allocation3 + $0x1b0] sm:$0xff] %vm699_vm2, %v8054_v21  ;;  %v8163_v49 = vadd.f32 %v8162_v37, %v8161_v4  ;;  %v8057_v57 = vadd.f32 %v10740_v27, %v15027_v38  ;;  %v8048_v25 = vpop.f32.mrb[111].mxu0  ;;  %v8263_v63 = vadd.f32 %v8262_v44, %v8261_v29  ;;  %v8217_v35 = vmul.f32 %v8054_v21, %v8054_v21 }
0x1403   :  { %8113 = vst.msk [vmem:[#allocation3 + $0x1a0] sm:$0xff] %vm699_vm2, %v8046_v62  ;;  %v8164_v24 = vsel %vm699_vm2, %v8046_v62, 0.0  ;;  %v8215_v33 = vmul.f32 %v8046_v62, %v8046_v62  ;;  %v8049_v61 = vadd.f32 %v15027_v38, %v8048_v25  ;;  %v8168_v47 = vsel %vm699_vm2, %v8054_v21, 0.0 }
0x1404   :  { %v8165_v20 = vadd.f32 %v8164_v24, %v8163_v49  ;;  %8116 = vst.msk [vmem:[#allocation3 + $0x1b8] sm:$0xff] %vm699_vm2, %v8057_v57  ;;  %v8265_v0 = vadd.f32 %v8264_v52, %v8263_v63  ;;  %v8218_v42 = vmul.f32 %v8057_v57, %v8057_v57  ;;  %v8170_v59 = vsel %vm699_vm2, %v8057_v57, 0.0 }
0x1405   :  { %v8266_v9 = vsel %vm699_vm2, %v8215_v33, 0.0  ;;  %8114 = vst.msk [vmem:[#allocation3 + $0x1a8] sm:$0xff] %vm699_vm2, %v8049_v61  ;;  %v8166_v28 = vsel %vm699_vm2, %v8049_v61, 0.0  ;;  %v8216_v8 = vmul.f32 %v8049_v61, %v8049_v61  ;;  %v8270_v18 = vsel %vm699_vm2, %v8217_v35, 0.0 }
0x1406   :  { %v8167_v54 = vadd.f32 %v8166_v28, %v8165_v20  ;;  %v8267_v48 = vadd.f32 %v8266_v9, %v8265_v0  ;;  %v8272_v6 = vsel %vm699_vm2, %v8218_v42, 0.0  ;;  %v4752_v29 = vrot.slane %v14082_v36, 4 }
0x1407   :  { %v8268_v50 = vsel %vm699_vm2, %v8216_v8, 0.0  ;;  %v10743_v10 = vpop.f32.mrb[112].mxu0  ;;  %v4854_v33 = vrot.slane %v14085_v41, 4 }
0x1408   :  { %v8169_v1 = vadd.f32 %v8168_v47, %v8167_v54  ;;  %v8070_v55 = vadd.f32 %v10743_v10, %v15027_v38  ;;  %v8061_v2 = vpop.f32.mrb[113].mxu0  ;;  %v8269_v51 = vadd.f32 %v8268_v50, %v8267_v48  ;;  %v4753_v8 = vadd.f32 %v4752_v29, %v14082_v36 }
0x1409   :  { %v8062_v30 = vadd.f32 %v15027_v38, %v8061_v2  ;;  %v10744_v11 = vpop.f32.mrb[114].mxu0  ;;  %v4855_v42 = vadd.f32 %v4854_v33, %v14085_v41 }
0x140a   :  { %8119 = vst.msk [vmem:[#allocation3 + $0x1d0] sm:$0xff] %vm699_vm2, %v8070_v55  ;;  %v8171_v56 = vadd.f32 %v8170_v59, %v8169_v1  ;;  %v8073_v34 = vadd.f32 %v10744_v11, %v15027_v38  ;;  %v8064_v5 = vpop.f32.mrb[115].mxu0  ;;  %v8271_v60 = vadd.f32 %v8270_v18, %v8269_v51  ;;  %v8221_v46 = vmul.f32 %v8070_v55, %v8070_v55 }
0x140b   :  { %8117 = vst.msk [vmem:[#allocation3 + $0x1c0] sm:$0xff] %vm699_vm2, %v8062_v30  ;;  %v8172_v32 = vsel %vm699_vm2, %v8062_v30, 0.0  ;;  %v8219_v14 = vmul.f32 %v8062_v30, %v8062_v30  ;;  %v8065_v40 = vadd.f32 %v15027_v38, %v8064_v5  ;;  %v8176_v58 = vsel %vm699_vm2, %v8070_v55, 0.0 }
0x140c   :  { %v8173_v26 = vadd.f32 %v8172_v32, %v8171_v56  ;;  %8120 = vst.msk [vmem:[#allocation3 + $0x1d8] sm:$0xff] %vm699_vm2, %v8073_v34  ;;  %v8273_v39 = vadd.f32 %v8272_v6, %v8271_v60  ;;  %v8222_v19 = vmul.f32 %v8073_v34, %v8073_v34  ;;  %v8178_v4 = vsel %vm699_vm2, %v8073_v34, 0.0 }
0x140d   :  { %v8274_v13 = vsel %vm699_vm2, %v8219_v14, 0.0  ;;  %8118 = vst.msk [vmem:[#allocation3 + $0x1c8] sm:$0xff] %vm699_vm2, %v8065_v40  ;;  %v8174_v43 = vsel %vm699_vm2, %v8065_v40, 0.0  ;;  %v8220_v12 = vmul.f32 %v8065_v40, %v8065_v40  ;;  %v8278_v62 = vsel %vm699_vm2, %v8221_v46, 0.0 }
0x140e   :  { %v8175_v7 = vadd.f32 %v8174_v43, %v8173_v26  ;;  %v8275_v17 = vadd.f32 %v8274_v13, %v8273_v39  ;;  %v8280_v61 = vsel %vm699_vm2, %v8222_v19, 0.0  ;;  %v4754_v2 = vrot.slane %v4753_v8, 2 }
0x140f   :  { %v8276_v23 = vsel %vm699_vm2, %v8220_v12, 0.0  ;;  %v10747_v31 = vpop.f32.mrb[116].mxu0  ;;  %v4856_v18 = vrot.slane %v4855_v42, 2 }
0x1410   :  { %v8177_v15 = vadd.f32 %v8176_v58, %v8175_v7  ;;  %v8086_v16 = vadd.f32 %v10747_v31, %v15027_v38  ;;  %v8077_v53 = vpop.f32.mrb[117].mxu0  ;;  %v8277_v21 = vadd.f32 %v8276_v23, %v8275_v17  ;;  %v4755_v34 = vadd.f32 %v4754_v2, %v4753_v8  ;;  %v8314_v8 = vld [vmem:[#allocation3 + $0x28] sm:$0xff]  ;;  %v8419_v2 = vld [vmem:[#allocation2 + $0x10] sm:$0xff] }
0x1411   :  { %v8078_v3 = vadd.f32 %v15027_v38, %v8077_v53  ;;  %v10748_v37 = vpop.f32.mrb[118].mxu0  ;;  %v4857_v14 = vadd.f32 %v4856_v18, %v4855_v42 }
0x1412   :  { %8123 = vst.msk [vmem:[#allocation3 + $0x1f0] sm:$0xff] %vm699_vm2, %v8086_v16  ;;  %v8179_v27 = vadd.f32 %v8178_v4, %v8177_v15  ;;  %v8089_v44 = vadd.f32 %v10748_v37, %v15027_v38  ;;  %v8080_v49 = vpop.f32.mrb[119].mxu0  ;;  %v8279_v57 = vadd.f32 %v8278_v62, %v8277_v21  ;;  %v8225_v35 = vmul.f32 %v8086_v16, %v8086_v16  ;;  %v8306_v62 = vld [vmem:[%s15564_s15] sm:$0x1] }
0x1413   :  { %8121 = vst.msk [vmem:[#allocation3 + $0x1e0] sm:$0xff] %vm699_vm2, %v8078_v3  ;;  %v8180_v25 = vsel %vm699_vm2, %v8078_v3, 0.0  ;;  %v8223_v63 = vmul.f32 %v8078_v3, %v8078_v3  ;;  %v8081_v24 = vadd.f32 %v15027_v38, %v8080_v49  ;;  %v8184_v38 = vsel %vm699_vm2, %v8086_v16, 0.0  ;;  %v8302_v3 = vld [vmem:[%s15563_s14] sm:$0x1] }
0x1414   :  { %v8181_v52 = vadd.f32 %v8180_v25, %v8179_v27  ;;  %8124 = vst.msk [vmem:[#allocation3 + $0x1f8] sm:$0xff] %vm699_vm2, %v8089_v44  ;;  %v8281_v20 = vadd.f32 %v8280_v61, %v8279_v57  ;;  %v8226_v50 = vmul.f32 %v8089_v44, %v8089_v44  ;;  %v8186_v1 = vsel %vm699_vm2, %v8089_v44, 0.0  ;;  %v8309_v57 = vld [vmem:[#allocation3] sm:$0xff]  ;;  %v8311_v25 = vld [vmem:[#allocation3 + $0x10] sm:$0xff] }
0x1415   :  { %v8282_v0 = vsel %vm699_vm2, %v8223_v63, 0.0  ;;  %8122 = vst.msk [vmem:[#allocation3 + $0x1e8] sm:$0xff] %vm699_vm2, %v8081_v24  ;;  %v8182_v9 = vsel %vm699_vm2, %v8081_v24, 0.0  ;;  %v8224_v28 = vmul.f32 %v8081_v24, %v8081_v24  ;;  %v8286_v59 = vsel %vm699_vm2, %v8225_v35, 0.0  ;;  %v8310_v63 = vld [vmem:[#allocation3 + $0x8] sm:$0xff]  ;;  %v8312_v24 = vld [vmem:[#allocation3 + $0x18] sm:$0xff] }
0x1416   :  { %v8183_v54 = vadd.f32 %v8182_v9, %v8181_v52  ;;  %v8283_v47 = vadd.f32 %v8282_v0, %v8281_v20  ;;  %v8288_v36 = vsel %vm699_vm2, %v8226_v50, 0.0  ;;  %v4756_v41 = vrot.slane %v4755_v34, 1  ;;  %v8315_v61 = vld [vmem:[#allocation3 + $0x30] sm:$0xff]  ;;  %v8316_v35 = vld [vmem:[#allocation3 + $0x38] sm:$0xff] }
0x1417   :  { %v8284_v48 = vsel %vm699_vm2, %v8224_v28, 0.0  ;;  %v4858_v13 = vrot.slane %v4857_v14, 1  ;;  %v8313_v28 = vld [vmem:[#allocation3 + $0x20] sm:$0xff] }
0x1418   :  { %v8185_v10 = vadd.f32 %v8184_v38, %v8183_v54  ;;  %v8285_v55 = vadd.f32 %v8284_v48, %v8283_v47  ;;  %v4757_v12 = vadd.f32 %v4756_v41, %v4755_v34 }
0x1419   :  { %v4859_v17 = vadd.f32 %v4858_v13, %v4857_v14  ;;  %v8317_v14 = vld [vmem:[#allocation3 + $0x40] sm:$0xff] }
0x141a   :  { %v8187_v51 = vadd.f32 %v8186_v1, %v8185_v10  ;;  %v8287_v30 = vadd.f32 %v8286_v59, %v8285_v55  ;;  %v8417_v1 = vld [vmem:[#allocation2] sm:$0xff]  ;;  %v8418_v55 = vld [vmem:[#allocation2 + $0x8] sm:$0xff]  ;;  %v8420_v59 = vld [vmem:[#allocation2 + $0x18] sm:$0xff] }
0x141c   :  { %v8188_v11 = vrot.slane %v8187_v51, 4  ;;  %v8289_v56 = vadd.f32 %v8288_v36, %v8287_v30  ;;  %v8421_v36 = vld [vmem:[#allocation2 + $0x20] sm:$0xff] }
0x141e   :  { %v8189_v5 = vadd.f32 %v8188_v11, %v8187_v51  ;;  %v8290_v60 = vrot.slane %v8289_v56, 4 }
0x1420   :  { %v8190_v32 = vrot.slane %v8189_v5, 2  ;;  %v8291_v40 = vadd.f32 %v8290_v60, %v8289_v56 }
0x1422   :  { %v8191_v6 = vadd.f32 %v8190_v32, %v8189_v5  ;;  %v8292_v26 = vrot.slane %v8291_v40, 2  ;;  %v8422_v32 = vld [vmem:[#allocation2 + $0x28] sm:$0xff] }
0x1424   :  { %v8192_v39 = vrot.slane %v8191_v6, 1  ;;  %v8293_v43 = vadd.f32 %v8292_v26, %v8291_v40  ;;  %v8318_v40 = vld [vmem:[#allocation3 + $0x48] sm:$0xff]  ;;  %v8423_v26 = vld [vmem:[#allocation2 + $0x30] sm:$0xff] }
0x1426   :  { %v8193_v46 = vadd.f32 %v8192_v39, %v8191_v6  ;;  %v8294_v7 = vrot.slane %v8293_v43, 1  ;;  %v8424_v39 = vld [vmem:[#allocation2 + $0x38] sm:$0xff] }
0x1428   :  { %v8194_v58 = vadd.f32 %v8193_v46, %v4757_v12  ;;  %v8295_v23 = vadd.f32 %v8294_v7, %v8293_v43 }
0x142a   :  { %v8297_v31 = vmul.f32 0.001953125, %v8194_v58  ;;  %v8296_v19 = vadd.f32 %v8295_v23, %v4859_v17 }
0x142c   :  { %v8299_v15 = vmul.f32 %v8297_v31, %v8297_v31  ;;  %v8298_v16 = vmul.f32 0.001953125, %v8296_v19 }
0x142e   :  { %v8300_v53 = vsub.f32 %v8298_v16, %v8299_v15  ;;  %v8319_v16 = vld [vmem:[#allocation3 + $0x50] sm:$0xff] }
0x1430   :  { %v8301_v4 = vmax.f32 %v8300_v53, 0.0  ;;  %v8320_v53 = vld [vmem:[#allocation3 + $0x58] sm:$0xff] }
0x1432   :  { %v8303_v21 = vadd.f32 1e-05, %v8301_v4 }
0x1434   :  { %11330 = vrsqrt.f32 %v8303_v21 }
0x143e   :  { %v11331_v37 = vpop.eup %11330 }
0x143f   :  { %v8305_v29 = vmul.f32 %v11331_v37, %v8302_v3  ;;  %v8425_v37 = vld [vmem:[#allocation2 + $0x40] sm:$0xff] }
0x1441   :  { %v8307_v27 = vmul.f32 %v8305_v29, %v8297_v31  ;;  %v15168_v44 = vrot.slane %v8305_v29, %v15783_v22  ;;  %v8426_v29 = vld [vmem:[#allocation2 + $0x48] sm:$0xff] }
0x1443   :  { %v8308_v49 = vsub.f32 %v8306_v62, %v8307_v27  ;;  %v8347_v33 = vmul.f32 %v15168_v44, %v8309_v57  ;;  %v8348_v20 = vmul.f32 %v15168_v44, %v8310_v63  ;;  %v8349_v0 = vmul.f32 %v15168_v44, %v8311_v25  ;;  %v8321_v25 = vld [vmem:[#allocation3 + $0x60] sm:$0xff] }
0x1444   :  { %v8350_v9 = vmul.f32 %v15168_v44, %v8312_v24  ;;  %v8351_v54 = vmul.f32 %v15168_v44, %v8313_v28  ;;  %v8352_v38 = vmul.f32 %v15168_v44, %v8314_v8  ;;  %v8353_v47 = vmul.f32 %v15168_v44, %v8315_v61  ;;  %v8322_v61 = vld [vmem:[#allocation3 + $0x68] sm:$0xff] }
0x1445   :  { %v15172_v52 = vrot.slane %v8308_v49, %v15783_v22  ;;  %v8354_v48 = vmul.f32 %v15168_v44, %v8316_v35  ;;  %v8355_v13 = vmul.f32 %v15168_v44, %v8317_v14  ;;  %v8356_v43 = vmul.f32 %v15168_v44, %v8318_v40 }
0x1446   :  { %v8357_v4 = vmul.f32 %v15168_v44, %v8319_v16  ;;  %v8358_v62 = vmul.f32 %v15168_v44, %v8320_v53 }
0x1447   :  { %v8385_v22 = vadd.f32 %v15172_v52, %v8347_v33  ;;  %v8386_v50 = vadd.f32 %v15172_v52, %v8348_v20  ;;  %v8387_v10 = vadd.f32 %v15172_v52, %v8349_v0  ;;  %v8388_v42 = vadd.f32 %v15172_v52, %v8350_v9  ;;  %v8427_v0 = vld [vmem:[#allocation2 + $0x50] sm:$0xff] }
0x1448   :  { %v8389_v51 = vadd.f32 %v15172_v52, %v8351_v54  ;;  %v8390_v30 = vadd.f32 %v15172_v52, %v8352_v38  ;;  %v8391_v11 = vadd.f32 %v15172_v52, %v8353_v47  ;;  %v8392_v18 = vadd.f32 %v15172_v52, %v8354_v48  ;;  %v8428_v54 = vld [vmem:[#allocation2 + $0x58] sm:$0xff]  ;;  %v8323_v47 = vld [vmem:[#allocation3 + $0x70] sm:$0xff] }
0x1449   :  { %v8449_v56 = vadd.f32 %v8417_v1, %v8385_v22  ;;  %v8450_v34 = vadd.f32 %v8418_v55, %v8386_v50  ;;  %v8451_v5 = vadd.f32 %v8419_v2, %v8387_v10  ;;  %v8452_v60 = vadd.f32 %v8420_v59, %v8388_v42  ;;  %v8324_v48 = vld [vmem:[#allocation3 + $0x78] sm:$0xff]  ;;  %v8429_v1 = vld [vmem:[#allocation2 + $0x60] sm:$0xff] }
0x144a   :  { %v8453_v41 = vadd.f32 %v8421_v36, %v8389_v51  ;;  %v8454_v6 = vadd.f32 %v8422_v32, %v8390_v30  ;;  %v8455_v7 = vadd.f32 %v8423_v26, %v8391_v11  ;;  %v8456_v58 = vadd.f32 %v8424_v39, %v8392_v18  ;;  %v8325_v59 = vld [vmem:[#allocation3 + $0x80] sm:$0xff]  ;;  %v8430_v51 = vld [vmem:[#allocation2 + $0x68] sm:$0xff]  ;;  %v8432_v32 = vld [vmem:[#allocation2 + $0x78] sm:$0xff] }
0x144b   :  { %v8481_v12 = vmax.f32 %v8449_v56, %v8451_v5  ;;  %v8482_v46 = vmax.f32 %v8450_v34, %v8452_v60  ;;  %v8393_v17 = vadd.f32 %v15172_v52, %v8355_v13  ;;  %v8394_v23 = vadd.f32 %v15172_v52, %v8356_v43 }
0x144c   :  { %v8483_v19 = vmax.f32 %v8451_v5, %v8453_v41  ;;  %v8484_v15 = vmax.f32 %v8452_v60, %v8454_v6  ;;  %v8485_v21 = vmax.f32 %v8453_v41, %v8455_v7  ;;  %v8486_v3 = vmax.f32 %v8454_v6, %v8456_v58  ;;  %v8326_v5 = vld [vmem:[#allocation3 + $0x88] sm:$0xff]  ;;  %v8431_v60 = vld [vmem:[#allocation2 + $0x70] sm:$0xff] }
0x144d   :  { %v8511_v31 = vpack.c.bf16 %v8482_v46, %v8481_v12  ;;  %v8457_v27 = vadd.f32 %v8425_v37, %v8393_v17  ;;  %v8458_v49 = vadd.f32 %v8426_v29, %v8394_v23  ;;  %v8395_v57 = vadd.f32 %v15172_v52, %v8357_v4  ;;  %v8433_v12 = vld [vmem:[#allocation2 + $0x80] sm:$0xff]  ;;  %v8327_v46 = vld [vmem:[#allocation3 + $0x90] sm:$0xff]  ;;  %v8330_v37 = vld [vmem:[#allocation3 + $0xa8] sm:$0xff] }
0x144e   :  { %v8512_v63 = vpack.c.bf16 %v8484_v15, %v8483_v19  ;;  %v8396_v24 = vadd.f32 %v15172_v52, %v8358_v62  ;;  %v8359_v33 = vmul.f32 %v15168_v44, %v8321_v25  ;;  %v8513_v20 = vpack.c.bf16 %v8486_v3, %v8485_v21  ;;  %v8434_v19 = vld [vmem:[#allocation2 + $0x88] sm:$0xff]  ;;  %v8329_v3 = vld [vmem:[#allocation3 + $0xa0] sm:$0xff] }
0x144f   :  { %8527 = vmatpush1.bf16.msra.mxu1 %v8511_v31  ;;  %8592 = vmatpush1.bf16.msra.mxu0 %v8511_v31  ;;  %v8360_v9 = vmul.f32 %v15168_v44, %v8322_v61  ;;  %v8487_v8 = vmax.f32 %v8455_v7, %v8457_v27  ;;  %v8488_v35 = vmax.f32 %v8456_v58, %v8458_v49  ;;  %v8328_v58 = vld [vmem:[#allocation3 + $0x98] sm:$0xff]  ;;  %v8331_v61 = vld [vmem:[#allocation3 + $0xb0] sm:$0xff] }
0x1450   :  { %8528 = vmatprep.subr.bf16.mxu1 %v15742_v45  ;;  %8593 = vmatprep.subr.bf16.mxu0 %v15742_v45  ;;  %v8397_v28 = vadd.f32 %v15172_v52, %v8359_v33  ;;  %v8459_v38 = vadd.f32 %v8427_v0, %v8395_v57  ;;  %v8460_v22 = vadd.f32 %v8428_v54, %v8396_v24 }
0x1451   :  { %v8398_v50 = vadd.f32 %v15172_v52, %v8360_v9  ;;  %v8361_v10 = vmul.f32 %v15168_v44, %v8323_v47  ;;  %v8362_v42 = vmul.f32 %v15168_v44, %v8324_v48  ;;  %v8363_v36 = vmul.f32 %v15168_v44, %v8325_v59  ;;  %v8437_v47 = vld [vmem:[#allocation2 + $0xa0] sm:$0xff]  ;;  %v8438_v48 = vld [vmem:[#allocation2 + $0xa8] sm:$0xff] }
0x1452   :  { %v8461_v30 = vadd.f32 %v8429_v1, %v8397_v28  ;;  %v8514_v11 = vpack.c.bf16 %v8488_v35, %v8487_v8  ;;  %v8489_v18 = vmax.f32 %v8457_v27, %v8459_v38  ;;  %v8490_v56 = vmax.f32 %v8458_v49, %v8460_v22  ;;  %v8435_v49 = vld [vmem:[#allocation2 + $0x90] sm:$0xff]  ;;  %v8333_v1 = vld [vmem:[#allocation3 + $0xc0] sm:$0xff]  ;;  %v8334_v59 = vld [vmem:[#allocation3 + $0xc8] sm:$0xff] }
0x1453   :  { %8529 = vmatpush1.bf16.msra.mxu1 %v8512_v63  ;;  %8594 = vmatpush1.bf16.msra.mxu0 %v8512_v63  ;;  %v8399_v55 = vadd.f32 %v15172_v52, %v8361_v10  ;;  %v8400_v2 = vadd.f32 %v15172_v52, %v8362_v42  ;;  %v8462_v34 = vadd.f32 %v8430_v51, %v8398_v50  ;;  %v8436_v63 = vld [vmem:[#allocation2 + $0x98] sm:$0xff] }
0x1454   :  { %8530 = vmatprep.subr.bf16.mxu1 %v15742_v45  ;;  %8595 = vmatprep.subr.bf16.mxu0 %v15742_v45  ;;  %v8364_v14 = vmul.f32 %v15168_v44, %v8326_v5  ;;  %v8401_v40 = vadd.f32 %v15172_v52, %v8363_v36  ;;  %v8515_v39 = vpack.c.bf16 %v8490_v56, %v8489_v18 }
0x1455   :  { %v8463_v41 = vadd.f32 %v8431_v60, %v8399_v55  ;;  %v8464_v6 = vadd.f32 %v8432_v32, %v8400_v2  ;;  %v8491_v13 = vmax.f32 %v8459_v38, %v8461_v30  ;;  %v8492_v43 = vmax.f32 %v8460_v22, %v8462_v34  ;;  %v8439_v55 = vld [vmem:[#allocation2 + $0xb0] sm:$0xff]  ;;  %v8440_v2 = vld [vmem:[#allocation2 + $0xb8] sm:$0xff] }
0x1456   :  { %v8402_v26 = vadd.f32 %v15172_v52, %v8364_v14  ;;  %v15217_v7 = vadd.f32 %v8433_v12, %v8401_v40  ;;  %v8365_v17 = vmul.f32 %v15168_v44, %v8327_v46  ;;  %v8366_v15 = vmul.f32 %v15168_v44, %v8328_v58  ;;  %v8335_v32 = vld [vmem:[#allocation3 + $0xd0] sm:$0xff]  ;;  %v8336_v14 = vld [vmem:[#allocation3 + $0xd8] sm:$0xff]  ;;  %v8442_v12 = vld [vmem:[#allocation2 + $0xc8] sm:$0xff] }
0x1457   :  { %8531 = vmatpush1.bf16.msra.mxu1 %v8513_v20  ;;  %8596 = vmatpush1.bf16.msra.mxu0 %v8513_v20  ;;  %v8493_v23 = vmax.f32 %v8461_v30, %v8463_v41  ;;  %v8494_v31 = vmax.f32 %v8462_v34, %v8464_v6  ;;  %v8516_v4 = vpack.c.bf16 %v8492_v43, %v8491_v13  ;;  %v8332_v20 = vld [vmem:[#allocation3 + $0xb8] sm:$0xff]  ;;  %v8337_v13 = vld [vmem:[#allocation3 + $0xe0] sm:$0xff]  ;;  %v8338_v43 = vld [vmem:[#allocation3 + $0xe8] sm:$0xff] }
0x1458   :  { %8532 = vmatprep.subr.bf16.mxu1 %v15742_v45  ;;  %8597 = vmatprep.subr.bf16.mxu0 %v15742_v45  ;;  %v8466_v16 = vadd.f32 %v8434_v19, %v8402_v26  ;;  %v8403_v53 = vadd.f32 %v15172_v52, %v8365_v17  ;;  %v8404_v21 = vadd.f32 %v15172_v52, %v8366_v15  ;;  %v8441_v26 = vld [vmem:[#allocation2 + $0xc0] sm:$0xff] }
0x1459   :  { %v8367_v29 = vmul.f32 %v15168_v44, %v8329_v3  ;;  %v8517_v62 = vpack.c.bf16 %v8494_v31, %v8493_v23  ;;  %v8495_v27 = vmax.f32 %v8463_v41, %v15217_v7  ;;  %v8368_v57 = vmul.f32 %v15168_v44, %v8330_v37  ;;  %v8443_v3 = vld [vmem:[#allocation2 + $0xd0] sm:$0xff]  ;;  %v8444_v37 = vld [vmem:[#allocation2 + $0xd8] sm:$0xff] }
0x145a   :  { %v8496_v25 = vmax.f32 %v8464_v6, %v8466_v16  ;;  %v8467_v24 = vadd.f32 %v8435_v49, %v8403_v53  ;;  %v8468_v0 = vadd.f32 %v8436_v63, %v8404_v21  ;;  %v8369_v28 = vmul.f32 %v15168_v44, %v8331_v61  ;;  %v8339_v53 = vld [vmem:[#allocation3 + $0xf0] sm:$0xff]  ;;  %v8446_v63 = vld [vmem:[#allocation2 + $0xe8] sm:$0xff] }
0x145b   :  { %8533 = vmatpush1.bf16.msra.mxu1 %v8514_v11  ;;  %8598 = vmatpush1.bf16.msra.mxu0 %v8514_v11  ;;  %v8405_v33 = vadd.f32 %v15172_v52, %v8367_v29  ;;  %v8406_v9 = vadd.f32 %v15172_v52, %v8368_v57  ;;  %v8370_v8 = vmul.f32 %v15168_v44, %v8332_v20  ;;  %v8340_v29 = vld [vmem:[#allocation3 + $0xf8] sm:$0xff] }
0x145c   :  { %8534 = vmatprep.subr.bf16.mxu1 %v15742_v45  ;;  %8599 = vmatprep.subr.bf16.mxu0 %v15742_v45  ;;  %v8407_v35 = vadd.f32 %v15172_v52, %v8369_v28  ;;  %v8518_v38 = vpack.c.bf16 %v8496_v25, %v8495_v27  ;;  %v8497_v22 = vmax.f32 %v15217_v7, %v8467_v24  ;;  %v8445_v25 = vld [vmem:[#allocation2 + $0xe0] sm:$0xff] }
0x145d   :  { %v8408_v54 = vadd.f32 %v15172_v52, %v8370_v8  ;;  %v8498_v50 = vmax.f32 %v8466_v16, %v8468_v0  ;;  %v8469_v10 = vadd.f32 %v8437_v47, %v8405_v33  ;;  %v8470_v42 = vadd.f32 %v8438_v48, %v8406_v9  ;;  %v8672_v9 = vld [vmem:[#allocation3 + $0x100] sm:$0xff] }
0x145e   :  { %v8371_v51 = vmul.f32 %v15168_v44, %v8333_v1  ;;  %v8471_v30 = vadd.f32 %v8439_v55, %v8407_v35  ;;  %v8372_v11 = vmul.f32 %v15168_v44, %v8334_v59  ;;  %v8373_v40 = vmul.f32 %v15168_v44, %v8335_v32  ;;  %v8675_v1 = vld [vmem:[#allocation3 + $0x118] sm:$0xff] }
0x145f   :  { %8535 = vmatpush1.bf16.msra.mxu1 %v8515_v39  ;;  %8600 = vmatpush1.bf16.msra.mxu0 %v8515_v39  ;;  %v8472_v36 = vadd.f32 %v8440_v2, %v8408_v54  ;;  %v8519_v56 = vpack.c.bf16 %v8498_v50, %v8497_v22  ;;  %v8499_v34 = vmax.f32 %v8467_v24, %v8469_v10  ;;  %v8447_v54 = vld [vmem:[#allocation2 + $0xf0] sm:$0xff]  ;;  %v8448_v50 = vld [vmem:[#allocation2 + $0xf8] sm:$0xff] }
0x1460   :  { %8536 = vmatprep.subr.bf16.mxu1 %v15742_v45  ;;  %8601 = vmatprep.subr.bf16.mxu0 %v15742_v45  ;;  %v8409_v18 = vadd.f32 %v15172_v52, %v8371_v51  ;;  %v8500_v5 = vmax.f32 %v8468_v0, %v8470_v42  ;;  %v8410_v60 = vadd.f32 %v15172_v52, %v8372_v11 }
0x1461   :  { %v8501_v41 = vmax.f32 %v8469_v10, %v8471_v30  ;;  %v8502_v6 = vmax.f32 %v8470_v42, %v8472_v36  ;;  %v8374_v39 = vmul.f32 %v15168_v44, %v8336_v14  ;;  %v8375_v7 = vmul.f32 %v15168_v44, %v8337_v13  ;;  %v8674_v42 = vld [vmem:[#allocation3 + $0x110] sm:$0xff]  ;;  %v8771_v13 = vld [vmem:[#allocation2 + $0x118] sm:$0xff] }
0x1462   :  { %v8473_v46 = vadd.f32 %v8441_v26, %v8409_v18  ;;  %v8376_v58 = vmul.f32 %v15168_v44, %v8338_v43  ;;  %v8520_v17 = vpack.c.bf16 %v8500_v5, %v8499_v34  ;;  %v8474_v23 = vadd.f32 %v8442_v12, %v8410_v60  ;;  %v8676_v34 = vld [vmem:[#allocation3 + $0x120] sm:$0xff]  ;;  %v8677_v60 = vld [vmem:[#allocation3 + $0x128] sm:$0xff] }
0x1463   :  { %8537 = vmatpush1.bf16.msra.mxu1 %v8516_v4  ;;  %8602 = vmatpush1.bf16.msra.mxu0 %v8516_v4  ;;  %v8411_v31 = vadd.f32 %v15172_v52, %v8373_v40  ;;  %v8412_v19 = vadd.f32 %v15172_v52, %v8374_v39  ;;  %v8413_v15 = vadd.f32 %v15172_v52, %v8375_v7  ;;  %v8770_v39 = vld [vmem:[#allocation2 + $0x110] sm:$0xff] }
0x1464   :  { %8538 = vmatprep.subr.bf16.mxu1 %v15742_v45  ;;  %8603 = vmatprep.subr.bf16.mxu0 %v15742_v45  ;;  %v8414_v16 = vadd.f32 %v15172_v52, %v8376_v58  ;;  %v8521_v4 = vpack.c.bf16 %v8502_v6, %v8501_v41  ;;  %v8503_v21 = vmax.f32 %v8471_v30, %v8473_v46  ;;  %v8768_v41 = vld [vmem:[#allocation2 + $0x100] sm:$0xff]  ;;  %v8769_v6 = vld [vmem:[#allocation2 + $0x108] sm:$0xff]  ;;  %v8678_v7 = vld [vmem:[#allocation3 + $0x130] sm:$0xff] }
0x1465   :  { %v8504_v27 = vmax.f32 %v8472_v36, %v8474_v23  ;;  %v8475_v49 = vadd.f32 %v8443_v3, %v8411_v31  ;;  %v8476_v57 = vadd.f32 %v8444_v37, %v8412_v19  ;;  %v8378_v24 = vmul.f32 %v15168_v44, %v8340_v29  ;;  %v8679_v19 = vld [vmem:[#allocation3 + $0x138] sm:$0xff]  ;;  %v8773_v3 = vld [vmem:[#allocation2 + $0x128] sm:$0xff] }
0x1466   :  { %v15259_v33 = vadd.f32 %v8445_v25, %v8413_v15  ;;  %v15261_v61 = vadd.f32 %v8446_v63, %v8414_v16  ;;  %v8704_v47 = vmul.f32 %v8672_v9, %v15168_v44  ;;  %v8706_v59 = vmul.f32 %v8674_v42, %v15168_v44  ;;  %v8772_v15 = vld [vmem:[#allocation2 + $0x120] sm:$0xff]  ;;  %v8681_v25 = vld [vmem:[#allocation3 + $0x148] sm:$0xff]  ;;  %v8774_v63 = vld [vmem:[#allocation2 + $0x130] sm:$0xff] }
0x1467   :  { %8539 = vmatpush1.bf16.msra.mxu1 %v8517_v62  ;;  %8604 = vmatpush1.bf16.msra.mxu0 %v8517_v62  ;;  %v8377_v62 = vmul.f32 %v15168_v44, %v8339_v53  ;;  %v8416_v0 = vadd.f32 %v15172_v52, %v8378_v24  ;;  %v8522_v28 = vpack.c.bf16 %v8504_v27, %v8503_v21 }
0x1468   :  { %8540 = vmatprep.subr.bf16.mxu1 %v15742_v45  ;;  %8605 = vmatprep.subr.bf16.mxu0 %v15742_v45  ;;  %v8505_v8 = vmax.f32 %v8473_v46, %v8475_v49  ;;  %v8506_v35 = vmax.f32 %v8474_v23, %v8476_v57  ;;  %v8507_v48 = vmax.f32 %v8475_v49, %v15259_v33 }
0x1469   :  { %v8415_v20 = vadd.f32 %v15172_v52, %v8377_v62  ;;  %v8508_v22 = vmax.f32 %v8476_v57, %v15261_v61  ;;  %v8480_v2 = vadd.f32 %v8448_v50, %v8416_v0  ;;  %v8707_v51 = vmul.f32 %v8675_v1, %v15168_v44  ;;  %v8777_v1 = vld [vmem:[#allocation2 + $0x148] sm:$0xff] }
0x146a   :  { %v8736_v30 = vadd.f32 %v8704_v47, %v15172_v52  ;;  %v8523_v11 = vpack.c.bf16 %v8506_v35, %v8505_v8  ;;  %v8738_v18 = vadd.f32 %v8706_v59, %v15172_v52  ;;  %v8708_v32 = vmul.f32 %v8676_v34, %v15168_v44  ;;  %v15307_v47 = vld [vmem:[%s15565_s16] ss:$8 sps:$4 sm:$0xff]  }
0x146b   :  { %8541 = vmatpush1.bf16.msra.mxu1 %v8518_v38  ;;  %8606 = vmatpush1.bf16.msra.mxu0 %v8518_v38  ;;  %v8673_v38 = vld [vmem:[#allocation3 + $0x108] sm:$0xff]  ;;  %v8479_v10 = vadd.f32 %v8447_v54, %v8415_v20  ;;  %v8524_v5 = vpack.c.bf16 %v8508_v22, %v8507_v48  ;;  %v8510_v40 = vmax.f32 %v15261_v61, %v8480_v2  ;;  %v8775_v20 = vld [vmem:[#allocation2 + $0x138] sm:$0xff]  ;;  %v8682_v54 = vld [vmem:[#allocation3 + $0x150] sm:$0xff] }
0x146c   :  { %8542 = vmatprep.subr.bf16.mxu1 %v15742_v45  ;;  %8607 = vmatprep.subr.bf16.mxu0 %v15742_v45  ;;  %v8705_v55 = vmul.f32 %v8673_v38, %v15168_v44  ;;  %v8709_v26 = vmul.f32 %v8677_v60, %v15168_v44  ;;  %v8800_v43 = vadd.f32 %v8768_v41, %v8736_v30  ;;  %v8683_v38 = vld [vmem:[#allocation3 + $0x158] sm:$0xff]  ;;  %v15313_v48 = vld [vmem:[%s15565_s16 + $0x40] ss:$8 sps:$4 sm:$0xff]  }
0x146d   :  { %v8509_v14 = vmax.f32 %v15259_v33, %v8479_v10  ;;  %v8740_v46 = vadd.f32 %v8708_v32, %v15172_v52  ;;  %v8802_v58 = vadd.f32 %v8770_v39, %v8738_v18  ;;  %v8710_v31 = vmul.f32 %v8678_v7, %v15168_v44  ;;  %v8776_v22 = vld [vmem:[#allocation2 + $0x140] sm:$0xff]  ;;  %v15340_v60 = vld [vmem:[%s15565_s16 + $0x54] ss:$8 sps:$4 sm:$0xff]   ;;  %v8781_v7 = vld [vmem:[#allocation2 + $0x168] sm:$0xff] }
0x146e   :  { %v8737_v36 = vadd.f32 %v8705_v55, %v15172_v52  ;;  %v8741_v23 = vadd.f32 %v8709_v26, %v15172_v52  ;;  %v8711_v16 = vmul.f32 %v8679_v19, %v15168_v44  ;;  %v8713_v24 = vmul.f32 %v8681_v25, %v15168_v44  ;;  %v8684_v30 = vld [vmem:[#allocation3 + $0x160] sm:$0xff] }
0x146f   :  { %8543 = vmatpush1.bf16.msra.mxu1 %v8519_v56  ;;  %8608 = vmatpush1.bf16.msra.mxu0 %v8519_v56  ;;  %v8739_v56 = vadd.f32 %v8707_v51, %v15172_v52  ;;  %v8742_v53 = vadd.f32 %v8710_v31, %v15172_v52  ;;  %v8525_v21 = vpack.c.bf16 %v8510_v40, %v8509_v14  ;;  %v8778_v14 = vld [vmem:[#allocation2 + $0x150] sm:$0xff]  ;;  %v8779_v40 = vld [vmem:[#allocation2 + $0x158] sm:$0xff] }
0x1470   :  { %8544 = vmatprep.subr.bf16.mxu1 %v15742_v45  ;;  %8609 = vmatprep.subr.bf16.mxu0 %v15742_v45  ;;  %v8801_v12 = vadd.f32 %v8769_v6, %v8737_v36  ;;  %v15292_v37 = vadd.f32 %v8772_v15, %v8740_v46  ;;  %v8832_v62 = vmax.f32 %v8800_v43, %v8802_v58  ;;  %v8685_v36 = vld [vmem:[#allocation3 + $0x168] sm:$0xff]  ;;  %v8780_v46 = vld [vmem:[#allocation2 + $0x160] sm:$0xff]  ;;  %v15361_v31 = vld [vmem:[%s15565_s16 + $0x50] ss:$8 sps:$4 sm:$0xff]  }
0x1471   :  { %v8805_v49 = vadd.f32 %v8773_v3, %v8741_v23  ;;  %v8743_v57 = vadd.f32 %v8711_v16, %v15172_v52  ;;  %v15297_v33 = vadd.f32 %v8774_v63, %v8742_v53  ;;  %v8745_v0 = vadd.f32 %v8713_v24, %v15172_v52  ;;  %v15355_v23 = vld [vmem:[%s15565_s16 + $0x10] ss:$8 sps:$4 sm:$0xff]   ;;  %v8688_v3 = vld [vmem:[#allocation3 + $0x180] sm:$0xff] }
0x1472   :  { %v8714_v50 = vmul.f32 %v8682_v54, %v15168_v44  ;;  %v8715_v10 = vmul.f32 %v8683_v38, %v15168_v44  ;;  %v8717_v34 = vmul.f32 %v8685_v36, %v15168_v44  ;;  %v8691_v54 = vld [vmem:[#allocation3 + $0x198] sm:$0xff]  ;;  %v8784_v38 = vld [vmem:[#allocation2 + $0x180] sm:$0xff] }
0x1473   :  { %8545 = vmatpush1.bf16.msra.mxu1 %v8520_v17  ;;  %8610 = vmatpush1.bf16.msra.mxu0 %v8520_v17  ;;  %v8803_v17 = vadd.f32 %v8771_v13, %v8739_v56  ;;  %v8807_v35 = vadd.f32 %v8775_v20, %v8743_v57  ;;  %v8836_v42 = vmax.f32 %v15292_v37, %v15297_v33  ;;  %v15386_v57 = vld [vmem:[%s15565_s16 + $0x64] ss:$8 sps:$4 sm:$0xff]   ;;  %v8783_v20 = vld [vmem:[#allocation2 + $0x178] sm:$0xff] }
0x1474   :  { %8546 = vmatprep.subr.bf16.mxu1 %v15742_v45  ;;  %8611 = vmatprep.subr.bf16.mxu0 %v15742_v45  ;;  %v15324_v2 = vadd.f32 %v8777_v1, %v8745_v0  ;;  %v8746_v59 = vadd.f32 %v8714_v50, %v15172_v52  ;;  %v8747_v51 = vadd.f32 %v8715_v10, %v15172_v52  ;;  %v15402_v10 = vld [vmem:[%s15565_s16 + $0x20] ss:$8 sps:$4 sm:$0xff]  }
0x1475   :  { %v8833_v27 = vmax.f32 %v8801_v12, %v8803_v17  ;;  %v8835_v8 = vmax.f32 %v8803_v17, %v8805_v49  ;;  %v8837_v18 = vmax.f32 %v8805_v49, %v8807_v35  ;;  %v8716_v56 = vmul.f32 %v8684_v30, %v15168_v44  ;;  %v8686_v12 = vld [vmem:[#allocation3 + $0x170] sm:$0xff]  ;;  %v15379_v49 = vld [vmem:[%s15565_s16 + $0x24] ss:$8 sps:$4 sm:$0xff]  }
0x1476   :  { %v8749_v6 = vadd.f32 %v8717_v34, %v15172_v52  ;;  %v8839_v26 = vmax.f32 %v8807_v35, %v15324_v2  ;;  %v8810_v39 = vadd.f32 %v8778_v14, %v8746_v59  ;;  %v8811_v13 = vadd.f32 %v8779_v40, %v8747_v51  ;;  %v8690_v35 = vld [vmem:[#allocation3 + $0x190] sm:$0xff]  ;;  %v8692_v36 = vld [vmem:[#allocation3 + $0x1a0] sm:$0xff]  ;;  %v8693_v14 = vld [vmem:[#allocation3 + $0x1a8] sm:$0xff] }
0x1477   :  { %8547 = vmatpush1.bf16.msra.mxu1 %v8521_v4  ;;  %8612 = vmatpush1.bf16.msra.mxu0 %v8521_v4  ;;  %v8680_v4 = vld [vmem:[#allocation3 + $0x140] sm:$0xff]  ;;  %v8862_v9 = vpack.c.bf16 %v8833_v27, %v8832_v62  ;;  %v8748_v41 = vadd.f32 %v8716_v56, %v15172_v52  ;;  %v8864_v43 = vpack.c.bf16 %v8837_v18, %v8836_v42  ;;  %v8689_v62 = vld [vmem:[#allocation3 + $0x188] sm:$0xff]  ;;  %v15423_v34 = vld [vmem:[%s15565_s16 + $0x34] ss:$8 sps:$4 sm:$0xff]  }
0x1478   :  { %8548 = vmatprep.subr.bf16.mxu1 %v15742_v45  ;;  %8613 = vmatprep.subr.bf16.mxu0 %v15742_v45  ;;  %v8712_v29 = vmul.f32 %v8680_v4, %v15168_v44  ;;  %v8718_v17 = vmul.f32 %v8686_v12, %v15168_v44  ;;  %v15366_v15 = vadd.f32 %v8781_v7, %v8749_v6  ;;  %v15408_v42 = vld [vmem:[%s15565_s16 + $0x60] ss:$8 sps:$4 sm:$0xff]   ;;  %v8787_v6 = vld [vmem:[#allocation2 + $0x198] sm:$0xff] }
0x1479   :  { %v15364_v19 = vadd.f32 %v8780_v46, %v8748_v41  ;;  %v8720_v27 = vmul.f32 %v8688_v3, %v15168_v44  ;;  %v8721_v25 = vmul.f32 %v8689_v62, %v15168_v44  ;;  %v8723_v50 = vmul.f32 %v8691_v54, %v15168_v44  ;;  %v8786_v41 = vld [vmem:[#allocation2 + $0x190] sm:$0xff]  ;;  %v8789_v62 = vld [vmem:[#allocation2 + $0x1a8] sm:$0xff]  ;;  %v8791_v54 = vld [vmem:[#allocation2 + $0x1b8] sm:$0xff] }
0x147a   :  { %v8744_v61 = vadd.f32 %v8712_v29, %v15172_v52  ;;  %v8843_v24 = vmax.f32 %v8811_v13, %v15366_v15  ;;  %v8724_v56 = vmul.f32 %v8692_v36, %v15168_v44  ;;  %v8792_v36 = vld [vmem:[#allocation2 + $0x1c0] sm:$0xff] }
0x147b   :  { %8549 = vmatpush1.bf16.msra.mxu1 %v8522_v28  ;;  %8614 = vmatpush1.bf16.msra.mxu0 %v8522_v28  ;;  %v8834_v28 = vmax.f32 %v8802_v58, %v15292_v37  ;;  %v8687_v58 = vld [vmem:[#allocation3 + $0x178] sm:$0xff]  ;;  %v8750_v37 = vadd.f32 %v8718_v17, %v15172_v52  ;;  %v8842_v63 = vmax.f32 %v8810_v39, %v15364_v19  ;;  %v8694_v17 = vld [vmem:[#allocation3 + $0x1b0] sm:$0xff] }
0x147c   :  { %8550 = vmatprep.subr.bf16.mxu1 %v15742_v45  ;;  %8615 = vmatprep.subr.bf16.mxu0 %v15742_v45  ;;  %v15320_v55 = vadd.f32 %v8776_v22, %v8744_v61  ;;  %v8719_v16 = vmul.f32 %v8687_v58, %v15168_v44  ;;  %v8782_v61 = vld [vmem:[#allocation2 + $0x170] sm:$0xff]  ;;  %v8753_v0 = vadd.f32 %v8721_v25, %v15172_v52  ;;  %v8788_v58 = vld [vmem:[#allocation2 + $0x1a0] sm:$0xff] }
0x147d   :  { %v8722_v22 = vmul.f32 %v8690_v35, %v15168_v44  ;;  %v8867_v1 = vpack.c.bf16 %v8843_v24, %v8842_v63  ;;  %v8755_v30 = vadd.f32 %v8723_v50, %v15172_v52  ;;  %v8696_v24 = vld [vmem:[#allocation3 + $0x1c0] sm:$0xff]  ;;  %v8790_v35 = vld [vmem:[#allocation2 + $0x1b0] sm:$0xff] }
0x147e   :  { %v8838_v32 = vmax.f32 %v15297_v33, %v15320_v55  ;;  %v8840_v4 = vmax.f32 %v15320_v55, %v8810_v39  ;;  %v8751_v29 = vadd.f32 %v8719_v16, %v15172_v52  ;;  %v8752_v33 = vadd.f32 %v8720_v27, %v15172_v52  ;;  %v8785_v55 = vld [vmem:[#allocation2 + $0x188] sm:$0xff]  ;;  %v15449_v16 = vld [vmem:[%s15565_s16 + $0x70] ss:$8 sps:$4 sm:$0xff]  }
0x147f   :  { %8551 = vmatpush1.bf16.msra.mxu1 %v8523_v11  ;;  %8616 = vmatpush1.bf16.msra.mxu0 %v8523_v11  ;;  %v8863_v11 = vpack.c.bf16 %v8835_v8, %v8834_v28  ;;  %v8814_v28 = vadd.f32 %v8782_v61, %v8750_v37  ;;  %v8817_v59 = vadd.f32 %v8785_v55, %v8753_v0  ;;  %v11363_v61 = vld [vmem:[%s15565_s16 + $0x4] ss:$8 sps:$4 sm:$0xff]   ;;  %v8698_v50 = vld [vmem:[#allocation3 + $0x1d0] sm:$0xff] }
0x1480   :  { %8552 = vmatprep.subr.bf16.mxu1 %v15742_v45  ;;  %8617 = vmatprep.subr.bf16.mxu0 %v15742_v45  ;;  %v8865_v53 = vpack.c.bf16 %v8839_v26, %v8838_v32  ;;  %v8815_v8 = vadd.f32 %v8783_v20, %v8751_v29  ;;  %v8754_v51 = vadd.f32 %v8722_v22, %v15172_v52  ;;  %v15430_v32 = vld [vmem:[%s15565_s16 + $0x74] ss:$8 sps:$4 sm:$0xff]   ;;  %v11364_v20 = vld [vmem:[%s15565_s16 + $0x44] ss:$8 sps:$4 sm:$0xff]  }
0x1481   :  { %v8725_v26 = vmul.f32 %v8693_v14, %v15168_v44  ;;  %v8756_v39 = vadd.f32 %v8724_v56, %v15172_v52  ;;  %v8819_v12 = vadd.f32 %v8787_v6, %v8755_v30  ;;  %v8728_v0 = vmul.f32 %v8696_v24, %v15168_v44 }
0x1482   :  { %v8845_v18 = vmax.f32 %v15366_v15, %v8815_v8  ;;  %v15443_v15 = vld [vmem:[%s15565_s16 + $0x30] ss:$8 sps:$4 sm:$0xff]  }
0x1483   :  { %8553 = vmatpush1.bf16.msra.mxu1 %v8524_v5  ;;  %8618 = vmatpush1.bf16.msra.mxu0 %v8524_v5  ;;  %v15333_v5 = vld [vmem:[%s15565_s16 + $0x14] ss:$8 sps:$4 sm:$0xff]   ;;  %v8757_v7 = vadd.f32 %v8725_v26, %v15172_v52  ;;  %v8849_v29 = vmax.f32 %v8817_v59, %v8819_v12  ;;  %s11394_s16 = smov [#allocation4]  }
0x1484   :  { %8554 = vmatprep.subr.bf16.mxu1 %v15742_v45  ;;  %8619 = vmatprep.subr.bf16.mxu0 %v15742_v45  ;;  %s9029_s6 = sshll.u32 %s11394_s16, 4  ;;  %s9030_s6 = int_to_ptr.vmem [resolvable:$true] %s9029_s6 }
0x1485   :  { %v8821_v27 = vadd.f32 %v8789_v62, %v8757_v7  ;;  %s11365_s2 = scalar_lea.vmem %s9030_s6, 2048  ;;  %p11370_p1 = scmp.lt.s32.totalorder %s9030_s6, %s9030_s6 }
0x1486   :  { %p11366_p0 = scmp.ne.s32.totalorder %s9030_s6, %s11365_s2  ;;  %p11371_p2 = scmp.lt.s32.totalorder %s11365_s2, %s11365_s2 }
0x1487   :  { %8555 = vmatpush1.bf16.msra.mxu1 %v8525_v21  ;;  %8620 = vmatpush1.bf16.msra.mxu0 %v8525_v21  ;;  %v8841_v21 = vmax.f32 %v15324_v2, %v8811_v13  ;;  %v15411_v2 = vadd.f32 %v8784_v38, %v8752_v33  ;;  %v8847_v13 = vmax.f32 %v8815_v8, %v8817_v59  ;;  %v8697_v33 = vld [vmem:[#allocation3 + $0x1c8] sm:$0xff]  ;;  %v8699_v59 = vld [vmem:[#allocation3 + $0x1d8] sm:$0xff] }
0x1488   :  { %8877 = vmatprep.subr.bf16.mxu1 %v15742_v45  ;;  %8942 = vmatprep.subr.bf16.mxu0 %v15742_v45  ;;  %v8760_v38 = vadd.f32 %v8728_v0, %v15172_v52  ;;  %v8731_v30 = vmul.f32 %v8699_v59, %v15168_v44  ;;  %p11372_p3 = por %p11371_p2, %p11370_p1 }
0x1489   :  { %v8846_v40 = vmax.f32 %v8814_v28, %v15411_v2 }
0x148a   :  { %8559 = vmatmul.mubr.bf16.vlgmr.msra.gmra.mrb[88].mxu1 %v15307_v47  ;;  %8624 = vmatmul.mubr.bf16.vlgmr.msra.gmra.mrb[120].mxu0 %v15313_v48  ;;  %v8824_v56 = vadd.f32 %v8792_v36, %v8760_v38  ;;  %p11373_p4 = pnand %p11372_p3, %p11366_p0 }
0x148b   :  { %8878 = vmatpush1.bf16.msra.mxu1 %v8862_v9  ;;  %8943 = vmatpush1.bf16.msra.mxu0 %v8862_v9  ;;  %v8866_v9 = vpack.c.bf16 %v8841_v21, %v8840_v4  ;;  %v8726_v4 = vmul.f32 %v8694_v17, %v15168_v44  ;;  %v8869_v3 = vpack.c.bf16 %v8847_v13, %v8846_v40  ;;  %v8700_v13 = vld [vmem:[#allocation3 + $0x1e0] sm:$0xff] }
0x148c   :  { %8879 = vmatprep.subr.bf16.mxu1 %v15742_v45  ;;  %8944 = vmatprep.subr.bf16.mxu0 %v15742_v45  ;;  %v8763_v40 = vadd.f32 %v8731_v30, %v15172_v52  ;;  %v8732_v7 = vmul.f32 %v8700_v13, %v15168_v44 }
0x148d   :  { %9531 = vmatprep.mubr.msk.bf16.mxu1 %vm3702_vm5, %v15333_v5  ;;  %9535 = vmatprep.mubr.msk.bf16.mxu0 %vm3702_vm5, %v15340_v60  ;;  %v8758_v25 = vadd.f32 %v8726_v4, %v15172_v52 }
0x148f   :  { %8880 = vmatpush1.bf16.msra.mxu1 %v8863_v11  ;;  %8945 = vmatpush1.bf16.msra.mxu0 %v8863_v11  ;;  %v8844_v11 = vmax.f32 %v15364_v19, %v8814_v28  ;;  %v8695_v19 = vld [vmem:[#allocation3 + $0x1b8] sm:$0xff]  ;;  %v8822_v55 = vadd.f32 %v8790_v35, %v8758_v25 }
0x1490   :  { %8881 = vmatprep.subr.bf16.mxu1 %v15742_v45  ;;  %8946 = vmatprep.subr.bf16.mxu0 %v15742_v45  ;;  %v8727_v21 = vmul.f32 %v8695_v19, %v15168_v44  ;;  %v8799_v35 = vld [vmem:[#allocation2 + $0x1f8] sm:$0xff] }
0x1491   :  { %v8868_v46 = vpack.c.bf16 %v8845_v18, %v8844_v11  ;;  %v8793_v11 = vld [vmem:[#allocation2 + $0x1c8] sm:$0xff]  ;;  %v8854_v17 = vmax.f32 %v8822_v55, %v8824_v56 }
0x1492   :  { %8567 = vmatmul.mubr.bf16.gmra.mrb[92].mxu1 %v15355_v23  ;;  %8632 = vmatmul.mubr.bf16.gmra.mrb[124].mxu0 %v15361_v31  ;;  %v8759_v63 = vadd.f32 %v8727_v21, %v15172_v52  ;;  %v8764_v21 = vadd.f32 %v8732_v7, %v15172_v52 }
0x1493   :  { %8882 = vmatpush1.bf16.msra.mxu1 %v8864_v43  ;;  %8947 = vmatpush1.bf16.msra.mxu0 %v8864_v43  ;;  %v8818_v43 = vadd.f32 %v8786_v41, %v8754_v51  ;;  %v8730_v51 = vmul.f32 %v8698_v50, %v15168_v44 }
0x1494   :  { %8883 = vmatprep.subr.bf16.mxu1 %v15742_v45  ;;  %8948 = vmatprep.subr.bf16.mxu0 %v15742_v45 }
0x1495   :  { %9532 = vmatprep.mubr.msk.bf16.mxu1 %vm3702_vm5, %v15379_v49  ;;  %9536 = vmatprep.mubr.msk.bf16.mxu0 %vm3702_vm5, %v15386_v57  ;;  %v8848_v37 = vmax.f32 %v15411_v2, %v8818_v43  ;;  %v8823_v2 = vadd.f32 %v8791_v54, %v8759_v63  ;;  %v8762_v18 = vadd.f32 %v8730_v51, %v15172_v52 }
0x1497   :  { %8884 = vmatpush1.bf16.msra.mxu1 %v8865_v53  ;;  %8949 = vmatpush1.bf16.msra.mxu0 %v8865_v53  ;;  %v15452_v53 = vadd.f32 %v8788_v58, %v8756_v39  ;;  %v8870_v8 = vpack.c.bf16 %v8849_v29, %v8848_v37  ;;  %v8853_v26 = vmax.f32 %v8821_v27, %v8823_v2  ;;  %v8794_v39 = vld [vmem:[#allocation2 + $0x1d0] sm:$0xff]  ;;  %v8703_v29 = vld [vmem:[#allocation3 + $0x1f8] sm:$0xff] }
0x1498   :  { %8885 = vmatprep.subr.bf16.mxu1 %v15742_v45  ;;  %8950 = vmatprep.subr.bf16.mxu0 %v15742_v45  ;;  %v8702_v37 = vld [vmem:[#allocation3 + $0x1f0] sm:$0xff] }
0x1499   :  { %v8850_v28 = vmax.f32 %v8818_v43, %v15452_v53  ;;  %v8852_v6 = vmax.f32 %v15452_v53, %v8822_v55  ;;  %v8701_v43 = vld [vmem:[#allocation3 + $0x1e8] sm:$0xff]  ;;  %v8734_v62 = vmul.f32 %v8702_v37, %v15168_v44 }
0x149a   :  { %8575 = vmatmul.mubr.bf16.gmra.mrb[96].mxu1 %v15402_v10  ;;  %8640 = vmatmul.mubr.bf16.gmra.mrb[128].mxu0 %v15408_v42  ;;  %v8733_v58 = vmul.f32 %v8701_v43, %v15168_v44 }
0x149b   :  { %8886 = vmatpush1.bf16.msra.mxu1 %v8866_v9  ;;  %8951 = vmatpush1.bf16.msra.mxu0 %v8866_v9  ;;  %v8729_v9 = vmul.f32 %v8697_v33, %v15168_v44  ;;  %v8872_v53 = vpack.c.bf16 %v8853_v26, %v8852_v6  ;;  %v8796_v33 = vld [vmem:[#allocation2 + $0x1e0] sm:$0xff] }
0x149c   :  { %8887 = vmatprep.subr.bf16.mxu1 %v15742_v45  ;;  %8952 = vmatprep.subr.bf16.mxu0 %v15742_v45 }
0x149d   :  { %9533 = vmatprep.mubr.msk.bf16.mxu1 %vm3702_vm5, %v15423_v34  ;;  %9537 = vmatprep.mubr.msk.bf16.mxu0 %vm3702_vm5, %v15430_v32  ;;  %v8761_v22 = vadd.f32 %v8729_v9, %v15172_v52  ;;  %v8766_v9 = vadd.f32 %v8734_v62, %v15172_v52 }
0x149f   :  { %8888 = vmatpush1.bf16.msra.mxu1 %v8867_v1  ;;  %8953 = vmatpush1.bf16.msra.mxu0 %v8867_v1  ;;  %v8851_v1 = vmax.f32 %v8819_v12, %v8821_v27  ;;  %v8825_v14 = vadd.f32 %v8793_v11, %v8761_v22  ;;  %v8795_v12 = vld [vmem:[#allocation2 + $0x1d8] sm:$0xff]  ;;  %v8735_v27 = vmul.f32 %v8703_v29, %v15168_v44 }
0x14a0   :  { %8889 = vmatprep.subr.bf16.mxu1 %v15742_v45  ;;  %8954 = vmatprep.subr.bf16.mxu0 %v15742_v45  ;;  %v8827_v4 = vadd.f32 %v8795_v12, %v8763_v40 }
0x14a1   :  { %v8871_v41 = vpack.c.bf16 %v8851_v1, %v8850_v28  ;;  %v8855_v19 = vmax.f32 %v8823_v2, %v8825_v14  ;;  %v8767_v28 = vadd.f32 %v8735_v27, %v15172_v52 }
0x14a2   :  { %8583 = vmatmul.mubr.bf16.gmra.mrb[100].mxu1 %v15443_v15  ;;  %8648 = vmatmul.mubr.bf16.gmra.mrb[132].mxu0 %v15449_v16  ;;  %v8857_v24 = vmax.f32 %v8825_v14, %v8827_v4 }
0x14a3   :  { %8890 = vmatpush1.bf16.msra.mxu1 %v8868_v46  ;;  %8955 = vmatpush1.bf16.msra.mxu0 %v8868_v46  ;;  %v8826_v46 = vadd.f32 %v8794_v39, %v8762_v18  ;;  %v8873_v25 = vpack.c.bf16 %v8855_v19, %v8854_v17  ;;  %v8831_v50 = vadd.f32 %v8799_v35, %v8767_v28 }
0x14a4   :  { %8891 = vmatprep.subr.bf16.mxu1 %v15742_v45  ;;  %8956 = vmatprep.subr.bf16.mxu0 %v15742_v45 }
0x14a5   :  { %9538 = vmatprep.mubr.msk.bf16.mxu1 %vm3702_vm5, %v11363_v61  ;;  %9542 = vmatprep.mubr.msk.bf16.mxu0 %vm3702_vm5, %v11364_v20  ;;  %v8856_v63 = vmax.f32 %v8824_v56, %v8826_v46  ;;  %v8797_v61 = vld [vmem:[#allocation2 + $0x1e8] sm:$0xff]  ;;  %v8828_v20 = vadd.f32 %v8796_v33, %v8764_v21 }
0x14a7   :  { %8892 = vmatpush1.bf16.msra.mxu1 %v8869_v3  ;;  %8957 = vmatpush1.bf16.msra.mxu0 %v8869_v3  ;;  %v8765_v3 = vadd.f32 %v8733_v58, %v15172_v52  ;;  %v8874_v44 = vpack.c.bf16 %v8857_v24, %v8856_v63  ;;  %v8858_v54 = vmax.f32 %v8826_v46, %v8828_v20 }
0x14a8   :  { %8893 = vmatprep.subr.bf16.mxu1 %v15742_v45  ;;  %8958 = vmatprep.subr.bf16.mxu0 %v15742_v45 }
0x14a9   :  { %v8829_v0 = vadd.f32 %v8797_v61, %v8765_v3 }
0x14ab   :  { %8894 = vmatpush1.bf16.msra.mxu1 %v8870_v8  ;;  %8959 = vmatpush1.bf16.msra.mxu0 %v8870_v8  ;;  %v8798_v8 = vld [vmem:[#allocation2 + $0x1f0] sm:$0xff]  ;;  %v8859_v38 = vmax.f32 %v8827_v4, %v8829_v0  ;;  %v8861_v55 = vmax.f32 %v8829_v0, %v8831_v50 }
0x14ac   :  { %8895 = vmatprep.subr.bf16.mxu1 %v15742_v45  ;;  %8960 = vmatprep.subr.bf16.mxu0 %v15742_v45  ;;  %v8830_v22 = vadd.f32 %v8798_v8, %v8766_v9 }
0x14ad   :  { %v8875_v52 = vpack.c.bf16 %v8859_v38, %v8858_v54 }
0x14ae   :  { %v8860_v1 = vmax.f32 %v8828_v20, %v8830_v22 }
0x14af   :  { %8896 = vmatpush1.bf16.msra.mxu1 %v8871_v41  ;;  %8961 = vmatpush1.bf16.msra.mxu0 %v8871_v41 }
0x14b0   :  { %8897 = vmatprep.subr.bf16.mxu1 %v15742_v45  ;;  %8962 = vmatprep.subr.bf16.mxu0 %v15742_v45  ;;  %v8876_v2 = vpack.c.bf16 %v8861_v55, %v8860_v1 }
0x14b3   :  { %8898 = vmatpush1.bf16.msra.mxu1 %v8872_v53  ;;  %8963 = vmatpush1.bf16.msra.mxu0 %v8872_v53 }
0x14b4   :  { %8899 = vmatprep.subr.bf16.mxu1 %v15742_v45  ;;  %8964 = vmatprep.subr.bf16.mxu0 %v15742_v45 }
0x14b7   :  { %8900 = vmatpush1.bf16.msra.mxu1 %v8873_v25  ;;  %8965 = vmatpush1.bf16.msra.mxu0 %v8873_v25 }
0x14b8   :  { %8901 = vmatprep.subr.bf16.mxu1 %v15742_v45  ;;  %8966 = vmatprep.subr.bf16.mxu0 %v15742_v45 }
0x14bb   :  { %8902 = vmatpush1.bf16.msra.mxu1 %v8874_v44  ;;  %8967 = vmatpush1.bf16.msra.mxu0 %v8874_v44 }
0x14bc   :  { %8903 = vmatprep.subr.bf16.mxu1 %v15742_v45  ;;  %8968 = vmatprep.subr.bf16.mxu0 %v15742_v45 }
0x14bf   :  { %8904 = vmatpush1.bf16.msra.mxu1 %v8875_v52  ;;  %8969 = vmatpush1.bf16.msra.mxu0 %v8875_v52 }
0x14c0   :  { %8905 = vmatprep.subr.bf16.mxu1 %v15742_v45  ;;  %8970 = vmatprep.subr.bf16.mxu0 %v15742_v45 }
0x14c3   :  { %8906 = vmatpush1.bf16.msra.mxu1 %v8876_v2  ;;  %8971 = vmatpush1.bf16.msra.mxu0 %v8876_v2 }
0x14c6   :  { %8910 = vmatmul.mubr.bf16.vlgmr.msra.gmra.mrb[104].mxu1 %v15307_v47  ;;  %8975 = vmatmul.mubr.bf16.vlgmr.msra.gmra.mrb[136].mxu0 %v15313_v48 }
0x14c7   :  { %9539 = vmatprep.mubr.msk.bf16.mxu1 %vm3702_vm5, %v15333_v5  ;;  %9543 = vmatprep.mubr.msk.bf16.mxu0 %vm3702_vm5, %v15340_v60 }
0x14ce   :  { %8918 = vmatmul.mubr.bf16.gmra.mrb[108].mxu1 %v15355_v23  ;;  %8983 = vmatmul.mubr.bf16.gmra.mrb[140].mxu0 %v15361_v31 }
0x14cf   :  { %9540 = vmatprep.mubr.msk.bf16.mxu1 %vm3702_vm5, %v15379_v49  ;;  %9544 = vmatprep.mubr.msk.bf16.mxu0 %vm3702_vm5, %v15386_v57 }
0x14d6   :  { %8926 = vmatmul.mubr.bf16.gmra.mrb[112].mxu1 %v15402_v10  ;;  %8991 = vmatmul.mubr.bf16.gmra.mrb[144].mxu0 %v15408_v42 }
0x14d7   :  { %9541 = vmatprep.mubr.msk.bf16.mxu1 %vm3702_vm5, %v15423_v34  ;;  %9545 = vmatprep.mubr.msk.bf16.mxu0 %vm3702_vm5, %v15430_v32 }
0x14de   :  { %8934 = vmatmul.mubr.bf16.gmra.mrb[116].mxu1 %v15443_v15  ;;  %8999 = vmatmul.mubr.bf16.gmra.mrb[148].mxu0 %v15449_v16 }
0x155d   :  { %v8560_v45 = vpop.f32.mrb[88].mxu1  ;;  %v8625_v47 = vpop.f32.mrb[120].mxu0 }
0x155e   :  { %v8656_v48 = vmax.f32 %v8560_v45, %v8625_v47  ;;  %v8562_v5 = vpop.f32.mrb[89].mxu1  ;;  %v8627_v60 = vpop.f32.mrb[121].mxu0 }
0x155f   :  { %v8563_v23 = vpop.f32.mrb[90].mxu1  ;;  %v8628_v31 = vpop.f32.mrb[122].mxu0 }
0x1560   :  { %8664 = vst.msk [vmem:[#allocation4] sm:$0xff] %vm699_vm2, %v8656_v48  ;;  %v8657_v49 = vmax.f32 %v8563_v23, %v8628_v31  ;;  %v8565_v57 = vpop.f32.mrb[91].mxu1  ;;  %v8630_v10 = vpop.f32.mrb[123].mxu0 }
0x1562   :  { %8665 = vst.msk [vmem:[#allocation4 + $0x8] sm:$0xff] %vm699_vm2, %v8657_v49 }
0x1565   :  { %v8568_v42 = vpop.f32.mrb[92].mxu1  ;;  %v8633_v34 = vpop.f32.mrb[124].mxu0 }
0x1566   :  { %v8658_v32 = vmax.f32 %v8568_v42, %v8633_v34  ;;  %v8570_v15 = vpop.f32.mrb[93].mxu1  ;;  %v8635_v59 = vpop.f32.mrb[125].mxu0 }
0x1567   :  { %v8571_v16 = vpop.f32.mrb[94].mxu1  ;;  %v8636_v51 = vpop.f32.mrb[126].mxu0 }
0x1568   :  { %8666 = vst.msk [vmem:[#allocation4 + $0x10] sm:$0xff] %vm699_vm2, %v8658_v32  ;;  %v8659_v30 = vmax.f32 %v8571_v16, %v8636_v51  ;;  %v8573_v36 = vpop.f32.mrb[95].mxu1  ;;  %v8638_v11 = vpop.f32.mrb[127].mxu0 }
0x156a   :  { %8667 = vst.msk [vmem:[#allocation4 + $0x18] sm:$0xff] %vm699_vm2, %v8659_v30 }
0x156d   :  { %v8576_v18 = vpop.f32.mrb[96].mxu1  ;;  %v8641_v56 = vpop.f32.mrb[128].mxu0 }
0x156e   :  { %v8660_v14 = vmax.f32 %v8576_v18, %v8641_v56  ;;  %v8578_v40 = vpop.f32.mrb[97].mxu1  ;;  %v8643_v41 = vpop.f32.mrb[129].mxu0 }
0x156f   :  { %v8579_v6 = vpop.f32.mrb[98].mxu1  ;;  %v8644_v26 = vpop.f32.mrb[130].mxu0 }
0x1570   :  { %8668 = vst.msk [vmem:[#allocation4 + $0x20] sm:$0xff] %vm699_vm2, %v8660_v14  ;;  %v8661_v39 = vmax.f32 %v8579_v6, %v8644_v26  ;;  %v8581_v13 = vpop.f32.mrb[99].mxu1  ;;  %v8646_v43 = vpop.f32.mrb[131].mxu0 }
0x1572   :  { %8669 = vst.msk [vmem:[#allocation4 + $0x28] sm:$0xff] %vm699_vm2, %v8661_v39 }
0x1575   :  { %v8584_v12 = vpop.f32.mrb[100].mxu1  ;;  %v8649_v46 = vpop.f32.mrb[132].mxu0 }
0x1576   :  { %v8662_v7 = vmax.f32 %v8584_v12, %v8649_v46  ;;  %v8586_v58 = vpop.f32.mrb[101].mxu1  ;;  %v8651_v17 = vpop.f32.mrb[133].mxu0 }
0x1577   :  { %v8587_v19 = vpop.f32.mrb[102].mxu1  ;;  %v8652_v4 = vpop.f32.mrb[134].mxu0 }
0x1578   :  { %8670 = vst.msk [vmem:[#allocation4 + $0x30] sm:$0xff] %vm699_vm2, %v8662_v7  ;;  %v8663_v53 = vmax.f32 %v8587_v19, %v8652_v4  ;;  %v8589_v21 = vpop.f32.mrb[103].mxu1  ;;  %v8654_v3 = vpop.f32.mrb[135].mxu0 }
0x157a   :  { %8671 = vst.msk [vmem:[#allocation4 + $0x38] sm:$0xff] %vm699_vm2, %v8663_v53 }
0x1599   :  { %v8911_v37 = vpop.f32.mrb[104].mxu1  ;;  %v8976_v29 = vpop.f32.mrb[136].mxu0 }
0x159a   :  { %v9007_v62 = vmax.f32 %v8911_v37, %v8976_v29  ;;  %v8913_v27 = vpop.f32.mrb[105].mxu1  ;;  %v8978_v25 = vpop.f32.mrb[137].mxu0 }
0x159b   :  { %v8914_v63 = vpop.f32.mrb[106].mxu1  ;;  %v8979_v24 = vpop.f32.mrb[138].mxu0 }
0x159c   :  { %9016 = vst.msk [vmem:[#allocation4 + $0x40] sm:$0xff] %vm699_vm2, %v9007_v62  ;;  %v9008_v33 = vmax.f32 %v8914_v63, %v8979_v24  ;;  %v8916_v61 = vpop.f32.mrb[107].mxu1  ;;  %v8981_v20 = vpop.f32.mrb[139].mxu0 }
0x159e   :  { %9017 = vst.msk [vmem:[#allocation4 + $0x48] sm:$0xff] %vm699_vm2, %v9008_v33 }
0x15a1   :  { %v8919_v0 = vpop.f32.mrb[108].mxu1  ;;  %v8984_v9 = vpop.f32.mrb[140].mxu0 }
0x15a2   :  { %v9009_v28 = vmax.f32 %v8919_v0, %v8984_v9  ;;  %v8921_v44 = vpop.f32.mrb[109].mxu1  ;;  %v8986_v8 = vpop.f32.mrb[141].mxu0 }
0x15a3   :  { %v8922_v35 = vpop.f32.mrb[110].mxu1  ;;  %v8987_v54 = vpop.f32.mrb[142].mxu0 }
0x15a4   :  { %9018 = vst.msk [vmem:[#allocation4 + $0x50] sm:$0xff] %vm699_vm2, %v9009_v28  ;;  %v9010_v38 = vmax.f32 %v8922_v35, %v8987_v54  ;;  %v8924_v22 = vpop.f32.mrb[111].mxu1  ;;  %v8989_v50 = vpop.f32.mrb[143].mxu0 }
0x15a6   :  { %9019 = vst.msk [vmem:[#allocation4 + $0x58] sm:$0xff] %vm699_vm2, %v9010_v38 }
0x15a9   :  { %v8927_v52 = vpop.f32.mrb[112].mxu1  ;;  %v8992_v1 = vpop.f32.mrb[144].mxu0 }
0x15aa   :  { %v9011_v55 = vmax.f32 %v8927_v52, %v8992_v1  ;;  %v8929_v2 = vpop.f32.mrb[113].mxu1  ;;  %v8994_v45 = vpop.f32.mrb[145].mxu0 }
0x15ab   :  { %v8930_v47 = vpop.f32.mrb[114].mxu1  ;;  %v8995_v48 = vpop.f32.mrb[146].mxu0 }
0x15ac   :  { %9020 = vst.msk [vmem:[#allocation4 + $0x60] sm:$0xff] %vm699_vm2, %v9011_v55  ;;  %v9012_v5 = vmax.f32 %v8930_v47, %v8995_v48  ;;  %v8932_v60 = vpop.f32.mrb[115].mxu1  ;;  %v8997_v23 = vpop.f32.mrb[147].mxu0 }
0x15ae   :  { %9021 = vst.msk [vmem:[#allocation4 + $0x68] sm:$0xff] %vm699_vm2, %v9012_v5 }
0x15b1   :  { %v8935_v31 = vpop.f32.mrb[116].mxu1  ;;  %v9000_v49 = vpop.f32.mrb[148].mxu0 }
0x15b2   :  { %v9013_v57 = vmax.f32 %v8935_v31, %v9000_v49  ;;  %v8937_v10 = vpop.f32.mrb[117].mxu1  ;;  %v9002_v42 = vpop.f32.mrb[149].mxu0 }
0x15b3   :  { %v8938_v34 = vpop.f32.mrb[118].mxu1  ;;  %v9003_v32 = vpop.f32.mrb[150].mxu0 }
0x15b4   :  { %9022 = vst.msk [vmem:[#allocation4 + $0x70] sm:$0xff] %vm699_vm2, %v9013_v57  ;;  %v9014_v15 = vmax.f32 %v8938_v34, %v9003_v32  ;;  %v8940_v59 = vpop.f32.mrb[119].mxu1  ;;  %v9005_v16 = vpop.f32.mrb[151].mxu0 }
0x15b6   :  { %9023 = vst.msk [vmem:[#allocation4 + $0x78] sm:$0xff] %vm699_vm2, %v9014_v15 }
0x15b7   :  { %11376 = shalt.err (!%p11373_p4)
}
0x15b8   :  { %s11377_s8 = scalar_lea.hbm %s15566_s17, 2048 }
0x15b9   :  { %p11378_p5 = scmp.ne.s32.totalorder %s15566_s17, %s11377_s8  ;;  %p11381_p6 = scmp.lt.u32.totalorder %s11377_s8, %s15566_s17 }
0x15bb   :  { %p11383_p7 = pnand %p11381_p6, %p11378_p5 }
0x15bd   :  { %11386 = shalt.err (!%p11383_p7)
}
0x15be   :  { %s11395_s0 = smov 128   ;;  %s11396_s30 = smov 8  }
0x15bf   :  { %9035 = dma.vmem_to_hbm [thread:$0]  %s9030_s6, 2048, %s15566_s17, [#allocation5], %s11395_s0, %s11395_s0, %s11396_s30  }
0x15c0   :  { %11387 = dma.done.wait [#allocation5], 2048  }
0x15c1   :  { %11388 = vsyncadd [#allocation5], 4294965248 }
0x15c2   :  { %9039 = vsyncpa [#allocation5], 1 }

</bundles_post_ra>
